<compile_context>
chip_gen: v7x
topology: tpu7x:2x2x1
jax: 0.10.0
libtpu: 0.0.40
codegen_flags: <defaults>
</compile_context>

<pallas_src>
import jax
import jax.numpy as jnp
from jax.experimental import pallas as pl
from jax.experimental.pallas import tpu as pltpu

# ----- problem sizes (small, consistent with the module's forward) -----
DX = 16                        # raw data dim fed to the embedding net
H_EMB = 32                     # embedding hidden width
E = 16                         # embedding output dim
C_EXTRA = 8                    # extra_condition dim
D_CTX = E + C_EXTRA
D_THETA = 8                    # flow feature dim
SPLIT = D_THETA // 2           # identity features of the coupling
D_TR = D_THETA - SPLIT         # transformed features
H_COND = 32                    # coupling conditioner hidden width
assert H_EMB == H_COND         # bias-slab packing below assumes equal widths

D_IN = D_THETA + DX + C_EXTRA  # 32 : packed [theta | x | extra] input lanes
D_OUT = 16                     # z in lanes 0:D_THETA, logdet in lane D_THETA

DEFAULT_TB = 1024              # batch tile (rows per grid step) -- swept parameter

# row offsets inside the packed weight slab (all multiples of 8)
R_W1 = 0                       # embedding layer-1, lifted to packed input  [D_IN,   H_COND]
R_WH = R_W1 + D_IN             # ew2 @ cw1_emb (fused embedding layer-2)    [H_EMB,  H_COND]
R_WCIN = R_WH + H_EMB          # conditioner rows for theta_id + extra      [D_IN,   H_COND]
R_W2S = R_WCIN + D_IN          # shift weights, zero-padded                 [H_COND, H_COND]
R_W2R = R_W2S + H_COND         # raw-scale weights, zero-padded             [H_COND, H_COND]
W_ROWS = R_W2R + H_COND        # = 160


def _cnf_forward_kernel(inp_ref, w_ref, b_ref, out_ref):
    f32 = jnp.float32
    inp = inp_ref[...]                                   # [TB, D_IN] = [theta|x|extra]

    # ---- embedding hidden: relu(x @ W1 + b1); W1 lifted onto the packed input ----
    w1p = w_ref[R_W1:R_W1 + D_IN, :]
    h = jnp.dot(inp, w1p, preferred_element_type=f32) + b_ref[0:1, :]
    h = jnp.maximum(h, 0.0)

    # ---- conditioner hidden; embedding layer-2 folded into wh / the bias,
    #      concat([theta_id, emb, extra]) folded into zero-row-padded weights ----
    wh = w_ref[R_WH:R_WH + H_EMB, :]
    wcin = w_ref[R_WCIN:R_WCIN + D_IN, :]
    ch = (jnp.dot(h, wh, preferred_element_type=f32)
          + jnp.dot(inp, wcin, preferred_element_type=f32)
          + b_ref[1:2, :])
    ch = jnp.maximum(ch, 0.0)

    # ---- coupling parameters at full H_COND width (no weight lane-slicing);
    #      identity lanes and lanes >= D_THETA are exactly zero by construction ----
    w2s = w_ref[R_W2S:R_W2S + H_COND, :]
    w2r = w_ref[R_W2R:R_W2R + H_COND, :]
    shift = jnp.dot(ch, w2s, preferred_element_type=f32) + b_ref[2:3, :]
    raw = jnp.dot(ch, w2r, preferred_element_type=f32) + b_ref[3:4, :]

    # nflows AffineCouplingTransform scale parametrization
    lane = jax.lax.broadcasted_iota(jnp.int32, shift.shape, 1)
    tr_mask = jnp.logical_and(lane >= SPLIT, lane < D_THETA)
    s = jax.nn.sigmoid(raw + 2.0) + 1e-3                 # finite everywhere (>= 1e-3)
    scale = jnp.where(tr_mask, s, jnp.where(lane < SPLIT, 1.0, 0.0))

    # z: identity lanes theta*1+0 == theta exactly; lanes >= D_THETA become 0
    z32 = inp * scale + shift
    logdet = jnp.sum(jnp.where(tr_mask, jnp.log(s), 0.0), axis=-1, keepdims=True)

    # single merged store: z in lanes 0:D_THETA, logdet in lane D_THETA
    lane_out = jax.lax.broadcasted_iota(jnp.int32, out_ref.shape, 1)
    out_ref[...] = jnp.where(lane_out == D_THETA, logdet, z32[:, :D_OUT])


def _round_up(v, m):
    return ((v + m - 1) // m) * m


def glasflow_forward(theta, x, extra_condition, w_pack, b_pack, *, tb=DEFAULT_TB):
    """Returns (z, logabsdet) exactly like flow._transform.forward(theta, context)."""
    n = theta.shape[0]

    # one packed 32-lane stream instead of three 8/16/8-lane streams
    inp = jnp.concatenate(
        [theta.astype(jnp.float32), x.astype(jnp.float32),
         extra_condition.astype(jnp.float32)], axis=-1)          # [n, D_IN]

    # tile selection: as large as requested, but keep grid >= 2 when there is
    # enough work so dimension_semantics=("parallel",) can shard across the two
    # TensorCores on v7x (no-op on v5e/v6e, costs one ~0.35us grid step).
    tb_eff = max(8, min(int(tb), _round_up(pl.cdiv(n, 2), 8)))
    n_pad = _round_up(n, tb_eff)
    if n_pad != n:
        # TODO(synk): ragged tails cost a host-side pad copy; arrange tb_eff | n
        # in production or handle the tail tile with a masked store.
        inp = jnp.pad(inp, ((0, n_pad - n), (0, 0)))

    grid = (n_pad // tb_eff,)
    out = pl.pallas_call(
        _cnf_forward_kernel,
        grid=grid,
        out_shape=jax.ShapeDtypeStruct((n_pad, D_OUT), jnp.float32),
        in_specs=[
            pl.BlockSpec((tb_eff, D_IN), lambda i: (i, 0)),      # streamed activations
            pl.BlockSpec((W_ROWS, H_COND), lambda i: (0, 0)),    # weights (VMEM resident)
            pl.BlockSpec((4, H_COND), lambda i: (0, 0)),         # biases  (VMEM resident)
        ],
        out_specs=pl.BlockSpec((tb_eff, D_OUT), lambda i: (i, 0)),
        compiler_params=pltpu.CompilerParams(
            dimension_semantics=("parallel",)),
    )(inp, w_pack, b_pack)

    return out[:n, :D_THETA], out[:n, D_THETA]


def _init_params(key):
    """Natural (PyTorch-layout) parameters of the synthetic sub-modules."""
    ks = jax.random.split(key, 8)
    s = 0.1
    ew1 = s * jax.random.normal(ks[0], (DX, H_EMB), jnp.float32)
    eb1 = s * jax.random.normal(ks[1], (1, H_EMB), jnp.float32)
    ew2 = s * jax.random.normal(ks[2], (H_EMB, E), jnp.float32)
    eb2 = s * jax.random.normal(ks[3], (1, E), jnp.float32)
    cw1 = s * jax.random.normal(ks[4], (SPLIT + D_CTX, H_COND), jnp.float32)
    cb1 = s * jax.random.normal(ks[5], (1, H_COND), jnp.float32)
    cw2 = s * jax.random.normal(ks[6], (H_COND, 2 * D_TR), jnp.float32)
    cb2 = s * jax.random.normal(ks[7], (1, 2 * D_TR), jnp.float32)
    return (ew1, eb1, ew2, eb2, cw1, cb1, cw2, cb2)


def _pack_params(params):
    """One-time host-side fusion + zero-padding + packing (exact, done once).

    NOTE: the identity-lane exactness of the kernel (z == theta, logdet
    contribution 0 on lanes < SPLIT) relies on the zero-padded columns staying
    exactly zero; any weight update must go through this re-pack.
    """
    ew1, eb1, ew2, eb2, cw1, cb1, cw2, cb2 = params
    cw1_id = cw1[:SPLIT, :]                    # theta_id rows of conditioner
    cw1_emb = cw1[SPLIT:SPLIT + E, :]          # embedding-output rows
    cw1_extra = cw1[SPLIT + E:, :]             # extra_condition rows

    # fold the (linear, no activation) embedding output layer into the conditioner
    wh = ew2 @ cw1_emb                                          # [H_EMB, H_COND]
    bc = cb1 + eb2 @ cw1_emb                                    # [1, H_COND]

    # embedding layer-1 lifted onto the packed [theta|x|extra] input (zero rows
    # for theta and extra)
    w1p = jnp.zeros((D_IN, H_COND), jnp.float32).at[D_THETA:D_THETA + DX, :].set(ew1)

    # direct conditioner rows for theta_id and extra_condition on the packed
    # input (theta_tr rows and x rows are zero)
    wcin = (jnp.zeros((D_IN, H_COND), jnp.float32)
            .at[:SPLIT, :].set(cw1_id)
            .at[D_THETA + DX:, :].set(cw1_extra))

    # coupling output weights/biases at full H_COND lane width: shift / raw land
    # at lanes SPLIT:D_THETA, identity lanes and lanes >= D_THETA are exactly zero
    w2s = jnp.zeros((H_COND, H_COND), jnp.float32).at[:, SPLIT:D_THETA].set(cw2[:, :D_TR])
    w2r = jnp.zeros((H_COND, H_COND), jnp.float32).at[:, SPLIT:D_THETA].set(cw2[:, D_TR:])
    b2s = jnp.zeros((1, H_COND), jnp.float32).at[:, SPLIT:D_THETA].set(cb2[:, :D_TR])
    b2r = jnp.zeros((1, H_COND), jnp.float32).at[:, SPLIT:D_THETA].set(cb2[:, D_TR:])

    w_pack = jnp.concatenate([w1p, wh, wcin, w2s, w2r], axis=0)   # [160, 32]
    b_pack = jnp.concatenate([eb1, bc, b2s, b2r], axis=0)         # [4, 32]
    assert w_pack.shape == (W_ROWS, H_COND)
    assert b_pack.shape == (4, H_COND)
    return w_pack.astype(jnp.float32), b_pack.astype(jnp.float32)


def _reference(theta, x, extra, params):
    """Pure-JAX mirror of the PyTorch module's forward."""
    ew1, eb1, ew2, eb2, cw1, cb1, cw2, cb2 = params
    h = jnp.maximum(x @ ew1 + eb1, 0.0)
    emb = h @ ew2 + eb2
    ctx = jnp.concatenate([emb, extra], axis=-1)
    theta_id, theta_tr = theta[:, :SPLIT], theta[:, SPLIT:]
    cin = jnp.concatenate([theta_id, ctx], axis=-1)
    ch = jnp.maximum(cin @ cw1 + cb1, 0.0)
    p = ch @ cw2 + cb2
    shift, raw = p[:, :D_TR], p[:, D_TR:]
    scale = jax.nn.sigmoid(raw + 2.0) + 1e-3
    z = jnp.concatenate([theta_id, theta_tr * scale + shift], axis=-1)
    return z, jnp.sum(jnp.log(scale), axis=-1)


if __name__ == "__main__":
    key = jax.random.PRNGKey(0)
    k_theta, k_x, k_extra, k_params = jax.random.split(key, 4)

    B = 2048  # 2 grid steps of 1024 rows -> exercises the batch grid / megacore path
    theta = jax.random.normal(k_theta, (B, D_THETA), jnp.float32)
    x = jax.random.normal(k_x, (B, DX), jnp.float32)
    extra_condition = jax.random.normal(k_extra, (B, C_EXTRA), jnp.float32)

    params = _init_params(k_params)
    w_pack, b_pack = _pack_params(params)

    z, logdet = glasflow_forward(theta, x, extra_condition, w_pack, b_pack)
    jax.block_until_ready((z, logdet))

    z_ref, ld_ref = _reference(theta, x, extra_condition, params)
    assert jnp.allclose(z, z_ref, atol=1e-4, rtol=1e-4), \
        float(jnp.max(jnp.abs(z - z_ref)))
    assert jnp.allclose(logdet, ld_ref, atol=1e-4, rtol=1e-4), \
        float(jnp.max(jnp.abs(logdet - ld_ref)))

    print("KERNEL_OK")
</pallas_src>

<mosaic_0001>
module attributes {stable_mosaic.version = 11 : i64} {
  func.func @_cnf_forward_kernel(%arg0: i32, %arg1: memref<1024x32xf32, #tpu.memory_space<vmem>>, %arg2: memref<160x32xf32, #tpu.memory_space<vmem>>, %arg3: memref<4x32xf32, #tpu.memory_space<vmem>>, %arg4: memref<1024x16xf32, #tpu.memory_space<vmem>>) attributes {dimension_semantics = [#tpu.dimension_semantics<parallel>], iteration_bounds = array<i64: 2>, scalar_prefetch = 0 : i64, scratch_operands = 0 : i64, tpu.core_type = #tpu.core_type<tc>, window_params = [{transform_indices = @transform_0, window_bounds = array<i64: 1024, 32>}, {pipeline_mode = #tpu.pipeline_mode<synchronous>, transform_indices = @transform_1, window_bounds = array<i64: 160, 32>}, {pipeline_mode = #tpu.pipeline_mode<synchronous>, transform_indices = @transform_2, window_bounds = array<i64: 4, 32>}, {transform_indices = @transform_3, window_bounds = array<i64: 1024, 16>}]} {
    %c0 = arith.constant 0 : index
    %c0_0 = arith.constant 0 : index
    %0 = vector.load %arg1[%c0, %c0_0] : memref<1024x32xf32, #tpu.memory_space<vmem>>, vector<1024x32xf32>
    %c0_1 = arith.constant 0 : index
    %c0_2 = arith.constant 0 : index
    %1 = vector.load %arg2[%c0_1, %c0_2] : memref<160x32xf32, #tpu.memory_space<vmem>>, vector<32x32xf32>
    %cst = arith.constant dense<0.000000e+00> : vector<1024x32xf32>
    %2 = tpu.matmul %0, %1, %cst {dimension_numbers = #tpu.dot_dimension_numbers<[1], [0], [0], [1], [0, 0, 1, 1], [], []>} : vector<1024x32xf32>, vector<32x32xf32>, vector<1024x32xf32> -> vector<1024x32xf32>
    %c0_3 = arith.constant 0 : index
    %c0_4 = arith.constant 0 : index
    %3 = vector.load %arg3[%c0_3, %c0_4] : memref<4x32xf32, #tpu.memory_space<vmem>>, vector<1x32xf32>
    %4 = vector.broadcast %3 : vector<1x32xf32> to vector<1024x32xf32>
    %5 = arith.addf %2, %4 : vector<1024x32xf32>
    %cst_5 = arith.constant 0.000000e+00 : f32
    %6 = vector.broadcast %cst_5 : f32 to vector<1024x32xf32>
    %7 = arith.maximumf %5, %6 : vector<1024x32xf32>
    %c32 = arith.constant 32 : index
    %c0_6 = arith.constant 0 : index
    %8 = vector.load %arg2[%c32, %c0_6] : memref<160x32xf32, #tpu.memory_space<vmem>>, vector<32x32xf32>
    %c64 = arith.constant 64 : index
    %c0_7 = arith.constant 0 : index
    %9 = vector.load %arg2[%c64, %c0_7] : memref<160x32xf32, #tpu.memory_space<vmem>>, vector<32x32xf32>
    %cst_8 = arith.constant dense<0.000000e+00> : vector<1024x32xf32>
    %10 = tpu.matmul %7, %8, %cst_8 {dimension_numbers = #tpu.dot_dimension_numbers<[1], [0], [0], [1], [0, 0, 1, 1], [], []>} : vector<1024x32xf32>, vector<32x32xf32>, vector<1024x32xf32> -> vector<1024x32xf32>
    %cst_9 = arith.constant dense<0.000000e+00> : vector<1024x32xf32>
    %11 = tpu.matmul %0, %9, %cst_9 {dimension_numbers = #tpu.dot_dimension_numbers<[1], [0], [0], [1], [0, 0, 1, 1], [], []>} : vector<1024x32xf32>, vector<32x32xf32>, vector<1024x32xf32> -> vector<1024x32xf32>
    %12 = arith.addf %10, %11 : vector<1024x32xf32>
    %c1 = arith.constant 1 : index
    %c0_10 = arith.constant 0 : index
    %13 = vector.load %arg3[%c1, %c0_10] : memref<4x32xf32, #tpu.memory_space<vmem>>, vector<1x32xf32>
    %14 = vector.broadcast %13 : vector<1x32xf32> to vector<1024x32xf32>
    %15 = arith.addf %12, %14 : vector<1024x32xf32>
    %cst_11 = arith.constant 0.000000e+00 : f32
    %16 = vector.broadcast %cst_11 : f32 to vector<1024x32xf32>
    %17 = arith.maximumf %15, %16 : vector<1024x32xf32>
    %c96 = arith.constant 96 : index
    %c0_12 = arith.constant 0 : index
    %18 = vector.load %arg2[%c96, %c0_12] : memref<160x32xf32, #tpu.memory_space<vmem>>, vector<32x32xf32>
    %c128 = arith.constant 128 : index
    %c0_13 = arith.constant 0 : index
    %19 = vector.load %arg2[%c128, %c0_13] : memref<160x32xf32, #tpu.memory_space<vmem>>, vector<32x32xf32>
    %cst_14 = arith.constant dense<0.000000e+00> : vector<1024x32xf32>
    %20 = tpu.matmul %17, %18, %cst_14 {dimension_numbers = #tpu.dot_dimension_numbers<[1], [0], [0], [1], [0, 0, 1, 1], [], []>} : vector<1024x32xf32>, vector<32x32xf32>, vector<1024x32xf32> -> vector<1024x32xf32>
    %c2 = arith.constant 2 : index
    %c0_15 = arith.constant 0 : index
    %21 = vector.load %arg3[%c2, %c0_15] : memref<4x32xf32, #tpu.memory_space<vmem>>, vector<1x32xf32>
    %22 = vector.broadcast %21 : vector<1x32xf32> to vector<1024x32xf32>
    %23 = arith.addf %20, %22 : vector<1024x32xf32>
    %cst_16 = arith.constant dense<0.000000e+00> : vector<1024x32xf32>
    %24 = tpu.matmul %17, %19, %cst_16 {dimension_numbers = #tpu.dot_dimension_numbers<[1], [0], [0], [1], [0, 0, 1, 1], [], []>} : vector<1024x32xf32>, vector<32x32xf32>, vector<1024x32xf32> -> vector<1024x32xf32>
    %c3 = arith.constant 3 : index
    %c0_17 = arith.constant 0 : index
    %25 = vector.load %arg3[%c3, %c0_17] : memref<4x32xf32, #tpu.memory_space<vmem>>, vector<1x32xf32>
    %26 = vector.broadcast %25 : vector<1x32xf32> to vector<1024x32xf32>
    %27 = arith.addf %24, %26 : vector<1024x32xf32>
    %28 = tpu.iota {dimensions = array<i32: 1>} : vector<1024x32xi32>
    %c4_i32 = arith.constant 4 : i32
    %29 = vector.broadcast %c4_i32 : i32 to vector<1024x32xi32>
    %30 = arith.cmpi sge, %28, %29 : vector<1024x32xi32>
    %c8_i32 = arith.constant 8 : i32
    %31 = vector.broadcast %c8_i32 : i32 to vector<1024x32xi32>
    %32 = arith.cmpi slt, %28, %31 : vector<1024x32xi32>
    %33 = arith.andi %30, %32 : vector<1024x32xi1>
    %cst_18 = arith.constant 2.000000e+00 : f32
    %34 = vector.broadcast %cst_18 : f32 to vector<1024x32xf32>
    %35 = arith.addf %27, %34 : vector<1024x32xf32>
    %36 = arith.negf %35 : vector<1024x32xf32>
    %37 = math.exp %36 : vector<1024x32xf32>
    %cst_19 = arith.constant 1.000000e+00 : f32
    %38 = vector.broadcast %cst_19 : f32 to vector<1024x32xf32>
    %39 = arith.addf %38, %37 : vector<1024x32xf32>
    %40 = arith.divf %38, %39 : vector<1024x32xf32>
    %cst_20 = arith.constant 1.000000e-03 : f32
    %41 = vector.broadcast %cst_20 : f32 to vector<1024x32xf32>
    %42 = arith.addf %40, %41 : vector<1024x32xf32>
    %c4_i32_21 = arith.constant 4 : i32
    %43 = vector.broadcast %c4_i32_21 : i32 to vector<1024x32xi32>
    %44 = arith.cmpi slt, %28, %43 : vector<1024x32xi32>
    %cst_22 = arith.constant 1.000000e+00 : f32
    %cst_23 = arith.constant 0.000000e+00 : f32
    %45 = vector.broadcast %cst_22 : f32 to vector<1024x32xf32>
    %46 = vector.broadcast %cst_23 : f32 to vector<1024x32xf32>
    %47 = arith.select %44, %45, %46 : vector<1024x32xi1>, vector<1024x32xf32>
    %48 = arith.select %33, %42, %47 : vector<1024x32xi1>, vector<1024x32xf32>
    %49 = arith.mulf %0, %48 : vector<1024x32xf32>
    %50 = arith.addf %49, %23 : vector<1024x32xf32>
    %51 = math.log %42 : vector<1024x32xf32>
    %cst_24 = arith.constant 0.000000e+00 : f32
    %52 = vector.broadcast %cst_24 : f32 to vector<1024x32xf32>
    %53 = arith.select %33, %51, %52 : vector<1024x32xi1>, vector<1024x32xf32>
    %cst_25 = arith.constant dense<0.000000e+00> : vector<1024xf32>
    %54 = vector.multi_reduction <add>, %53, %cst_25 [1] : vector<1024x32xf32> to vector<1024xf32>
    %55 = vector.shape_cast %54 : vector<1024xf32> to vector<1024x1xf32>
    %56 = tpu.iota {dimensions = array<i32: 1>} : vector<1024x16xi32>
    %c8_i32_26 = arith.constant 8 : i32
    %57 = vector.broadcast %c8_i32_26 : i32 to vector<1024x16xi32>
    %58 = arith.cmpi eq, %56, %57 : vector<1024x16xi32>
    %59 = vector.extract_strided_slice %50 {offsets = [0, 0], sizes = [1024, 16], strides = [1, 1]} : vector<1024x32xf32> to vector<1024x16xf32>
    %60 = vector.shape_cast %55 : vector<1024x1xf32> to vector<1024x1xf32>
    %61 = vector.broadcast %60 : vector<1024x1xf32> to vector<1024x16xf32>
    %62 = arith.select %58, %61, %59 : vector<1024x16xi1>, vector<1024x16xf32>
    %c0_27 = arith.constant 0 : index
    %c0_28 = arith.constant 0 : index
    %63 = vector.load %arg4[%c0_27, %c0_28] : memref<1024x16xf32, #tpu.memory_space<vmem>>, vector<1024x16xf32>
    tpu.vector_store %arg4[%c0_27, %c0_28], %62 {strides = array<i32>} : memref<1024x16xf32, #tpu.memory_space<vmem>>, vector<1024x16xf32>,
    return
  }
  func.func @transform_0(%arg0: i32) -> (i32, i32) {
    %c0_i32 = arith.constant 0 : i32
    %c0_i32_0 = arith.constant 0 : i32
    return %arg0, %c0_i32 : i32, i32
  }
  func.func @transform_1(%arg0: i32) -> (i32, i32) {
    %c0_i32 = arith.constant 0 : i32
    %c0_i32_0 = arith.constant 0 : i32
    %c0_i32_1 = arith.constant 0 : i32
    return %c0_i32, %c0_i32_0 : i32, i32
  }
  func.func @transform_2(%arg0: i32) -> (i32, i32) {
    %c0_i32 = arith.constant 0 : i32
    %c0_i32_0 = arith.constant 0 : i32
    %c0_i32_1 = arith.constant 0 : i32
    return %c0_i32, %c0_i32_0 : i32, i32
  }
  func.func @transform_3(%arg0: i32) -> (i32, i32) {
    %c0_i32 = arith.constant 0 : i32
    %c0_i32_0 = arith.constant 0 : i32
    return %arg0, %c0_i32 : i32, i32
  }
}

</mosaic_0001>

<bundles_post_ra>
// kernel: tpu_custom_call.1
= control target key start
LH: loop header
LB: loop body
LE: loop exit
PB: predicated region body
PF: predicated region fallthrough
CT: control target
= control target key end

     0   :  { %s11455_s12 = smov 0   ;;  %s17853_s0 = inlined_call_operand.vmem [shape: f32[2048,32], index: 0, kind: input, shape index: {}]   ;;  %s17854_s1 = inlined_call_operand.vmem [shape: f32[160,32], index: 1, kind: input, shape index: {}]   ;;  %s17855_s2 = inlined_call_operand.vmem [shape: f32[4,32], index: 2, kind: input, shape index: {}]   ;;  %s17856_s3 = inlined_call_operand.vmem [shape: f32[2048,16], index: 3, kind: output, shape index: {}]  }
   0x1 LB: > { %s7901_s13 = sadd.s32 4294967295, %s11432_s12   ;;  %p7905_p0 = scmp.ge.s32.totalorder %s11432_s12, 1  ;;  %s11432_s12 = sphi %s11455_s12, %s13_s12  }
   0x2   : > { %p138_p1 = scmp.lt.s32.totalorder %s11432_s12, 3 }
   0x4   : > { %p139_p2 = pnand %p7905_p0, %p138_p1 }
   0x6   : > { %142 = sbr.rel (%p139_p2) target bundleno = 1682 (0x692), region = 32 }
   0xd   : > { %v302_v0 = vld [vmem:[%s17854_s1] sm:$0xff]  ;;  %v303_v1 = vld [vmem:[%s17854_s1 + $0x8] sm:$0xff]  ;;  %v304_v2 = vld [vmem:[%s17854_s1 + $0x10] sm:$0xff]  ;;  %s7906_s20 = sshll.u32 %s7901_s13, 7  ;;  %vm311_vm0 = vcmask 261120   ;;  %vm7716_vm6 = vcmask 130048  }
   0xe   : > { %v10344_v3 = vpack.c.bf16 %v303_v1, %v302_v0  ;;  %v305_v4 = vld [vmem:[%s17854_s1 + $0x18] sm:$0xff]  ;;  %p163_p3 = scmp.lt.s32.totalorder %s7906_s20, 255  ;;  %v1533_v6 = vld [vmem:[%s17854_s1 + $0x40] sm:$0xff]  ;;  %v1534_v7 = vld [vmem:[%s17854_s1 + $0x48] sm:$0xff] }
   0xf   : > { %v10348_v5 = vpack.c.bf16 %v305_v4, %v304_v2  ;;  %v10352_v8 = vpack.c.bf16 %v1534_v7, %v1533_v6  ;;  %v1535_v9 = vld [vmem:[%s17854_s1 + $0x50] sm:$0xff]  ;;  %v1536_v10 = vld [vmem:[%s17854_s1 + $0x58] sm:$0xff]  ;;  %v1529_v27 = vld [vmem:[%s17854_s1 + $0x20] sm:$0xff] }
  0x10   : > { %10384 = vmatprep.subr.bf16.mxu1 %v10344_v3  ;;  %s19307_s20 = smov (!%p163_p3, %s7906_s20), 255  ;;  %10345 = vmatprep.subr.bf16.mxu0 %v10344_v3  ;;  %v10356_v14 = vpack.c.bf16 %v1536_v10, %v1535_v9  ;;  %v1530_v28 = vld [vmem:[%s17854_s1 + $0x28] sm:$0xff] }
  0x11   : > { %10386 = vmatpush3.bf16.msra.mxu1 %v10344_v3  ;;  %10347 = vmatpush3.bf16.msra.mxu0 %v10344_v3  ;;  %s7907_s27 = sshll.u32 %s19307_s20, 3  ;;  %v11572_v29 = vpack.c.bf16 %v1530_v28, %v1529_v27 }
  0x12   : > { %10385 = vmatprep.subr.bf16.mxu1 %v10348_v5  ;;  %10349 = vmatprep.subr.bf16.mxu0 %v10348_v5  ;;  %s11489_s30 = scalar_lea.vmem %s17853_s0, %s7907_s27  ;;  %s15682_s28 = scalar_lea.vmem %s17856_s3, %s7907_s27 }
  0x13   : > { %v11498_v11 = vld [vmem:[%s11489_s30 + $0x200] sm:$0xff]  ;;  %v11503_v12 = vld [vmem:[%s11489_s30 + $0x208] sm:$0xff]  ;;  %v11506_v13 = vld [vmem:[%s11489_s30 + $0x210] sm:$0xff] }
  0x14   : > { %9448 = vmatprep.mubr.msk.f32.mxu1 %vm311_vm0, %v11498_v11  ;;  %v11513_v15 = vld [vmem:[%s11489_s30 + $0x218] sm:$0xff]  ;;  %v11516_v16 = vld [vmem:[%s11489_s30 + $0x220] sm:$0xff]  ;;  %v11523_v17 = vld [vmem:[%s11489_s30 + $0x228] sm:$0xff] }
  0x15   : > { %10387 = vmatpush3.bf16.msra.mxu1 %v10348_v5  ;;  %10351 = vmatpush3.bf16.msra.mxu0 %v10348_v5  ;;  %18221 = vst [vmem:[#allocation2_spill] sm:$0xff] %v11513_v15  ;;  %18222 = vst [vmem:[#allocation3_spill] sm:$0xff] %v11516_v16  ;;  %v11526_v18 = vld [vmem:[%s11489_s30 + $0x230] sm:$0xff]  ;;  %v11533_v19 = vld [vmem:[%s11489_s30 + $0x238] sm:$0xff] }
  0x16   : > { %10353 = vmatprep.subr.bf16.mxu1 %v10352_v8  ;;  %18223 = vst [vmem:[#allocation4_spill] sm:$0xff] %v11523_v17  ;;  %18224 = vst [vmem:[#allocation5_spill] sm:$0xff] %v11526_v18  ;;  %v11536_v20 = vld [vmem:[%s11489_s30 + $0x240] sm:$0xff]  ;;  %v11543_v21 = vld [vmem:[%s11489_s30 + $0x248] sm:$0xff] }
  0x17   : > { %18225 = vst [vmem:[#allocation6_spill] sm:$0xff] %v11533_v19  ;;  %18226 = vst [vmem:[#allocation7_spill] sm:$0xff] %v11536_v20  ;;  %v11546_v22 = vld [vmem:[%s11489_s30 + $0x250] sm:$0xff]  ;;  %v11553_v23 = vld [vmem:[%s11489_s30 + $0x258] sm:$0xff] }
  0x18   : > { %9449 = vmatmul.mubr.msk.f32.vlgmr.msra.gmra.mrb[0].mxu1 %vm311_vm0, %v11503_v12  ;;  %18227 = vst [vmem:[#allocation8_spill] sm:$0xff] %v11543_v21  ;;  %18228 = vst [vmem:[#allocation9_spill] sm:$0xff] %v11546_v22  ;;  %v11556_v24 = vld [vmem:[%s11489_s30 + $0x260] sm:$0xff]  ;;  %v11562_v26 = vld [vmem:[%s11489_s30 + $0x8] sm:$0xff] }
  0x19   : > { %10355 = vmatpush3.bf16.msra.mxu1 %v10352_v8  ;;  %9451 = vmatprep.mubr.msk.f32.mxu1 %vm311_vm0, %v11506_v13  ;;  %18229 = vst [vmem:[#allocation10_spill] sm:$0xff] %v11553_v23  ;;  %18230 = vst [vmem:[#allocation11_spill] sm:$0xff] %v11556_v24  ;;  %v11559_v25 = vld [vmem:[%s11489_s30] sm:$0xff]  ;;  %v11575_v30 = vld [vmem:[%s11489_s30 + $0x10] sm:$0xff] }
  0x1a   : > { %10357 = vmatprep.subr.bf16.mxu1 %v10356_v14  ;;  %9352 = vmatprep.mubr.msk.f32.mxu0 %vm311_vm0, %v11559_v25  ;;  %v11586_v31 = vld [vmem:[%s11489_s30 + $0x268] sm:$0xff]  ;;  %v11590_v32 = vld [vmem:[%s11489_s30 + $0x270] sm:$0xff]  ;;  %v11593_v33 = vld [vmem:[%s11489_s30 + $0x18] sm:$0xff] }
  0x1b   : > { %9353 = vmatmul.mubr.msk.f32.vlgmr.msra.gmra.mrb[0].mxu0 %vm311_vm0, %v11562_v26  ;;  %18231 = vst [vmem:[#allocation12_spill] sm:$0xff] %v11586_v31  ;;  %18232 = vst [vmem:[#allocation13_spill] sm:$0xff] %v11590_v32  ;;  %v11596_v34 = vld [vmem:[%s11489_s30 + $0x20] sm:$0xff]  ;;  %v11607_v35 = vld [vmem:[%s11489_s30 + $0x278] sm:$0xff] }
  0x1c   : > { %9452 = vmatmul.mubr.msk.f32.gmra.mrb[2].mxu1 %vm311_vm0, %v11513_v15  ;;  %9355 = vmatprep.mubr.msk.f32.mxu0 %vm311_vm0, %v11575_v30  ;;  %18233 = vst [vmem:[#allocation14_spill] sm:$0xff] %v11607_v35  ;;  %v11610_v36 = vld [vmem:[%s11489_s30 + $0x280] sm:$0xff]  ;;  %v11613_v37 = vld [vmem:[%s11489_s30 + $0x28] sm:$0xff]  ;;  %v11616_v38 = vld [vmem:[%s11489_s30 + $0x30] sm:$0xff] }
  0x1d   : > { %9454 = vmatprep.mubr.msk.f32.mxu1 %vm311_vm0, %v11516_v16  ;;  %10359 = vmatpush3.bf16.msra.mxu1 %v10356_v14  ;;  %18234 = vst [vmem:[#allocation15_spill] sm:$0xff] %v11610_v36  ;;  %v11627_v39 = vld [vmem:[%s11489_s30 + $0x288] sm:$0xff]  ;;  %v11630_v40 = vld [vmem:[%s11489_s30 + $0x290] sm:$0xff]  ;;  %v11633_v41 = vld [vmem:[%s11489_s30 + $0x38] sm:$0xff] }
  0x1e   : > { %10361 = vmatprep.subr.bf16.mxu1 %v11572_v29  ;;  %18235 = vst [vmem:[#allocation16_spill] sm:$0xff] %v11627_v39  ;;  %18236 = vst [vmem:[#allocation17_spill] sm:$0xff] %v11630_v40  ;;  %v11636_v42 = vld [vmem:[%s11489_s30 + $0x40] sm:$0xff]  ;;  %v11647_v43 = vld [vmem:[%s11489_s30 + $0x298] sm:$0xff] }
  0x1f   : > { %9356 = vmatmul.mubr.msk.f32.gmra.mrb[2].mxu0 %vm311_vm0, %v11593_v33  ;;  %18237 = vst [vmem:[#allocation18_spill] sm:$0xff] %v11647_v43  ;;  %v11650_v44 = vld [vmem:[%s11489_s30 + $0x2a0] sm:$0xff]  ;;  %v11653_v45 = vld [vmem:[%s11489_s30 + $0x48] sm:$0xff]  ;;  %v11656_v46 = vld [vmem:[%s11489_s30 + $0x50] sm:$0xff] }
  0x20   : > { %9455 = vmatmul.mubr.msk.f32.gmra.mrb[4].mxu1 %vm311_vm0, %v11523_v17  ;;  %9358 = vmatprep.mubr.msk.f32.mxu0 %vm311_vm0, %v11596_v34  ;;  %18238 = vst [vmem:[#allocation19_spill] sm:$0xff] %v11650_v44  ;;  %v11667_v47 = vld [vmem:[%s11489_s30 + $0x2a8] sm:$0xff]  ;;  %v11670_v48 = vld [vmem:[%s11489_s30 + $0x2b0] sm:$0xff]  ;;  %v11673_v49 = vld [vmem:[%s11489_s30 + $0x58] sm:$0xff] }
  0x21   : > { %9457 = vmatprep.mubr.msk.f32.mxu1 %vm311_vm0, %v11526_v18  ;;  %18239 = vst [vmem:[#allocation20_spill] sm:$0xff] %v11667_v47  ;;  %18240 = vst [vmem:[#allocation21_spill] sm:$0xff] %v11670_v48  ;;  %v11676_v50 = vld [vmem:[%s11489_s30 + $0x60] sm:$0xff]  ;;  %v11687_v51 = vld [vmem:[%s11489_s30 + $0x2b8] sm:$0xff] }
  0x22   : > { %18241 = vst [vmem:[#allocation22_spill] sm:$0xff] %v11687_v51  ;;  %v11690_v52 = vld [vmem:[%s11489_s30 + $0x2c0] sm:$0xff]  ;;  %v11693_v53 = vld [vmem:[%s11489_s30 + $0x68] sm:$0xff]  ;;  %v11696_v54 = vld [vmem:[%s11489_s30 + $0x70] sm:$0xff] }
  0x23   : > { %9359 = vmatmul.mubr.msk.f32.gmra.mrb[4].mxu0 %vm311_vm0, %v11613_v37  ;;  %18242 = vst [vmem:[#allocation23_spill] sm:$0xff] %v11690_v52  ;;  %v11707_v55 = vld [vmem:[%s11489_s30 + $0x2c8] sm:$0xff]  ;;  %v11710_v56 = vld [vmem:[%s11489_s30 + $0x2d0] sm:$0xff]  ;;  %v11713_v57 = vld [vmem:[%s11489_s30 + $0x78] sm:$0xff] }
  0x24   : > { %9458 = vmatmul.mubr.msk.f32.gmra.mrb[6].mxu1 %vm311_vm0, %v11533_v19  ;;  %9361 = vmatprep.mubr.msk.f32.mxu0 %vm311_vm0, %v11616_v38  ;;  %18243 = vst [vmem:[#allocation24_spill] sm:$0xff] %v11707_v55  ;;  %18244 = vst [vmem:[#allocation25_spill] sm:$0xff] %v11710_v56  ;;  %v11716_v58 = vld [vmem:[%s11489_s30 + $0x80] sm:$0xff]  ;;  %v11727_v59 = vld [vmem:[%s11489_s30 + $0x2d8] sm:$0xff] }
  0x25   : > { %9460 = vmatprep.mubr.msk.f32.mxu1 %vm311_vm0, %v11536_v20  ;;  %18245 = vst [vmem:[#allocation26_spill] sm:$0xff] %v11727_v59  ;;  %v11730_v60 = vld [vmem:[%s11489_s30 + $0x2e0] sm:$0xff]  ;;  %v11733_v61 = vld [vmem:[%s11489_s30 + $0x88] sm:$0xff]  ;;  %v11736_v62 = vld [vmem:[%s11489_s30 + $0x90] sm:$0xff] }
  0x26   : > { %18246 = vst [vmem:[#allocation27_spill] sm:$0xff] %v11730_v60  ;;  %v11747_v63 = vld [vmem:[%s11489_s30 + $0x2e8] sm:$0xff]  ;;  %v11750_v0 = vld [vmem:[%s11489_s30 + $0x2f0] sm:$0xff]  ;;  %v11753_v1 = vld [vmem:[%s11489_s30 + $0x98] sm:$0xff] }
  0x27   : > { %9362 = vmatmul.mubr.msk.f32.gmra.mrb[6].mxu0 %vm311_vm0, %v11633_v41  ;;  %18247 = vst [vmem:[#allocation28_spill] sm:$0xff] %v11747_v63  ;;  %18248 = vst [vmem:[#allocation29_spill] sm:$0xff] %v11750_v0  ;;  %v11756_v2 = vld [vmem:[%s11489_s30 + $0xa0] sm:$0xff]  ;;  %v11767_v3 = vld [vmem:[%s11489_s30 + $0x2f8] sm:$0xff] }
  0x28   : > { %9461 = vmatmul.mubr.msk.f32.gmra.mrb[8].mxu1 %vm311_vm0, %v11543_v21  ;;  %9364 = vmatprep.mubr.msk.f32.mxu0 %vm311_vm0, %v11636_v42  ;;  %18249 = vst [vmem:[#allocation30_spill] sm:$0xff] %v11767_v3  ;;  %v11770_v4 = vld [vmem:[%s11489_s30 + $0x300] sm:$0xff]  ;;  %v11773_v5 = vld [vmem:[%s11489_s30 + $0xa8] sm:$0xff]  ;;  %v11776_v6 = vld [vmem:[%s11489_s30 + $0xb0] sm:$0xff] }
  0x29   : > { %9463 = vmatprep.mubr.msk.f32.mxu1 %vm311_vm0, %v11546_v22  ;;  %18250 = vst [vmem:[#allocation31_spill] sm:$0xff] %v11770_v4  ;;  %v11787_v7 = vld [vmem:[%s11489_s30 + $0x308] sm:$0xff]  ;;  %v11790_v8 = vld [vmem:[%s11489_s30 + $0x310] sm:$0xff]  ;;  %v11793_v9 = vld [vmem:[%s11489_s30 + $0xb8] sm:$0xff] }
  0x2a   : > { %18251 = vst [vmem:[#allocation32_spill] sm:$0xff] %v11787_v7  ;;  %18252 = vst [vmem:[#allocation33_spill] sm:$0xff] %v11790_v8  ;;  %v11796_v10 = vld [vmem:[%s11489_s30 + $0xc0] sm:$0xff]  ;;  %v11807_v14 = vld [vmem:[%s11489_s30 + $0x318] sm:$0xff] }
  0x2b   : > { %9365 = vmatmul.mubr.msk.f32.gmra.mrb[8].mxu0 %vm311_vm0, %v11653_v45  ;;  %18253 = vst [vmem:[#allocation34_spill] sm:$0xff] %v11807_v14  ;;  %v11810_v27 = vld [vmem:[%s11489_s30 + $0x320] sm:$0xff]  ;;  %v11813_v28 = vld [vmem:[%s11489_s30 + $0xc8] sm:$0xff]  ;;  %v12056_v20 = vld [vmem:[%s11489_s30 + $0x190] sm:$0xff] }
  0x2c   : > { %9464 = vmatmul.mubr.msk.f32.gmra.mrb[10].mxu1 %vm311_vm0, %v11553_v23  ;;  %9367 = vmatprep.mubr.msk.f32.mxu0 %vm311_vm0, %v11656_v46  ;;  %18254 = vst [vmem:[#allocation35_spill] sm:$0xff] %v11810_v27  ;;  %v12033_v23 = vld [vmem:[%s11489_s30 + $0x178] sm:$0xff]  ;;  %v12036_v22 = vld [vmem:[%s11489_s30 + $0x180] sm:$0xff]  ;;  %v12053_v21 = vld [vmem:[%s11489_s30 + $0x188] sm:$0xff] }
  0x2d   : > { %9466 = vmatprep.mubr.msk.f32.mxu1 %vm311_vm0, %v11556_v24  ;;  %v12016_v24 = vld [vmem:[%s11489_s30 + $0x170] sm:$0xff]  ;;  %v12073_v19 = vld [vmem:[%s11489_s30 + $0x198] sm:$0xff]  ;;  %v12076_v18 = vld [vmem:[%s11489_s30 + $0x1a0] sm:$0xff] }
  0x2e   : > { %v12093_v17 = vld [vmem:[%s11489_s30 + $0x1b0] sm:$0xff]  ;;  %v12142_v15 = vld [vmem:[%s11489_s30 + $0x1e0] sm:$0xff] }
  0x2f   : > { %9368 = vmatmul.mubr.msk.f32.gmra.mrb[10].mxu0 %vm311_vm0, %v11673_v49  ;;  %v1531_v16 = vld [vmem:[%s17854_s1 + $0x30] sm:$0xff] }
  0x30   : > { %9467 = vmatmul.mubr.msk.f32.gmra.mrb[12].mxu1 %vm311_vm0, %v11586_v31  ;;  %9370 = vmatprep.mubr.msk.f32.mxu0 %vm311_vm0, %v11676_v50  ;;  %v12013_v31 = vld [vmem:[%s11489_s30 + $0x168] sm:$0xff] }
  0x31   : > { %9469 = vmatprep.mubr.msk.f32.mxu1 %vm311_vm0, %v11590_v32  ;;  %v11996_v32 = vld [vmem:[%s11489_s30 + $0x160] sm:$0xff] }
  0x33   : > { %9371 = vmatmul.mubr.msk.f32.gmra.mrb[12].mxu0 %vm311_vm0, %v11693_v53 }
  0x34   : > { %9470 = vmatmul.mubr.msk.f32.gmra.mrb[14].mxu1 %vm311_vm0, %v11607_v35  ;;  %9373 = vmatprep.mubr.msk.f32.mxu0 %vm311_vm0, %v11696_v54  ;;  %v11993_v35 = vld [vmem:[%s11489_s30 + $0x158] sm:$0xff] }
  0x35   : > { %9472 = vmatprep.mubr.msk.f32.mxu1 %vm311_vm0, %v11610_v36  ;;  %v11976_v36 = vld [vmem:[%s11489_s30 + $0x150] sm:$0xff] }
  0x37   : > { %9374 = vmatmul.mubr.msk.f32.gmra.mrb[14].mxu0 %vm311_vm0, %v11713_v57 }
  0x38   : > { %9473 = vmatmul.mubr.msk.f32.gmra.mrb[16].mxu1 %vm311_vm0, %v11627_v39  ;;  %9376 = vmatprep.mubr.msk.f32.mxu0 %vm311_vm0, %v11716_v58  ;;  %v11973_v39 = vld [vmem:[%s11489_s30 + $0x148] sm:$0xff] }
  0x39   : > { %9475 = vmatprep.mubr.msk.f32.mxu1 %vm311_vm0, %v11630_v40  ;;  %v11956_v40 = vld [vmem:[%s11489_s30 + $0x140] sm:$0xff] }
  0x3b   : > { %9377 = vmatmul.mubr.msk.f32.gmra.mrb[16].mxu0 %vm311_vm0, %v11733_v61 }
  0x3c   : > { %9476 = vmatmul.mubr.msk.f32.gmra.mrb[18].mxu1 %vm311_vm0, %v11647_v43  ;;  %9379 = vmatprep.mubr.msk.f32.mxu0 %vm311_vm0, %v11736_v62  ;;  %v11953_v43 = vld [vmem:[%s11489_s30 + $0x138] sm:$0xff] }
  0x3d   : > { %9478 = vmatprep.mubr.msk.f32.mxu1 %vm311_vm0, %v11650_v44  ;;  %v11936_v44 = vld [vmem:[%s11489_s30 + $0x130] sm:$0xff] }
  0x3f   : > { %9380 = vmatmul.mubr.msk.f32.gmra.mrb[18].mxu0 %vm311_vm0, %v11753_v1 }
  0x40   : > { %9479 = vmatmul.mubr.msk.f32.gmra.mrb[20].mxu1 %vm311_vm0, %v11667_v47  ;;  %9382 = vmatprep.mubr.msk.f32.mxu0 %vm311_vm0, %v11756_v2  ;;  %v11933_v47 = vld [vmem:[%s11489_s30 + $0x128] sm:$0xff] }
  0x41   : > { %9481 = vmatprep.mubr.msk.f32.mxu1 %vm311_vm0, %v11670_v48  ;;  %v11916_v48 = vld [vmem:[%s11489_s30 + $0x120] sm:$0xff] }
  0x43   : > { %9383 = vmatmul.mubr.msk.f32.gmra.mrb[20].mxu0 %vm311_vm0, %v11773_v5 }
  0x44   : > { %9482 = vmatmul.mubr.msk.f32.gmra.mrb[22].mxu1 %vm311_vm0, %v11687_v51  ;;  %9385 = vmatprep.mubr.msk.f32.mxu0 %vm311_vm0, %v11776_v6  ;;  %v11913_v51 = vld [vmem:[%s11489_s30 + $0x118] sm:$0xff] }
  0x45   : > { %9484 = vmatprep.mubr.msk.f32.mxu1 %vm311_vm0, %v11690_v52  ;;  %v11896_v52 = vld [vmem:[%s11489_s30 + $0x110] sm:$0xff] }
  0x47   : > { %9386 = vmatmul.mubr.msk.f32.gmra.mrb[22].mxu0 %vm311_vm0, %v11793_v9 }
  0x48   : > { %9485 = vmatmul.mubr.msk.f32.gmra.mrb[24].mxu1 %vm311_vm0, %v11707_v55  ;;  %9388 = vmatprep.mubr.msk.f32.mxu0 %vm311_vm0, %v11796_v10  ;;  %v11893_v55 = vld [vmem:[%s11489_s30 + $0x108] sm:$0xff] }
  0x49   : > { %9487 = vmatprep.mubr.msk.f32.mxu1 %vm311_vm0, %v11710_v56  ;;  %v11876_v56 = vld [vmem:[%s11489_s30 + $0x100] sm:$0xff] }
  0x4b   : > { %9389 = vmatmul.mubr.msk.f32.gmra.mrb[24].mxu0 %vm311_vm0, %v11813_v28 }
  0x4c   : > { %9488 = vmatmul.mubr.msk.f32.gmra.mrb[26].mxu1 %vm311_vm0, %v11727_v59  ;;  %v11873_v59 = vld [vmem:[%s11489_s30 + $0xf8] sm:$0xff] }
  0x4d   : > { %9490 = vmatprep.mubr.msk.f32.mxu1 %vm311_vm0, %v11730_v60  ;;  %v11856_v60 = vld [vmem:[%s11489_s30 + $0xf0] sm:$0xff] }
  0x50   : > { %9491 = vmatmul.mubr.msk.f32.gmra.mrb[28].mxu1 %vm311_vm0, %v11747_v63  ;;  %v11853_v63 = vld [vmem:[%s11489_s30 + $0xe8] sm:$0xff] }
  0x51   : > { %9493 = vmatprep.mubr.msk.f32.mxu1 %vm311_vm0, %v11750_v0  ;;  %v11836_v0 = vld [vmem:[%s11489_s30 + $0xe0] sm:$0xff] }
  0x54   : > { %9494 = vmatmul.mubr.msk.f32.gmra.mrb[30].mxu1 %vm311_vm0, %v11767_v3  ;;  %v11833_v3 = vld [vmem:[%s11489_s30 + $0xd8] sm:$0xff] }
  0x55   : > { %9496 = vmatprep.mubr.msk.f32.mxu1 %vm311_vm0, %v11770_v4  ;;  %v11816_v4 = vld [vmem:[%s11489_s30 + $0xd0] sm:$0xff] }
  0x56   : > { %9391 = vmatprep.mubr.msk.f32.mxu0 %vm311_vm0, %v11816_v4 }
  0x57   : > { %9392 = vmatmul.mubr.msk.f32.gmra.mrb[26].mxu0 %vm311_vm0, %v11833_v3 }
  0x58   : > { %9497 = vmatmul.mubr.msk.f32.gmra.mrb[32].mxu1 %vm311_vm0, %v11787_v7  ;;  %v11830_v7 = vld [vmem:[%s11489_s30 + $0x330] sm:$0xff]  ;;  %9394 = vmatprep.mubr.msk.f32.mxu0 %vm311_vm0, %v11836_v0 }
  0x59   : > { %9499 = vmatprep.mubr.msk.f32.mxu1 %vm311_vm0, %v11790_v8  ;;  %v11827_v8 = vld [vmem:[%s11489_s30 + $0x328] sm:$0xff]  ;;  %18256 = vst [vmem:[#allocation37_spill] sm:$0xff] %v11830_v7 }
  0x5a   : > { %18255 = vst [vmem:[#allocation36_spill] sm:$0xff] %v11827_v8 }
  0x5b   : > { %9395 = vmatmul.mubr.msk.f32.gmra.mrb[28].mxu0 %vm311_vm0, %v11853_v63 }
  0x5c   : > { %9500 = vmatmul.mubr.msk.f32.gmra.mrb[34].mxu1 %vm311_vm0, %v11807_v14  ;;  %v11850_v14 = vld [vmem:[%s11489_s30 + $0x340] sm:$0xff]  ;;  %9397 = vmatprep.mubr.msk.f32.mxu0 %vm311_vm0, %v11856_v60 }
  0x5d   : > { %9502 = vmatprep.mubr.msk.f32.mxu1 %vm311_vm0, %v11810_v27  ;;  %v11847_v27 = vld [vmem:[%s11489_s30 + $0x338] sm:$0xff]  ;;  %18258 = vst [vmem:[#allocation39_spill] sm:$0xff] %v11850_v14 }
  0x5e   : > { %18257 = vst [vmem:[#allocation38_spill] sm:$0xff] %v11847_v27 }
  0x5f   : > { %9398 = vmatmul.mubr.msk.f32.gmra.mrb[30].mxu0 %vm311_vm0, %v11873_v59 }
  0x60   : > { %9503 = vmatmul.mubr.msk.f32.gmra.mrb[36].mxu1 %vm311_vm0, %v11827_v8  ;;  %v11870_v8 = vld [vmem:[%s11489_s30 + $0x350] sm:$0xff]  ;;  %9400 = vmatprep.mubr.msk.f32.mxu0 %vm311_vm0, %v11876_v56 }
  0x61   : > { %9505 = vmatprep.mubr.msk.f32.mxu1 %vm311_vm0, %v11830_v7  ;;  %v11867_v7 = vld [vmem:[%s11489_s30 + $0x348] sm:$0xff]  ;;  %18260 = vst [vmem:[#allocation41_spill] sm:$0xff] %v11870_v8 }
  0x62   : > { %18259 = vst [vmem:[#allocation40_spill] sm:$0xff] %v11867_v7 }
  0x63   : > { %9401 = vmatmul.mubr.msk.f32.gmra.mrb[32].mxu0 %vm311_vm0, %v11893_v55 }
  0x64   : > { %9506 = vmatmul.mubr.msk.f32.gmra.mrb[38].mxu1 %vm311_vm0, %v11847_v27  ;;  %v11890_v27 = vld [vmem:[%s11489_s30 + $0x360] sm:$0xff]  ;;  %9403 = vmatprep.mubr.msk.f32.mxu0 %vm311_vm0, %v11896_v52 }
  0x65   : > { %9508 = vmatprep.mubr.msk.f32.mxu1 %vm311_vm0, %v11850_v14  ;;  %v11887_v14 = vld [vmem:[%s11489_s30 + $0x358] sm:$0xff]  ;;  %18262 = vst [vmem:[#allocation43_spill] sm:$0xff] %v11890_v27 }
  0x66   : > { %18261 = vst [vmem:[#allocation42_spill] sm:$0xff] %v11887_v14 }
  0x67   : > { %9404 = vmatmul.mubr.msk.f32.gmra.mrb[34].mxu0 %vm311_vm0, %v11913_v51 }
  0x68   : > { %9509 = vmatmul.mubr.msk.f32.gmra.mrb[40].mxu1 %vm311_vm0, %v11867_v7  ;;  %v11910_v7 = vld [vmem:[%s11489_s30 + $0x370] sm:$0xff]  ;;  %9406 = vmatprep.mubr.msk.f32.mxu0 %vm311_vm0, %v11916_v48 }
  0x69   : > { %9511 = vmatprep.mubr.msk.f32.mxu1 %vm311_vm0, %v11870_v8  ;;  %v11907_v8 = vld [vmem:[%s11489_s30 + $0x368] sm:$0xff]  ;;  %18264 = vst [vmem:[#allocation45_spill] sm:$0xff] %v11910_v7 }
  0x6a   : > { %18263 = vst [vmem:[#allocation44_spill] sm:$0xff] %v11907_v8 }
  0x6b   : > { %9407 = vmatmul.mubr.msk.f32.gmra.mrb[36].mxu0 %vm311_vm0, %v11933_v47 }
  0x6c   : > { %9512 = vmatmul.mubr.msk.f32.gmra.mrb[42].mxu1 %vm311_vm0, %v11887_v14  ;;  %v11930_v14 = vld [vmem:[%s11489_s30 + $0x380] sm:$0xff]  ;;  %9409 = vmatprep.mubr.msk.f32.mxu0 %vm311_vm0, %v11936_v44 }
  0x6d   : > { %9514 = vmatprep.mubr.msk.f32.mxu1 %vm311_vm0, %v11890_v27  ;;  %v11927_v27 = vld [vmem:[%s11489_s30 + $0x378] sm:$0xff]  ;;  %18266 = vst [vmem:[#allocation47_spill] sm:$0xff] %v11930_v14 }
  0x6e   : > { %18265 = vst [vmem:[#allocation46_spill] sm:$0xff] %v11927_v27 }
  0x6f   : > { %9410 = vmatmul.mubr.msk.f32.gmra.mrb[38].mxu0 %vm311_vm0, %v11953_v43 }
  0x70   : > { %9515 = vmatmul.mubr.msk.f32.gmra.mrb[44].mxu1 %vm311_vm0, %v11907_v8  ;;  %v11950_v8 = vld [vmem:[%s11489_s30 + $0x390] sm:$0xff]  ;;  %9412 = vmatprep.mubr.msk.f32.mxu0 %vm311_vm0, %v11956_v40 }
  0x71   : > { %9517 = vmatprep.mubr.msk.f32.mxu1 %vm311_vm0, %v11910_v7  ;;  %v11947_v7 = vld [vmem:[%s11489_s30 + $0x388] sm:$0xff]  ;;  %18268 = vst [vmem:[#allocation49_spill] sm:$0xff] %v11950_v8 }
  0x72   : > { %18267 = vst [vmem:[#allocation48_spill] sm:$0xff] %v11947_v7 }
  0x73   : > { %9413 = vmatmul.mubr.msk.f32.gmra.mrb[40].mxu0 %vm311_vm0, %v11973_v39 }
  0x74   : > { %9518 = vmatmul.mubr.msk.f32.gmra.mrb[46].mxu1 %vm311_vm0, %v11927_v27  ;;  %v11970_v27 = vld [vmem:[%s11489_s30 + $0x3a0] sm:$0xff]  ;;  %9415 = vmatprep.mubr.msk.f32.mxu0 %vm311_vm0, %v11976_v36 }
  0x75   : > { %9520 = vmatprep.mubr.msk.f32.mxu1 %vm311_vm0, %v11930_v14  ;;  %v11967_v14 = vld [vmem:[%s11489_s30 + $0x398] sm:$0xff]  ;;  %18270 = vst [vmem:[#allocation51_spill] sm:$0xff] %v11970_v27 }
  0x76   : > { %18269 = vst [vmem:[#allocation50_spill] sm:$0xff] %v11967_v14 }
  0x77   : > { %9416 = vmatmul.mubr.msk.f32.gmra.mrb[42].mxu0 %vm311_vm0, %v11993_v35 }
  0x78   : > { %9521 = vmatmul.mubr.msk.f32.gmra.mrb[48].mxu1 %vm311_vm0, %v11947_v7  ;;  %v11990_v7 = vld [vmem:[%s11489_s30 + $0x3b0] sm:$0xff]  ;;  %9418 = vmatprep.mubr.msk.f32.mxu0 %vm311_vm0, %v11996_v32 }
  0x79   : > { %9523 = vmatprep.mubr.msk.f32.mxu1 %vm311_vm0, %v11950_v8  ;;  %v11987_v8 = vld [vmem:[%s11489_s30 + $0x3a8] sm:$0xff]  ;;  %18272 = vst [vmem:[#allocation53_spill] sm:$0xff] %v11990_v7 }
  0x7a   : > { %18271 = vst [vmem:[#allocation52_spill] sm:$0xff] %v11987_v8 }
  0x7b   : > { %9419 = vmatmul.mubr.msk.f32.gmra.mrb[44].mxu0 %vm311_vm0, %v12013_v31 }
  0x7c   : > { %9524 = vmatmul.mubr.msk.f32.gmra.mrb[50].mxu1 %vm311_vm0, %v11967_v14  ;;  %v12010_v14 = vld [vmem:[%s11489_s30 + $0x3c0] sm:$0xff]  ;;  %9421 = vmatprep.mubr.msk.f32.mxu0 %vm311_vm0, %v12016_v24 }
  0x7d   : > { %9526 = vmatprep.mubr.msk.f32.mxu1 %vm311_vm0, %v11970_v27  ;;  %v12007_v27 = vld [vmem:[%s11489_s30 + $0x3b8] sm:$0xff]  ;;  %18274 = vst [vmem:[#allocation55_spill] sm:$0xff] %v12010_v14 }
  0x7e   : > { %18273 = vst [vmem:[#allocation54_spill] sm:$0xff] %v12007_v27 }
  0x7f   : > { %9422 = vmatmul.mubr.msk.f32.gmra.mrb[46].mxu0 %vm311_vm0, %v12033_v23 }
  0x80   : > { %9527 = vmatmul.mubr.msk.f32.gmra.mrb[52].mxu1 %vm311_vm0, %v11987_v8  ;;  %v12030_v8 = vld [vmem:[%s11489_s30 + $0x3d0] sm:$0xff]  ;;  %9424 = vmatprep.mubr.msk.f32.mxu0 %vm311_vm0, %v12036_v22 }
  0x81   : > { %9529 = vmatprep.mubr.msk.f32.mxu1 %vm311_vm0, %v11990_v7  ;;  %v12027_v7 = vld [vmem:[%s11489_s30 + $0x3c8] sm:$0xff]  ;;  %18276 = vst [vmem:[#allocation57_spill] sm:$0xff] %v12030_v8 }
  0x82   : > { %18275 = vst [vmem:[#allocation56_spill] sm:$0xff] %v12027_v7 }
  0x83   : > { %9425 = vmatmul.mubr.msk.f32.gmra.mrb[48].mxu0 %vm311_vm0, %v12053_v21 }
  0x84   : > { %9530 = vmatmul.mubr.msk.f32.gmra.mrb[54].mxu1 %vm311_vm0, %v12007_v27  ;;  %v12050_v27 = vld [vmem:[%s11489_s30 + $0x3e0] sm:$0xff]  ;;  %9427 = vmatprep.mubr.msk.f32.mxu0 %vm311_vm0, %v12056_v20 }
  0x85   : > { %9532 = vmatprep.mubr.msk.f32.mxu1 %vm311_vm0, %v12010_v14  ;;  %v12047_v14 = vld [vmem:[%s11489_s30 + $0x3d8] sm:$0xff]  ;;  %18278 = vst [vmem:[#allocation59_spill] sm:$0xff] %v12050_v27 }
  0x86   : > { %18277 = vst [vmem:[#allocation58_spill] sm:$0xff] %v12047_v14 }
  0x87   : > { %9428 = vmatmul.mubr.msk.f32.gmra.mrb[50].mxu0 %vm311_vm0, %v12073_v19 }
  0x88   : > { %9533 = vmatmul.mubr.msk.f32.gmra.mrb[56].mxu1 %vm311_vm0, %v12027_v7  ;;  %v12070_v7 = vld [vmem:[%s11489_s30 + $0x3f0] sm:$0xff]  ;;  %9430 = vmatprep.mubr.msk.f32.mxu0 %vm311_vm0, %v12076_v18 }
  0x89   : > { %9535 = vmatprep.mubr.msk.f32.mxu1 %vm311_vm0, %v12030_v8  ;;  %v12067_v8 = vld [vmem:[%s11489_s30 + $0x3e8] sm:$0xff]  ;;  %18280 = vst [vmem:[#allocation61_spill] sm:$0xff] %v12070_v7 }
  0x8a   : > { %18279 = vst [vmem:[#allocation60_spill] sm:$0xff] %v12067_v8 }
  0x8c   : > { %9536 = vmatmul.mubr.msk.f32.gmra.mrb[58].mxu1 %vm311_vm0, %v12047_v14  ;;  %v12090_v14 = vld [vmem:[%s11489_s30 + $0x1a8] sm:$0xff] }
  0x8d   : > { %9538 = vmatprep.mubr.msk.f32.mxu1 %vm311_vm0, %v12050_v27  ;;  %v12087_v27 = vld [vmem:[%s11489_s30 + $0x3f8] sm:$0xff]  ;;  %9431 = vmatmul.mubr.msk.f32.gmra.mrb[52].mxu0 %vm311_vm0, %v12090_v14 }
  0x8e   : > { %18281 = vst [vmem:[#allocation62_spill] sm:$0xff] %v12087_v27  ;;  %9433 = vmatprep.mubr.msk.f32.mxu0 %vm311_vm0, %v12093_v17 }
  0x90   : > { %9539 = vmatmul.mubr.msk.f32.gmra.mrb[60].mxu1 %vm311_vm0, %v12067_v8  ;;  %v12107_v8 = vld [vmem:[%s11489_s30 + $0x1c0] sm:$0xff] }
  0x91   : > { %9541 = vmatprep.mubr.msk.f32.mxu1 %vm311_vm0, %v12070_v7  ;;  %v12104_v7 = vld [vmem:[%s11489_s30 + $0x1b8] sm:$0xff] }
  0x92   : > { %9434 = vmatmul.mubr.msk.f32.gmra.mrb[54].mxu0 %vm311_vm0, %v12104_v7 }
  0x93   : > { %9436 = vmatprep.mubr.msk.f32.mxu0 %vm311_vm0, %v12107_v8 }
  0x94   : > { %9542 = vmatmul.mubr.msk.f32.gmra.mrb[62].mxu1 %vm311_vm0, %v12087_v27  ;;  %v12122_v27 = vld [vmem:[%s11489_s30 + $0x1d0] sm:$0xff] }
  0x95   : > { %9552 = vmatprep.mubr.msk.f32.mxu1 %vm311_vm0, %v11559_v25  ;;  %v12119_v25 = vld [vmem:[%s11489_s30 + $0x1c8] sm:$0xff] }
  0x96   : > { %9437 = vmatmul.mubr.msk.f32.gmra.mrb[56].mxu0 %vm311_vm0, %v12119_v25 }
  0x97   : > { %9439 = vmatprep.mubr.msk.f32.mxu0 %vm311_vm0, %v12122_v27 }
  0x98   : > { %9553 = vmatmul.mubr.msk.f32.vlgmr.msra.gmra.mrb[64].mxu1 %vm311_vm0, %v11562_v26  ;;  %v1532_v26 = vld [vmem:[%s17854_s1 + $0x38] sm:$0xff] }
  0x99   : > { %10363 = vmatpush3.bf16.msra.mxu1 %v11572_v29  ;;  %9555 = vmatprep.mubr.msk.f32.mxu1 %vm311_vm0, %v11575_v30  ;;  %v10364_v29 = vpack.c.bf16 %v1532_v26, %v1531_v16  ;;  %v12139_v30 = vld [vmem:[%s11489_s30 + $0x1d8] sm:$0xff]  ;;  %v12153_v16 = vld [vmem:[%s11489_s30 + $0x1e8] sm:$0xff] }
  0x9a   : > { %9440 = vmatmul.mubr.msk.f32.gmra.mrb[58].mxu0 %vm311_vm0, %v12139_v30  ;;  %v18325_v26 = vld [vmem:[#allocation11_spill] sm:$0xff] }
  0x9b   : > { %10365 = vmatprep.subr.bf16.mxu1 %v10364_v29  ;;  %9442 = vmatprep.mubr.msk.f32.mxu0 %vm311_vm0, %v12142_v15 }
  0x9c   : > { %9556 = vmatmul.mubr.msk.f32.gmra.mrb[66].mxu1 %vm311_vm0, %v11593_v33  ;;  %v12156_v33 = vld [vmem:[%s11489_s30 + $0x1f0] sm:$0xff] }
  0x9d   : > { %9558 = vmatprep.mubr.msk.f32.mxu1 %vm311_vm0, %v11596_v34  ;;  %10367 = vmatpush3.bf16.msra.mxu1 %v10364_v29  ;;  %v12167_v34 = vld [vmem:[%s11489_s30 + $0x1f8] sm:$0xff] }
  0x9e   : > { %9443 = vmatmul.mubr.msk.f32.gmra.mrb[60].mxu0 %vm311_vm0, %v12153_v16 }
  0x9f   : > { %9445 = vmatprep.mubr.msk.f32.mxu0 %vm311_vm0, %v12156_v33 }
  0xa0   : > { %9559 = vmatmul.mubr.msk.f32.gmra.mrb[68].mxu1 %vm311_vm0, %v11613_v37 }
  0xa1   : > { %9561 = vmatprep.mubr.msk.f32.mxu1 %vm311_vm0, %v11616_v38 }
  0xa2   : > { %9446 = vmatmul.mubr.msk.f32.gmra.mrb[62].mxu0 %vm311_vm0, %v12167_v34 }
  0xa4   : > { %9562 = vmatmul.mubr.msk.f32.gmra.mrb[70].mxu1 %vm311_vm0, %v11633_v41 }
  0xa5   : > { %9564 = vmatprep.mubr.msk.f32.mxu1 %vm311_vm0, %v11636_v42 }
  0xa8   : > { %9565 = vmatmul.mubr.msk.f32.gmra.mrb[72].mxu1 %vm311_vm0, %v11653_v45 }
  0xa9   : > { %9567 = vmatprep.mubr.msk.f32.mxu1 %vm311_vm0, %v11656_v46 }
  0xac   : > { %9568 = vmatmul.mubr.msk.f32.gmra.mrb[74].mxu1 %vm311_vm0, %v11673_v49 }
  0xad   : > { %9570 = vmatprep.mubr.msk.f32.mxu1 %vm311_vm0, %v11676_v50 }
  0xb0   : > { %9571 = vmatmul.mubr.msk.f32.gmra.mrb[76].mxu1 %vm311_vm0, %v11693_v53 }
  0xb1   : > { %9573 = vmatprep.mubr.msk.f32.mxu1 %vm311_vm0, %v11696_v54 }
  0xb4   : > { %9574 = vmatmul.mubr.msk.f32.gmra.mrb[78].mxu1 %vm311_vm0, %v11713_v57  ;;  %v18309_v57 = vld [vmem:[#allocation3_spill] sm:$0xff] }
  0xb5   : > { %9576 = vmatprep.mubr.msk.f32.mxu1 %vm311_vm0, %v11716_v58 }
  0xb8   : > { %9577 = vmatmul.mubr.msk.f32.gmra.mrb[80].mxu1 %vm311_vm0, %v11733_v61  ;;  %v18313_v61 = vld [vmem:[#allocation5_spill] sm:$0xff] }
  0xb9   : > { %9579 = vmatprep.mubr.msk.f32.mxu1 %vm311_vm0, %v11736_v62 }
  0xbc   : > { %9580 = vmatmul.mubr.msk.f32.gmra.mrb[82].mxu1 %vm311_vm0, %v11753_v1  ;;  %v18316_v1 = vld [vmem:[#allocation6_spill] sm:$0xff] }
  0xbd   : > { %9582 = vmatprep.mubr.msk.f32.mxu1 %vm311_vm0, %v11756_v2 }
  0xc0   : > { %9583 = vmatmul.mubr.msk.f32.gmra.mrb[84].mxu1 %vm311_vm0, %v11773_v5 }
  0xc1   : > { %9585 = vmatprep.mubr.msk.f32.mxu1 %vm311_vm0, %v11776_v6 }
  0xc4   : > { %9586 = vmatmul.mubr.msk.f32.gmra.mrb[86].mxu1 %vm311_vm0, %v11793_v9  ;;  %v18321_v9 = vld [vmem:[#allocation9_spill] sm:$0xff] }
  0xc5   : > { %9588 = vmatprep.mubr.msk.f32.mxu1 %vm311_vm0, %v11796_v10 }
  0xc8   : > { %9589 = vmatmul.mubr.msk.f32.gmra.mrb[88].mxu1 %vm311_vm0, %v11813_v28  ;;  %v18324_v28 = vld [vmem:[#allocation10_spill] sm:$0xff] }
  0xc9   : > { %9591 = vmatprep.mubr.msk.f32.mxu1 %vm311_vm0, %v11816_v4 }
  0xcc   : > { %9592 = vmatmul.mubr.msk.f32.gmra.mrb[90].mxu1 %vm311_vm0, %v11833_v3  ;;  %v18317_v3 = vld [vmem:[#allocation7_spill] sm:$0xff] }
  0xcd   : > { %9594 = vmatprep.mubr.msk.f32.mxu1 %vm311_vm0, %v11836_v0 }
  0xd0   : > { %9595 = vmatmul.mubr.msk.f32.gmra.mrb[92].mxu1 %vm311_vm0, %v11853_v63 }
  0xd1   : > { %9597 = vmatprep.mubr.msk.f32.mxu1 %vm311_vm0, %v11856_v60 }
  0xd4   : > { %9598 = vmatmul.mubr.msk.f32.gmra.mrb[94].mxu1 %vm311_vm0, %v11873_v59 }
  0xd5   : > { %9600 = vmatprep.mubr.msk.f32.mxu1 %vm311_vm0, %v11876_v56 }
  0xd8   : > { %9601 = vmatmul.mubr.msk.f32.gmra.mrb[96].mxu1 %vm311_vm0, %v11893_v55 }
  0xd9   : > { %9603 = vmatprep.mubr.msk.f32.mxu1 %vm311_vm0, %v11896_v52 }
  0xdc   : > { %9604 = vmatmul.mubr.msk.f32.gmra.mrb[98].mxu1 %vm311_vm0, %v11913_v51 }
  0xdd   : > { %9606 = vmatprep.mubr.msk.f32.mxu1 %vm311_vm0, %v11916_v48 }
  0xe0   : > { %9607 = vmatmul.mubr.msk.f32.gmra.mrb[100].mxu1 %vm311_vm0, %v11933_v47 }
  0xe1   : > { %9609 = vmatprep.mubr.msk.f32.mxu1 %vm311_vm0, %v11936_v44 }
  0xe4   : > { %9610 = vmatmul.mubr.msk.f32.gmra.mrb[102].mxu1 %vm311_vm0, %v11953_v43 }
  0xe5   : > { %9612 = vmatprep.mubr.msk.f32.mxu1 %vm311_vm0, %v11956_v40 }
  0xe8   : > { %9613 = vmatmul.mubr.msk.f32.gmra.mrb[104].mxu1 %vm311_vm0, %v11973_v39 }
  0xe9   : > { %9615 = vmatprep.mubr.msk.f32.mxu1 %vm311_vm0, %v11976_v36 }
  0xeb   : > { %v12239_v37 = vpop.f32.mrb[0].mxu1 }
  0xec   : > { %18282 = vst [vmem:[#allocation63_spill] sm:$0xff] %v12239_v37  ;;  %v12241_v38 = vpop.f32.mrb[1].mxu1  ;;  %9616 = vmatmul.mubr.msk.f32.gmra.mrb[106].mxu1 %vm311_vm0, %v11993_v35  ;;  %v18402_v37 = vld [vmem:[#allocation54_spill] sm:$0xff] }
  0xed   : > { %18283 = vst [vmem:[#allocation64_spill] sm:$0xff] %v12241_v38  ;;  %9618 = vmatprep.mubr.msk.f32.mxu1 %vm311_vm0, %v11996_v32  ;;  %v18404_v38 = vld [vmem:[#allocation55_spill] sm:$0xff] }
  0xee   : > { %v12317_v45 = vpop.f32.mrb[0].mxu0 }
  0xef   : > { %v12247_v41 = vpop.f32.mrb[2].mxu1  ;;  %v12321_v46 = vpop.f32.mrb[1].mxu0 }
  0xf0   : > { %18284 = vst [vmem:[#allocation65_spill] sm:$0xff] %v12247_v41  ;;  %v12249_v42 = vpop.f32.mrb[3].mxu1  ;;  %9619 = vmatmul.mubr.msk.f32.gmra.mrb[108].mxu1 %vm311_vm0, %v12013_v31  ;;  %v18398_v41 = vld [vmem:[#allocation52_spill] sm:$0xff] }
  0xf1   : > { %18285 = vst [vmem:[#allocation66_spill] sm:$0xff] %v12249_v42  ;;  %9621 = vmatprep.mubr.msk.f32.mxu1 %vm311_vm0, %v12016_v24  ;;  %v18400_v42 = vld [vmem:[#allocation53_spill] sm:$0xff] }
  0xf3   : > { %v12255_v36 = vpop.f32.mrb[4].mxu1 }
  0xf4   : > { %18286 = vst [vmem:[#allocation67_spill] sm:$0xff] %v12255_v36  ;;  %v12257_v39 = vpop.f32.mrb[5].mxu1  ;;  %9622 = vmatmul.mubr.msk.f32.gmra.mrb[110].mxu1 %vm311_vm0, %v12033_v23  ;;  %v18392_v36 = vld [vmem:[#allocation48_spill] sm:$0xff] }
  0xf5   : > { %18287 = vst [vmem:[#allocation68_spill] sm:$0xff] %v12257_v39  ;;  %9624 = vmatprep.mubr.msk.f32.mxu1 %vm311_vm0, %v12036_v22 }
  0xf7   : > { %v12263_v32 = vpop.f32.mrb[6].mxu1 }
  0xf8   : > { %18288 = vst [vmem:[#allocation69_spill] sm:$0xff] %v12263_v32  ;;  %v12265_v35 = vpop.f32.mrb[7].mxu1  ;;  %9625 = vmatmul.mubr.msk.f32.gmra.mrb[112].mxu1 %vm311_vm0, %v12053_v21  ;;  %v18391_v32 = vld [vmem:[#allocation47_spill] sm:$0xff] }
  0xf9   : > { %18289 = vst [vmem:[#allocation70_spill] sm:$0xff] %v12265_v35  ;;  %9627 = vmatprep.mubr.msk.f32.mxu1 %vm311_vm0, %v12056_v20 }
  0xfb   : > { %v12271_v24 = vpop.f32.mrb[8].mxu1 }
  0xfc   : > { %18290 = vst [vmem:[#allocation71_spill] sm:$0xff] %v12271_v24  ;;  %v12273_v31 = vpop.f32.mrb[9].mxu1  ;;  %9628 = vmatmul.mubr.msk.f32.gmra.mrb[114].mxu1 %vm311_vm0, %v12073_v19 }
  0xfd   : > { %18291 = vst [vmem:[#allocation72_spill] sm:$0xff] %v12273_v31  ;;  %9630 = vmatprep.mubr.msk.f32.mxu1 %vm311_vm0, %v12076_v18  ;;  %v18390_v31 = vld [vmem:[#allocation46_spill] sm:$0xff] }
  0xff   : > { %v12279_v22 = vpop.f32.mrb[10].mxu1 }
 0x100   : > { %18292 = vst [vmem:[#allocation73_spill] sm:$0xff] %v12279_v22  ;;  %v12281_v23 = vpop.f32.mrb[11].mxu1  ;;  %9631 = vmatmul.mubr.msk.f32.gmra.mrb[116].mxu1 %vm311_vm0, %v12090_v14  ;;  %v18387_v22 = vld [vmem:[#allocation43_spill] sm:$0xff] }
 0x101   : > { %18293 = vst [vmem:[#allocation74_spill] sm:$0xff] %v12281_v23  ;;  %9633 = vmatprep.mubr.msk.f32.mxu1 %vm311_vm0, %v12093_v17  ;;  %v18389_v23 = vld [vmem:[#allocation45_spill] sm:$0xff] }
 0x103   : > { %v12287_v20 = vpop.f32.mrb[12].mxu1 }
 0x104   : > { %18294 = vst [vmem:[#allocation75_spill] sm:$0xff] %v12287_v20  ;;  %v12289_v21 = vpop.f32.mrb[13].mxu1  ;;  %9634 = vmatmul.mubr.msk.f32.gmra.mrb[118].mxu1 %vm311_vm0, %v12104_v7  ;;  %v18320_v7 = vld [vmem:[#allocation8_spill] sm:$0xff] }
 0x105   : > { %18295 = vst [vmem:[#allocation76_spill] sm:$0xff] %v12289_v21  ;;  %9636 = vmatprep.mubr.msk.f32.mxu1 %vm311_vm0, %v12107_v8  ;;  %v18386_v21 = vld [vmem:[#allocation42_spill] sm:$0xff] }
 0x107   : > { %v12295_v18 = vpop.f32.mrb[14].mxu1 }
 0x108   : > { %18296 = vst [vmem:[#allocation77_spill] sm:$0xff] %v12295_v18  ;;  %v12297_v19 = vpop.f32.mrb[15].mxu1  ;;  %9637 = vmatmul.mubr.msk.f32.gmra.mrb[120].mxu1 %vm311_vm0, %v12119_v25 }
 0x109   : > { %18297 = vst [vmem:[#allocation78_spill] sm:$0xff] %v12297_v19  ;;  %9639 = vmatprep.mubr.msk.f32.mxu1 %vm311_vm0, %v12122_v27 }
 0x10b   : > { %v12303_v17 = vpop.f32.mrb[16].mxu1 }
 0x10c   : > { %18298 = vst [vmem:[#allocation79_spill] sm:$0xff] %v12303_v17  ;;  %v12305_v40 = vpop.f32.mrb[17].mxu1  ;;  %9640 = vmatmul.mubr.msk.f32.gmra.mrb[122].mxu1 %vm311_vm0, %v12139_v30 }
 0x10d   : > { %18299 = vst [vmem:[#allocation80_spill] sm:$0xff] %v12305_v40  ;;  %9642 = vmatprep.mubr.msk.f32.mxu1 %vm311_vm0, %v12142_v15  ;;  %v12329_v15 = vpop.f32.mrb[2].mxu0 }
 0x10e   : > { %v12333_v49 = vpop.f32.mrb[3].mxu0 }
 0x10f   : > { %v12311_v43 = vpop.f32.mrb[18].mxu1  ;;  %v12341_v52 = vpop.f32.mrb[4].mxu0 }
 0x110   : > { %18300 = vst [vmem:[#allocation81_spill] sm:$0xff] %v12311_v43  ;;  %v12313_v44 = vpop.f32.mrb[19].mxu1  ;;  %9643 = vmatmul.mubr.msk.f32.gmra.mrb[124].mxu1 %vm311_vm0, %v12153_v16  ;;  %v12345_v53 = vpop.f32.mrb[5].mxu0 }
 0x111   : > { %18301 = vst [vmem:[#allocation82_spill] sm:$0xff] %v12313_v44  ;;  %9645 = vmatprep.mubr.msk.f32.mxu1 %vm311_vm0, %v12156_v33  ;;  %v12353_v56 = vpop.f32.mrb[6].mxu0  ;;  %v18328_v33 = vld [vmem:[#allocation12_spill] sm:$0xff] }
 0x113   : > { %v12323_v47 = vpop.f32.mrb[20].mxu1 }
 0x114   : > { %18302 = vst [vmem:[#allocation83_spill] sm:$0xff] %v12323_v47  ;;  %v12325_v48 = vpop.f32.mrb[21].mxu1  ;;  %9646 = vmatmul.mubr.msk.f32.gmra.mrb[126].mxu1 %vm311_vm0, %v12167_v34 }
 0x115   : > { %18303 = vst [vmem:[#allocation84_spill] sm:$0xff] %v12325_v48  ;;  %9648 = vmatprep.mubr.msk.f32.mxu1 %vm311_vm0, %v11498_v11  ;;  %v18308_v11 = vld [vmem:[#allocation2_spill] sm:$0xff] }
 0x117   : > { %v12335_v50 = vpop.f32.mrb[22].mxu1 }
 0x118   : > { %18304 = vst [vmem:[#allocation85_spill] sm:$0xff] %v12335_v50  ;;  %v12337_v51 = vpop.f32.mrb[23].mxu1  ;;  %9649 = vmatmul.mubr.msk.f32.gmra.mrb[128].mxu1 %vm311_vm0, %v11503_v12  ;;  %v12357_v12 = vpop.f32.mrb[7].mxu0 }
 0x119   : > { %18305 = vst [vmem:[#allocation86_spill] sm:$0xff] %v12337_v51  ;;  %9651 = vmatprep.mubr.msk.f32.mxu1 %vm311_vm0, %v11506_v13  ;;  %v18312_v13 = vld [vmem:[#allocation4_spill] sm:$0xff]  ;;  %v12365_v60 = vpop.f32.mrb[8].mxu0 }
 0x11a   : > { %v12369_v62 = vpop.f32.mrb[9].mxu0 }
 0x11b   : > { %v12347_v54 = vpop.f32.mrb[24].mxu1  ;;  %v12377_v2 = vpop.f32.mrb[10].mxu0 }
 0x11c   : > { %18306 = vst [vmem:[#allocation87_spill] sm:$0xff] %v12347_v54  ;;  %v12349_v55 = vpop.f32.mrb[25].mxu1  ;;  %9652 = vmatmul.mubr.msk.f32.gmra.mrb[130].mxu1 %vm311_vm0, %v18308_v11  ;;  %v12381_v4 = vpop.f32.mrb[11].mxu0  ;;  %v18329_v11 = vld [vmem:[#allocation13_spill] sm:$0xff] }
 0x11d   : > { %18307 = vst [vmem:[#allocation88_spill] sm:$0xff] %v12349_v55  ;;  %9654 = vmatprep.mubr.msk.f32.mxu1 %vm311_vm0, %v18309_v57  ;;  %v12389_v8 = vpop.f32.mrb[12].mxu0 }
 0x11e   : > { %v12393_v10 = vpop.f32.mrb[13].mxu0 }
 0x11f   : > { %v12359_v58 = vpop.f32.mrb[26].mxu1  ;;  %v12401_v25 = vpop.f32.mrb[14].mxu0 }
 0x120   : > { %18310 = vst [vmem:[#allocation2_spill] sm:$0xff] %v12359_v58  ;;  %v12361_v59 = vpop.f32.mrb[27].mxu1  ;;  %9655 = vmatmul.mubr.msk.f32.gmra.mrb[132].mxu1 %vm311_vm0, %v18312_v13  ;;  %v12405_v29 = vpop.f32.mrb[15].mxu0 }
 0x121   : > { %18311 = vst [vmem:[#allocation3_spill] sm:$0xff] %v12361_v59  ;;  %9657 = vmatprep.mubr.msk.f32.mxu1 %vm311_vm0, %v18313_v61  ;;  %v12413_v34 = vpop.f32.mrb[16].mxu0 }
 0x122   : > { %v12417_v57 = vpop.f32.mrb[17].mxu0 }
 0x123   : > { %v12371_v63 = vpop.f32.mrb[28].mxu1 }
 0x124   : > { %18314 = vst [vmem:[#allocation4_spill] sm:$0xff] %v12371_v63  ;;  %v12373_v0 = vpop.f32.mrb[29].mxu1  ;;  %9658 = vmatmul.mubr.msk.f32.gmra.mrb[134].mxu1 %vm311_vm0, %v18316_v1  ;;  %v18332_v1 = vld [vmem:[#allocation14_spill] sm:$0xff] }
 0x125   : > { %18315 = vst [vmem:[#allocation5_spill] sm:$0xff] %v12373_v0  ;;  %9660 = vmatprep.mubr.msk.f32.mxu1 %vm311_vm0, %v18317_v3  ;;  %v12425_v3 = vpop.f32.mrb[18].mxu0 }
 0x127   : > { %v12383_v5 = vpop.f32.mrb[30].mxu1 }
 0x128   : > { %18318 = vst [vmem:[#allocation6_spill] sm:$0xff] %v12383_v5  ;;  %v12385_v6 = vpop.f32.mrb[31].mxu1  ;;  %9661 = vmatmul.mubr.msk.f32.gmra.mrb[136].mxu1 %vm311_vm0, %v18320_v7  ;;  %v18333_v7 = vld [vmem:[#allocation15_spill] sm:$0xff] }
 0x129   : > { %18319 = vst [vmem:[#allocation7_spill] sm:$0xff] %v12385_v6  ;;  %9663 = vmatprep.mubr.msk.f32.mxu1 %vm311_vm0, %v18321_v9  ;;  %v12429_v9 = vpop.f32.mrb[19].mxu0 }
 0x12b   : > { %v12395_v14 = vpop.f32.mrb[32].mxu1 }
 0x12c   : > { %18322 = vst [vmem:[#allocation8_spill] sm:$0xff] %v12395_v14  ;;  %v12397_v27 = vpop.f32.mrb[33].mxu1  ;;  %9664 = vmatmul.mubr.msk.f32.gmra.mrb[138].mxu1 %vm311_vm0, %v18324_v28 }
 0x12d   : > { %18323 = vst [vmem:[#allocation9_spill] sm:$0xff] %v12397_v27  ;;  %9666 = vmatprep.mubr.msk.f32.mxu1 %vm311_vm0, %v18325_v26 }
 0x12f   : > { %v12407_v30 = vpop.f32.mrb[34].mxu1 }
 0x130   : > { %18326 = vst [vmem:[#allocation10_spill] sm:$0xff] %v12407_v30  ;;  %v12409_v16 = vpop.f32.mrb[35].mxu1  ;;  %9667 = vmatmul.mubr.msk.f32.gmra.mrb[140].mxu1 %vm311_vm0, %v18328_v33  ;;  %v18336_v33 = vld [vmem:[#allocation16_spill] sm:$0xff] }
 0x131   : > { %18327 = vst [vmem:[#allocation11_spill] sm:$0xff] %v12409_v16  ;;  %9669 = vmatprep.mubr.msk.f32.mxu1 %vm311_vm0, %v18329_v11  ;;  %v12437_v11 = vpop.f32.mrb[20].mxu0 }
 0x133   : > { %v12419_v13 = vpop.f32.mrb[36].mxu1 }
 0x134   : > { %18330 = vst [vmem:[#allocation12_spill] sm:$0xff] %v12419_v13  ;;  %v12421_v61 = vpop.f32.mrb[37].mxu1  ;;  %9670 = vmatmul.mubr.msk.f32.gmra.mrb[142].mxu1 %vm311_vm0, %v18332_v1  ;;  %v18337_v13 = vld [vmem:[#allocation17_spill] sm:$0xff]  ;;  %v12441_v1 = vpop.f32.mrb[21].mxu0 }
 0x135   : > { %18331 = vst [vmem:[#allocation13_spill] sm:$0xff] %v12421_v61  ;;  %9672 = vmatprep.mubr.msk.f32.mxu1 %vm311_vm0, %v18333_v7  ;;  %v18340_v7 = vld [vmem:[#allocation18_spill] sm:$0xff] }
 0x137   : > { %v12431_v28 = vpop.f32.mrb[38].mxu1 }
 0x138   : > { %18334 = vst [vmem:[#allocation14_spill] sm:$0xff] %v12431_v28  ;;  %v12433_v26 = vpop.f32.mrb[39].mxu1  ;;  %9673 = vmatmul.mubr.msk.f32.gmra.mrb[144].mxu1 %vm311_vm0, %v18336_v33  ;;  %v12449_v28 = vpop.f32.mrb[22].mxu0 }
 0x139   : > { %18335 = vst [vmem:[#allocation15_spill] sm:$0xff] %v12433_v26  ;;  %9675 = vmatprep.mubr.msk.f32.mxu1 %vm311_vm0, %v18337_v13  ;;  %v18341_v26 = vld [vmem:[#allocation19_spill] sm:$0xff]  ;;  %v12453_v33 = vpop.f32.mrb[23].mxu0  ;;  %v18344_v13 = vld [vmem:[#allocation20_spill] sm:$0xff] }
 0x13b   : > { %v12443_v61 = vpop.f32.mrb[40].mxu1 }
 0x13c   : > { %18338 = vst [vmem:[#allocation16_spill] sm:$0xff] %v12443_v61  ;;  %v12445_v30 = vpop.f32.mrb[41].mxu1  ;;  %9676 = vmatmul.mubr.msk.f32.gmra.mrb[146].mxu1 %vm311_vm0, %v18340_v7  ;;  %v12461_v61 = vpop.f32.mrb[24].mxu0 }
 0x13d   : > { %18339 = vst [vmem:[#allocation17_spill] sm:$0xff] %v12445_v30  ;;  %9678 = vmatprep.mubr.msk.f32.mxu1 %vm311_vm0, %v18341_v26  ;;  %v18345_v30 = vld [vmem:[#allocation21_spill] sm:$0xff]  ;;  %v12465_v7 = vpop.f32.mrb[25].mxu0  ;;  %v18348_v26 = vld [vmem:[#allocation22_spill] sm:$0xff] }
 0x13f   : > { %v12455_v16 = vpop.f32.mrb[42].mxu1 }
 0x140   : > { %18342 = vst [vmem:[#allocation18_spill] sm:$0xff] %v12455_v16  ;;  %v12457_v14 = vpop.f32.mrb[43].mxu1  ;;  %9679 = vmatmul.mubr.msk.f32.gmra.mrb[148].mxu1 %vm311_vm0, %v18344_v13  ;;  %v12473_v16 = vpop.f32.mrb[26].mxu0 }
 0x141   : > { %18343 = vst [vmem:[#allocation19_spill] sm:$0xff] %v12457_v14  ;;  %9681 = vmatprep.mubr.msk.f32.mxu1 %vm311_vm0, %v18345_v30  ;;  %v18349_v14 = vld [vmem:[#allocation23_spill] sm:$0xff]  ;;  %v12477_v13 = vpop.f32.mrb[27].mxu0  ;;  %v18352_v30 = vld [vmem:[#allocation24_spill] sm:$0xff] }
 0x143   : > { %v12467_v27 = vpop.f32.mrb[44].mxu1 }
 0x144   : > { %18346 = vst [vmem:[#allocation20_spill] sm:$0xff] %v12467_v27  ;;  %v12469_v5 = vpop.f32.mrb[45].mxu1  ;;  %9682 = vmatmul.mubr.msk.f32.gmra.mrb[150].mxu1 %vm311_vm0, %v18348_v26  ;;  %v12485_v27 = vpop.f32.mrb[28].mxu0 }
 0x145   : > { %18347 = vst [vmem:[#allocation21_spill] sm:$0xff] %v12469_v5  ;;  %9684 = vmatprep.mubr.msk.f32.mxu1 %vm311_vm0, %v18349_v14  ;;  %v18353_v5 = vld [vmem:[#allocation25_spill] sm:$0xff]  ;;  %v12489_v26 = vpop.f32.mrb[29].mxu0  ;;  %v18356_v14 = vld [vmem:[#allocation26_spill] sm:$0xff] }
 0x147   : > { %v12479_v6 = vpop.f32.mrb[46].mxu1 }
 0x148   : > { %18350 = vst [vmem:[#allocation22_spill] sm:$0xff] %v12479_v6  ;;  %v12481_v63 = vpop.f32.mrb[47].mxu1  ;;  %9685 = vmatmul.mubr.msk.f32.gmra.mrb[152].mxu1 %vm311_vm0, %v18352_v30  ;;  %v12497_v6 = vpop.f32.mrb[30].mxu0 }
 0x149   : > { %18351 = vst [vmem:[#allocation23_spill] sm:$0xff] %v12481_v63  ;;  %9687 = vmatprep.mubr.msk.f32.mxu1 %vm311_vm0, %v18353_v5  ;;  %v18357_v63 = vld [vmem:[#allocation27_spill] sm:$0xff]  ;;  %v12501_v30 = vpop.f32.mrb[31].mxu0  ;;  %v18360_v5 = vld [vmem:[#allocation28_spill] sm:$0xff] }
 0x14b   : > { %v12491_v0 = vpop.f32.mrb[48].mxu1 }
 0x14c   : > { %18354 = vst [vmem:[#allocation24_spill] sm:$0xff] %v12491_v0  ;;  %v12493_v58 = vpop.f32.mrb[49].mxu1  ;;  %9688 = vmatmul.mubr.msk.f32.gmra.mrb[154].mxu1 %vm311_vm0, %v18356_v14  ;;  %v12509_v0 = vpop.f32.mrb[32].mxu0 }
 0x14d   : > { %18355 = vst [vmem:[#allocation25_spill] sm:$0xff] %v12493_v58  ;;  %9690 = vmatprep.mubr.msk.f32.mxu1 %vm311_vm0, %v18357_v63  ;;  %v18361_v58 = vld [vmem:[#allocation29_spill] sm:$0xff]  ;;  %v12513_v14 = vpop.f32.mrb[33].mxu0  ;;  %v18364_v63 = vld [vmem:[#allocation30_spill] sm:$0xff] }
 0x14f   : > { %v12503_v59 = vpop.f32.mrb[50].mxu1 }
 0x150   : > { %18358 = vst [vmem:[#allocation26_spill] sm:$0xff] %v12503_v59  ;;  %v12505_v54 = vpop.f32.mrb[51].mxu1  ;;  %9691 = vmatmul.mubr.msk.f32.gmra.mrb[156].mxu1 %vm311_vm0, %v18360_v5  ;;  %v12521_v59 = vpop.f32.mrb[34].mxu0 }
 0x151   : > { %18359 = vst [vmem:[#allocation27_spill] sm:$0xff] %v12505_v54  ;;  %9693 = vmatprep.mubr.msk.f32.mxu1 %vm311_vm0, %v18361_v58  ;;  %v18365_v54 = vld [vmem:[#allocation31_spill] sm:$0xff]  ;;  %v12525_v5 = vpop.f32.mrb[35].mxu0  ;;  %v18368_v58 = vld [vmem:[#allocation32_spill] sm:$0xff] }
 0x153   : > { %v12515_v55 = vpop.f32.mrb[52].mxu1 }
 0x154   : > { %18362 = vst [vmem:[#allocation28_spill] sm:$0xff] %v12515_v55  ;;  %v12517_v50 = vpop.f32.mrb[53].mxu1  ;;  %9694 = vmatmul.mubr.msk.f32.gmra.mrb[158].mxu1 %vm311_vm0, %v18364_v63  ;;  %v12533_v55 = vpop.f32.mrb[36].mxu0 }
 0x155   : > { %18363 = vst [vmem:[#allocation29_spill] sm:$0xff] %v12517_v50  ;;  %9696 = vmatprep.mubr.msk.f32.mxu1 %vm311_vm0, %v18365_v54  ;;  %v18369_v50 = vld [vmem:[#allocation33_spill] sm:$0xff]  ;;  %v12537_v63 = vpop.f32.mrb[37].mxu0  ;;  %v18372_v54 = vld [vmem:[#allocation34_spill] sm:$0xff] }
 0x157   : > { %v12527_v51 = vpop.f32.mrb[54].mxu1 }
 0x158   : > { %18366 = vst [vmem:[#allocation30_spill] sm:$0xff] %v12527_v51  ;;  %v12529_v47 = vpop.f32.mrb[55].mxu1  ;;  %9697 = vmatmul.mubr.msk.f32.gmra.mrb[160].mxu1 %vm311_vm0, %v18368_v58  ;;  %v12545_v51 = vpop.f32.mrb[38].mxu0 }
 0x159   : > { %18367 = vst [vmem:[#allocation31_spill] sm:$0xff] %v12529_v47  ;;  %9699 = vmatprep.mubr.msk.f32.mxu1 %vm311_vm0, %v18369_v50  ;;  %v18373_v47 = vld [vmem:[#allocation35_spill] sm:$0xff]  ;;  %v12549_v58 = vpop.f32.mrb[39].mxu0  ;;  %v18376_v50 = vld [vmem:[#allocation36_spill] sm:$0xff] }
 0x15b   : > { %v12539_v48 = vpop.f32.mrb[56].mxu1 }
 0x15c   : > { %18370 = vst [vmem:[#allocation32_spill] sm:$0xff] %v12539_v48  ;;  %v12541_v43 = vpop.f32.mrb[57].mxu1  ;;  %9700 = vmatmul.mubr.msk.f32.gmra.mrb[162].mxu1 %vm311_vm0, %v18372_v54  ;;  %v12557_v48 = vpop.f32.mrb[40].mxu0 }
 0x15d   : > { %18371 = vst [vmem:[#allocation33_spill] sm:$0xff] %v12541_v43  ;;  %9702 = vmatprep.mubr.msk.f32.mxu1 %vm311_vm0, %v18373_v47  ;;  %v18377_v43 = vld [vmem:[#allocation37_spill] sm:$0xff]  ;;  %v12561_v54 = vpop.f32.mrb[41].mxu0  ;;  %v18380_v47 = vld [vmem:[#allocation38_spill] sm:$0xff] }
 0x15f   : > { %v12551_v44 = vpop.f32.mrb[58].mxu1 }
 0x160   : > { %18374 = vst [vmem:[#allocation34_spill] sm:$0xff] %v12551_v44  ;;  %v12553_v17 = vpop.f32.mrb[59].mxu1  ;;  %9703 = vmatmul.mubr.msk.f32.gmra.mrb[164].mxu1 %vm311_vm0, %v18376_v50  ;;  %v12569_v44 = vpop.f32.mrb[42].mxu0 }
 0x161   : > { %18375 = vst [vmem:[#allocation35_spill] sm:$0xff] %v12553_v17  ;;  %9705 = vmatprep.mubr.msk.f32.mxu1 %vm311_vm0, %v18377_v43  ;;  %v18381_v17 = vld [vmem:[#allocation39_spill] sm:$0xff]  ;;  %v12573_v50 = vpop.f32.mrb[43].mxu0  ;;  %v18384_v43 = vld [vmem:[#allocation40_spill] sm:$0xff] }
 0x163   : > { %v12563_v40 = vpop.f32.mrb[60].mxu1 }
 0x164   : > { %18378 = vst [vmem:[#allocation36_spill] sm:$0xff] %v12563_v40  ;;  %v12565_v18 = vpop.f32.mrb[61].mxu1  ;;  %9706 = vmatmul.mubr.msk.f32.gmra.mrb[166].mxu1 %vm311_vm0, %v18380_v47  ;;  %v12581_v40 = vpop.f32.mrb[44].mxu0 }
 0x165   : > { %18379 = vst [vmem:[#allocation37_spill] sm:$0xff] %v12565_v18  ;;  %9708 = vmatprep.mubr.msk.f32.mxu1 %vm311_vm0, %v18381_v17  ;;  %v18385_v18 = vld [vmem:[#allocation41_spill] sm:$0xff]  ;;  %v12585_v47 = vpop.f32.mrb[45].mxu0 }
 0x166   : > { %v12589_v17 = vpop.f32.mrb[46].mxu0 }
 0x167   : > { %v12575_v19 = vpop.f32.mrb[62].mxu1 }
 0x168   : > { %18382 = vst [vmem:[#allocation38_spill] sm:$0xff] %v12575_v19  ;;  %v12577_v20 = vpop.f32.mrb[63].mxu1  ;;  %9709 = vmatmul.mubr.msk.f32.gmra.mrb[168].mxu1 %vm311_vm0, %v18384_v43  ;;  %v12593_v19 = vpop.f32.mrb[47].mxu0 }
 0x169   : > { %18383 = vst [vmem:[#allocation39_spill] sm:$0xff] %v12577_v20  ;;  %9711 = vmatprep.mubr.msk.f32.mxu1 %vm311_vm0, %v18385_v18  ;;  %v18388_v20 = vld [vmem:[#allocation44_spill] sm:$0xff]  ;;  %v12597_v43 = vpop.f32.mrb[48].mxu0  ;;  %v3592_v18 = vld [vmem:[%s17854_s1 + $0x60] sm:$0xff] }
 0x16a   : > { %v12607_v24 = vpop.f32.mrb[49].mxu0 }
 0x16c   : > { %9712 = vmatmul.mubr.msk.f32.gmra.mrb[170].mxu1 %vm311_vm0, %v18386_v21  ;;  %v3593_v21 = vld [vmem:[%s17854_s1 + $0x68] sm:$0xff] }
 0x16d   : > { %9714 = vmatprep.mubr.msk.f32.mxu1 %vm311_vm0, %v18387_v22  ;;  %v10368_v22 = vpack.c.bf16 %v3593_v21, %v3592_v18  ;;  %v18395_v21 = vld [vmem:[#allocation50_spill] sm:$0xff] }
 0x16f   : > { %10369 = vmatprep.subr.bf16.mxu0 %v10368_v22 }
 0x170   : > { %9715 = vmatmul.mubr.msk.f32.gmra.mrb[172].mxu1 %vm311_vm0, %v18388_v20  ;;  %10371 = vmatpush3.bf16.msra.mxu0 %v10368_v22  ;;  %v12611_v20 = vpop.f32.mrb[50].mxu0  ;;  %v18397_v22 = vld [vmem:[#allocation51_spill] sm:$0xff] }
 0x171   : > { %9717 = vmatprep.mubr.msk.f32.mxu1 %vm311_vm0, %v18389_v23  ;;  %v12615_v35 = vpop.f32.mrb[51].mxu0  ;;  %v18394_v23 = vld [vmem:[#allocation49_spill] sm:$0xff] }
 0x172   : > { %v12619_v39 = vpop.f32.mrb[52].mxu0 }
 0x173   : > { %18393 = vst [vmem:[#allocation40_spill] sm:$0xff] %v12619_v39  ;;  %v12623_v18 = vpop.f32.mrb[53].mxu0  ;;  %v18415_v39 = vld [vmem:[#allocation62_spill] sm:$0xff] }
 0x174   : > { %9718 = vmatmul.mubr.msk.f32.gmra.mrb[174].mxu1 %vm311_vm0, %v18390_v31  ;;  %v12627_v31 = vpop.f32.mrb[54].mxu0 }
 0x175   : > { %9720 = vmatprep.mubr.msk.f32.mxu1 %vm311_vm0, %v18391_v32  ;;  %18396 = vst [vmem:[#allocation41_spill] sm:$0xff] %v12627_v31  ;;  %v12631_v32 = vpop.f32.mrb[55].mxu0  ;;  %v18406_v31 = vld [vmem:[#allocation56_spill] sm:$0xff] }
 0x178   : > { %9721 = vmatmul.mubr.msk.f32.gmra.mrb[176].mxu1 %vm311_vm0, %v18392_v36  ;;  %v12635_v36 = vpop.f32.mrb[56].mxu0 }
 0x179   : > { %9723 = vmatprep.mubr.msk.f32.mxu1 %vm311_vm0, %v18394_v23  ;;  %18399 = vst [vmem:[#allocation42_spill] sm:$0xff] %v12635_v36  ;;  %v12639_v23 = vpop.f32.mrb[57].mxu0  ;;  %v18408_v36 = vld [vmem:[#allocation57_spill] sm:$0xff] }
 0x17a   : > { %18401 = vst [vmem:[#allocation43_spill] sm:$0xff] %v12639_v23  ;;  %v18414_v23 = vld [vmem:[#allocation61_spill] sm:$0xff] }
 0x17c   : > { %9724 = vmatmul.mubr.msk.f32.gmra.mrb[178].mxu1 %vm311_vm0, %v18395_v21  ;;  %v12643_v21 = vpop.f32.mrb[58].mxu0 }
 0x17d   : > { %9726 = vmatprep.mubr.msk.f32.mxu1 %vm311_vm0, %v18397_v22  ;;  %18403 = vst [vmem:[#allocation44_spill] sm:$0xff] %v12643_v21  ;;  %v12647_v22 = vpop.f32.mrb[59].mxu0  ;;  %v18410_v21 = vld [vmem:[#allocation58_spill] sm:$0xff] }
 0x17e   : > { %18405 = vst [vmem:[#allocation45_spill] sm:$0xff] %v12647_v22  ;;  %v18412_v22 = vld [vmem:[#allocation59_spill] sm:$0xff] }
 0x180   : > { %9727 = vmatmul.mubr.msk.f32.gmra.mrb[180].mxu1 %vm311_vm0, %v18398_v41  ;;  %v12651_v41 = vpop.f32.mrb[60].mxu0 }
 0x181   : > { %9729 = vmatprep.mubr.msk.f32.mxu1 %vm311_vm0, %v18400_v42  ;;  %18407 = vst [vmem:[#allocation46_spill] sm:$0xff] %v12651_v41  ;;  %v12655_v42 = vpop.f32.mrb[61].mxu0 }
 0x182   : > { %18409 = vst [vmem:[#allocation47_spill] sm:$0xff] %v12655_v42 }
 0x184   : > { %9730 = vmatmul.mubr.msk.f32.gmra.mrb[182].mxu1 %vm311_vm0, %v18402_v37  ;;  %v12660_v37 = vld [vmem:[%s17855_s2] ss:$0 sm:$0xff] }
 0x185   : > { %9732 = vmatprep.mubr.msk.f32.mxu1 %vm311_vm0, %v18404_v38  ;;  %v12664_v38 = vpop.f32.mrb[62].mxu0 }
 0x186   : > { %18411 = vst [vmem:[#allocation48_spill] sm:$0xff] %v12664_v38  ;;  %v12670_v41 = vpop.f32.mrb[63].mxu0  ;;  %v768_v38 = vadd.f32 %v12317_v45, %v12660_v37  ;;  %v793_v45 = vadd.f32 %v12660_v37, %v12357_v12 }
 0x188   : > { %9733 = vmatmul.mubr.msk.f32.gmra.mrb[184].mxu1 %vm311_vm0, %v18406_v31  ;;  %v763_v31 = vadd.f32 %v12660_v37, %v12321_v46  ;;  %v783_v46 = vadd.f32 %v12660_v37, %v12345_v53 }
 0x189   : > { %9735 = vmatprep.mubr.msk.f32.mxu1 %vm311_vm0, %v18408_v36  ;;  %v18413_v36 = vld [vmem:[#allocation60_spill] sm:$0xff] }
 0x18a   : > { %v1401_v42 = vmax.f32 %v763_v31, 0.0  ;;  %v778_v31 = vadd.f32 %v12329_v15, %v12660_v37  ;;  %v803_v15 = vadd.f32 %v12660_v37, %v12369_v62 }
 0x18c   : > { %9736 = vmatmul.mubr.msk.f32.gmra.mrb[186].mxu1 %vm311_vm0, %v18410_v21  ;;  %v773_v21 = vadd.f32 %v12660_v37, %v12333_v49  ;;  %v1404_v49 = vmax.f32 %v778_v31, 0.0 }
 0x18d   : > { %9738 = vmatprep.mubr.msk.f32.mxu1 %vm311_vm0, %v18412_v22 }
 0x18e   : > { %v1403_v22 = vmax.f32 %v773_v21, 0.0  ;;  %v1409_v21 = vmax.f32 %v803_v15, 0.0 }
 0x190   : > { %9739 = vmatmul.mubr.msk.f32.gmra.mrb[188].mxu1 %vm311_vm0, %v18413_v36  ;;  %v1402_v36 = vmax.f32 %v768_v38, 0.0  ;;  %v798_v38 = vadd.f32 %v12353_v56, %v12660_v37  ;;  %v823_v56 = vadd.f32 %v12660_v37, %v12393_v10 }
 0x191   : > { %9741 = vmatprep.mubr.msk.f32.mxu1 %vm311_vm0, %v18414_v23  ;;  %v1405_v23 = vmax.f32 %v783_v46, 0.0 }
 0x192   : > { %v1408_v12 = vmax.f32 %v798_v38, 0.0  ;;  %v1413_v31 = vmax.f32 %v823_v56, 0.0  ;;  %v878_v56 = vadd.f32 %v12449_v28, %v12660_v37  ;;  %v903_v28 = vadd.f32 %v12660_v37, %v12489_v26 }
 0x194   : > { %9742 = vmatmul.mubr.msk.f32.gmra.mrb[190].mxu1 %vm311_vm0, %v18415_v39  ;;  %v788_v39 = vadd.f32 %v12341_v52, %v12660_v37  ;;  %v813_v52 = vadd.f32 %v12660_v37, %v12381_v4 }
 0x195   : > { %9752 = vmatprep.mubr.msk.f32.mxu1 %vm311_vm0, %v1401_v42  ;;  %v1407_v42 = vmax.f32 %v793_v45, 0.0 }
 0x196   : > { %v1406_v53 = vmax.f32 %v788_v39, 0.0  ;;  %v1411_v46 = vmax.f32 %v813_v52, 0.0 }
 0x198   : > { %9753 = vmatmul.mubr.msk.f32.vlgmr.msra.gmra.mrb[64].mxu1 %vm311_vm0, %v1402_v36  ;;  %v818_v36 = vadd.f32 %v12377_v2, %v12660_v37  ;;  %v843_v2 = vadd.f32 %v12660_v37, %v12417_v57  ;;  %v3595_v57 = vld [vmem:[%s17854_s1 + $0x78] sm:$0xff] }
 0x199   : > { %9755 = vmatprep.mubr.msk.f32.mxu1 %vm311_vm0, %v1403_v22  ;;  %v808_v22 = vadd.f32 %v12365_v60, %v12660_v37  ;;  %v833_v60 = vadd.f32 %v12660_v37, %v12405_v29  ;;  %v3594_v29 = vld [vmem:[%s17854_s1 + $0x70] sm:$0xff] }
 0x19a   : > { %v1412_v4 = vmax.f32 %v818_v36, 0.0  ;;  %v1417_v39 = vmax.f32 %v843_v2, 0.0  ;;  %v10372_v15 = vpack.c.bf16 %v3595_v57, %v3594_v29  ;;  %v888_v36 = vadd.f32 %v12461_v61, %v12660_v37 }
 0x19b   : > { %v1410_v62 = vmax.f32 %v808_v22, 0.0  ;;  %v1415_v45 = vmax.f32 %v833_v60, 0.0  ;;  %v868_v22 = vadd.f32 %v12437_v11, %v12660_v37  ;;  %v893_v11 = vadd.f32 %v12660_v37, %v12477_v13 }
 0x19c   : > { %9756 = vmatmul.mubr.msk.f32.gmra.mrb[66].mxu1 %vm311_vm0, %v1404_v49  ;;  %v838_v49 = vadd.f32 %v12401_v25, %v12660_v37  ;;  %v848_v25 = vadd.f32 %v12413_v34, %v12660_v37  ;;  %10373 = vmatprep.subr.bf16.mxu0 %v10372_v15  ;;  %v873_v34 = vadd.f32 %v12660_v37, %v12453_v33  ;;  %v1424_v33 = vmax.f32 %v878_v56, 0.0 }
 0x19d   : > { %9758 = vmatprep.mubr.msk.f32.mxu1 %vm311_vm0, %v1405_v23  ;;  %v828_v23 = vadd.f32 %v12389_v8, %v12660_v37  ;;  %v853_v8 = vadd.f32 %v12660_v37, %v12429_v9  ;;  %v863_v9 = vadd.f32 %v12660_v37, %v12441_v1  ;;  %10375 = vmatpush3.bf16.msra.mxu0 %v10372_v15 }
 0x19e   : > { %v1418_v38 = vmax.f32 %v848_v25, 0.0  ;;  %v1423_v1 = vmax.f32 %v873_v34, 0.0  ;;  %v898_v60 = vadd.f32 %v12473_v16, %v12660_v37  ;;  %v913_v61 = vadd.f32 %v12660_v37, %v12501_v30 }
 0x19f   : > { %v1414_v10 = vmax.f32 %v828_v23, 0.0  ;;  %v1421_v52 = vmax.f32 %v863_v9, 0.0  ;;  %v908_v23 = vadd.f32 %v12485_v27, %v12660_v37  ;;  %v923_v16 = vadd.f32 %v12660_v37, %v12513_v14 }
 0x1a0   : > { %9759 = vmatmul.mubr.msk.f32.gmra.mrb[68].mxu1 %vm311_vm0, %v1406_v53  ;;  %v1419_v53 = vmax.f32 %v853_v8, 0.0  ;;  %v1428_v13 = vmax.f32 %v898_v60, 0.0  ;;  %v918_v2 = vadd.f32 %v12497_v6, %v12660_v37  ;;  %v933_v27 = vadd.f32 %v12660_v37, %v12525_v5  ;;  %v18418_v60 = vld [vmem:[#allocation41_spill] sm:$0xff] }
 0x1a1   : > { %9761 = vmatprep.mubr.msk.f32.mxu1 %vm311_vm0, %v1407_v42  ;;  %v1416_v42 = vmax.f32 %v838_v49, 0.0  ;;  %v1430_v26 = vmax.f32 %v908_v23, 0.0  ;;  %v928_v49 = vadd.f32 %v12509_v0, %v12660_v37  ;;  %v943_v6 = vadd.f32 %v12660_v37, %v12537_v63 }
 0x1a2   : > { %v1432_v30 = vmax.f32 %v918_v2, 0.0  ;;  %v938_v8 = vadd.f32 %v12521_v59, %v12660_v37  ;;  %v953_v0 = vadd.f32 %v12660_v37, %v12549_v58  ;;  %v948_v57 = vadd.f32 %v12533_v55, %v12660_v37  ;;  %v18421_v2 = vld [vmem:[#allocation47_spill] sm:$0xff] }
 0x1a3   : > { %v1434_v14 = vmax.f32 %v928_v49, 0.0  ;;  %v1437_v29 = vmax.f32 %v943_v6, 0.0  ;;  %v963_v59 = vadd.f32 %v12660_v37, %v12561_v54  ;;  %v958_v25 = vadd.f32 %v12545_v51, %v12660_v37 }
 0x1a4   : > { %9762 = vmatmul.mubr.msk.f32.gmra.mrb[70].mxu1 %vm311_vm0, %v1408_v12  ;;  %v1436_v5 = vmax.f32 %v938_v8, 0.0  ;;  %v1438_v63 = vmax.f32 %v948_v57, 0.0  ;;  %v973_v55 = vadd.f32 %v12660_v37, %v12573_v50  ;;  %v983_v51 = vadd.f32 %v12660_v37, %v12585_v47  ;;  %v18423_v8 = vld [vmem:[#allocation46_spill] sm:$0xff]  ;;  %v18424_v57 = vld [vmem:[#allocation48_spill] sm:$0xff] }
 0x1a5   : > { %9764 = vmatprep.mubr.msk.f32.mxu1 %vm311_vm0, %v1409_v21  ;;  %v858_v21 = vadd.f32 %v12425_v3, %v12660_v37  ;;  %v883_v3 = vadd.f32 %v12660_v37, %v12465_v7  ;;  %v1426_v7 = vmax.f32 %v888_v36, 0.0  ;;  %v1441_v15 = vmax.f32 %v963_v59, 0.0  ;;  %v18416_v36 = vld [vmem:[#allocation40_spill] sm:$0xff] }
 0x1a6   : > { %v1440_v58 = vmax.f32 %v958_v25, 0.0  ;;  %v1443_v9 = vmax.f32 %v973_v55, 0.0  ;;  %v1073_v6 = vadd.f32 %v12660_v37, %v12670_v41  ;;  %v18425_v59 = vld [vmem:[#allocation64_spill] sm:$0xff]  ;;  %v18426_v41 = vld [vmem:[#allocation63_spill] sm:$0xff] }
 0x1a7   : > { %v1420_v12 = vmax.f32 %v858_v21, 0.0  ;;  %v1445_v21 = vmax.f32 %v983_v51, 0.0  ;;  %v1088_v25 = vadd.f32 %v18426_v41, %v12660_v37  ;;  %v18428_v51 = vld [vmem:[#allocation65_spill] sm:$0xff] }
 0x1a8   : > { %9765 = vmatmul.mubr.msk.f32.gmra.mrb[72].mxu1 %vm311_vm0, %v1410_v62  ;;  %v1425_v62 = vmax.f32 %v883_v3, 0.0 }
 0x1a9   : > { %9767 = vmatprep.mubr.msk.f32.mxu1 %vm311_vm0, %v1411_v46  ;;  %v1422_v46 = vmax.f32 %v868_v22, 0.0 }
 0x1ac   : > { %9768 = vmatmul.mubr.msk.f32.gmra.mrb[74].mxu1 %vm311_vm0, %v1412_v4  ;;  %v1429_v4 = vmax.f32 %v903_v28, 0.0 }
 0x1ad   : > { %9770 = vmatprep.mubr.msk.f32.mxu1 %vm311_vm0, %v1413_v31  ;;  %v1427_v31 = vmax.f32 %v893_v11, 0.0  ;;  %v1033_v11 = vadd.f32 %v12660_v37, %v12631_v32  ;;  %v18419_v32 = vld [vmem:[#allocation45_spill] sm:$0xff] }
 0x1b0   : > { %9771 = vmatmul.mubr.msk.f32.gmra.mrb[76].mxu1 %vm311_vm0, %v1414_v10  ;;  %v1433_v10 = vmax.f32 %v923_v16, 0.0 }
 0x1b1   : > { %9773 = vmatprep.mubr.msk.f32.mxu1 %vm311_vm0, %v1415_v45  ;;  %v1431_v45 = vmax.f32 %v913_v61, 0.0 }
 0x1b4   : > { %9774 = vmatmul.mubr.msk.f32.gmra.mrb[78].mxu1 %vm311_vm0, %v1416_v42  ;;  %v1439_v42 = vmax.f32 %v953_v0, 0.0  ;;  %v1463_v0 = vmax.f32 %v1073_v6, 0.0  ;;  %v18443_v6 = vld [vmem:[#allocation82_spill] sm:$0xff] }
 0x1b5   : > { %9776 = vmatprep.mubr.msk.f32.mxu1 %vm311_vm0, %v1417_v39  ;;  %v1435_v39 = vmax.f32 %v933_v27, 0.0 }
 0x1b8   : > { %9777 = vmatmul.mubr.msk.f32.gmra.mrb[80].mxu1 %vm311_vm0, %v1418_v38  ;;  %v978_v38 = vadd.f32 %v12569_v44, %v12660_v37  ;;  %v1003_v44 = vadd.f32 %v12660_v37, %v12607_v24  ;;  %v3596_v24 = vld [vmem:[%s17854_s1 + $0x80] sm:$0xff] }
 0x1b9   : > { %9779 = vmatprep.mubr.msk.f32.mxu1 %vm311_vm0, %v1419_v53  ;;  %v968_v53 = vadd.f32 %v12557_v48, %v12660_v37  ;;  %v993_v48 = vadd.f32 %v12660_v37, %v12593_v19  ;;  %v1013_v19 = vadd.f32 %v12660_v37, %v12615_v35  ;;  %v1023_v35 = vadd.f32 %v12660_v37, %v12623_v18 }
 0x1ba   : > { %v1444_v50 = vmax.f32 %v978_v38, 0.0  ;;  %v1449_v22 = vmax.f32 %v1003_v44, 0.0  ;;  %v1455_v18 = vmax.f32 %v1033_v11, 0.0 }
 0x1bb   : > { %v1442_v54 = vmax.f32 %v968_v53, 0.0  ;;  %v1447_v34 = vmax.f32 %v993_v48, 0.0 }
 0x1bc   : > { %9780 = vmatmul.mubr.msk.f32.gmra.mrb[82].mxu1 %vm311_vm0, %v1420_v12  ;;  %v998_v12 = vadd.f32 %v12589_v17, %v12660_v37  ;;  %v3597_v17 = vld [vmem:[%s17854_s1 + $0x88] sm:$0xff] }
 0x1bd   : > { %9782 = vmatprep.mubr.msk.f32.mxu1 %vm311_vm0, %v1421_v52  ;;  %v988_v52 = vadd.f32 %v12581_v40, %v12660_v37  ;;  %v12838_v3 = vpack.c.bf16 %v3597_v17, %v3596_v24  ;;  %v18433_v24 = vld [vmem:[#allocation72_spill] sm:$0xff] }
 0x1be   : > { %v1448_v40 = vmax.f32 %v998_v12, 0.0  ;;  %v1123_v17 = vadd.f32 %v12660_v37, %v18433_v24 }
 0x1bf   : > { %v1446_v47 = vmax.f32 %v988_v52, 0.0  ;;  %10377 = vmatprep.subr.bf16.mxu0 %v12838_v3  ;;  %v18430_v52 = vld [vmem:[#allocation67_spill] sm:$0xff] }
 0x1c0   : > { %9783 = vmatmul.mubr.msk.f32.gmra.mrb[84].mxu1 %vm311_vm0, %v1422_v46  ;;  %v1451_v46 = vmax.f32 %v1013_v19, 0.0  ;;  %v18432_v19 = vld [vmem:[#allocation69_spill] sm:$0xff] }
 0x1c1   : > { %9785 = vmatprep.mubr.msk.f32.mxu1 %vm311_vm0, %v1423_v1  ;;  %v1008_v1 = vadd.f32 %v12597_v43, %v12660_v37  ;;  %v1018_v43 = vadd.f32 %v12611_v20, %v12660_v37  ;;  %v18417_v20 = vld [vmem:[#allocation43_spill] sm:$0xff] }
 0x1c2   : > { %v1043_v28 = vadd.f32 %v12660_v37, %v18417_v20  ;;  %v18437_v20 = vld [vmem:[#allocation76_spill] sm:$0xff] }
 0x1c3   : > { %v1450_v56 = vmax.f32 %v1008_v1, 0.0 }
 0x1c4   : > { %9786 = vmatmul.mubr.msk.f32.gmra.mrb[86].mxu1 %vm311_vm0, %v1424_v33  ;;  %v1452_v33 = vmax.f32 %v1018_v43, 0.0  ;;  %v1457_v61 = vmax.f32 %v1043_v28, 0.0  ;;  %v1473_v43 = vmax.f32 %v1123_v17, 0.0  ;;  %v1143_v28 = vadd.f32 %v12660_v37, %v18437_v20  ;;  %v18454_v17 = vld [vmem:[#allocation4_spill] sm:$0xff] }
 0x1c5   : > { %9788 = vmatprep.mubr.msk.f32.mxu1 %vm311_vm0, %v1425_v62  ;;  %v1453_v62 = vmax.f32 %v1023_v35, 0.0  ;;  %v18434_v35 = vld [vmem:[#allocation71_spill] sm:$0xff] }
 0x1c8   : > { %9789 = vmatmul.mubr.msk.f32.gmra.mrb[88].mxu1 %vm311_vm0, %v1426_v7 }
 0x1c9   : > { %9791 = vmatprep.mubr.msk.f32.mxu1 %vm311_vm0, %v1427_v31  ;;  %v1028_v31 = vadd.f32 %v18416_v36, %v12660_v37  ;;  %v18436_v36 = vld [vmem:[#allocation73_spill] sm:$0xff] }
 0x1cb   : > { %v1454_v7 = vmax.f32 %v1028_v31, 0.0  ;;  %v1138_v31 = vadd.f32 %v18436_v36, %v12660_v37 }
 0x1cc   : > { %9792 = vmatmul.mubr.msk.f32.gmra.mrb[90].mxu1 %vm311_vm0, %v1428_v13  ;;  %v1053_v13 = vadd.f32 %v12660_v37, %v18419_v32  ;;  %v18439_v32 = vld [vmem:[#allocation78_spill] sm:$0xff] }
 0x1cd   : > { %9794 = vmatprep.mubr.msk.f32.mxu1 %vm311_vm0, %v1429_v4  ;;  %v1038_v4 = vadd.f32 %v18418_v60, %v12660_v37  ;;  %v18438_v60 = vld [vmem:[#allocation75_spill] sm:$0xff] }
 0x1cf   : > { %v1456_v23 = vmax.f32 %v1038_v4, 0.0  ;;  %v1148_v4 = vadd.f32 %v18438_v60, %v12660_v37 }
 0x1d0   : > { %9795 = vmatmul.mubr.msk.f32.gmra.mrb[92].mxu1 %vm311_vm0, %v1430_v26  ;;  %v1459_v26 = vmax.f32 %v1053_v13, 0.0  ;;  %v1153_v13 = vadd.f32 %v12660_v37, %v18439_v32 }
 0x1d1   : > { %9797 = vmatprep.mubr.msk.f32.mxu1 %vm311_vm0, %v1431_v45  ;;  %v18420_v45 = vld [vmem:[#allocation42_spill] sm:$0xff] }
 0x1d2   : > { %v1048_v16 = vadd.f32 %v18420_v45, %v12660_v37  ;;  %v18440_v45 = vld [vmem:[#allocation77_spill] sm:$0xff] }
 0x1d4   : > { %9798 = vmatmul.mubr.msk.f32.gmra.mrb[94].mxu1 %vm311_vm0, %v1432_v30  ;;  %v1458_v27 = vmax.f32 %v1048_v16, 0.0  ;;  %v18422_v30 = vld [vmem:[#allocation44_spill] sm:$0xff]  ;;  %v1158_v16 = vadd.f32 %v18440_v45, %v12660_v37 }
 0x1d5   : > { %9800 = vmatprep.mubr.msk.f32.mxu1 %vm311_vm0, %v1433_v10  ;;  %v1063_v10 = vadd.f32 %v12660_v37, %v18421_v2  ;;  %v1058_v49 = vadd.f32 %v18422_v30, %v12660_v37  ;;  %v18441_v2 = vld [vmem:[#allocation80_spill] sm:$0xff]  ;;  %v18442_v30 = vld [vmem:[#allocation79_spill] sm:$0xff] }
 0x1d8   : > { %9801 = vmatmul.mubr.msk.f32.gmra.mrb[96].mxu1 %vm311_vm0, %v1434_v14  ;;  %v1460_v14 = vmax.f32 %v1058_v49, 0.0  ;;  %v1168_v49 = vadd.f32 %v18442_v30, %v12660_v37 }
 0x1d9   : > { %9803 = vmatprep.mubr.msk.f32.mxu1 %vm311_vm0, %v1435_v39  ;;  %v1461_v39 = vmax.f32 %v1063_v10, 0.0  ;;  %v1163_v10 = vadd.f32 %v12660_v37, %v18441_v2 }
 0x1dc   : > { %9804 = vmatmul.mubr.msk.f32.gmra.mrb[98].mxu1 %vm311_vm0, %v1436_v5 }
 0x1dd   : > { %9806 = vmatprep.mubr.msk.f32.mxu1 %vm311_vm0, %v1437_v29  ;;  %v1068_v29 = vadd.f32 %v18423_v8, %v12660_v37  ;;  %v1482_v8 = vmax.f32 %v1168_v49, 0.0  ;;  %v18463_v49 = vld [vmem:[#allocation15_spill] sm:$0xff] }
 0x1df   : > { %v1462_v5 = vmax.f32 %v1068_v29, 0.0  ;;  %v18444_v29 = vld [vmem:[#allocation81_spill] sm:$0xff] }
 0x1e0   : > { %9807 = vmatmul.mubr.msk.f32.gmra.mrb[100].mxu1 %vm311_vm0, %v1438_v63  ;;  %v1083_v63 = vadd.f32 %v12660_v37, %v18425_v59 }
 0x1e1   : > { %9809 = vmatprep.mubr.msk.f32.mxu1 %vm311_vm0, %v1439_v42  ;;  %v1078_v42 = vadd.f32 %v18424_v57, %v12660_v37  ;;  %v18445_v57 = vld [vmem:[#allocation84_spill] sm:$0xff] }
 0x1e2   : > { %v1465_v55 = vmax.f32 %v1083_v63, 0.0  ;;  %v18446_v63 = vld [vmem:[#allocation83_spill] sm:$0xff] }
 0x1e3   : > { %v1188_v41 = vadd.f32 %v18446_v63, %v12660_v37 }
 0x1e4   : > { %9810 = vmatmul.mubr.msk.f32.gmra.mrb[102].mxu1 %vm311_vm0, %v1440_v58  ;;  %v18427_v58 = vld [vmem:[#allocation66_spill] sm:$0xff] }
 0x1e5   : > { %9812 = vmatprep.mubr.msk.f32.mxu1 %vm311_vm0, %v1441_v15  ;;  %v1464_v15 = vmax.f32 %v1078_v42, 0.0  ;;  %v1093_v53 = vadd.f32 %v12660_v37, %v18427_v58  ;;  %v1183_v42 = vadd.f32 %v12660_v37, %v18445_v57  ;;  %v1486_v58 = vmax.f32 %v1188_v41, 0.0  ;;  %v18467_v41 = vld [vmem:[#allocation19_spill] sm:$0xff] }
 0x1e7   : > { %v1467_v38 = vmax.f32 %v1093_v53, 0.0  ;;  %v18448_v53 = vld [vmem:[#allocation85_spill] sm:$0xff] }
 0x1e8   : > { %9813 = vmatmul.mubr.msk.f32.gmra.mrb[104].mxu1 %vm311_vm0, %v1442_v54  ;;  %v1098_v54 = vadd.f32 %v18428_v51, %v12660_v37 }
 0x1e9   : > { %9815 = vmatprep.mubr.msk.f32.mxu1 %vm311_vm0, %v1443_v9  ;;  %v1466_v9 = vmax.f32 %v1088_v25, 0.0  ;;  %v1485_v25 = vmax.f32 %v1183_v42, 0.0  ;;  %v18466_v42 = vld [vmem:[#allocation16_spill] sm:$0xff] }
 0x1ec   : > { %9816 = vmatmul.mubr.msk.f32.gmra.mrb[106].mxu1 %vm311_vm0, %v1444_v50  ;;  %v1468_v50 = vmax.f32 %v1098_v54, 0.0  ;;  %v18449_v54 = vld [vmem:[#allocation88_spill] sm:$0xff] }
 0x1ed   : > { %9818 = vmatprep.mubr.msk.f32.mxu1 %vm311_vm0, %v1445_v21  ;;  %v18429_v21 = vld [vmem:[#allocation68_spill] sm:$0xff] }
 0x1ee   : > { %v1103_v48 = vadd.f32 %v12660_v37, %v18429_v21 }
 0x1f0   : > { %9819 = vmatmul.mubr.msk.f32.gmra.mrb[108].mxu1 %vm311_vm0, %v1446_v47  ;;  %v1469_v44 = vmax.f32 %v1103_v48, 0.0  ;;  %v18431_v47 = vld [vmem:[#allocation70_spill] sm:$0xff]  ;;  %v18450_v48 = vld [vmem:[#allocation87_spill] sm:$0xff] }
 0x1f1   : > { %9821 = vmatprep.mubr.msk.f32.mxu1 %vm311_vm0, %v1447_v34  ;;  %v1108_v34 = vadd.f32 %v18430_v52, %v12660_v37  ;;  %v1113_v12 = vadd.f32 %v12660_v37, %v18431_v47 }
 0x1f3   : > { %v1471_v1 = vmax.f32 %v1113_v12, 0.0  ;;  %v18452_v12 = vld [vmem:[#allocation2_spill] sm:$0xff] }
 0x1f4   : > { %9822 = vmatmul.mubr.msk.f32.gmra.mrb[110].mxu1 %vm311_vm0, %v1448_v40  ;;  %v1118_v40 = vadd.f32 %v18432_v19, %v12660_v37 }
 0x1f5   : > { %9824 = vmatprep.mubr.msk.f32.mxu1 %vm311_vm0, %v1449_v22  ;;  %v1470_v22 = vmax.f32 %v1108_v34, 0.0  ;;  %v18451_v34 = vld [vmem:[#allocation3_spill] sm:$0xff] }
 0x1f8   : > { %9825 = vmatmul.mubr.msk.f32.gmra.mrb[112].mxu1 %vm311_vm0, %v1450_v56  ;;  %v1128_v56 = vadd.f32 %v18434_v35, %v12660_v37 }
 0x1f9   : > { %9827 = vmatprep.mubr.msk.f32.mxu1 %vm311_vm0, %v1451_v46  ;;  %v1472_v46 = vmax.f32 %v1118_v40, 0.0  ;;  %v18453_v40 = vld [vmem:[#allocation5_spill] sm:$0xff] }
 0x1fc   : > { %9828 = vmatmul.mubr.msk.f32.gmra.mrb[114].mxu1 %vm311_vm0, %v1452_v33  ;;  %v1474_v33 = vmax.f32 %v1128_v56, 0.0  ;;  %v18455_v56 = vld [vmem:[#allocation7_spill] sm:$0xff] }
 0x1fd   : > { %9830 = vmatprep.mubr.msk.f32.mxu1 %vm311_vm0, %v1453_v62  ;;  %v18435_v62 = vld [vmem:[#allocation74_spill] sm:$0xff] }
 0x1fe   : > { %v1133_v11 = vadd.f32 %v12660_v37, %v18435_v62 }
 0x200   : > { %9831 = vmatmul.mubr.msk.f32.gmra.mrb[116].mxu1 %vm311_vm0, %v1454_v7  ;;  %v1476_v7 = vmax.f32 %v1138_v31, 0.0  ;;  %v18457_v31 = vld [vmem:[#allocation9_spill] sm:$0xff] }
 0x201   : > { %9833 = vmatprep.mubr.msk.f32.mxu1 %vm311_vm0, %v1455_v18  ;;  %v1475_v18 = vmax.f32 %v1133_v11, 0.0  ;;  %v18456_v11 = vld [vmem:[#allocation6_spill] sm:$0xff] }
 0x204   : > { %9834 = vmatmul.mubr.msk.f32.gmra.mrb[118].mxu1 %vm311_vm0, %v1456_v23  ;;  %v1478_v23 = vmax.f32 %v1148_v4, 0.0  ;;  %v18459_v4 = vld [vmem:[#allocation11_spill] sm:$0xff] }
 0x205   : > { %9836 = vmatprep.mubr.msk.f32.mxu1 %vm311_vm0, %v1457_v61  ;;  %v1477_v61 = vmax.f32 %v1143_v28, 0.0  ;;  %v18458_v28 = vld [vmem:[#allocation8_spill] sm:$0xff] }
 0x208   : > { %9837 = vmatmul.mubr.msk.f32.gmra.mrb[120].mxu1 %vm311_vm0, %v1458_v27  ;;  %v1480_v27 = vmax.f32 %v1158_v16, 0.0  ;;  %v18461_v16 = vld [vmem:[#allocation13_spill] sm:$0xff] }
 0x209   : > { %9839 = vmatprep.mubr.msk.f32.mxu1 %vm311_vm0, %v1459_v26  ;;  %v1479_v26 = vmax.f32 %v1153_v13, 0.0  ;;  %v18460_v13 = vld [vmem:[#allocation10_spill] sm:$0xff] }
 0x20c   : > { %9840 = vmatmul.mubr.msk.f32.gmra.mrb[122].mxu1 %vm311_vm0, %v1460_v14  ;;  %v1173_v14 = vadd.f32 %v12660_v37, %v18443_v6 }
 0x20d   : > { %9842 = vmatprep.mubr.msk.f32.mxu1 %vm311_vm0, %v1461_v39  ;;  %v1481_v39 = vmax.f32 %v1163_v10, 0.0  ;;  %v18462_v10 = vld [vmem:[#allocation12_spill] sm:$0xff] }
 0x210   : > { %9843 = vmatmul.mubr.msk.f32.gmra.mrb[124].mxu1 %vm311_vm0, %v1462_v5  ;;  %v1483_v5 = vmax.f32 %v1173_v14, 0.0  ;;  %v18464_v14 = vld [vmem:[#allocation14_spill] sm:$0xff] }
 0x211   : > { %9845 = vmatprep.mubr.msk.f32.mxu1 %vm311_vm0, %v1463_v0  ;;  %v1178_v0 = vadd.f32 %v18444_v29, %v12660_v37 }
 0x213   : > { %v1484_v59 = vmax.f32 %v1178_v0, 0.0  ;;  %v18465_v0 = vld [vmem:[#allocation17_spill] sm:$0xff] }
 0x214   : > { %9846 = vmatmul.mubr.msk.f32.gmra.mrb[126].mxu1 %vm311_vm0, %v1464_v15  ;;  %v18447_v15 = vld [vmem:[#allocation86_spill] sm:$0xff] }
 0x215   : > { %9848 = vmatprep.mubr.msk.f32.mxu1 %vm311_vm0, %v1465_v55  ;;  %v1193_v55 = vadd.f32 %v12660_v37, %v18447_v15 }
 0x217   : > { %v1487_v51 = vmax.f32 %v1193_v55, 0.0  ;;  %v18468_v55 = vld [vmem:[#allocation18_spill] sm:$0xff] }
 0x218   : > { %9849 = vmatmul.mubr.msk.f32.gmra.mrb[128].mxu1 %vm311_vm0, %v1466_v9  ;;  %v1198_v9 = vadd.f32 %v18448_v53, %v12660_v37 }
 0x219   : > { %9851 = vmatprep.mubr.msk.f32.mxu1 %vm311_vm0, %v1467_v38  ;;  %v1203_v38 = vadd.f32 %v12660_v37, %v18449_v54  ;;  %v13019_v54 = vld [vmem:[%s17855_s2 + $0x1] ss:$0 sm:$0xff] }
 0x21a   : > { %v1488_v21 = vmax.f32 %v1198_v9, 0.0  ;;  %v18469_v9 = vld [vmem:[#allocation21_spill] sm:$0xff] }
 0x21b   : > { %v1489_v52 = vmax.f32 %v1203_v38, 0.0 }
 0x21c   : > { %9852 = vmatmul.mubr.msk.f32.gmra.mrb[130].mxu1 %vm311_vm0, %v1468_v50  ;;  %v1208_v50 = vadd.f32 %v18450_v48, %v12660_v37 }
 0x21d   : > { %9854 = vmatprep.mubr.msk.f32.mxu1 %vm311_vm0, %v1469_v44  ;;  %v1213_v44 = vadd.f32 %v12660_v37, %v18451_v34 }
 0x21e   : > { %v1490_v47 = vmax.f32 %v1208_v50, 0.0 }
 0x21f   : > { %v1491_v19 = vmax.f32 %v1213_v44, 0.0 }
 0x220   : > { %9855 = vmatmul.mubr.msk.f32.gmra.mrb[132].mxu1 %vm311_vm0, %v1470_v22  ;;  %v1218_v22 = vadd.f32 %v18452_v12, %v12660_v37 }
 0x221   : > { %9857 = vmatprep.mubr.msk.f32.mxu1 %vm311_vm0, %v1471_v1  ;;  %v1223_v1 = vadd.f32 %v12660_v37, %v18453_v40  ;;  %v18472_v40 = vld [vmem:[#allocation22_spill] sm:$0xff] }
 0x222   : > { %v1492_v24 = vmax.f32 %v1218_v22, 0.0 }
 0x223   : > { %v1493_v35 = vmax.f32 %v1223_v1, 0.0  ;;  %v1318_v1 = vadd.f32 %v18472_v40, %v12660_v37 }
 0x224   : > { %9858 = vmatmul.mubr.msk.f32.gmra.mrb[134].mxu1 %vm311_vm0, %v1472_v46  ;;  %v1228_v46 = vadd.f32 %v18454_v17, %v12660_v37  ;;  %v18473_v17 = vld [vmem:[#allocation25_spill] sm:$0xff] }
 0x225   : > { %9860 = vmatprep.mubr.msk.f32.mxu1 %vm311_vm0, %v1473_v43  ;;  %v1233_v43 = vadd.f32 %v12660_v37, %v18455_v56 }
 0x226   : > { %v1494_v62 = vmax.f32 %v1228_v46, 0.0  ;;  %v1323_v46 = vadd.f32 %v12660_v37, %v18473_v17  ;;  %v18482_v17 = vld [vmem:[#allocation32_spill] sm:$0xff] }
 0x227   : > { %v1495_v36 = vmax.f32 %v1233_v43, 0.0 }
 0x228   : > { %9861 = vmatmul.mubr.msk.f32.gmra.mrb[136].mxu1 %vm311_vm0, %v1474_v33  ;;  %v1238_v33 = vadd.f32 %v18456_v11, %v12660_v37 }
 0x229   : > { %9863 = vmatprep.mubr.msk.f32.mxu1 %vm311_vm0, %v1475_v18  ;;  %v1243_v18 = vadd.f32 %v12660_v37, %v18457_v31  ;;  %v18474_v31 = vld [vmem:[#allocation24_spill] sm:$0xff] }
 0x22a   : > { %v1496_v20 = vmax.f32 %v1238_v33, 0.0 }
 0x22b   : > { %v1497_v60 = vmax.f32 %v1243_v18, 0.0  ;;  %v1328_v18 = vadd.f32 %v18474_v31, %v12660_v37 }
 0x22c   : > { %9864 = vmatmul.mubr.msk.f32.gmra.mrb[138].mxu1 %vm311_vm0, %v1476_v7  ;;  %v1248_v7 = vadd.f32 %v18458_v28, %v12660_v37  ;;  %v18475_v28 = vld [vmem:[#allocation27_spill] sm:$0xff] }
 0x22d   : > { %9866 = vmatprep.mubr.msk.f32.mxu1 %vm311_vm0, %v1477_v61  ;;  %v1253_v61 = vadd.f32 %v12660_v37, %v18459_v4 }
 0x22e   : > { %v1498_v32 = vmax.f32 %v1248_v7, 0.0  ;;  %v1333_v7 = vadd.f32 %v12660_v37, %v18475_v28 }
 0x22f   : > { %v1499_v45 = vmax.f32 %v1253_v61, 0.0  ;;  %v3598_v61 = vld [vmem:[%s17854_s1 + $0x90] sm:$0xff] }
 0x230   : > { %9867 = vmatmul.mubr.msk.f32.gmra.mrb[140].mxu1 %vm311_vm0, %v1478_v23  ;;  %v1258_v23 = vadd.f32 %v18460_v13, %v12660_v37 }
 0x231   : > { %9869 = vmatprep.mubr.msk.f32.mxu1 %vm311_vm0, %v1479_v26  ;;  %v1263_v26 = vadd.f32 %v12660_v37, %v18461_v16 }
 0x232   : > { %v1500_v2 = vmax.f32 %v1258_v23, 0.0 }
 0x233   : > { %v1501_v30 = vmax.f32 %v1263_v26, 0.0 }
 0x234   : > { %9870 = vmatmul.mubr.msk.f32.gmra.mrb[142].mxu1 %vm311_vm0, %v1480_v27  ;;  %v1268_v27 = vadd.f32 %v18462_v10, %v12660_v37 }
 0x235   : > { %9872 = vmatprep.mubr.msk.f32.mxu1 %vm311_vm0, %v1481_v39  ;;  %v1273_v39 = vadd.f32 %v12660_v37, %v18463_v49 }
 0x236   : > { %v1502_v6 = vmax.f32 %v1268_v27, 0.0  ;;  %v1515_v27 = vmax.f32 %v1333_v7, 0.0 }
 0x237   : > { %v1503_v29 = vmax.f32 %v1273_v39, 0.0 }
 0x238   : > { %9873 = vmatmul.mubr.msk.f32.gmra.mrb[144].mxu1 %vm311_vm0, %v1482_v8  ;;  %v1278_v8 = vadd.f32 %v18464_v14, %v12660_v37 }
 0x239   : > { %9875 = vmatprep.mubr.msk.f32.mxu1 %vm311_vm0, %v1483_v5  ;;  %v1283_v5 = vadd.f32 %v12660_v37, %v18465_v0 }
 0x23a   : > { %v1504_v57 = vmax.f32 %v1278_v8, 0.0 }
 0x23b   : > { %v1505_v63 = vmax.f32 %v1283_v5, 0.0 }
 0x23c   : > { %9876 = vmatmul.mubr.msk.f32.gmra.mrb[146].mxu1 %vm311_vm0, %v1484_v59  ;;  %v1288_v59 = vadd.f32 %v18466_v42, %v12660_v37 }
 0x23d   : > { %9878 = vmatprep.mubr.msk.f32.mxu1 %vm311_vm0, %v1485_v25  ;;  %v1293_v25 = vadd.f32 %v12660_v37, %v18467_v41 }
 0x23e   : > { %v1506_v15 = vmax.f32 %v1288_v59, 0.0 }
 0x23f   : > { %v1507_v53 = vmax.f32 %v1293_v25, 0.0 }
 0x240   : > { %9879 = vmatmul.mubr.msk.f32.gmra.mrb[148].mxu1 %vm311_vm0, %v1486_v58  ;;  %v1298_v58 = vadd.f32 %v18468_v55, %v12660_v37 }
 0x241   : > { %9881 = vmatprep.mubr.msk.f32.mxu1 %vm311_vm0, %v1487_v51  ;;  %v1303_v51 = vadd.f32 %v12660_v37, %v18469_v9 }
 0x242   : > { %v1508_v38 = vmax.f32 %v1298_v58, 0.0 }
 0x243   : > { %v1509_v50 = vmax.f32 %v1303_v51, 0.0 }
 0x244   : > { %9882 = vmatmul.mubr.msk.f32.gmra.mrb[150].mxu1 %vm311_vm0, %v1488_v21  ;;  %v18470_v21 = vld [vmem:[#allocation20_spill] sm:$0xff] }
 0x245   : > { %9884 = vmatprep.mubr.msk.f32.mxu1 %vm311_vm0, %v1489_v52  ;;  %v1308_v48 = vadd.f32 %v18470_v21, %v12660_v37  ;;  %v18471_v52 = vld [vmem:[#allocation23_spill] sm:$0xff] }
 0x246   : > { %v1313_v34 = vadd.f32 %v12660_v37, %v18471_v52 }
 0x248   : > { %9885 = vmatmul.mubr.msk.f32.gmra.mrb[152].mxu1 %vm311_vm0, %v1490_v47 }
 0x249   : > { %9887 = vmatprep.mubr.msk.f32.mxu1 %vm311_vm0, %v1491_v19  ;;  %v1510_v19 = vmax.f32 %v1308_v48, 0.0 }
 0x24c   : > { %9888 = vmatmul.mubr.msk.f32.gmra.mrb[154].mxu1 %vm311_vm0, %v1492_v24  ;;  %v1511_v24 = vmax.f32 %v1313_v34, 0.0 }
 0x24d   : > { %9890 = vmatprep.mubr.msk.f32.mxu1 %vm311_vm0, %v1493_v35 }
 0x250   : > { %9891 = vmatmul.mubr.msk.f32.gmra.mrb[156].mxu1 %vm311_vm0, %v1494_v62 }
 0x251   : > { %9893 = vmatprep.mubr.msk.f32.mxu1 %vm311_vm0, %v1495_v36  ;;  %v1512_v36 = vmax.f32 %v1318_v1, 0.0 }
 0x254   : > { %9894 = vmatmul.mubr.msk.f32.gmra.mrb[158].mxu1 %vm311_vm0, %v1496_v20  ;;  %v1513_v20 = vmax.f32 %v1323_v46, 0.0  ;;  %v1368_v46 = vadd.f32 %v18482_v17, %v12660_v37 }
 0x255   : > { %9896 = vmatprep.mubr.msk.f32.mxu1 %vm311_vm0, %v1497_v60 }
 0x258   : > { %9897 = vmatmul.mubr.msk.f32.gmra.mrb[160].mxu1 %vm311_vm0, %v1498_v32  ;;  %v3599_v32 = vld [vmem:[%s17854_s1 + $0x98] sm:$0xff] }
 0x259   : > { %9899 = vmatprep.mubr.msk.f32.mxu1 %vm311_vm0, %v1499_v45  ;;  %v10380_v16 = vpack.c.bf16 %v3599_v32, %v3598_v61  ;;  %v1522_v61 = vmax.f32 %v1368_v46, 0.0  ;;  %v18484_v32 = vld [vmem:[#allocation34_spill] sm:$0xff] }
 0x25c   : > { %9900 = vmatmul.mubr.msk.f32.gmra.mrb[162].mxu1 %vm311_vm0, %v1500_v2  ;;  %v18476_v2 = vld [vmem:[#allocation26_spill] sm:$0xff] }
 0x25d   : > { %9902 = vmatprep.mubr.msk.f32.mxu1 %vm311_vm0, %v1501_v30  ;;  %v1338_v10 = vadd.f32 %v18476_v2, %v12660_v37  ;;  %v18477_v30 = vld [vmem:[#allocation29_spill] sm:$0xff] }
 0x25e   : > { %v1343_v49 = vadd.f32 %v12660_v37, %v18477_v30 }
 0x25f   : > { %v1516_v5 = vmax.f32 %v1338_v10, 0.0 }
 0x260   : > { %9903 = vmatmul.mubr.msk.f32.gmra.mrb[164].mxu1 %vm311_vm0, %v1502_v6  ;;  %v1517_v59 = vmax.f32 %v1343_v49, 0.0 }
 0x261   : > { %9905 = vmatprep.mubr.msk.f32.mxu1 %vm311_vm0, %v1503_v29 }
 0x264   : > { %9906 = vmatmul.mubr.msk.f32.gmra.mrb[166].mxu1 %vm311_vm0, %v1504_v57  ;;  %v18478_v57 = vld [vmem:[#allocation28_spill] sm:$0xff] }
 0x265   : > { %9908 = vmatprep.mubr.msk.f32.mxu1 %vm311_vm0, %v1505_v63  ;;  %v1348_v42 = vadd.f32 %v18478_v57, %v12660_v37  ;;  %v18479_v63 = vld [vmem:[#allocation31_spill] sm:$0xff]  ;;  %v18486_v57 = vld [vmem:[#allocation36_spill] sm:$0xff] }
 0x266   : > { %v1353_v41 = vadd.f32 %v12660_v37, %v18479_v63  ;;  %v18487_v63 = vld [vmem:[#allocation39_spill] sm:$0xff] }
 0x267   : > { %v1518_v51 = vmax.f32 %v1348_v42, 0.0  ;;  %v1388_v42 = vadd.f32 %v18486_v57, %v12660_v37 }
 0x268   : > { %9909 = vmatmul.mubr.msk.f32.gmra.mrb[168].mxu1 %vm311_vm0, %v1506_v15  ;;  %v1519_v48 = vmax.f32 %v1353_v41, 0.0  ;;  %v1393_v41 = vadd.f32 %v12660_v37, %v18487_v63 }
 0x269   : > { %9911 = vmatprep.mubr.msk.f32.mxu1 %vm311_vm0, %v1507_v53 }
 0x26b   : > { %v9754_v44 = vpop.f32.mrb[64].mxu1 }
 0x26c   : > { %v13026_v47 = vadd.f32 %v9754_v44, %v13019_v54  ;;  %v2692_v12 = vpop.f32.mrb[65].mxu1  ;;  %9912 = vmatmul.mubr.msk.f32.gmra.mrb[170].mxu1 %vm311_vm0, %v1508_v38  ;;  %v18480_v38 = vld [vmem:[#allocation30_spill] sm:$0xff] }
 0x26d   : > { %v13030_v22 = vadd.f32 %v13019_v54, %v2692_v12  ;;  %9914 = vmatprep.mubr.msk.f32.mxu1 %vm311_vm0, %v1509_v50  ;;  %v1358_v21 = vadd.f32 %v18480_v38, %v12660_v37  ;;  %v18481_v50 = vld [vmem:[#allocation33_spill] sm:$0xff] }
 0x26e   : > { %v17966_v43 = vmax.f32 %v13026_v47, 0.0  ;;  %v1363_v52 = vadd.f32 %v12660_v37, %v18481_v50  ;;  %v1526_v50 = vmax.f32 %v1388_v42, 0.0 }
 0x26f   : > { %v17969_v35 = vmax.f32 %v13030_v22, 0.0  ;;  %v9757_v56 = vpop.f32.mrb[66].mxu1 }
 0x270   : > { %v13040_v62 = vadd.f32 %v9757_v56, %v13019_v54  ;;  %v2702_v11 = vpop.f32.mrb[67].mxu1  ;;  %9915 = vmatmul.mubr.msk.f32.gmra.mrb[172].mxu1 %vm311_vm0, %v1510_v19  ;;  %v1521_v56 = vmax.f32 %v1363_v52, 0.0  ;;  %v18488_v52 = vld [vmem:[#allocation38_spill] sm:$0xff] }
 0x271   : > { %v13044_v33 = vadd.f32 %v13019_v54, %v2702_v11  ;;  %9917 = vmatprep.mubr.msk.f32.mxu1 %vm311_vm0, %v1511_v24  ;;  %9952 = vmatprep.mubr.msk.f32.mxu0 %vm311_vm0, %v17969_v35  ;;  %v1520_v24 = vmax.f32 %v1358_v21, 0.0  ;;  %v18483_v11 = vld [vmem:[#allocation35_spill] sm:$0xff] }
 0x272   : > { %9953 = vmatmul.mubr.msk.f32.vlgmr.msra.gmra.mrb[64].mxu0 %vm311_vm0, %v17966_v43  ;;  %v17962_v13 = vmax.f32 %v13040_v62, 0.0 }
 0x273   : > { %v17965_v60 = vmax.f32 %v13044_v33, 0.0  ;;  %v9760_v4 = vpop.f32.mrb[68].mxu1  ;;  %10379 = vmatpush3.bf16.msra.mxu0 %v12838_v3  ;;  %v1514_v3 = vmax.f32 %v1328_v18, 0.0 }
 0x274   : > { %v13067_v23 = vadd.f32 %v9760_v4, %v13019_v54  ;;  %v2712_v45 = vpop.f32.mrb[69].mxu1  ;;  %9918 = vmatmul.mubr.msk.f32.gmra.mrb[174].mxu1 %vm311_vm0, %v1512_v36  ;;  %10381 = vmatprep.subr.bf16.mxu0 %v10380_v16  ;;  %v1373_v36 = vadd.f32 %v12660_v37, %v18483_v11 }
 0x275   : > { %v13071_v26 = vadd.f32 %v13019_v54, %v2712_v45  ;;  %9920 = vmatprep.mubr.msk.f32.mxu1 %vm311_vm0, %v1513_v20  ;;  %9955 = vmatprep.mubr.msk.f32.mxu0 %vm311_vm0, %v17965_v60  ;;  %v1378_v45 = vadd.f32 %v18484_v32, %v12660_v37 }
 0x276   : > { %9956 = vmatmul.mubr.msk.f32.gmra.mrb[66].mxu0 %vm311_vm0, %v17962_v13  ;;  %v17958_v14 = vmax.f32 %v13067_v23, 0.0 }
 0x277   : > { %v17961_v39 = vmax.f32 %v13071_v26, 0.0  ;;  %v9763_v6 = vpop.f32.mrb[70].mxu1  ;;  %10383 = vmatpush3.bf16.msra.mxu0 %v10380_v16  ;;  %v1523_v16 = vmax.f32 %v1373_v36, 0.0 }
 0x278   : > { %v13087_v8 = vadd.f32 %v9763_v6, %v13019_v54  ;;  %v2722_v29 = vpop.f32.mrb[71].mxu1  ;;  %9921 = vmatmul.mubr.msk.f32.gmra.mrb[176].mxu1 %vm311_vm0, %v1514_v3  ;;  %v18485_v3 = vld [vmem:[#allocation37_spill] sm:$0xff] }
 0x279   : > { %v13091_v0 = vadd.f32 %v13019_v54, %v2722_v29  ;;  %9923 = vmatprep.mubr.msk.f32.mxu1 %vm311_vm0, %v1515_v27  ;;  %9958 = vmatprep.mubr.msk.f32.mxu0 %vm311_vm0, %v17961_v39  ;;  %v1383_v2 = vadd.f32 %v12660_v37, %v18485_v3 }
 0x27a   : > { %9959 = vmatmul.mubr.msk.f32.gmra.mrb[68].mxu0 %vm311_vm0, %v17958_v14  ;;  %v17954_v55 = vmax.f32 %v13087_v8, 0.0 }
 0x27b   : > { %v17957_v25 = vmax.f32 %v13091_v0, 0.0  ;;  %v9766_v15 = vpop.f32.mrb[72].mxu1 }
 0x27c   : > { %v13107_v58 = vadd.f32 %v9766_v15, %v13019_v54  ;;  %v2732_v53 = vpop.f32.mrb[73].mxu1  ;;  %9924 = vmatmul.mubr.msk.f32.gmra.mrb[178].mxu1 %vm311_vm0, %v1516_v5  ;;  %v1524_v5 = vmax.f32 %v1378_v45, 0.0 }
 0x27d   : > { %v13111_v9 = vadd.f32 %v13019_v54, %v2732_v53  ;;  %9926 = vmatprep.mubr.msk.f32.mxu1 %vm311_vm0, %v1517_v59  ;;  %9961 = vmatprep.mubr.msk.f32.mxu0 %vm311_vm0, %v17957_v25  ;;  %v1525_v59 = vmax.f32 %v1383_v2, 0.0 }
 0x27e   : > { %9962 = vmatmul.mubr.msk.f32.gmra.mrb[70].mxu0 %vm311_vm0, %v17954_v55  ;;  %v17950_v12 = vmax.f32 %v13107_v58, 0.0 }
 0x27f   : > { %v17953_v34 = vmax.f32 %v13111_v9, 0.0  ;;  %v9769_v44 = vpop.f32.mrb[74].mxu1 }
 0x280   : > { %v13127_v19 = vadd.f32 %v9769_v44, %v13019_v54  ;;  %v2742_v40 = vpop.f32.mrb[75].mxu1  ;;  %9927 = vmatmul.mubr.msk.f32.gmra.mrb[180].mxu1 %vm311_vm0, %v1518_v51  ;;  %v1398_v44 = vadd.f32 %v18488_v52, %v12660_v37 }
 0x281   : > { %v13131_v1 = vadd.f32 %v13019_v54, %v2742_v40  ;;  %9929 = vmatprep.mubr.msk.f32.mxu1 %vm311_vm0, %v1519_v48  ;;  %9964 = vmatprep.mubr.msk.f32.mxu0 %vm311_vm0, %v17953_v34  ;;  %v1527_v40 = vmax.f32 %v1393_v41, 0.0 }
 0x282   : > { %9965 = vmatmul.mubr.msk.f32.gmra.mrb[72].mxu0 %vm311_vm0, %v17950_v12  ;;  %v17946_v20 = vmax.f32 %v13127_v19, 0.0  ;;  %v1528_v37 = vmax.f32 %v1398_v44, 0.0 }
 0x283   : > { %v17949_v31 = vmax.f32 %v13131_v1, 0.0  ;;  %v9772_v18 = vpop.f32.mrb[76].mxu1 }
 0x284   : > { %v13147_v28 = vadd.f32 %v9772_v18, %v13019_v54  ;;  %v2752_v7 = vpop.f32.mrb[77].mxu1  ;;  %9930 = vmatmul.mubr.msk.f32.gmra.mrb[182].mxu1 %vm311_vm0, %v1520_v24 }
 0x285   : > { %v13151_v4 = vadd.f32 %v13019_v54, %v2752_v7  ;;  %9932 = vmatprep.mubr.msk.f32.mxu1 %vm311_vm0, %v1521_v56  ;;  %9967 = vmatprep.mubr.msk.f32.mxu0 %vm311_vm0, %v17949_v31 }
 0x286   : > { %9968 = vmatmul.mubr.msk.f32.gmra.mrb[74].mxu0 %vm311_vm0, %v17946_v20  ;;  %v17942_v30 = vmax.f32 %v13147_v28, 0.0 }
 0x287   : > { %v17945_v10 = vmax.f32 %v13151_v4, 0.0  ;;  %v9775_v27 = vpop.f32.mrb[78].mxu1 }
 0x288   : > { %v13167_v49 = vadd.f32 %v9775_v27, %v13019_v54  ;;  %v2762_v6 = vpop.f32.mrb[79].mxu1  ;;  %9933 = vmatmul.mubr.msk.f32.gmra.mrb[184].mxu1 %vm311_vm0, %v1522_v61 }
 0x289   : > { %v13171_v29 = vadd.f32 %v13019_v54, %v2762_v6  ;;  %9935 = vmatprep.mubr.msk.f32.mxu1 %vm311_vm0, %v1523_v16  ;;  %9970 = vmatprep.mubr.msk.f32.mxu0 %vm311_vm0, %v17945_v10 }
 0x28a   : > { %9971 = vmatmul.mubr.msk.f32.gmra.mrb[76].mxu0 %vm311_vm0, %v17942_v30  ;;  %v17938_v51 = vmax.f32 %v13167_v49, 0.0 }
 0x28b   : > { %v17941_v15 = vmax.f32 %v13171_v29, 0.0  ;;  %v9778_v53 = vpop.f32.mrb[80].mxu1 }
 0x28c   : > { %v13187_v38 = vadd.f32 %v9778_v53, %v13019_v54  ;;  %v2772_v21 = vpop.f32.mrb[81].mxu1  ;;  %9936 = vmatmul.mubr.msk.f32.gmra.mrb[186].mxu1 %vm311_vm0, %v1524_v5 }
 0x28d   : > { %v13191_v48 = vadd.f32 %v13019_v54, %v2772_v21  ;;  %9938 = vmatprep.mubr.msk.f32.mxu1 %vm311_vm0, %v1525_v59  ;;  %9973 = vmatprep.mubr.msk.f32.mxu0 %vm311_vm0, %v17941_v15 }
 0x28e   : > { %9974 = vmatmul.mubr.msk.f32.gmra.mrb[78].mxu0 %vm311_vm0, %v17938_v51  ;;  %v17934_v46 = vmax.f32 %v13187_v38, 0.0 }
 0x28f   : > { %v17937_v24 = vmax.f32 %v13191_v48, 0.0  ;;  %v9781_v17 = vpop.f32.mrb[82].mxu1 }
 0x290   : > { %v13205_v56 = vadd.f32 %v9781_v17, %v13019_v54  ;;  %v2782_v11 = vpop.f32.mrb[83].mxu1  ;;  %9939 = vmatmul.mubr.msk.f32.gmra.mrb[188].mxu1 %vm311_vm0, %v1526_v50 }
 0x291   : > { %v13209_v36 = vadd.f32 %v13019_v54, %v2782_v11  ;;  %9941 = vmatprep.mubr.msk.f32.mxu1 %vm311_vm0, %v1527_v40  ;;  %9976 = vmatprep.mubr.msk.f32.mxu0 %vm311_vm0, %v17937_v24 }
 0x292   : > { %9977 = vmatmul.mubr.msk.f32.gmra.mrb[80].mxu0 %vm311_vm0, %v17934_v46  ;;  %v17930_v61 = vmax.f32 %v13205_v56, 0.0 }
 0x293   : > { %v17933_v18 = vmax.f32 %v13209_v36, 0.0  ;;  %v9784_v7 = vpop.f32.mrb[84].mxu1 }
 0x294   : > { %v13221_v32 = vadd.f32 %v9784_v7, %v13019_v54  ;;  %v2792_v45 = vpop.f32.mrb[85].mxu1  ;;  %9942 = vmatmul.mubr.msk.f32.gmra.mrb[190].mxu1 %vm311_vm0, %v1528_v37 }
 0x295   : > { %v13225_v16 = vadd.f32 %v13019_v54, %v2792_v45  ;;  %9979 = vmatprep.mubr.msk.f32.mxu0 %vm311_vm0, %v17933_v18 }
 0x296   : > { %9980 = vmatmul.mubr.msk.f32.gmra.mrb[82].mxu0 %vm311_vm0, %v17930_v61  ;;  %v17926_v27 = vmax.f32 %v13221_v32, 0.0 }
 0x297   : > { %v17929_v3 = vmax.f32 %v13225_v16, 0.0  ;;  %v9787_v2 = vpop.f32.mrb[86].mxu1 }
 0x298   : > { %v13236_v6 = vadd.f32 %v9787_v2, %v13019_v54  ;;  %v2802_v5 = vpop.f32.mrb[87].mxu1 }
 0x299   : > { %v13239_v57 = vadd.f32 %v13019_v54, %v2802_v5  ;;  %9982 = vmatprep.mubr.msk.f32.mxu0 %vm311_vm0, %v17929_v3 }
 0x29a   : > { %9983 = vmatmul.mubr.msk.f32.gmra.mrb[84].mxu0 %vm311_vm0, %v17926_v27  ;;  %v17922_v63 = vmax.f32 %v13236_v6, 0.0 }
 0x29b   : > { %v17925_v42 = vmax.f32 %v13239_v57, 0.0  ;;  %v9790_v59 = vpop.f32.mrb[88].mxu1 }
 0x29c   : > { %v13250_v41 = vadd.f32 %v9790_v59, %v13019_v54  ;;  %v2812_v53 = vpop.f32.mrb[89].mxu1 }
 0x29d   : > { %v13253_v21 = vadd.f32 %v13019_v54, %v2812_v53  ;;  %9985 = vmatprep.mubr.msk.f32.mxu0 %vm311_vm0, %v17925_v42 }
 0x29e   : > { %9986 = vmatmul.mubr.msk.f32.gmra.mrb[86].mxu0 %vm311_vm0, %v17922_v63  ;;  %v17918_v44 = vmax.f32 %v13250_v41, 0.0 }
 0x29f   : > { %v17921_v50 = vmax.f32 %v13253_v21, 0.0  ;;  %v9793_v52 = vpop.f32.mrb[90].mxu1 }
 0x2a0   : > { %v13264_v40 = vadd.f32 %v9793_v52, %v13019_v54  ;;  %v2822_v17 = vpop.f32.mrb[91].mxu1 }
 0x2a1   : > { %v13267_v11 = vadd.f32 %v13019_v54, %v2822_v17  ;;  %9988 = vmatprep.mubr.msk.f32.mxu0 %vm311_vm0, %v17921_v50 }
 0x2a2   : > { %9989 = vmatmul.mubr.msk.f32.gmra.mrb[88].mxu0 %vm311_vm0, %v17918_v44  ;;  %v17919_v45 = vmax.f32 %v13264_v40, 0.0 }
 0x2a3   : > { %v17920_v37 = vmax.f32 %v13267_v11, 0.0  ;;  %v9796_v7 = vpop.f32.mrb[92].mxu1 }
 0x2a4   : > { %v13278_v2 = vadd.f32 %v9796_v7, %v13019_v54  ;;  %v2832_v5 = vpop.f32.mrb[93].mxu1 }
 0x2a5   : > { %v13281_v59 = vadd.f32 %v13019_v54, %v2832_v5  ;;  %9991 = vmatprep.mubr.msk.f32.mxu0 %vm311_vm0, %v17920_v37 }
 0x2a6   : > { %9992 = vmatmul.mubr.msk.f32.gmra.mrb[90].mxu0 %vm311_vm0, %v17919_v45  ;;  %v17923_v17 = vmax.f32 %v13278_v2, 0.0 }
 0x2a7   : > { %v17924_v53 = vmax.f32 %v13281_v59, 0.0  ;;  %v9799_v52 = vpop.f32.mrb[94].mxu1 }
 0x2a8   : > { %v13292_v7 = vadd.f32 %v9799_v52, %v13019_v54  ;;  %v2842_v44 = vpop.f32.mrb[95].mxu1 }
 0x2a9   : > { %v13295_v5 = vadd.f32 %v13019_v54, %v2842_v44  ;;  %9994 = vmatprep.mubr.msk.f32.mxu0 %vm311_vm0, %v17924_v53 }
 0x2aa   : > { %9995 = vmatmul.mubr.msk.f32.gmra.mrb[92].mxu0 %vm311_vm0, %v17923_v17  ;;  %v17927_v50 = vmax.f32 %v13292_v7, 0.0 }
 0x2ab   : > { %v17928_v45 = vmax.f32 %v13295_v5, 0.0  ;;  %v9802_v37 = vpop.f32.mrb[96].mxu1 }
 0x2ac   : > { %v13306_v52 = vadd.f32 %v9802_v37, %v13019_v54  ;;  %v2852_v63 = vpop.f32.mrb[97].mxu1 }
 0x2ad   : > { %v13309_v44 = vadd.f32 %v13019_v54, %v2852_v63  ;;  %9997 = vmatprep.mubr.msk.f32.mxu0 %vm311_vm0, %v17928_v45 }
 0x2ae   : > { %9998 = vmatmul.mubr.msk.f32.gmra.mrb[94].mxu0 %vm311_vm0, %v17927_v50  ;;  %v17931_v42 = vmax.f32 %v13306_v52, 0.0 }
 0x2af   : > { %v17932_v17 = vmax.f32 %v13309_v44, 0.0  ;;  %v9805_v53 = vpop.f32.mrb[98].mxu1 }
 0x2b0   : > { %v13320_v37 = vadd.f32 %v9805_v53, %v13019_v54  ;;  %v2862_v27 = vpop.f32.mrb[99].mxu1 }
 0x2b1   : > { %v13323_v63 = vadd.f32 %v13019_v54, %v2862_v27  ;;  %10000 = vmatprep.mubr.msk.f32.mxu0 %vm311_vm0, %v17932_v17 }
 0x2b2   : > { %10001 = vmatmul.mubr.msk.f32.gmra.mrb[96].mxu0 %vm311_vm0, %v17931_v42  ;;  %v17935_v3 = vmax.f32 %v13320_v37, 0.0 }
 0x2b3   : > { %v17936_v50 = vmax.f32 %v13323_v63, 0.0  ;;  %v9808_v45 = vpop.f32.mrb[100].mxu1 }
 0x2b4   : > { %v13334_v53 = vadd.f32 %v9808_v45, %v13019_v54  ;;  %v2872_v61 = vpop.f32.mrb[101].mxu1 }
 0x2b5   : > { %v13337_v27 = vadd.f32 %v13019_v54, %v2872_v61  ;;  %10003 = vmatprep.mubr.msk.f32.mxu0 %vm311_vm0, %v17936_v50 }
 0x2b6   : > { %10004 = vmatmul.mubr.msk.f32.gmra.mrb[98].mxu0 %vm311_vm0, %v17935_v3  ;;  %v17939_v18 = vmax.f32 %v13334_v53, 0.0 }
 0x2b7   : > { %v17940_v42 = vmax.f32 %v13337_v27, 0.0  ;;  %v9811_v17 = vpop.f32.mrb[102].mxu1 }
 0x2b8   : > { %v13348_v45 = vadd.f32 %v9811_v17, %v13019_v54  ;;  %v2882_v46 = vpop.f32.mrb[103].mxu1 }
 0x2b9   : > { %v13351_v61 = vadd.f32 %v13019_v54, %v2882_v46  ;;  %10006 = vmatprep.mubr.msk.f32.mxu0 %vm311_vm0, %v17940_v42 }
 0x2ba   : > { %10007 = vmatmul.mubr.msk.f32.gmra.mrb[100].mxu0 %vm311_vm0, %v17939_v18  ;;  %v17943_v24 = vmax.f32 %v13348_v45, 0.0 }
 0x2bb   : > { %v17944_v3 = vmax.f32 %v13351_v61, 0.0  ;;  %v9814_v50 = vpop.f32.mrb[104].mxu1 }
 0x2bc   : > { %v13362_v17 = vadd.f32 %v9814_v50, %v13019_v54  ;;  %v2892_v51 = vpop.f32.mrb[105].mxu1 }
 0x2bd   : > { %v13365_v46 = vadd.f32 %v13019_v54, %v2892_v51  ;;  %10009 = vmatprep.mubr.msk.f32.mxu0 %vm311_vm0, %v17944_v3 }
 0x2be   : > { %10010 = vmatmul.mubr.msk.f32.gmra.mrb[102].mxu0 %vm311_vm0, %v17943_v24  ;;  %v17947_v15 = vmax.f32 %v13362_v17, 0.0 }
 0x2bf   : > { %v17948_v18 = vmax.f32 %v13365_v46, 0.0  ;;  %v9817_v42 = vpop.f32.mrb[106].mxu1 }
 0x2c0   : > { %v13376_v50 = vadd.f32 %v9817_v42, %v13019_v54  ;;  %v2902_v30 = vpop.f32.mrb[107].mxu1 }
 0x2c1   : > { %v13379_v51 = vadd.f32 %v13019_v54, %v2902_v30  ;;  %10012 = vmatprep.mubr.msk.f32.mxu0 %vm311_vm0, %v17948_v18 }
 0x2c2   : > { %10013 = vmatmul.mubr.msk.f32.gmra.mrb[104].mxu0 %vm311_vm0, %v17947_v15  ;;  %v17951_v10 = vmax.f32 %v13376_v50, 0.0 }
 0x2c3   : > { %v17952_v24 = vmax.f32 %v13379_v51, 0.0  ;;  %v9820_v3 = vpop.f32.mrb[108].mxu1 }
 0x2c4   : > { %v13390_v42 = vadd.f32 %v9820_v3, %v13019_v54  ;;  %v2912_v20 = vpop.f32.mrb[109].mxu1 }
 0x2c5   : > { %v13393_v30 = vadd.f32 %v13019_v54, %v2912_v20  ;;  %10015 = vmatprep.mubr.msk.f32.mxu0 %vm311_vm0, %v17952_v24 }
 0x2c6   : > { %10016 = vmatmul.mubr.msk.f32.gmra.mrb[106].mxu0 %vm311_vm0, %v17951_v10  ;;  %v17955_v31 = vmax.f32 %v13390_v42, 0.0 }
 0x2c7   : > { %v17956_v15 = vmax.f32 %v13393_v30, 0.0  ;;  %v9823_v18 = vpop.f32.mrb[110].mxu1 }
 0x2c8   : > { %v13404_v3 = vadd.f32 %v9823_v18, %v13019_v54  ;;  %v2922_v12 = vpop.f32.mrb[111].mxu1 }
 0x2c9   : > { %v13407_v20 = vadd.f32 %v13019_v54, %v2922_v12  ;;  %10018 = vmatprep.mubr.msk.f32.mxu0 %vm311_vm0, %v17956_v15 }
 0x2ca   : > { %10019 = vmatmul.mubr.msk.f32.gmra.mrb[108].mxu0 %vm311_vm0, %v17955_v31  ;;  %v17959_v34 = vmax.f32 %v13404_v3, 0.0 }
 0x2cb   : > { %v17960_v10 = vmax.f32 %v13407_v20, 0.0  ;;  %v9826_v24 = vpop.f32.mrb[112].mxu1 }
 0x2cc   : > { %v13418_v18 = vadd.f32 %v9826_v24, %v13019_v54  ;;  %v2932_v55 = vpop.f32.mrb[113].mxu1 }
 0x2cd   : > { %v13421_v12 = vadd.f32 %v13019_v54, %v2932_v55  ;;  %10021 = vmatprep.mubr.msk.f32.mxu0 %vm311_vm0, %v17960_v10 }
 0x2ce   : > { %10022 = vmatmul.mubr.msk.f32.gmra.mrb[110].mxu0 %vm311_vm0, %v17959_v34  ;;  %v17963_v25 = vmax.f32 %v13418_v18, 0.0 }
 0x2cf   : > { %v17964_v31 = vmax.f32 %v13421_v12, 0.0  ;;  %v9829_v15 = vpop.f32.mrb[114].mxu1 }
 0x2d0   : > { %v13432_v24 = vadd.f32 %v9829_v15, %v13019_v54  ;;  %v2942_v14 = vpop.f32.mrb[115].mxu1 }
 0x2d1   : > { %v13435_v55 = vadd.f32 %v13019_v54, %v2942_v14  ;;  %10024 = vmatprep.mubr.msk.f32.mxu0 %vm311_vm0, %v17964_v31 }
 0x2d2   : > { %18489 = vst [vmem:[#allocation49_spill] sm:$0xff] %v13432_v24  ;;  %10025 = vmatmul.mubr.msk.f32.gmra.mrb[112].mxu0 %vm311_vm0, %v17963_v25  ;;  %v17967_v39 = vmax.f32 %v13432_v24, 0.0 }
 0x2d3   : > { %18490 = vst [vmem:[#allocation50_spill] sm:$0xff] %v13435_v55  ;;  %v17968_v34 = vmax.f32 %v13435_v55, 0.0  ;;  %v9832_v10 = vpop.f32.mrb[116].mxu1 }
 0x2d4   : > { %v13446_v15 = vadd.f32 %v9832_v10, %v13019_v54  ;;  %v2952_v13 = vpop.f32.mrb[117].mxu1 }
 0x2d5   : > { %v13449_v14 = vadd.f32 %v13019_v54, %v2952_v13  ;;  %10027 = vmatprep.mubr.msk.f32.mxu0 %vm311_vm0, %v17968_v34 }
 0x2d6   : > { %18491 = vst [vmem:[#allocation51_spill] sm:$0xff] %v13446_v15  ;;  %10028 = vmatmul.mubr.msk.f32.gmra.mrb[114].mxu0 %vm311_vm0, %v17967_v39  ;;  %v17971_v60 = vmax.f32 %v13446_v15, 0.0 }
 0x2d7   : > { %18492 = vst [vmem:[#allocation52_spill] sm:$0xff] %v13449_v14  ;;  %v17972_v25 = vmax.f32 %v13449_v14, 0.0  ;;  %v9835_v31 = vpop.f32.mrb[118].mxu1 }
 0x2d8   : > { %v13460_v10 = vadd.f32 %v9835_v31, %v13019_v54  ;;  %v2962_v43 = vpop.f32.mrb[119].mxu1 }
 0x2d9   : > { %v13463_v13 = vadd.f32 %v13019_v54, %v2962_v43  ;;  %10030 = vmatprep.mubr.msk.f32.mxu0 %vm311_vm0, %v17972_v25 }
 0x2da   : > { %18493 = vst [vmem:[#allocation53_spill] sm:$0xff] %v13460_v10  ;;  %10031 = vmatmul.mubr.msk.f32.gmra.mrb[116].mxu0 %vm311_vm0, %v17971_v60  ;;  %v17975_v35 = vmax.f32 %v13460_v10, 0.0 }
 0x2db   : > { %18494 = vst [vmem:[#allocation54_spill] sm:$0xff] %v13463_v13  ;;  %v17976_v39 = vmax.f32 %v13463_v13, 0.0  ;;  %v9838_v34 = vpop.f32.mrb[120].mxu1 }
 0x2dc   : > { %v13474_v31 = vadd.f32 %v9838_v34, %v13019_v54  ;;  %v2972_v24 = vpop.f32.mrb[121].mxu1 }
 0x2dd   : > { %v13477_v43 = vadd.f32 %v13019_v54, %v2972_v24  ;;  %10033 = vmatprep.mubr.msk.f32.mxu0 %vm311_vm0, %v17976_v39 }
 0x2de   : > { %18495 = vst [vmem:[#allocation55_spill] sm:$0xff] %v13474_v31  ;;  %10034 = vmatmul.mubr.msk.f32.gmra.mrb[118].mxu0 %vm311_vm0, %v17975_v35  ;;  %v17979_v15 = vmax.f32 %v13474_v31, 0.0 }
 0x2df   : > { %18496 = vst [vmem:[#allocation56_spill] sm:$0xff] %v13477_v43  ;;  %v17980_v60 = vmax.f32 %v13477_v43, 0.0  ;;  %v9841_v25 = vpop.f32.mrb[122].mxu1 }
 0x2e0   : > { %v13488_v34 = vadd.f32 %v9841_v25, %v13019_v54  ;;  %v2982_v14 = vpop.f32.mrb[123].mxu1 }
 0x2e1   : > { %v13491_v24 = vadd.f32 %v13019_v54, %v2982_v14  ;;  %10036 = vmatprep.mubr.msk.f32.mxu0 %vm311_vm0, %v17980_v60 }
 0x2e2   : > { %18497 = vst [vmem:[#allocation57_spill] sm:$0xff] %v13488_v34  ;;  %10037 = vmatmul.mubr.msk.f32.gmra.mrb[120].mxu0 %vm311_vm0, %v17979_v15  ;;  %v17983_v10 = vmax.f32 %v13488_v34, 0.0 }
 0x2e3   : > { %18498 = vst [vmem:[#allocation58_spill] sm:$0xff] %v13491_v24  ;;  %v17984_v35 = vmax.f32 %v13491_v24, 0.0  ;;  %v9844_v39 = vpop.f32.mrb[124].mxu1 }
 0x2e4   : > { %v13502_v25 = vadd.f32 %v9844_v39, %v13019_v54  ;;  %v2992_v13 = vpop.f32.mrb[125].mxu1 }
 0x2e5   : > { %v13505_v14 = vadd.f32 %v13019_v54, %v2992_v13  ;;  %10039 = vmatprep.mubr.msk.f32.mxu0 %vm311_vm0, %v17984_v35 }
 0x2e6   : > { %18499 = vst [vmem:[#allocation59_spill] sm:$0xff] %v13502_v25  ;;  %10040 = vmatmul.mubr.msk.f32.gmra.mrb[122].mxu0 %vm311_vm0, %v17983_v10  ;;  %v17987_v31 = vmax.f32 %v13502_v25, 0.0 }
 0x2e7   : > { %18500 = vst [vmem:[#allocation60_spill] sm:$0xff] %v13505_v14  ;;  %v17988_v15 = vmax.f32 %v13505_v14, 0.0  ;;  %v9847_v60 = vpop.f32.mrb[126].mxu1 }
 0x2e8   : > { %v13516_v39 = vadd.f32 %v9847_v60, %v13019_v54  ;;  %v3002_v43 = vpop.f32.mrb[127].mxu1 }
 0x2e9   : > { %v13519_v13 = vadd.f32 %v13019_v54, %v3002_v43  ;;  %10042 = vmatprep.mubr.msk.f32.mxu0 %vm311_vm0, %v17988_v15 }
 0x2ea   : > { %18501 = vst [vmem:[#allocation61_spill] sm:$0xff] %v13516_v39  ;;  %10043 = vmatmul.mubr.msk.f32.gmra.mrb[124].mxu0 %vm311_vm0, %v17987_v31  ;;  %v17991_v34 = vmax.f32 %v13516_v39, 0.0 }
 0x2eb   : > { %18502 = vst [vmem:[#allocation62_spill] sm:$0xff] %v13519_v13  ;;  %v17992_v10 = vmax.f32 %v13519_v13, 0.0  ;;  %v9850_v35 = vpop.f32.mrb[128].mxu1 }
 0x2ec   : > { %v13530_v60 = vadd.f32 %v9850_v35, %v13019_v54  ;;  %v3012_v24 = vpop.f32.mrb[129].mxu1 }
 0x2ed   : > { %v13533_v43 = vadd.f32 %v13019_v54, %v3012_v24  ;;  %10045 = vmatprep.mubr.msk.f32.mxu0 %vm311_vm0, %v17992_v10 }
 0x2ee   : > { %18503 = vst [vmem:[#allocation40_spill] sm:$0xff] %v13530_v60  ;;  %10046 = vmatmul.mubr.msk.f32.gmra.mrb[126].mxu0 %vm311_vm0, %v17991_v34  ;;  %v17995_v25 = vmax.f32 %v13530_v60, 0.0 }
 0x2ef   : > { %18504 = vst [vmem:[#allocation43_spill] sm:$0xff] %v13533_v43  ;;  %v17996_v31 = vmax.f32 %v13533_v43, 0.0  ;;  %v9853_v15 = vpop.f32.mrb[130].mxu1 }
 0x2f0   : > { %v13544_v35 = vadd.f32 %v9853_v15, %v13019_v54  ;;  %v3022_v14 = vpop.f32.mrb[131].mxu1 }
 0x2f1   : > { %v13547_v24 = vadd.f32 %v13019_v54, %v3022_v14  ;;  %10048 = vmatprep.mubr.msk.f32.mxu0 %vm311_vm0, %v17996_v31 }
 0x2f2   : > { %18505 = vst [vmem:[#allocation41_spill] sm:$0xff] %v13544_v35  ;;  %10049 = vmatmul.mubr.msk.f32.gmra.mrb[128].mxu0 %vm311_vm0, %v17995_v25  ;;  %v17999_v39 = vmax.f32 %v13544_v35, 0.0 }
 0x2f3   : > { %18506 = vst [vmem:[#allocation45_spill] sm:$0xff] %v13547_v24  ;;  %v18000_v34 = vmax.f32 %v13547_v24, 0.0  ;;  %v9856_v10 = vpop.f32.mrb[132].mxu1 }
 0x2f4   : > { %v13558_v15 = vadd.f32 %v9856_v10, %v13019_v54  ;;  %v3032_v13 = vpop.f32.mrb[133].mxu1 }
 0x2f5   : > { %v13561_v14 = vadd.f32 %v13019_v54, %v3032_v13  ;;  %10051 = vmatprep.mubr.msk.f32.mxu0 %vm311_vm0, %v18000_v34 }
 0x2f6   : > { %18507 = vst [vmem:[#allocation42_spill] sm:$0xff] %v13558_v15  ;;  %10052 = vmatmul.mubr.msk.f32.gmra.mrb[130].mxu0 %vm311_vm0, %v17999_v39  ;;  %v18003_v60 = vmax.f32 %v13558_v15, 0.0 }
 0x2f7   : > { %18508 = vst [vmem:[#allocation47_spill] sm:$0xff] %v13561_v14  ;;  %v18004_v25 = vmax.f32 %v13561_v14, 0.0  ;;  %v9859_v31 = vpop.f32.mrb[134].mxu1 }
 0x2f8   : > { %v13572_v10 = vadd.f32 %v9859_v31, %v13019_v54  ;;  %v3042_v43 = vpop.f32.mrb[135].mxu1 }
 0x2f9   : > { %v13575_v13 = vadd.f32 %v13019_v54, %v3042_v43  ;;  %10054 = vmatprep.mubr.msk.f32.mxu0 %vm311_vm0, %v18004_v25 }
 0x2fa   : > { %18509 = vst [vmem:[#allocation44_spill] sm:$0xff] %v13572_v10  ;;  %10055 = vmatmul.mubr.msk.f32.gmra.mrb[132].mxu0 %vm311_vm0, %v18003_v60  ;;  %v18007_v35 = vmax.f32 %v13572_v10, 0.0 }
 0x2fb   : > { %18510 = vst [vmem:[#allocation46_spill] sm:$0xff] %v13575_v13  ;;  %v18008_v39 = vmax.f32 %v13575_v13, 0.0  ;;  %v9862_v34 = vpop.f32.mrb[136].mxu1 }
 0x2fc   : > { %v13586_v31 = vadd.f32 %v9862_v34, %v13019_v54  ;;  %v3052_v24 = vpop.f32.mrb[137].mxu1 }
 0x2fd   : > { %v13589_v43 = vadd.f32 %v13019_v54, %v3052_v24  ;;  %10057 = vmatprep.mubr.msk.f32.mxu0 %vm311_vm0, %v18008_v39 }
 0x2fe   : > { %18511 = vst [vmem:[#allocation48_spill] sm:$0xff] %v13586_v31  ;;  %10058 = vmatmul.mubr.msk.f32.gmra.mrb[134].mxu0 %vm311_vm0, %v18007_v35  ;;  %v18011_v15 = vmax.f32 %v13586_v31, 0.0 }
 0x2ff   : > { %18512 = vst [vmem:[#allocation64_spill] sm:$0xff] %v13589_v43  ;;  %v18012_v60 = vmax.f32 %v13589_v43, 0.0  ;;  %v9865_v25 = vpop.f32.mrb[138].mxu1 }
 0x300   : > { %v13600_v34 = vadd.f32 %v9865_v25, %v13019_v54  ;;  %v3062_v14 = vpop.f32.mrb[139].mxu1 }
 0x301   : > { %v13603_v24 = vadd.f32 %v13019_v54, %v3062_v14  ;;  %10060 = vmatprep.mubr.msk.f32.mxu0 %vm311_vm0, %v18012_v60 }
 0x302   : > { %18513 = vst [vmem:[#allocation63_spill] sm:$0xff] %v13600_v34  ;;  %10061 = vmatmul.mubr.msk.f32.gmra.mrb[136].mxu0 %vm311_vm0, %v18011_v15  ;;  %v18015_v10 = vmax.f32 %v13600_v34, 0.0 }
 0x303   : > { %18514 = vst [vmem:[#allocation66_spill] sm:$0xff] %v13603_v24  ;;  %v18016_v35 = vmax.f32 %v13603_v24, 0.0  ;;  %v9868_v39 = vpop.f32.mrb[140].mxu1 }
 0x304   : > { %v13614_v25 = vadd.f32 %v9868_v39, %v13019_v54  ;;  %v3072_v13 = vpop.f32.mrb[141].mxu1 }
 0x305   : > { %v13617_v14 = vadd.f32 %v13019_v54, %v3072_v13  ;;  %10063 = vmatprep.mubr.msk.f32.mxu0 %vm311_vm0, %v18016_v35 }
 0x306   : > { %18515 = vst [vmem:[#allocation65_spill] sm:$0xff] %v13614_v25  ;;  %10064 = vmatmul.mubr.msk.f32.gmra.mrb[138].mxu0 %vm311_vm0, %v18015_v10  ;;  %v18019_v31 = vmax.f32 %v13614_v25, 0.0 }
 0x307   : > { %18516 = vst [vmem:[#allocation68_spill] sm:$0xff] %v13617_v14  ;;  %v18020_v15 = vmax.f32 %v13617_v14, 0.0  ;;  %v9871_v60 = vpop.f32.mrb[142].mxu1 }
 0x308   : > { %v13628_v39 = vadd.f32 %v9871_v60, %v13019_v54  ;;  %v3082_v43 = vpop.f32.mrb[143].mxu1 }
 0x309   : > { %v13631_v13 = vadd.f32 %v13019_v54, %v3082_v43  ;;  %10066 = vmatprep.mubr.msk.f32.mxu0 %vm311_vm0, %v18020_v15 }
 0x30a   : > { %18517 = vst [vmem:[#allocation67_spill] sm:$0xff] %v13628_v39  ;;  %10067 = vmatmul.mubr.msk.f32.gmra.mrb[140].mxu0 %vm311_vm0, %v18019_v31  ;;  %v18023_v34 = vmax.f32 %v13628_v39, 0.0 }
 0x30b   : > { %18518 = vst [vmem:[#allocation70_spill] sm:$0xff] %v13631_v13  ;;  %v18024_v10 = vmax.f32 %v13631_v13, 0.0  ;;  %v9874_v35 = vpop.f32.mrb[144].mxu1 }
 0x30c   : > { %v13642_v60 = vadd.f32 %v9874_v35, %v13019_v54  ;;  %v3092_v24 = vpop.f32.mrb[145].mxu1 }
 0x30d   : > { %v13645_v43 = vadd.f32 %v13019_v54, %v3092_v24  ;;  %10069 = vmatprep.mubr.msk.f32.mxu0 %vm311_vm0, %v18024_v10 }
 0x30e   : > { %18519 = vst [vmem:[#allocation69_spill] sm:$0xff] %v13642_v60  ;;  %10070 = vmatmul.mubr.msk.f32.gmra.mrb[142].mxu0 %vm311_vm0, %v18023_v34  ;;  %v18027_v25 = vmax.f32 %v13642_v60, 0.0 }
 0x30f   : > { %18520 = vst [vmem:[#allocation72_spill] sm:$0xff] %v13645_v43  ;;  %v18028_v31 = vmax.f32 %v13645_v43, 0.0  ;;  %v9877_v15 = vpop.f32.mrb[146].mxu1 }
 0x310   : > { %v13656_v35 = vadd.f32 %v9877_v15, %v13019_v54  ;;  %v3102_v14 = vpop.f32.mrb[147].mxu1 }
 0x311   : > { %v13659_v24 = vadd.f32 %v13019_v54, %v3102_v14  ;;  %10072 = vmatprep.mubr.msk.f32.mxu0 %vm311_vm0, %v18028_v31 }
 0x312   : > { %18521 = vst [vmem:[#allocation71_spill] sm:$0xff] %v13656_v35  ;;  %10073 = vmatmul.mubr.msk.f32.gmra.mrb[144].mxu0 %vm311_vm0, %v18027_v25  ;;  %v18031_v39 = vmax.f32 %v13656_v35, 0.0 }
 0x313   : > { %18522 = vst [vmem:[#allocation74_spill] sm:$0xff] %v13659_v24  ;;  %v18032_v34 = vmax.f32 %v13659_v24, 0.0  ;;  %v9880_v10 = vpop.f32.mrb[148].mxu1 }
 0x314   : > { %v13670_v15 = vadd.f32 %v9880_v10, %v13019_v54  ;;  %v3112_v13 = vpop.f32.mrb[149].mxu1 }
 0x315   : > { %v13673_v14 = vadd.f32 %v13019_v54, %v3112_v13  ;;  %10075 = vmatprep.mubr.msk.f32.mxu0 %vm311_vm0, %v18032_v34 }
 0x316   : > { %18523 = vst [vmem:[#allocation73_spill] sm:$0xff] %v13670_v15  ;;  %10076 = vmatmul.mubr.msk.f32.gmra.mrb[146].mxu0 %vm311_vm0, %v18031_v39  ;;  %v18035_v60 = vmax.f32 %v13670_v15, 0.0 }
 0x317   : > { %18524 = vst [vmem:[#allocation76_spill] sm:$0xff] %v13673_v14  ;;  %v18036_v25 = vmax.f32 %v13673_v14, 0.0  ;;  %v9883_v31 = vpop.f32.mrb[150].mxu1 }
 0x318   : > { %v13684_v10 = vadd.f32 %v9883_v31, %v13019_v54  ;;  %v3122_v43 = vpop.f32.mrb[151].mxu1 }
 0x319   : > { %v13687_v13 = vadd.f32 %v13019_v54, %v3122_v43  ;;  %10078 = vmatprep.mubr.msk.f32.mxu0 %vm311_vm0, %v18036_v25 }
 0x31a   : > { %18525 = vst [vmem:[#allocation75_spill] sm:$0xff] %v13684_v10  ;;  %10079 = vmatmul.mubr.msk.f32.gmra.mrb[148].mxu0 %vm311_vm0, %v18035_v60  ;;  %v18039_v35 = vmax.f32 %v13684_v10, 0.0 }
 0x31b   : > { %18526 = vst [vmem:[#allocation78_spill] sm:$0xff] %v13687_v13  ;;  %v18040_v39 = vmax.f32 %v13687_v13, 0.0  ;;  %v9886_v34 = vpop.f32.mrb[152].mxu1 }
 0x31c   : > { %v13698_v31 = vadd.f32 %v9886_v34, %v13019_v54  ;;  %v3132_v24 = vpop.f32.mrb[153].mxu1 }
 0x31d   : > { %v13701_v43 = vadd.f32 %v13019_v54, %v3132_v24  ;;  %10081 = vmatprep.mubr.msk.f32.mxu0 %vm311_vm0, %v18040_v39 }
 0x31e   : > { %18527 = vst [vmem:[#allocation77_spill] sm:$0xff] %v13698_v31  ;;  %10082 = vmatmul.mubr.msk.f32.gmra.mrb[150].mxu0 %vm311_vm0, %v18039_v35  ;;  %v18043_v15 = vmax.f32 %v13698_v31, 0.0 }
 0x31f   : > { %18528 = vst [vmem:[#allocation80_spill] sm:$0xff] %v13701_v43  ;;  %v18044_v60 = vmax.f32 %v13701_v43, 0.0  ;;  %v9889_v25 = vpop.f32.mrb[154].mxu1 }
 0x320   : > { %v13712_v34 = vadd.f32 %v9889_v25, %v13019_v54  ;;  %v3142_v14 = vpop.f32.mrb[155].mxu1 }
 0x321   : > { %v13715_v24 = vadd.f32 %v13019_v54, %v3142_v14  ;;  %10084 = vmatprep.mubr.msk.f32.mxu0 %vm311_vm0, %v18044_v60 }
 0x322   : > { %18529 = vst [vmem:[#allocation79_spill] sm:$0xff] %v13712_v34  ;;  %10085 = vmatmul.mubr.msk.f32.gmra.mrb[152].mxu0 %vm311_vm0, %v18043_v15  ;;  %v18047_v10 = vmax.f32 %v13712_v34, 0.0 }
 0x323   : > { %18530 = vst [vmem:[#allocation82_spill] sm:$0xff] %v13715_v24  ;;  %v18048_v35 = vmax.f32 %v13715_v24, 0.0  ;;  %v9892_v39 = vpop.f32.mrb[156].mxu1 }
 0x324   : > { %v13726_v25 = vadd.f32 %v9892_v39, %v13019_v54  ;;  %v3152_v13 = vpop.f32.mrb[157].mxu1 }
 0x325   : > { %v13729_v14 = vadd.f32 %v13019_v54, %v3152_v13  ;;  %10087 = vmatprep.mubr.msk.f32.mxu0 %vm311_vm0, %v18048_v35 }
 0x326   : > { %18531 = vst [vmem:[#allocation81_spill] sm:$0xff] %v13726_v25  ;;  %10088 = vmatmul.mubr.msk.f32.gmra.mrb[154].mxu0 %vm311_vm0, %v18047_v10  ;;  %v18051_v31 = vmax.f32 %v13726_v25, 0.0 }
 0x327   : > { %18532 = vst [vmem:[#allocation84_spill] sm:$0xff] %v13729_v14  ;;  %v18052_v15 = vmax.f32 %v13729_v14, 0.0  ;;  %v9895_v60 = vpop.f32.mrb[158].mxu1 }
 0x328   : > { %v13740_v39 = vadd.f32 %v9895_v60, %v13019_v54  ;;  %v3162_v43 = vpop.f32.mrb[159].mxu1 }
 0x329   : > { %v13743_v13 = vadd.f32 %v13019_v54, %v3162_v43  ;;  %10090 = vmatprep.mubr.msk.f32.mxu0 %vm311_vm0, %v18052_v15 }
 0x32a   : > { %18533 = vst [vmem:[#allocation83_spill] sm:$0xff] %v13740_v39  ;;  %10091 = vmatmul.mubr.msk.f32.gmra.mrb[156].mxu0 %vm311_vm0, %v18051_v31  ;;  %v18055_v34 = vmax.f32 %v13740_v39, 0.0 }
 0x32b   : > { %18534 = vst [vmem:[#allocation86_spill] sm:$0xff] %v13743_v13  ;;  %v18056_v10 = vmax.f32 %v13743_v13, 0.0  ;;  %v9898_v35 = vpop.f32.mrb[160].mxu1 }
 0x32c   : > { %v13754_v60 = vadd.f32 %v9898_v35, %v13019_v54  ;;  %v3172_v24 = vpop.f32.mrb[161].mxu1 }
 0x32d   : > { %v13757_v43 = vadd.f32 %v13019_v54, %v3172_v24  ;;  %10093 = vmatprep.mubr.msk.f32.mxu0 %vm311_vm0, %v18056_v10 }
 0x32e   : > { %18535 = vst [vmem:[#allocation85_spill] sm:$0xff] %v13754_v60  ;;  %10094 = vmatmul.mubr.msk.f32.gmra.mrb[158].mxu0 %vm311_vm0, %v18055_v34  ;;  %v18059_v25 = vmax.f32 %v13754_v60, 0.0 }
 0x32f   : > { %18536 = vst [vmem:[#allocation88_spill] sm:$0xff] %v13757_v43  ;;  %v18060_v31 = vmax.f32 %v13757_v43, 0.0  ;;  %v9901_v15 = vpop.f32.mrb[162].mxu1 }
 0x330   : > { %v13768_v35 = vadd.f32 %v9901_v15, %v13019_v54  ;;  %v3182_v14 = vpop.f32.mrb[163].mxu1 }
 0x331   : > { %v13771_v24 = vadd.f32 %v13019_v54, %v3182_v14  ;;  %10096 = vmatprep.mubr.msk.f32.mxu0 %vm311_vm0, %v18060_v31 }
 0x332   : > { %18537 = vst [vmem:[#allocation87_spill] sm:$0xff] %v13768_v35  ;;  %10097 = vmatmul.mubr.msk.f32.gmra.mrb[160].mxu0 %vm311_vm0, %v18059_v25  ;;  %v18063_v39 = vmax.f32 %v13768_v35, 0.0 }
 0x333   : > { %18538 = vst [vmem:[#allocation3_spill] sm:$0xff] %v13771_v24  ;;  %v18064_v34 = vmax.f32 %v13771_v24, 0.0  ;;  %v9904_v10 = vpop.f32.mrb[164].mxu1 }
 0x334   : > { %v13782_v15 = vadd.f32 %v9904_v10, %v13019_v54  ;;  %v3192_v13 = vpop.f32.mrb[165].mxu1 }
 0x335   : > { %v13785_v14 = vadd.f32 %v13019_v54, %v3192_v13  ;;  %10099 = vmatprep.mubr.msk.f32.mxu0 %vm311_vm0, %v18064_v34 }
 0x336   : > { %18539 = vst [vmem:[#allocation2_spill] sm:$0xff] %v13782_v15  ;;  %10100 = vmatmul.mubr.msk.f32.gmra.mrb[162].mxu0 %vm311_vm0, %v18063_v39  ;;  %v18067_v60 = vmax.f32 %v13782_v15, 0.0 }
 0x337   : > { %18540 = vst [vmem:[#allocation5_spill] sm:$0xff] %v13785_v14  ;;  %v18068_v25 = vmax.f32 %v13785_v14, 0.0  ;;  %v9907_v31 = vpop.f32.mrb[166].mxu1 }
 0x338   : > { %v13796_v10 = vadd.f32 %v9907_v31, %v13019_v54  ;;  %v3202_v43 = vpop.f32.mrb[167].mxu1 }
 0x339   : > { %v13799_v13 = vadd.f32 %v13019_v54, %v3202_v43  ;;  %10102 = vmatprep.mubr.msk.f32.mxu0 %vm311_vm0, %v18068_v25 }
 0x33a   : > { %18541 = vst [vmem:[#allocation4_spill] sm:$0xff] %v13796_v10  ;;  %10103 = vmatmul.mubr.msk.f32.gmra.mrb[164].mxu0 %vm311_vm0, %v18067_v60  ;;  %v18071_v35 = vmax.f32 %v13796_v10, 0.0 }
 0x33b   : > { %18542 = vst [vmem:[#allocation7_spill] sm:$0xff] %v13799_v13  ;;  %v18072_v39 = vmax.f32 %v13799_v13, 0.0  ;;  %v9910_v34 = vpop.f32.mrb[168].mxu1 }
 0x33c   : > { %v13810_v31 = vadd.f32 %v9910_v34, %v13019_v54  ;;  %v3212_v24 = vpop.f32.mrb[169].mxu1 }
 0x33d   : > { %v13813_v43 = vadd.f32 %v13019_v54, %v3212_v24  ;;  %10105 = vmatprep.mubr.msk.f32.mxu0 %vm311_vm0, %v18072_v39 }
 0x33e   : > { %18543 = vst [vmem:[#allocation6_spill] sm:$0xff] %v13810_v31  ;;  %10106 = vmatmul.mubr.msk.f32.gmra.mrb[166].mxu0 %vm311_vm0, %v18071_v35  ;;  %v18077_v15 = vmax.f32 %v13810_v31, 0.0 }
 0x33f   : > { %18544 = vst [vmem:[#allocation9_spill] sm:$0xff] %v13813_v43  ;;  %v18076_v60 = vmax.f32 %v13813_v43, 0.0  ;;  %v9913_v25 = vpop.f32.mrb[170].mxu1 }
 0x340   : > { %v13824_v34 = vadd.f32 %v9913_v25, %v13019_v54  ;;  %v3222_v14 = vpop.f32.mrb[171].mxu1 }
 0x341   : > { %v13827_v24 = vadd.f32 %v13019_v54, %v3222_v14  ;;  %10108 = vmatprep.mubr.msk.f32.mxu0 %vm311_vm0, %v18076_v60 }
 0x342   : > { %18545 = vst [vmem:[#allocation8_spill] sm:$0xff] %v13824_v34  ;;  %10109 = vmatmul.mubr.msk.f32.gmra.mrb[168].mxu0 %vm311_vm0, %v18077_v15  ;;  %v18082_v10 = vmax.f32 %v13824_v34, 0.0 }
 0x343   : > { %18546 = vst [vmem:[#allocation11_spill] sm:$0xff] %v13827_v24  ;;  %v18081_v35 = vmax.f32 %v13827_v24, 0.0  ;;  %v9916_v39 = vpop.f32.mrb[172].mxu1 }
 0x344   : > { %v13838_v25 = vadd.f32 %v9916_v39, %v13019_v54  ;;  %v3232_v13 = vpop.f32.mrb[173].mxu1 }
 0x345   : > { %v13841_v14 = vadd.f32 %v13019_v54, %v3232_v13  ;;  %v13843_v55 = vpop.f32.mrb[64].mxu0  ;;  %10111 = vmatprep.mubr.msk.f32.mxu0 %vm311_vm0, %v18081_v35 }
 0x346   : > { %18547 = vst [vmem:[#allocation10_spill] sm:$0xff] %v13838_v25  ;;  %18549 = vst [vmem:[#allocation12_spill] sm:$0xff] %v13843_v55  ;;  %v13848_v60 = vpop.f32.mrb[65].mxu0  ;;  %10112 = vmatmul.mubr.msk.f32.gmra.mrb[170].mxu0 %vm311_vm0, %v18082_v10  ;;  %v18087_v31 = vmax.f32 %v13838_v25, 0.0 }
 0x347   : > { %18548 = vst [vmem:[#allocation13_spill] sm:$0xff] %v13841_v14  ;;  %18550 = vst [vmem:[#allocation15_spill] sm:$0xff] %v13848_v60  ;;  %v18084_v15 = vmax.f32 %v13841_v14, 0.0  ;;  %v9919_v39 = vpop.f32.mrb[174].mxu1 }
 0x348   : > { %v13856_v13 = vadd.f32 %v9919_v39, %v13019_v54  ;;  %v3242_v43 = vpop.f32.mrb[175].mxu1 }
 0x349   : > { %v13859_v55 = vadd.f32 %v13019_v54, %v3242_v43  ;;  %v13861_v24 = vpop.f32.mrb[66].mxu0  ;;  %10114 = vmatprep.mubr.msk.f32.mxu0 %vm311_vm0, %v18084_v15  ;;  %v13876_v54 = vld [vmem:[%s17855_s2 + $0x1] ss:$0 sm:$0xff] }
 0x34a   : > { %18551 = vst [vmem:[#allocation14_spill] sm:$0xff] %v13856_v13  ;;  %18553 = vst [vmem:[#allocation16_spill] sm:$0xff] %v13861_v24  ;;  %v13866_v35 = vpop.f32.mrb[67].mxu0  ;;  %10115 = vmatmul.mubr.msk.f32.gmra.mrb[172].mxu0 %vm311_vm0, %v18087_v31  ;;  %v18090_v34 = vmax.f32 %v13856_v13, 0.0 }
 0x34b   : > { %18552 = vst [vmem:[#allocation17_spill] sm:$0xff] %v13859_v55  ;;  %18554 = vst [vmem:[#allocation19_spill] sm:$0xff] %v13866_v35  ;;  %v18089_v10 = vmax.f32 %v13859_v55, 0.0  ;;  %v9922_v39 = vpop.f32.mrb[176].mxu1 }
 0x34c   : > { %v13879_v43 = vadd.f32 %v13876_v54, %v9922_v39  ;;  %v3252_v15 = vpop.f32.mrb[177].mxu1 }
 0x34d   : > { %v13882_v14 = vadd.f32 %v13876_v54, %v3252_v15  ;;  %v13884_v25 = vpop.f32.mrb[68].mxu0  ;;  %10117 = vmatprep.mubr.msk.f32.mxu0 %vm311_vm0, %v18089_v10 }
 0x34e   : > { %18555 = vst [vmem:[#allocation18_spill] sm:$0xff] %v13879_v43  ;;  %18557 = vst [vmem:[#allocation20_spill] sm:$0xff] %v13884_v25  ;;  %v13889_v31 = vpop.f32.mrb[69].mxu0  ;;  %10118 = vmatmul.mubr.msk.f32.gmra.mrb[174].mxu0 %vm311_vm0, %v18090_v34  ;;  %v18094_v24 = vmax.f32 %v13879_v43, 0.0 }
 0x34f   : > { %18556 = vst [vmem:[#allocation21_spill] sm:$0xff] %v13882_v14  ;;  %18558 = vst [vmem:[#allocation23_spill] sm:$0xff] %v13889_v31  ;;  %v18093_v35 = vmax.f32 %v13882_v14, 0.0  ;;  %v9925_v39 = vpop.f32.mrb[178].mxu1 }
 0x350   : > { %v13897_v15 = vadd.f32 %v13876_v54, %v9925_v39  ;;  %v3262_v60 = vpop.f32.mrb[179].mxu1 }
 0x351   : > { %v13900_v25 = vadd.f32 %v13876_v54, %v3262_v60  ;;  %v13902_v55 = vpop.f32.mrb[70].mxu0  ;;  %10120 = vmatprep.mubr.msk.f32.mxu0 %vm311_vm0, %v18093_v35 }
 0x352   : > { %18559 = vst [vmem:[#allocation22_spill] sm:$0xff] %v13897_v15  ;;  %18561 = vst [vmem:[#allocation24_spill] sm:$0xff] %v13902_v55  ;;  %v13907_v10 = vpop.f32.mrb[71].mxu0  ;;  %10121 = vmatmul.mubr.msk.f32.gmra.mrb[176].mxu0 %vm311_vm0, %v18094_v24  ;;  %v18098_v13 = vmax.f32 %v13897_v15, 0.0 }
 0x353   : > { %18560 = vst [vmem:[#allocation25_spill] sm:$0xff] %v13900_v25  ;;  %18562 = vst [vmem:[#allocation27_spill] sm:$0xff] %v13907_v10  ;;  %v18097_v34 = vmax.f32 %v13900_v25, 0.0  ;;  %v9928_v39 = vpop.f32.mrb[180].mxu1 }
 0x354   : > { %v13915_v60 = vadd.f32 %v13876_v54, %v9928_v39  ;;  %v3272_v31 = vpop.f32.mrb[181].mxu1 }
 0x355   : > { %v13918_v55 = vadd.f32 %v13876_v54, %v3272_v31  ;;  %v13920_v14 = vpop.f32.mrb[72].mxu0  ;;  %10123 = vmatprep.mubr.msk.f32.mxu0 %vm311_vm0, %v18097_v34 }
 0x356   : > { %18563 = vst [vmem:[#allocation26_spill] sm:$0xff] %v13915_v60  ;;  %18565 = vst [vmem:[#allocation28_spill] sm:$0xff] %v13920_v14  ;;  %v13925_v35 = vpop.f32.mrb[73].mxu0  ;;  %10124 = vmatmul.mubr.msk.f32.gmra.mrb[178].mxu0 %vm311_vm0, %v18098_v13  ;;  %v18102_v43 = vmax.f32 %v13915_v60, 0.0 }
 0x357   : > { %18564 = vst [vmem:[#allocation29_spill] sm:$0xff] %v13918_v55  ;;  %18566 = vst [vmem:[#allocation31_spill] sm:$0xff] %v13925_v35  ;;  %v18101_v24 = vmax.f32 %v13918_v55, 0.0  ;;  %v9931_v39 = vpop.f32.mrb[182].mxu1 }
 0x358   : > { %v13933_v31 = vadd.f32 %v13876_v54, %v9931_v39  ;;  %v3282_v10 = vpop.f32.mrb[183].mxu1 }
 0x359   : > { %v13936_v14 = vadd.f32 %v13876_v54, %v3282_v10  ;;  %v13938_v25 = vpop.f32.mrb[74].mxu0  ;;  %10126 = vmatprep.mubr.msk.f32.mxu0 %vm311_vm0, %v18101_v24 }
 0x35a   : > { %18567 = vst [vmem:[#allocation30_spill] sm:$0xff] %v13933_v31  ;;  %18569 = vst [vmem:[#allocation32_spill] sm:$0xff] %v13938_v25  ;;  %v13943_v34 = vpop.f32.mrb[75].mxu0  ;;  %10127 = vmatmul.mubr.msk.f32.gmra.mrb[180].mxu0 %vm311_vm0, %v18102_v43  ;;  %v18106_v15 = vmax.f32 %v13933_v31, 0.0 }
 0x35b   : > { %18568 = vst [vmem:[#allocation33_spill] sm:$0xff] %v13936_v14  ;;  %18570 = vst [vmem:[#allocation35_spill] sm:$0xff] %v13943_v34  ;;  %v18105_v13 = vmax.f32 %v13936_v14, 0.0  ;;  %v9934_v39 = vpop.f32.mrb[184].mxu1 }
 0x35c   : > { %v13951_v10 = vadd.f32 %v13876_v54, %v9934_v39  ;;  %v3292_v35 = vpop.f32.mrb[185].mxu1 }
 0x35d   : > { %v13954_v25 = vadd.f32 %v13876_v54, %v3292_v35  ;;  %v13956_v55 = vpop.f32.mrb[76].mxu0  ;;  %10129 = vmatprep.mubr.msk.f32.mxu0 %vm311_vm0, %v18105_v13 }
 0x35e   : > { %18571 = vst [vmem:[#allocation34_spill] sm:$0xff] %v13951_v10  ;;  %18573 = vst [vmem:[#allocation36_spill] sm:$0xff] %v13956_v55  ;;  %v13961_v24 = vpop.f32.mrb[77].mxu0  ;;  %10130 = vmatmul.mubr.msk.f32.gmra.mrb[182].mxu0 %vm311_vm0, %v18106_v15  ;;  %v18110_v60 = vmax.f32 %v13951_v10, 0.0 }
 0x35f   : > { %18572 = vst [vmem:[#allocation37_spill] sm:$0xff] %v13954_v25  ;;  %18574 = vst [vmem:[#allocation39_spill] sm:$0xff] %v13961_v24  ;;  %v18109_v43 = vmax.f32 %v13954_v25, 0.0  ;;  %v9937_v39 = vpop.f32.mrb[186].mxu1 }
 0x360   : > { %v13969_v35 = vadd.f32 %v13876_v54, %v9937_v39  ;;  %v3302_v34 = vpop.f32.mrb[187].mxu1 }
 0x361   : > { %v13972_v55 = vadd.f32 %v13876_v54, %v3302_v34  ;;  %v13974_v14 = vpop.f32.mrb[78].mxu0  ;;  %10132 = vmatprep.mubr.msk.f32.mxu0 %vm311_vm0, %v18109_v43 }
 0x362   : > { %18575 = vst [vmem:[#allocation38_spill] sm:$0xff] %v13969_v35  ;;  %18577 = vst [vmem:[#allocation90_spill] sm:$0xff] %v13974_v14  ;;  %v13979_v13 = vpop.f32.mrb[79].mxu0  ;;  %10133 = vmatmul.mubr.msk.f32.gmra.mrb[184].mxu0 %vm311_vm0, %v18110_v60  ;;  %v18114_v31 = vmax.f32 %v13969_v35, 0.0 }
 0x363   : > { %18576 = vst [vmem:[#allocation89_spill] sm:$0xff] %v13972_v55  ;;  %18578 = vst [vmem:[#allocation91_spill] sm:$0xff] %v13979_v13  ;;  %v18113_v15 = vmax.f32 %v13972_v55, 0.0  ;;  %v9940_v39 = vpop.f32.mrb[188].mxu1 }
 0x364   : > { %v13987_v34 = vadd.f32 %v13876_v54, %v9940_v39  ;;  %v3312_v24 = vpop.f32.mrb[189].mxu1 }
 0x365   : > { %v13990_v14 = vadd.f32 %v13876_v54, %v3312_v24  ;;  %v13992_v25 = vpop.f32.mrb[80].mxu0  ;;  %10135 = vmatprep.mubr.msk.f32.mxu0 %vm311_vm0, %v18113_v15 }
 0x366   : > { %18579 = vst [vmem:[#allocation92_spill] sm:$0xff] %v13987_v34  ;;  %18581 = vst [vmem:[#allocation94_spill] sm:$0xff] %v13992_v25  ;;  %v13997_v43 = vpop.f32.mrb[81].mxu0  ;;  %10136 = vmatmul.mubr.msk.f32.gmra.mrb[186].mxu0 %vm311_vm0, %v18114_v31  ;;  %v18116_v10 = vmax.f32 %v13987_v34, 0.0  ;;  %v18585_v34 = vmax.f32 %v13026_v47, 0.0 }
 0x367   : > { %18580 = vst [vmem:[#allocation93_spill] sm:$0xff] %v13990_v14  ;;  %v18117_v60 = vmax.f32 %v13990_v14, 0.0  ;;  %v9943_v39 = vpop.f32.mrb[190].mxu1 }
 0x368   : > { %v14005_v24 = vadd.f32 %v13876_v54, %v9943_v39  ;;  %v3322_v13 = vpop.f32.mrb[191].mxu1 }
 0x369   : > { %v14008_v25 = vadd.f32 %v13876_v54, %v3322_v13  ;;  %v14010_v55 = vpop.f32.mrb[82].mxu0  ;;  %10138 = vmatprep.mubr.msk.f32.mxu0 %vm311_vm0, %v18117_v60  ;;  %v18584_v54 = vmax.f32 %v13030_v22, 0.0  ;;  %v18587_v22 = vmax.f32 %v13040_v62, 0.0 }
 0x36a   : > { %18582 = vst [vmem:[#allocation95_spill] sm:$0xff] %v14005_v24  ;;  %v14015_v15 = vpop.f32.mrb[83].mxu0  ;;  %10139 = vmatmul.mubr.msk.f32.gmra.mrb[188].mxu0 %vm311_vm0, %v18116_v10  ;;  %v18122_v39 = vmax.f32 %v14005_v24, 0.0 }
 0x36b   : > { %18583 = vst [vmem:[#allocation96_spill] sm:$0xff] %v14008_v25  ;;  %v18119_v31 = vmax.f32 %v14008_v25, 0.0 }
 0x36d   : > { %v14022_v35 = vpop.f32.mrb[84].mxu0  ;;  %10141 = vmatprep.mubr.msk.f32.mxu0 %vm311_vm0, %v18119_v31  ;;  %v18586_v31 = vmax.f32 %v13044_v33, 0.0  ;;  %v18589_v33 = vmax.f32 %v13067_v23, 0.0 }
 0x36e   : > { %v14027_v13 = vpop.f32.mrb[85].mxu0  ;;  %10142 = vmatmul.mubr.msk.f32.gmra.mrb[190].mxu0 %vm311_vm0, %v18122_v39 }
 0x36f   : > { %10152 = vmatprep.mubr.msk.f32.mxu0 %vm311_vm0, %v18584_v54  ;;  %v18588_v54 = vmax.f32 %v13071_v26, 0.0  ;;  %v18591_v26 = vmax.f32 %v13087_v8, 0.0 }
 0x371   : > { %v14035_v10 = vpop.f32.mrb[86].mxu0 }
 0x372   : > { %v14037_v60 = vpop.f32.mrb[87].mxu0  ;;  %10153 = vmatmul.mubr.msk.f32.vlgmr.msra.gmra.mrb[192].mxu0 %vm311_vm0, %v18585_v34 }
 0x373   : > { %10155 = vmatprep.mubr.msk.f32.mxu0 %vm311_vm0, %v18586_v31  ;;  %v18590_v31 = vmax.f32 %v13091_v0, 0.0  ;;  %v18593_v0 = vmax.f32 %v13107_v58, 0.0 }
 0x375   : > { %v14045_v25 = vpop.f32.mrb[88].mxu0 }
 0x376   : > { %v14047_v24 = vpop.f32.mrb[89].mxu0  ;;  %10156 = vmatmul.mubr.msk.f32.gmra.mrb[194].mxu0 %vm311_vm0, %v18587_v22  ;;  %v18592_v22 = vmax.f32 %v13111_v9, 0.0  ;;  %v18595_v9 = vmax.f32 %v13127_v19, 0.0 }
 0x377   : > { %10158 = vmatprep.mubr.msk.f32.mxu0 %vm311_vm0, %v18588_v54 }
 0x379   : > { %v14055_v39 = vpop.f32.mrb[90].mxu0 }
 0x37a   : > { %v14057_v47 = vpop.f32.mrb[91].mxu0  ;;  %10159 = vmatmul.mubr.msk.f32.gmra.mrb[196].mxu0 %vm311_vm0, %v18589_v33  ;;  %v18594_v33 = vmax.f32 %v13131_v1, 0.0  ;;  %v18597_v1 = vmax.f32 %v13147_v28, 0.0 }
 0x37b   : > { %10161 = vmatprep.mubr.msk.f32.mxu0 %vm311_vm0, %v18590_v31 }
 0x37d   : > { %v14065_v34 = vpop.f32.mrb[92].mxu0 }
 0x37e   : > { %v14067_v62 = vpop.f32.mrb[93].mxu0  ;;  %10162 = vmatmul.mubr.msk.f32.gmra.mrb[198].mxu0 %vm311_vm0, %v18591_v26  ;;  %v18596_v26 = vmax.f32 %v13151_v4, 0.0  ;;  %v18599_v4 = vmax.f32 %v13167_v49, 0.0 }
 0x37f   : > { %10164 = vmatprep.mubr.msk.f32.mxu0 %vm311_vm0, %v18592_v22 }
 0x381   : > { %v14075_v54 = vpop.f32.mrb[94].mxu0 }
 0x382   : > { %v14077_v23 = vpop.f32.mrb[95].mxu0  ;;  %10165 = vmatmul.mubr.msk.f32.gmra.mrb[200].mxu0 %vm311_vm0, %v18593_v0  ;;  %v18598_v0 = vmax.f32 %v13171_v29, 0.0  ;;  %v18601_v29 = vmax.f32 %v13187_v38, 0.0 }
 0x383   : > { %10167 = vmatprep.mubr.msk.f32.mxu0 %vm311_vm0, %v18594_v33 }
 0x385   : > { %v14085_v31 = vpop.f32.mrb[96].mxu0 }
 0x386   : > { %v14087_v8 = vpop.f32.mrb[97].mxu0  ;;  %10168 = vmatmul.mubr.msk.f32.gmra.mrb[202].mxu0 %vm311_vm0, %v18595_v9  ;;  %v18600_v9 = vmax.f32 %v13191_v48, 0.0  ;;  %v18603_v48 = vmax.f32 %v13205_v56, 0.0 }
 0x387   : > { %10170 = vmatprep.mubr.msk.f32.mxu0 %vm311_vm0, %v18596_v26 }
 0x389   : > { %v14095_v22 = vpop.f32.mrb[98].mxu0 }
 0x38a   : > { %v14097_v58 = vpop.f32.mrb[99].mxu0  ;;  %10171 = vmatmul.mubr.msk.f32.gmra.mrb[204].mxu0 %vm311_vm0, %v18597_v1  ;;  %v18602_v1 = vmax.f32 %v13209_v36, 0.0  ;;  %v18605_v36 = vmax.f32 %v13221_v32, 0.0 }
 0x38b   : > { %10173 = vmatprep.mubr.msk.f32.mxu0 %vm311_vm0, %v18598_v0 }
 0x38d   : > { %v14105_v33 = vpop.f32.mrb[100].mxu0 }
 0x38e   : > { %v14107_v19 = vpop.f32.mrb[101].mxu0  ;;  %10174 = vmatmul.mubr.msk.f32.gmra.mrb[206].mxu0 %vm311_vm0, %v18599_v4  ;;  %v18604_v4 = vmax.f32 %v13225_v16, 0.0  ;;  %v18607_v16 = vmax.f32 %v13236_v6, 0.0 }
 0x38f   : > { %10176 = vmatprep.mubr.msk.f32.mxu0 %vm311_vm0, %v18600_v9 }
 0x391   : > { %v14115_v26 = vpop.f32.mrb[102].mxu0 }
 0x392   : > { %v14117_v28 = vpop.f32.mrb[103].mxu0  ;;  %10177 = vmatmul.mubr.msk.f32.gmra.mrb[208].mxu0 %vm311_vm0, %v18601_v29  ;;  %v18606_v29 = vmax.f32 %v13239_v57, 0.0  ;;  %v18609_v57 = vmax.f32 %v13250_v41, 0.0 }
 0x393   : > { %10179 = vmatprep.mubr.msk.f32.mxu0 %vm311_vm0, %v18602_v1 }
 0x395   : > { %v14125_v0 = vpop.f32.mrb[104].mxu0 }
 0x396   : > { %v14127_v49 = vpop.f32.mrb[105].mxu0  ;;  %10180 = vmatmul.mubr.msk.f32.gmra.mrb[210].mxu0 %vm311_vm0, %v18603_v48  ;;  %v18608_v48 = vmax.f32 %v13253_v21, 0.0  ;;  %v18611_v21 = vmax.f32 %v13264_v40, 0.0 }
 0x397   : > { %10182 = vmatprep.mubr.msk.f32.mxu0 %vm311_vm0, %v18604_v4 }
 0x399   : > { %v14135_v9 = vpop.f32.mrb[106].mxu0 }
 0x39a   : > { %v14137_v38 = vpop.f32.mrb[107].mxu0  ;;  %10183 = vmatmul.mubr.msk.f32.gmra.mrb[212].mxu0 %vm311_vm0, %v18605_v36  ;;  %v18610_v36 = vmax.f32 %v13267_v11, 0.0  ;;  %v18613_v11 = vmax.f32 %v13278_v2, 0.0 }
 0x39b   : > { %10185 = vmatprep.mubr.msk.f32.mxu0 %vm311_vm0, %v18606_v29 }
 0x39d   : > { %v14145_v1 = vpop.f32.mrb[108].mxu0 }
 0x39e   : > { %v14147_v56 = vpop.f32.mrb[109].mxu0  ;;  %10186 = vmatmul.mubr.msk.f32.gmra.mrb[214].mxu0 %vm311_vm0, %v18607_v16  ;;  %v18612_v16 = vmax.f32 %v13281_v59, 0.0  ;;  %v18615_v59 = vmax.f32 %v13292_v7, 0.0 }
 0x39f   : > { %10188 = vmatprep.mubr.msk.f32.mxu0 %vm311_vm0, %v18608_v48 }
 0x3a1   : > { %v14155_v4 = vpop.f32.mrb[110].mxu0 }
 0x3a2   : > { %v14157_v32 = vpop.f32.mrb[111].mxu0  ;;  %10189 = vmatmul.mubr.msk.f32.gmra.mrb[216].mxu0 %vm311_vm0, %v18609_v57  ;;  %v18614_v57 = vmax.f32 %v13295_v5, 0.0  ;;  %v18617_v5 = vmax.f32 %v13306_v52, 0.0 }
 0x3a3   : > { %10191 = vmatprep.mubr.msk.f32.mxu0 %vm311_vm0, %v18610_v36 }
 0x3a5   : > { %v14165_v29 = vpop.f32.mrb[112].mxu0 }
 0x3a6   : > { %v14167_v6 = vpop.f32.mrb[113].mxu0  ;;  %10192 = vmatmul.mubr.msk.f32.gmra.mrb[218].mxu0 %vm311_vm0, %v18611_v21  ;;  %v18616_v21 = vmax.f32 %v13309_v44, 0.0  ;;  %v18619_v44 = vmax.f32 %v13320_v37, 0.0 }
 0x3a7   : > { %10194 = vmatprep.mubr.msk.f32.mxu0 %vm311_vm0, %v18612_v16 }
 0x3a9   : > { %v14175_v48 = vpop.f32.mrb[114].mxu0 }
 0x3aa   : > { %v14177_v41 = vpop.f32.mrb[115].mxu0  ;;  %10195 = vmatmul.mubr.msk.f32.gmra.mrb[220].mxu0 %vm311_vm0, %v18613_v11  ;;  %v18618_v11 = vmax.f32 %v13323_v63, 0.0  ;;  %v18621_v63 = vmax.f32 %v13334_v53, 0.0 }
 0x3ab   : > { %10197 = vmatprep.mubr.msk.f32.mxu0 %vm311_vm0, %v18614_v57 }
 0x3ad   : > { %v14185_v36 = vpop.f32.mrb[116].mxu0 }
 0x3ae   : > { %v14187_v40 = vpop.f32.mrb[117].mxu0  ;;  %10198 = vmatmul.mubr.msk.f32.gmra.mrb[222].mxu0 %vm311_vm0, %v18615_v59  ;;  %v18620_v59 = vmax.f32 %v13337_v27, 0.0  ;;  %v18623_v27 = vmax.f32 %v13348_v45, 0.0 }
 0x3af   : > { %10200 = vmatprep.mubr.msk.f32.mxu0 %vm311_vm0, %v18616_v21 }
 0x3b1   : > { %v14195_v16 = vpop.f32.mrb[118].mxu0 }
 0x3b2   : > { %v14197_v2 = vpop.f32.mrb[119].mxu0  ;;  %10201 = vmatmul.mubr.msk.f32.gmra.mrb[224].mxu0 %vm311_vm0, %v18617_v5  ;;  %v18622_v5 = vmax.f32 %v13351_v61, 0.0  ;;  %v18625_v61 = vmax.f32 %v13362_v17, 0.0 }
 0x3b3   : > { %10203 = vmatprep.mubr.msk.f32.mxu0 %vm311_vm0, %v18618_v11 }
 0x3b5   : > { %v14205_v57 = vpop.f32.mrb[120].mxu0 }
 0x3b6   : > { %v14207_v7 = vpop.f32.mrb[121].mxu0  ;;  %10204 = vmatmul.mubr.msk.f32.gmra.mrb[226].mxu0 %vm311_vm0, %v18619_v44  ;;  %v18624_v44 = vmax.f32 %v13365_v46, 0.0  ;;  %v18627_v46 = vmax.f32 %v13376_v50, 0.0 }
 0x3b7   : > { %10206 = vmatprep.mubr.msk.f32.mxu0 %vm311_vm0, %v18620_v59 }
 0x3b9   : > { %v14215_v21 = vpop.f32.mrb[122].mxu0 }
 0x3ba   : > { %v14217_v52 = vpop.f32.mrb[123].mxu0  ;;  %10207 = vmatmul.mubr.msk.f32.gmra.mrb[228].mxu0 %vm311_vm0, %v18621_v63  ;;  %v18626_v63 = vmax.f32 %v13379_v51, 0.0  ;;  %v18629_v51 = vmax.f32 %v13390_v42, 0.0 }
 0x3bb   : > { %10209 = vmatprep.mubr.msk.f32.mxu0 %vm311_vm0, %v18622_v5 }
 0x3bd   : > { %v14225_v11 = vpop.f32.mrb[124].mxu0 }
 0x3be   : > { %v14227_v37 = vpop.f32.mrb[125].mxu0  ;;  %10210 = vmatmul.mubr.msk.f32.gmra.mrb[230].mxu0 %vm311_vm0, %v18623_v27  ;;  %v18628_v27 = vmax.f32 %v13393_v30, 0.0  ;;  %v18632_v30 = vmax.f32 %v13404_v3, 0.0 }
 0x3bf   : > { %10212 = vmatprep.mubr.msk.f32.mxu0 %vm311_vm0, %v18624_v44 }
 0x3c1   : > { %v14235_v59 = vpop.f32.mrb[126].mxu0 }
 0x3c2   : > { %v14237_v53 = vpop.f32.mrb[127].mxu0  ;;  %10213 = vmatmul.mubr.msk.f32.gmra.mrb[232].mxu0 %vm311_vm0, %v18625_v61  ;;  %v18630_v61 = vmax.f32 %v13407_v20, 0.0  ;;  %v18636_v20 = vmax.f32 %v13418_v18, 0.0 }
 0x3c3   : > { %10215 = vmatprep.mubr.msk.f32.mxu0 %vm311_vm0, %v18626_v63 }
 0x3c5   : > { %v14245_v5 = vpop.f32.mrb[128].mxu0 }
 0x3c6   : > { %v14247_v45 = vpop.f32.mrb[129].mxu0  ;;  %10216 = vmatmul.mubr.msk.f32.gmra.mrb[234].mxu0 %vm311_vm0, %v18627_v46  ;;  %v18633_v46 = vmax.f32 %v13421_v12, 0.0 }
 0x3c7   : > { %10218 = vmatprep.mubr.msk.f32.mxu0 %vm311_vm0, %v18628_v27 }
 0x3c9   : > { %v14255_v44 = vpop.f32.mrb[130].mxu0 }
 0x3ca   : > { %v14257_v17 = vpop.f32.mrb[131].mxu0  ;;  %10219 = vmatmul.mubr.msk.f32.gmra.mrb[236].mxu0 %vm311_vm0, %v18629_v51  ;;  %v18637_v51 = vld [vmem:[#allocation50_spill] sm:$0xff] }
 0x3cb   : > { %10221 = vmatprep.mubr.msk.f32.mxu0 %vm311_vm0, %v18630_v61  ;;  %v18638_v61 = vmax.f32 %v18637_v51, 0.0 }
 0x3cd   : > { %v14265_v63 = vpop.f32.mrb[132].mxu0 }
 0x3ce   : > { %v14267_v50 = vpop.f32.mrb[133].mxu0  ;;  %10222 = vmatmul.mubr.msk.f32.gmra.mrb[238].mxu0 %vm311_vm0, %v18632_v30  ;;  %v18641_v30 = vld [vmem:[#allocation49_spill] sm:$0xff] }
 0x3cf   : > { %18631 = vst [vmem:[#allocation97_spill] sm:$0xff] %v14267_v50  ;;  %10224 = vmatprep.mubr.msk.f32.mxu0 %vm311_vm0, %v18633_v46  ;;  %v18642_v12 = vmax.f32 %v18641_v30, 0.0  ;;  %v18643_v46 = vld [vmem:[#allocation52_spill] sm:$0xff] }
 0x3d1   : > { %v14275_v27 = vpop.f32.mrb[134].mxu0 }
 0x3d2   : > { %18634 = vst [vmem:[#allocation98_spill] sm:$0xff] %v14275_v27  ;;  %v14277_v42 = vpop.f32.mrb[135].mxu0  ;;  %10225 = vmatmul.mubr.msk.f32.gmra.mrb[240].mxu0 %vm311_vm0, %v18636_v20  ;;  %v18644_v27 = vmax.f32 %v18643_v46, 0.0  ;;  %v18647_v20 = vld [vmem:[#allocation51_spill] sm:$0xff] }
 0x3d3   : > { %18635 = vst [vmem:[#allocation99_spill] sm:$0xff] %v14277_v42  ;;  %10227 = vmatprep.mubr.msk.f32.mxu0 %vm311_vm0, %v18638_v61  ;;  %v18648_v51 = vmax.f32 %v18647_v20, 0.0  ;;  %v18649_v61 = vld [vmem:[#allocation54_spill] sm:$0xff] }
 0x3d5   : > { %v14285_v14 = vpop.f32.mrb[136].mxu0 }
 0x3d6   : > { %18639 = vst [vmem:[#allocation50_spill] sm:$0xff] %v14285_v14  ;;  %v14287_v3 = vpop.f32.mrb[137].mxu0  ;;  %10228 = vmatmul.mubr.msk.f32.gmra.mrb[242].mxu0 %vm311_vm0, %v18642_v12  ;;  %v18650_v14 = vmax.f32 %v18649_v61, 0.0  ;;  %v18653_v12 = vld [vmem:[#allocation53_spill] sm:$0xff] }
 0x3d7   : > { %18640 = vst [vmem:[#allocation100_spill] sm:$0xff] %v14287_v3  ;;  %10230 = vmatprep.mubr.msk.f32.mxu0 %vm311_vm0, %v18644_v27  ;;  %v18654_v46 = vmax.f32 %v18653_v12, 0.0  ;;  %v18655_v27 = vld [vmem:[#allocation56_spill] sm:$0xff] }
 0x3d9   : > { %v14295_v42 = vpop.f32.mrb[138].mxu0 }
 0x3da   : > { %18645 = vst [vmem:[#allocation49_spill] sm:$0xff] %v14295_v42  ;;  %v14297_v18 = vpop.f32.mrb[139].mxu0  ;;  %10231 = vmatmul.mubr.msk.f32.gmra.mrb[244].mxu0 %vm311_vm0, %v18648_v51  ;;  %v18656_v42 = vmax.f32 %v18655_v27, 0.0  ;;  %v18659_v51 = vld [vmem:[#allocation55_spill] sm:$0xff] }
 0x3db   : > { %18646 = vst [vmem:[#allocation52_spill] sm:$0xff] %v14297_v18  ;;  %10233 = vmatprep.mubr.msk.f32.mxu0 %vm311_vm0, %v18650_v14  ;;  %v18660_v61 = vmax.f32 %v18659_v51, 0.0  ;;  %v18661_v14 = vld [vmem:[#allocation58_spill] sm:$0xff] }
 0x3dd   : > { %v14305_v3 = vpop.f32.mrb[140].mxu0 }
 0x3de   : > { %18651 = vst [vmem:[#allocation51_spill] sm:$0xff] %v14305_v3  ;;  %v14307_v30 = vpop.f32.mrb[141].mxu0  ;;  %10234 = vmatmul.mubr.msk.f32.gmra.mrb[246].mxu0 %vm311_vm0, %v18654_v46  ;;  %v18662_v3 = vmax.f32 %v18661_v14, 0.0  ;;  %v18665_v46 = vld [vmem:[#allocation57_spill] sm:$0xff] }
 0x3df   : > { %18652 = vst [vmem:[#allocation54_spill] sm:$0xff] %v14307_v30  ;;  %10236 = vmatprep.mubr.msk.f32.mxu0 %vm311_vm0, %v18656_v42  ;;  %v18666_v27 = vmax.f32 %v18665_v46, 0.0  ;;  %v18667_v42 = vld [vmem:[#allocation60_spill] sm:$0xff] }
 0x3e1   : > { %v14315_v18 = vpop.f32.mrb[142].mxu0 }
 0x3e2   : > { %18657 = vst [vmem:[#allocation53_spill] sm:$0xff] %v14315_v18  ;;  %v14317_v20 = vpop.f32.mrb[143].mxu0  ;;  %10237 = vmatmul.mubr.msk.f32.gmra.mrb[248].mxu0 %vm311_vm0, %v18660_v61  ;;  %v18668_v18 = vmax.f32 %v18667_v42, 0.0  ;;  %v18671_v61 = vld [vmem:[#allocation59_spill] sm:$0xff] }
 0x3e3   : > { %18658 = vst [vmem:[#allocation56_spill] sm:$0xff] %v14317_v20  ;;  %10239 = vmatprep.mubr.msk.f32.mxu0 %vm311_vm0, %v18662_v3  ;;  %v18672_v14 = vmax.f32 %v18671_v61, 0.0  ;;  %v18673_v3 = vld [vmem:[#allocation62_spill] sm:$0xff] }
 0x3e5   : > { %v14325_v30 = vpop.f32.mrb[144].mxu0 }
 0x3e6   : > { %18663 = vst [vmem:[#allocation55_spill] sm:$0xff] %v14325_v30  ;;  %v14327_v12 = vpop.f32.mrb[145].mxu0  ;;  %10240 = vmatmul.mubr.msk.f32.gmra.mrb[250].mxu0 %vm311_vm0, %v18666_v27  ;;  %v18674_v30 = vmax.f32 %v18673_v3, 0.0  ;;  %v18677_v27 = vld [vmem:[#allocation61_spill] sm:$0xff] }
 0x3e7   : > { %18664 = vst [vmem:[#allocation58_spill] sm:$0xff] %v14327_v12  ;;  %10242 = vmatprep.mubr.msk.f32.mxu0 %vm311_vm0, %v18668_v18  ;;  %v18678_v42 = vmax.f32 %v18677_v27, 0.0  ;;  %v18679_v18 = vld [vmem:[#allocation43_spill] sm:$0xff] }
 0x3e9   : > { %v14335_v20 = vpop.f32.mrb[146].mxu0 }
 0x3ea   : > { %18669 = vst [vmem:[#allocation57_spill] sm:$0xff] %v14335_v20  ;;  %v14337_v51 = vpop.f32.mrb[147].mxu0  ;;  %10243 = vmatmul.mubr.msk.f32.gmra.mrb[252].mxu0 %vm311_vm0, %v18672_v14  ;;  %v18680_v20 = vmax.f32 %v18679_v18, 0.0  ;;  %v18683_v14 = vld [vmem:[#allocation40_spill] sm:$0xff] }
 0x3eb   : > { %18670 = vst [vmem:[#allocation60_spill] sm:$0xff] %v14337_v51  ;;  %10245 = vmatprep.mubr.msk.f32.mxu0 %vm311_vm0, %v18674_v30  ;;  %v18684_v3 = vmax.f32 %v18683_v14, 0.0  ;;  %v18685_v30 = vld [vmem:[#allocation45_spill] sm:$0xff] }
 0x3ed   : > { %v14345_v12 = vpop.f32.mrb[148].mxu0 }
 0x3ee   : > { %18675 = vst [vmem:[#allocation59_spill] sm:$0xff] %v14345_v12  ;;  %v14347_v46 = vpop.f32.mrb[149].mxu0  ;;  %10246 = vmatmul.mubr.msk.f32.gmra.mrb[254].mxu0 %vm311_vm0, %v18678_v42  ;;  %v18686_v12 = vmax.f32 %v18685_v30, 0.0  ;;  %v18689_v42 = vld [vmem:[#allocation41_spill] sm:$0xff] }
 0x3ef   : > { %18676 = vst [vmem:[#allocation62_spill] sm:$0xff] %v14347_v46  ;;  %10248 = vmatprep.mubr.msk.f32.mxu0 %vm311_vm0, %v18680_v20  ;;  %v18690_v18 = vmax.f32 %v18689_v42, 0.0  ;;  %v18691_v20 = vld [vmem:[#allocation47_spill] sm:$0xff] }
 0x3f1   : > { %v14355_v51 = vpop.f32.mrb[150].mxu0 }
 0x3f2   : > { %18681 = vst [vmem:[#allocation61_spill] sm:$0xff] %v14355_v51  ;;  %v14357_v61 = vpop.f32.mrb[151].mxu0  ;;  %10249 = vmatmul.mubr.msk.f32.gmra.mrb[0].mxu0 %vm311_vm0, %v18684_v3  ;;  %v18692_v51 = vmax.f32 %v18691_v20, 0.0  ;;  %v18695_v3 = vld [vmem:[#allocation42_spill] sm:$0xff] }
 0x3f3   : > { %18682 = vst [vmem:[#allocation43_spill] sm:$0xff] %v14357_v61  ;;  %10251 = vmatprep.mubr.msk.f32.mxu0 %vm311_vm0, %v18686_v12  ;;  %v18696_v30 = vmax.f32 %v18695_v3, 0.0  ;;  %v18697_v12 = vld [vmem:[#allocation46_spill] sm:$0xff] }
 0x3f5   : > { %v14365_v46 = vpop.f32.mrb[152].mxu0 }
 0x3f6   : > { %18687 = vst [vmem:[#allocation40_spill] sm:$0xff] %v14365_v46  ;;  %v14367_v27 = vpop.f32.mrb[153].mxu0  ;;  %10252 = vmatmul.mubr.msk.f32.gmra.mrb[2].mxu0 %vm311_vm0, %v18690_v18  ;;  %v18698_v46 = vmax.f32 %v18697_v12, 0.0  ;;  %v18701_v18 = vld [vmem:[#allocation44_spill] sm:$0xff] }
 0x3f7   : > { %18688 = vst [vmem:[#allocation45_spill] sm:$0xff] %v14367_v27  ;;  %10254 = vmatprep.mubr.msk.f32.mxu0 %vm311_vm0, %v18692_v51  ;;  %v18702_v20 = vmax.f32 %v18701_v18, 0.0  ;;  %v18703_v51 = vld [vmem:[#allocation64_spill] sm:$0xff] }
 0x3f9   : > { %v14375_v61 = vpop.f32.mrb[154].mxu0 }
 0x3fa   : > { %18693 = vst [vmem:[#allocation41_spill] sm:$0xff] %v14375_v61  ;;  %v14377_v14 = vpop.f32.mrb[155].mxu0  ;;  %10255 = vmatmul.mubr.msk.f32.gmra.mrb[4].mxu0 %vm311_vm0, %v18696_v30  ;;  %v18704_v61 = vmax.f32 %v18703_v51, 0.0  ;;  %v18707_v30 = vld [vmem:[#allocation48_spill] sm:$0xff] }
 0x3fb   : > { %18694 = vst [vmem:[#allocation47_spill] sm:$0xff] %v14377_v14  ;;  %10257 = vmatprep.mubr.msk.f32.mxu0 %vm311_vm0, %v18698_v46  ;;  %v18708_v12 = vmax.f32 %v18707_v30, 0.0  ;;  %v18709_v46 = vld [vmem:[#allocation66_spill] sm:$0xff] }
 0x3fd   : > { %v14385_v27 = vpop.f32.mrb[156].mxu0 }
 0x3fe   : > { %18699 = vst [vmem:[#allocation42_spill] sm:$0xff] %v14385_v27  ;;  %v14387_v42 = vpop.f32.mrb[157].mxu0  ;;  %10258 = vmatmul.mubr.msk.f32.gmra.mrb[6].mxu0 %vm311_vm0, %v18702_v20  ;;  %v18710_v27 = vmax.f32 %v18709_v46, 0.0  ;;  %v18713_v20 = vld [vmem:[#allocation63_spill] sm:$0xff] }
 0x3ff   : > { %18700 = vst [vmem:[#allocation46_spill] sm:$0xff] %v14387_v42  ;;  %10260 = vmatprep.mubr.msk.f32.mxu0 %vm311_vm0, %v18704_v61  ;;  %v18714_v51 = vmax.f32 %v18713_v20, 0.0  ;;  %v18715_v61 = vld [vmem:[#allocation68_spill] sm:$0xff] }
 0x401   : > { %v14395_v14 = vpop.f32.mrb[158].mxu0 }
 0x402   : > { %18705 = vst [vmem:[#allocation44_spill] sm:$0xff] %v14395_v14  ;;  %v14397_v3 = vpop.f32.mrb[159].mxu0  ;;  %10261 = vmatmul.mubr.msk.f32.gmra.mrb[8].mxu0 %vm311_vm0, %v18708_v12  ;;  %v18716_v14 = vmax.f32 %v18715_v61, 0.0  ;;  %v18719_v12 = vld [vmem:[#allocation65_spill] sm:$0xff] }
 0x403   : > { %18706 = vst [vmem:[#allocation64_spill] sm:$0xff] %v14397_v3  ;;  %10263 = vmatprep.mubr.msk.f32.mxu0 %vm311_vm0, %v18710_v27  ;;  %v18720_v46 = vmax.f32 %v18719_v12, 0.0  ;;  %v18721_v27 = vld [vmem:[#allocation70_spill] sm:$0xff] }
 0x405   : > { %v14405_v42 = vpop.f32.mrb[160].mxu0 }
 0x406   : > { %18711 = vst [vmem:[#allocation48_spill] sm:$0xff] %v14405_v42  ;;  %v14407_v18 = vpop.f32.mrb[161].mxu0  ;;  %10264 = vmatmul.mubr.msk.f32.gmra.mrb[10].mxu0 %vm311_vm0, %v18714_v51  ;;  %v18722_v42 = vmax.f32 %v18721_v27, 0.0  ;;  %v18725_v51 = vld [vmem:[#allocation67_spill] sm:$0xff] }
 0x407   : > { %18712 = vst [vmem:[#allocation66_spill] sm:$0xff] %v14407_v18  ;;  %10266 = vmatprep.mubr.msk.f32.mxu0 %vm311_vm0, %v18716_v14  ;;  %v18726_v61 = vmax.f32 %v18725_v51, 0.0  ;;  %v18727_v14 = vld [vmem:[#allocation72_spill] sm:$0xff] }
 0x409   : > { %v14415_v3 = vpop.f32.mrb[162].mxu0 }
 0x40a   : > { %18717 = vst [vmem:[#allocation63_spill] sm:$0xff] %v14415_v3  ;;  %v14417_v30 = vpop.f32.mrb[163].mxu0  ;;  %10267 = vmatmul.mubr.msk.f32.gmra.mrb[12].mxu0 %vm311_vm0, %v18720_v46  ;;  %v18728_v3 = vmax.f32 %v18727_v14, 0.0  ;;  %v18731_v46 = vld [vmem:[#allocation69_spill] sm:$0xff] }
 0x40b   : > { %18718 = vst [vmem:[#allocation68_spill] sm:$0xff] %v14417_v30  ;;  %10269 = vmatprep.mubr.msk.f32.mxu0 %vm311_vm0, %v18722_v42  ;;  %v18732_v27 = vmax.f32 %v18731_v46, 0.0  ;;  %v18733_v42 = vld [vmem:[#allocation74_spill] sm:$0xff] }
 0x40d   : > { %v14425_v18 = vpop.f32.mrb[164].mxu0 }
 0x40e   : > { %18723 = vst [vmem:[#allocation65_spill] sm:$0xff] %v14425_v18  ;;  %v14427_v20 = vpop.f32.mrb[165].mxu0  ;;  %10270 = vmatmul.mubr.msk.f32.gmra.mrb[14].mxu0 %vm311_vm0, %v18726_v61  ;;  %v18734_v18 = vmax.f32 %v18733_v42, 0.0  ;;  %v18737_v61 = vld [vmem:[#allocation71_spill] sm:$0xff] }
 0x40f   : > { %18724 = vst [vmem:[#allocation70_spill] sm:$0xff] %v14427_v20  ;;  %10272 = vmatprep.mubr.msk.f32.mxu0 %vm311_vm0, %v18728_v3  ;;  %v18738_v14 = vmax.f32 %v18737_v61, 0.0  ;;  %v18739_v3 = vld [vmem:[#allocation76_spill] sm:$0xff] }
 0x411   : > { %v14435_v30 = vpop.f32.mrb[166].mxu0 }
 0x412   : > { %18729 = vst [vmem:[#allocation67_spill] sm:$0xff] %v14435_v30  ;;  %v14437_v12 = vpop.f32.mrb[167].mxu0  ;;  %10273 = vmatmul.mubr.msk.f32.gmra.mrb[16].mxu0 %vm311_vm0, %v18732_v27  ;;  %v18740_v30 = vmax.f32 %v18739_v3, 0.0  ;;  %v18743_v27 = vld [vmem:[#allocation73_spill] sm:$0xff] }
 0x413   : > { %18730 = vst [vmem:[#allocation72_spill] sm:$0xff] %v14437_v12  ;;  %10275 = vmatprep.mubr.msk.f32.mxu0 %vm311_vm0, %v18734_v18  ;;  %v18744_v42 = vmax.f32 %v18743_v27, 0.0  ;;  %v18745_v18 = vld [vmem:[#allocation78_spill] sm:$0xff] }
 0x415   : > { %v14445_v20 = vpop.f32.mrb[168].mxu0 }
 0x416   : > { %18735 = vst [vmem:[#allocation69_spill] sm:$0xff] %v14445_v20  ;;  %v14447_v51 = vpop.f32.mrb[169].mxu0  ;;  %10276 = vmatmul.mubr.msk.f32.gmra.mrb[18].mxu0 %vm311_vm0, %v18738_v14  ;;  %v18746_v20 = vmax.f32 %v18745_v18, 0.0  ;;  %v18749_v14 = vld [vmem:[#allocation75_spill] sm:$0xff] }
 0x417   : > { %18736 = vst [vmem:[#allocation74_spill] sm:$0xff] %v14447_v51  ;;  %10278 = vmatprep.mubr.msk.f32.mxu0 %vm311_vm0, %v18740_v30  ;;  %v18750_v3 = vmax.f32 %v18749_v14, 0.0  ;;  %v18751_v30 = vld [vmem:[#allocation80_spill] sm:$0xff] }
 0x419   : > { %v14455_v12 = vpop.f32.mrb[170].mxu0 }
 0x41a   : > { %18741 = vst [vmem:[#allocation71_spill] sm:$0xff] %v14455_v12  ;;  %v14457_v46 = vpop.f32.mrb[171].mxu0  ;;  %10279 = vmatmul.mubr.msk.f32.gmra.mrb[20].mxu0 %vm311_vm0, %v18744_v42  ;;  %v18752_v12 = vmax.f32 %v18751_v30, 0.0  ;;  %v18755_v42 = vld [vmem:[#allocation77_spill] sm:$0xff] }
 0x41b   : > { %18742 = vst [vmem:[#allocation76_spill] sm:$0xff] %v14457_v46  ;;  %10281 = vmatprep.mubr.msk.f32.mxu0 %vm311_vm0, %v18746_v20  ;;  %v18756_v18 = vmax.f32 %v18755_v42, 0.0  ;;  %v18757_v20 = vld [vmem:[#allocation82_spill] sm:$0xff] }
 0x41d   : > { %v14465_v51 = vpop.f32.mrb[172].mxu0 }
 0x41e   : > { %18747 = vst [vmem:[#allocation73_spill] sm:$0xff] %v14465_v51  ;;  %v14467_v61 = vpop.f32.mrb[173].mxu0  ;;  %10282 = vmatmul.mubr.msk.f32.gmra.mrb[22].mxu0 %vm311_vm0, %v18750_v3  ;;  %v18758_v51 = vmax.f32 %v18757_v20, 0.0  ;;  %v18761_v3 = vld [vmem:[#allocation79_spill] sm:$0xff] }
 0x41f   : > { %18748 = vst [vmem:[#allocation78_spill] sm:$0xff] %v14467_v61  ;;  %10284 = vmatprep.mubr.msk.f32.mxu0 %vm311_vm0, %v18752_v12  ;;  %v18762_v30 = vmax.f32 %v18761_v3, 0.0  ;;  %v18763_v12 = vld [vmem:[#allocation84_spill] sm:$0xff] }
 0x421   : > { %v14475_v46 = vpop.f32.mrb[174].mxu0 }
 0x422   : > { %18753 = vst [vmem:[#allocation75_spill] sm:$0xff] %v14475_v46  ;;  %v14477_v27 = vpop.f32.mrb[175].mxu0  ;;  %10285 = vmatmul.mubr.msk.f32.gmra.mrb[24].mxu0 %vm311_vm0, %v18756_v18  ;;  %v18764_v46 = vmax.f32 %v18763_v12, 0.0  ;;  %v18767_v18 = vld [vmem:[#allocation81_spill] sm:$0xff] }
 0x423   : > { %18754 = vst [vmem:[#allocation80_spill] sm:$0xff] %v14477_v27  ;;  %10287 = vmatprep.mubr.msk.f32.mxu0 %vm311_vm0, %v18758_v51  ;;  %v18768_v20 = vmax.f32 %v18767_v18, 0.0  ;;  %v18769_v51 = vld [vmem:[#allocation86_spill] sm:$0xff] }
 0x425   : > { %v14485_v61 = vpop.f32.mrb[176].mxu0 }
 0x426   : > { %18759 = vst [vmem:[#allocation77_spill] sm:$0xff] %v14485_v61  ;;  %v14487_v14 = vpop.f32.mrb[177].mxu0  ;;  %10288 = vmatmul.mubr.msk.f32.gmra.mrb[26].mxu0 %vm311_vm0, %v18762_v30  ;;  %v18770_v61 = vmax.f32 %v18769_v51, 0.0  ;;  %v18773_v30 = vld [vmem:[#allocation83_spill] sm:$0xff] }
 0x427   : > { %18760 = vst [vmem:[#allocation82_spill] sm:$0xff] %v14487_v14  ;;  %10290 = vmatprep.mubr.msk.f32.mxu0 %vm311_vm0, %v18764_v46  ;;  %v18774_v12 = vmax.f32 %v18773_v30, 0.0  ;;  %v18775_v46 = vld [vmem:[#allocation88_spill] sm:$0xff] }
 0x429   : > { %v14495_v27 = vpop.f32.mrb[178].mxu0 }
 0x42a   : > { %18765 = vst [vmem:[#allocation79_spill] sm:$0xff] %v14495_v27  ;;  %v14497_v42 = vpop.f32.mrb[179].mxu0  ;;  %10291 = vmatmul.mubr.msk.f32.gmra.mrb[28].mxu0 %vm311_vm0, %v18768_v20  ;;  %v18776_v27 = vmax.f32 %v18775_v46, 0.0  ;;  %v18779_v20 = vld [vmem:[#allocation85_spill] sm:$0xff] }
 0x42b   : > { %18766 = vst [vmem:[#allocation84_spill] sm:$0xff] %v14497_v42  ;;  %10293 = vmatprep.mubr.msk.f32.mxu0 %vm311_vm0, %v18770_v61  ;;  %v18780_v51 = vmax.f32 %v18779_v20, 0.0  ;;  %v18781_v61 = vld [vmem:[#allocation3_spill] sm:$0xff] }
 0x42d   : > { %v14505_v14 = vpop.f32.mrb[180].mxu0 }
 0x42e   : > { %18771 = vst [vmem:[#allocation81_spill] sm:$0xff] %v14505_v14  ;;  %v14507_v3 = vpop.f32.mrb[181].mxu0  ;;  %10294 = vmatmul.mubr.msk.f32.gmra.mrb[30].mxu0 %vm311_vm0, %v18774_v12  ;;  %v18782_v14 = vmax.f32 %v18781_v61, 0.0  ;;  %v18785_v12 = vld [vmem:[#allocation87_spill] sm:$0xff] }
 0x42f   : > { %18772 = vst [vmem:[#allocation86_spill] sm:$0xff] %v14507_v3  ;;  %10296 = vmatprep.mubr.msk.f32.mxu0 %vm311_vm0, %v18776_v27  ;;  %v18786_v46 = vmax.f32 %v18785_v12, 0.0  ;;  %v18787_v27 = vld [vmem:[#allocation5_spill] sm:$0xff]  ;;  %v18793_v12 = vld [vmem:[#allocation7_spill] sm:$0xff] }
 0x431   : > { %v14515_v42 = vpop.f32.mrb[182].mxu0 }
 0x432   : > { %18777 = vst [vmem:[#allocation83_spill] sm:$0xff] %v14515_v42  ;;  %v14517_v18 = vpop.f32.mrb[183].mxu0  ;;  %10297 = vmatmul.mubr.msk.f32.gmra.mrb[32].mxu0 %vm311_vm0, %v18780_v51  ;;  %v18788_v42 = vmax.f32 %v18787_v27, 0.0  ;;  %v18791_v51 = vld [vmem:[#allocation2_spill] sm:$0xff] }
 0x433   : > { %18778 = vst [vmem:[#allocation88_spill] sm:$0xff] %v14517_v18  ;;  %10299 = vmatprep.mubr.msk.f32.mxu0 %vm311_vm0, %v18782_v14  ;;  %v18792_v61 = vmax.f32 %v18791_v51, 0.0  ;;  %v14545_v14 = vld [vmem:[%s17855_s2 + $0x2] ss:$0 sm:$0xff] }
 0x435   : > { %v14525_v3 = vpop.f32.mrb[184].mxu0 }
 0x436   : > { %18783 = vst [vmem:[#allocation85_spill] sm:$0xff] %v14525_v3  ;;  %v14527_v30 = vpop.f32.mrb[185].mxu0  ;;  %10300 = vmatmul.mubr.msk.f32.gmra.mrb[34].mxu0 %vm311_vm0, %v18786_v46  ;;  %v18794_v3 = vmax.f32 %v18793_v12, 0.0  ;;  %v18803_v12 = vld [vmem:[#allocation16_spill] sm:$0xff] }
 0x437   : > { %18784 = vst [vmem:[#allocation3_spill] sm:$0xff] %v14527_v30  ;;  %10302 = vmatprep.mubr.msk.f32.mxu0 %vm311_vm0, %v18788_v42  ;;  %v18796_v42 = vld [vmem:[#allocation12_spill] sm:$0xff]  ;;  %v14567_v50 = vadd.f32 %v18803_v12, %v14545_v14 }
 0x438   : > { %v14554_v27 = vadd.f32 %v18796_v42, %v14545_v14  ;;  %v18807_v42 = vld [vmem:[#allocation20_spill] sm:$0xff] }
 0x439   : > { %v14535_v18 = vpop.f32.mrb[186].mxu0 }
 0x43a   : > { %18789 = vst [vmem:[#allocation87_spill] sm:$0xff] %v14535_v18  ;;  %v14537_v20 = vpop.f32.mrb[187].mxu0  ;;  %10303 = vmatmul.mubr.msk.f32.gmra.mrb[36].mxu0 %vm311_vm0, %v18792_v61  ;;  %18797 = vst [vmem:[#allocation7_spill] sm:$0xff] %v14554_v27  ;;  %v18798_v18 = vld [vmem:[#allocation15_spill] sm:$0xff]  ;;  %v14575_v27 = vadd.f32 %v18807_v42, %v14545_v14 }
 0x43b   : > { %18790 = vst [vmem:[#allocation5_spill] sm:$0xff] %v14537_v20  ;;  %10305 = vmatprep.mubr.msk.f32.mxu0 %vm311_vm0, %v18794_v3  ;;  %v14558_v51 = vadd.f32 %v14545_v14, %v18798_v18  ;;  %v18801_v20 = vld [vmem:[#allocation4_spill] sm:$0xff]  ;;  %v18805_v3 = vld [vmem:[#allocation19_spill] sm:$0xff] }
 0x43c   : > { %v18802_v30 = vmax.f32 %v18801_v20, 0.0  ;;  %18804 = vst [vmem:[#allocation4_spill] sm:$0xff] %v14567_v50  ;;  %18808 = vst [vmem:[#allocation19_spill] sm:$0xff] %v14575_v27  ;;  %v18809_v18 = vld [vmem:[#allocation23_spill] sm:$0xff] }
 0x43d   : > { %v14550_v46 = vpop.f32.mrb[188].mxu0  ;;  %18799 = vst [vmem:[#allocation12_spill] sm:$0xff] %v14558_v51  ;;  %v14579_v51 = vadd.f32 %v14545_v14, %v18809_v18  ;;  %v18815_v50 = vld [vmem:[#allocation27_spill] sm:$0xff] }
 0x43e   : > { %18795 = vst [vmem:[#allocation2_spill] sm:$0xff] %v14550_v46  ;;  %v14560_v61 = vpop.f32.mrb[189].mxu0  ;;  %10306 = vmatmul.mubr.msk.f32.gmra.mrb[38].mxu0 %vm311_vm0, %v18802_v30  ;;  %v14571_v46 = vadd.f32 %v14545_v14, %v18805_v3  ;;  %v18813_v30 = vld [vmem:[#allocation24_spill] sm:$0xff]  ;;  %v14590_v3 = vadd.f32 %v14545_v14, %v18815_v50  ;;  %v18819_v27 = vld [vmem:[#allocation31_spill] sm:$0xff] }
 0x43f   : > { %18800 = vst [vmem:[#allocation15_spill] sm:$0xff] %v14560_v61  ;;  %18810 = vst [vmem:[#allocation20_spill] sm:$0xff] %v14579_v51  ;;  %v18811_v61 = vld [vmem:[#allocation9_spill] sm:$0xff]  ;;  %v14586_v12 = vadd.f32 %v18813_v30, %v14545_v14  ;;  %v14598_v18 = vadd.f32 %v14545_v14, %v18819_v27  ;;  %v18830_v27 = vld [vmem:[#allocation90_spill] sm:$0xff] }
 0x440   : > { %18806 = vst [vmem:[#allocation16_spill] sm:$0xff] %v14571_v46  ;;  %v18812_v20 = vmax.f32 %v18811_v61, 0.0  ;;  %18816 = vst [vmem:[#allocation9_spill] sm:$0xff] %v14590_v3  ;;  %v18817_v46 = vld [vmem:[#allocation28_spill] sm:$0xff]  ;;  %v18827_v3 = vld [vmem:[#allocation39_spill] sm:$0xff] }
 0x441   : > { %18814 = vst [vmem:[#allocation23_spill] sm:$0xff] %v14586_v12  ;;  %v14594_v42 = vadd.f32 %v18817_v46, %v14545_v14  ;;  %18820 = vst [vmem:[#allocation27_spill] sm:$0xff] %v14598_v18  ;;  %v18821_v61 = vld [vmem:[#allocation32_spill] sm:$0xff]  ;;  %v14614_v46 = vadd.f32 %v14545_v14, %v18827_v3  ;;  %v14620_v18 = vadd.f32 %v18830_v27, %v14545_v14 }
 0x442   : > { %10308 = vmatprep.mubr.msk.f32.mxu0 %vm311_vm0, %v18812_v20  ;;  %v14602_v51 = vadd.f32 %v18821_v61, %v14545_v14  ;;  %v18823_v20 = vld [vmem:[#allocation35_spill] sm:$0xff]  ;;  %v18825_v12 = vld [vmem:[#allocation36_spill] sm:$0xff]  ;;  %v14641_v27 = vadd.f32 %v14010_v55, %v14545_v14  ;;  %v14661_v55 = vld [vmem:[%s17855_s2 + $0x3] ss:$0 sm:$0xff] }
 0x443   : > { %18818 = vst [vmem:[#allocation24_spill] sm:$0xff] %v14594_v42  ;;  %v14606_v30 = vadd.f32 %v14545_v14, %v18823_v20  ;;  %v14610_v50 = vadd.f32 %v18825_v12, %v14545_v14  ;;  %18828 = vst [vmem:[#allocation35_spill] sm:$0xff] %v14614_v46  ;;  %v14616_v42 = vpop.f32.mrb[190].mxu0  ;;  %v18832_v61 = vld [vmem:[#allocation91_spill] sm:$0xff]  ;;  %v18834_v20 = vld [vmem:[#allocation94_spill] sm:$0xff]  ;;  %v14632_v12 = vadd.f32 %v14545_v14, %v13997_v43 }
 0x444   : > { %18822 = vst [vmem:[#allocation28_spill] sm:$0xff] %v14602_v51  ;;  %18829 = vst [vmem:[#allocation36_spill] sm:$0xff] %v14616_v42  ;;  %v14624_v51 = vadd.f32 %v14545_v14, %v18832_v61  ;;  %v14634_v3 = vpop.f32.mrb[191].mxu0  ;;  %v14645_v61 = vadd.f32 %v14545_v14, %v14015_v15  ;;  %v14653_v43 = vadd.f32 %v14545_v14, %v14027_v13 }
 0x445   : > { %18824 = vst [vmem:[#allocation31_spill] sm:$0xff] %v14606_v30  ;;  %18826 = vst [vmem:[#allocation32_spill] sm:$0xff] %v14610_v50  ;;  %v14628_v30 = vadd.f32 %v18834_v20, %v14545_v14  ;;  %v18838_v50 = vld [vmem:[#allocation6_spill] sm:$0xff]  ;;  %v14649_v20 = vadd.f32 %v14022_v35, %v14545_v14  ;;  %v14665_v15 = vadd.f32 %v14035_v10, %v14545_v14 }
 0x446   : > { %18831 = vst [vmem:[#allocation39_spill] sm:$0xff] %v14620_v18  ;;  %18833 = vst [vmem:[#allocation90_spill] sm:$0xff] %v14624_v51  ;;  %v18839_v42 = vmax.f32 %v18838_v50, 0.0  ;;  %v14669_v35 = vadd.f32 %v14545_v14, %v14037_v60  ;;  %v14673_v13 = vadd.f32 %v14045_v25, %v14545_v14  ;;  %v14685_v10 = vadd.f32 %v14545_v14, %v14057_v47 }
 0x447   : > { %18835 = vst [vmem:[#allocation91_spill] sm:$0xff] %v14628_v30  ;;  %18836 = vst [vmem:[#allocation94_spill] sm:$0xff] %v14632_v12  ;;  %v14689_v60 = vadd.f32 %v14065_v34, %v14545_v14  ;;  %v14693_v25 = vadd.f32 %v14545_v14, %v14067_v62  ;;  %v14705_v47 = vadd.f32 %v14085_v31, %v14545_v14 }
 0x448   : > { %18837 = vst [vmem:[#allocation101_spill] sm:$0xff] %v14634_v3  ;;  %10309 = vmatmul.mubr.msk.f32.gmra.mrb[40].mxu0 %vm311_vm0, %v18839_v42  ;;  %18840 = vst [vmem:[#allocation6_spill] sm:$0xff] %v14641_v27  ;;  %v18844_v3 = vld [vmem:[#allocation11_spill] sm:$0xff]  ;;  %v14677_v42 = vadd.f32 %v14545_v14, %v14047_v24  ;;  %v14697_v24 = vadd.f32 %v14075_v54, %v14545_v14  ;;  %v14713_v62 = vadd.f32 %v14545_v14, %v14087_v8 }
 0x449   : > { %18841 = vst [vmem:[#allocation102_spill] sm:$0xff] %v14645_v61  ;;  %18842 = vst [vmem:[#allocation103_spill] sm:$0xff] %v14649_v20  ;;  %v18845_v50 = vmax.f32 %v18844_v3, 0.0  ;;  %v14681_v3 = vadd.f32 %v14055_v39, %v14545_v14  ;;  %v14701_v39 = vadd.f32 %v14545_v14, %v14077_v23  ;;  %v14717_v54 = vadd.f32 %v14095_v22, %v14545_v14 }
 0x44a   : > { %18843 = vst [vmem:[#allocation104_spill] sm:$0xff] %v14653_v43  ;;  %18846 = vst [vmem:[#allocation11_spill] sm:$0xff] %v14665_v15  ;;  %v14721_v23 = vadd.f32 %v14545_v14, %v14097_v58  ;;  %v14733_v8 = vadd.f32 %v14545_v14, %v14107_v19  ;;  %v14737_v22 = vadd.f32 %v14115_v26, %v14545_v14 }
 0x44b   : > { %10311 = vmatprep.mubr.msk.f32.mxu0 %vm311_vm0, %v18845_v50  ;;  %18847 = vst [vmem:[#allocation105_spill] sm:$0xff] %v14669_v35  ;;  %18848 = vst [vmem:[#allocation106_spill] sm:$0xff] %v14673_v13  ;;  %v10154_v50 = vpop.f32.mrb[192].mxu0  ;;  %v14757_v26 = vadd.f32 %v14545_v14, %v14137_v38 }
 0x44c   : > { %18849 = vst [vmem:[#allocation107_spill] sm:$0xff] %v14677_v42  ;;  %18850 = vst [vmem:[#allocation108_spill] sm:$0xff] %v14681_v3  ;;  %v4771_v34 = vadd.f32 %v10154_v50, %v14661_v55  ;;  %v18857_v3 = vld [vmem:[#allocation8_spill] sm:$0xff]  ;;  %v18862_v50 = vld [vmem:[#allocation13_spill] sm:$0xff] }
 0x44d   : > { %18851 = vst [vmem:[#allocation109_spill] sm:$0xff] %v14685_v10  ;;  %18852 = vst [vmem:[#allocation110_spill] sm:$0xff] %v14689_v60  ;;  %v4765_v60 = vpop.f32.mrb[193].mxu0  ;;  %v18858_v10 = vmax.f32 %v18857_v3, 0.0  ;;  %v14729_v3 = vadd.f32 %v14105_v33, %v14545_v14  ;;  %v14749_v33 = vadd.f32 %v14545_v14, %v14127_v49  ;;  %v14765_v49 = vadd.f32 %v14145_v1, %v14545_v14 }
 0x44e   : > { %18853 = vst [vmem:[#allocation111_spill] sm:$0xff] %v14693_v25  ;;  %18854 = vst [vmem:[#allocation112_spill] sm:$0xff] %v14697_v24  ;;  %v4766_v31 = vadd.f32 %v14661_v55, %v4765_v60  ;;  %v5410_v58 = vadd.f32 2.0, %v4771_v34  ;;  %v14745_v60 = vadd.f32 %v14125_v0, %v14545_v14  ;;  %v10157_v19 = vpop.f32.mrb[194].mxu0  ;;  %v18872_v0 = vld [vmem:[#allocation10_spill] sm:$0xff] }
 0x44f   : > { %18855 = vst [vmem:[#allocation113_spill] sm:$0xff] %v14701_v39  ;;  %18856 = vst [vmem:[#allocation114_spill] sm:$0xff] %v14705_v47  ;;  %10312 = vmatmul.mubr.msk.f32.gmra.mrb[42].mxu0 %vm311_vm0, %v18858_v10  ;;  %v18863_v47 = vmax.f32 %v18862_v50, 0.0  ;;  %v14741_v10 = vadd.f32 %v14545_v14, %v14117_v28  ;;  %v14753_v50 = vadd.f32 %v14135_v9, %v14545_v14 }
 0x450   : > { %18859 = vst [vmem:[#allocation8_spill] sm:$0xff] %v14713_v62  ;;  %18860 = vst [vmem:[#allocation115_spill] sm:$0xff] %v14717_v54  ;;  %v8555_v28 = vmul.f32 -1.442695, %v5410_v58  ;;  %v4781_v34 = vadd.f32 %v10157_v19, %v14661_v55  ;;  %v14769_v9 = vadd.f32 %v14545_v14, %v14147_v56  ;;  %v14777_v19 = vadd.f32 %v14155_v4, %v14545_v14 }
 0x451   : > { %18861 = vst [vmem:[#allocation116_spill] sm:$0xff] %v14721_v23  ;;  %10314 = vmatprep.mubr.msk.f32.mxu0 %vm311_vm0, %v18863_v47  ;;  %18864 = vst [vmem:[#allocation13_spill] sm:$0xff] %v14729_v3  ;;  %v5409_v47 = vadd.f32 2.0, %v4766_v31  ;;  %v14785_v56 = vadd.f32 %v14165_v29, %v14545_v14  ;;  %v14793_v4 = vadd.f32 %v14175_v48, %v14545_v14  ;;  %v11298_v3 = vld [vmem:[%s11489_s30 + $0x20] sm:$0xff] }
 0x452   : > { %18865 = vst [vmem:[#allocation117_spill] sm:$0xff] %v14733_v8  ;;  %18866 = vst [vmem:[#allocation118_spill] sm:$0xff] %v14737_v22  ;;  %v4775_v22 = vpop.f32.mrb[195].mxu0  ;;  %10525 = vpow2.f32 %v8555_v28  ;;  %v5412_v1 = vadd.f32 2.0, %v4781_v34  ;;  %v14809_v48 = vadd.f32 %v14545_v14, %v14187_v40  ;;  %v14825_v40 = vadd.f32 %v14205_v57, %v14545_v14 }
 0x453   : > { %18867 = vst [vmem:[#allocation119_spill] sm:$0xff] %v14741_v10  ;;  %18868 = vst [vmem:[#allocation120_spill] sm:$0xff] %v14745_v60  ;;  %v18873_v60 = vmax.f32 %v18872_v0, 0.0  ;;  %v8554_v31 = vmul.f32 -1.442695, %v5409_v47  ;;  %v4776_v38 = vadd.f32 %v14661_v55, %v4775_v22  ;;  %v14789_v22 = vadd.f32 %v14545_v14, %v14167_v6  ;;  %v18884_v0 = vld [vmem:[#allocation14_spill] sm:$0xff] }
 0x454   : > { %18869 = vst [vmem:[#allocation121_spill] sm:$0xff] %v14749_v33  ;;  %18870 = vst [vmem:[#allocation122_spill] sm:$0xff] %v14753_v50  ;;  %v18876_v50 = vld [vmem:[#allocation17_spill] sm:$0xff]  ;;  %v8557_v28 = vmul.f32 -1.442695, %v5412_v1  ;;  %v14805_v6 = vadd.f32 %v14185_v36, %v14545_v14  ;;  %v18964_v33 = vld [vmem:[#allocation16_spill] sm:$0xff] }
 0x455   : > { %18871 = vst [vmem:[#allocation123_spill] sm:$0xff] %v14757_v26  ;;  %10315 = vmatmul.mubr.msk.f32.gmra.mrb[44].mxu0 %vm311_vm0, %v18873_v60  ;;  %18874 = vst [vmem:[#allocation10_spill] sm:$0xff] %v14765_v49  ;;  %v18877_v58 = vmax.f32 %v18876_v50, 0.0  ;;  %v14781_v60 = vadd.f32 %v14545_v14, %v14157_v32  ;;  %10527 = vpow2.f32 %v8554_v31  ;;  %v5411_v47 = vadd.f32 2.0, %v4776_v38  ;;  %v10160_v50 = vpop.f32.mrb[196].mxu0  ;;  %v18888_v38 = vld [vmem:[#allocation21_spill] sm:$0xff] }
 0x456   : > { %18875 = vst [vmem:[#allocation124_spill] sm:$0xff] %v14769_v9  ;;  %18878 = vst [vmem:[#allocation17_spill] sm:$0xff] %v14777_v19  ;;  %v14797_v32 = vadd.f32 %v14545_v14, %v14177_v41  ;;  %v4791_v34 = vadd.f32 %v10160_v50, %v14661_v55  ;;  %v4785_v29 = vpop.f32.mrb[197].mxu0  ;;  %v18889_v1 = vmax.f32 %v18888_v38, 0.0  ;;  %v14817_v50 = vadd.f32 %v14195_v16, %v14545_v14  ;;  %v18896_v38 = vld [vmem:[#allocation18_spill] sm:$0xff]  ;;  %v11297_v49 = vld [vmem:[%s11489_s30 + $0x10] sm:$0xff] }
 0x457   : > { %10317 = vmatprep.mubr.msk.f32.mxu0 %vm311_vm0, %v18877_v58  ;;  %18879 = vst [vmem:[#allocation125_spill] sm:$0xff] %v14781_v60  ;;  %18880 = vst [vmem:[#allocation126_spill] sm:$0xff] %v14785_v56  ;;  %v18885_v58 = vmax.f32 %v18884_v0, 0.0  ;;  %v8556_v31 = vmul.f32 -1.442695, %v5411_v47  ;;  %v4786_v41 = vadd.f32 %v14661_v55, %v4785_v29  ;;  %v14821_v0 = vadd.f32 %v14545_v14, %v14197_v2 }
 0x458   : > { %18881 = vst [vmem:[#allocation127_spill] sm:$0xff] %v14789_v22  ;;  %18882 = vst [vmem:[#allocation128_spill] sm:$0xff] %v14793_v4  ;;  %10529 = vpow2.f32 %v8557_v28  ;;  %v5414_v36 = vadd.f32 2.0, %v4791_v34  ;;  %v14829_v47 = vadd.f32 %v14545_v14, %v14207_v7  ;;  %v14833_v16 = vadd.f32 %v14215_v21, %v14545_v14  ;;  %v11296_v22 = vld [vmem:[%s11489_s30] sm:$0xff] }
 0x459   : > { %18883 = vst [vmem:[#allocation129_spill] sm:$0xff] %v14797_v32  ;;  %10318 = vmatmul.mubr.msk.f32.gmra.mrb[46].mxu0 %vm311_vm0, %v18885_v58  ;;  %18886 = vst [vmem:[#allocation14_spill] sm:$0xff] %v14805_v6  ;;  %10531 = vpow2.f32 %v8556_v31  ;;  %v5413_v29 = vadd.f32 2.0, %v4786_v41  ;;  %v10163_v58 = vpop.f32.mrb[198].mxu0  ;;  %v14837_v2 = vadd.f32 %v14545_v14, %v14217_v52  ;;  %v14845_v7 = vadd.f32 %v14225_v11, %v14545_v14  ;;  %v18900_v41 = vld [vmem:[#allocation25_spill] sm:$0xff] }
 0x45a   : > { %18887 = vst [vmem:[#allocation130_spill] sm:$0xff] %v14809_v48  ;;  %10320 = vmatprep.mubr.msk.f32.mxu0 %vm311_vm0, %v18889_v1  ;;  %18890 = vst [vmem:[#allocation21_spill] sm:$0xff] %v14817_v50  ;;  %v8559_v28 = vmul.f32 -1.442695, %v5414_v36  ;;  %v4801_v34 = vadd.f32 %v10163_v58, %v14661_v55  ;;  %v4795_v57 = vpop.f32.mrb[199].mxu0  ;;  %v18897_v1 = vmax.f32 %v18896_v38, 0.0  ;;  %v14849_v21 = vadd.f32 %v14545_v14, %v14227_v37 }
 0x45b   : > { %18891 = vst [vmem:[#allocation131_spill] sm:$0xff] %v14821_v0  ;;  %18892 = vst [vmem:[#allocation132_spill] sm:$0xff] %v14825_v40  ;;  %v8558_v31 = vmul.f32 -1.442695, %v5413_v29  ;;  %v4796_v52 = vadd.f32 %v14661_v55, %v4795_v57  ;;  %v18901_v36 = vmax.f32 %v18900_v41, 0.0  ;;  %v14857_v58 = vadd.f32 %v14235_v59, %v14545_v14 }
 0x45c   : > { %18893 = vst [vmem:[#allocation133_spill] sm:$0xff] %v14829_v47  ;;  %18894 = vst [vmem:[#allocation134_spill] sm:$0xff] %v14833_v16  ;;  %v14861_v38 = vadd.f32 %v14545_v14, %v14237_v53  ;;  %10533 = vpow2.f32 %v8559_v28  ;;  %v5416_v11 = vadd.f32 2.0, %v4801_v34  ;;  %v14865_v37 = vadd.f32 %v14245_v5, %v14545_v14  ;;  %v10526_v41 = vpop.eup %10525 }
 0x45d   : > { %18895 = vst [vmem:[#allocation135_spill] sm:$0xff] %v14837_v2  ;;  %10321 = vmatmul.mubr.msk.f32.gmra.mrb[48].mxu0 %vm311_vm0, %v18897_v1  ;;  %18898 = vst [vmem:[#allocation18_spill] sm:$0xff] %v14845_v7  ;;  %v14869_v29 = vadd.f32 %v14545_v14, %v14247_v45  ;;  %10535 = vpow2.f32 %v8558_v31  ;;  %v5415_v57 = vadd.f32 2.0, %v4796_v52  ;;  %v10166_v1 = vpop.f32.mrb[200].mxu0  ;;  %v14873_v59 = vadd.f32 %v14255_v44, %v14545_v14 }
 0x45e   : > { %18899 = vst [vmem:[#allocation136_spill] sm:$0xff] %v14849_v21  ;;  %10323 = vmatprep.mubr.msk.f32.mxu0 %vm311_vm0, %v18901_v36  ;;  %18902 = vst [vmem:[#allocation25_spill] sm:$0xff] %v14857_v58  ;;  %v14877_v53 = vadd.f32 %v14545_v14, %v14257_v17  ;;  %v8561_v28 = vmul.f32 -1.442695, %v5416_v11  ;;  %v4811_v5 = vadd.f32 %v10166_v1, %v14661_v55  ;;  %v4805_v34 = vpop.f32.mrb[201].mxu0  ;;  %v18908_v36 = vld [vmem:[#allocation22_spill] sm:$0xff] }
 0x45f   : > { %18903 = vst [vmem:[#allocation137_spill] sm:$0xff] %v14861_v38  ;;  %18904 = vst [vmem:[#allocation138_spill] sm:$0xff] %v14865_v37  ;;  %v18909_v37 = vmax.f32 %v18908_v36, 0.0  ;;  %v10528_v45 = vpop.eup %10527  ;;  %v14885_v31 = vadd.f32 %v14265_v63, %v14545_v14  ;;  %v5922_v52 = vadd.f32 1.0, %v10526_v41  ;;  %v8560_v44 = vmul.f32 -1.442695, %v5415_v57 }
 0x460   : > { %18905 = vst [vmem:[#allocation139_spill] sm:$0xff] %v14869_v29  ;;  %18906 = vst [vmem:[#allocation140_spill] sm:$0xff] %v14873_v59  ;;  %v4806_v59 = vadd.f32 %v14661_v55, %v4805_v34  ;;  %v18911_v29 = vld [vmem:[#allocation29_spill] sm:$0xff]  ;;  %v5921_v11 = vadd.f32 1.0, %v10528_v45  ;;  %10537 = vpow2.f32 %v8561_v28  ;;  %v5418_v1 = vadd.f32 2.0, %v4811_v5  ;;  %v18915_v58 = vld [vmem:[#allocation98_spill] sm:$0xff] }
 0x461   : > { %18907 = vst [vmem:[#allocation141_spill] sm:$0xff] %v14877_v53  ;;  %10324 = vmatmul.mubr.msk.f32.gmra.mrb[50].mxu0 %vm311_vm0, %v18909_v37  ;;  %18910 = vst [vmem:[#allocation22_spill] sm:$0xff] %v14885_v31  ;;  %v18912_v17 = vmax.f32 %v18911_v29, 0.0  ;;  %v5404_v53 = vlaneseq  ;;  %v18913_v36 = vld [vmem:[#allocation97_spill] sm:$0xff]  ;;  %v14897_v63 = vadd.f32 %v18915_v58, %v14545_v14  ;;  %10539 = vrcp.f32 %v5922_v52  ;;  %v10169_v41 = vpop.f32.mrb[202].mxu0  ;;  %v18917_v31 = vld [vmem:[#allocation99_spill] sm:$0xff] }
 0x462   : > { %v14893_v37 = vadd.f32 %v14545_v14, %v18913_v36  ;;  %v5417_v57 = vadd.f32 2.0, %v4806_v59  ;;  %v10530_v34 = vpop.eup %10529  ;;  %v14901_v29 = vadd.f32 %v14545_v14, %v18917_v31  ;;  %10541 = vrcp.f32 %v5921_v11  ;;  %v4815_v45 = vpop.f32.mrb[203].mxu0  ;;  %v18944_v21 = vld [vmem:[#allocation93_spill] sm:$0xff] }
 0x463   : > { %10326 = vmatprep.mubr.msk.f32.mxu0 %vm311_vm0, %v18912_v17  ;;  %18916 = vst [vmem:[#allocation97_spill] sm:$0xff] %v14897_v63  ;;  %v8563_v28 = vmul.f32 -1.442695, %v5418_v1  ;;  %v4821_v5 = vadd.f32 %v10169_v41, %v14661_v55  ;;  %v18919_v17 = vld [vmem:[#allocation26_spill] sm:$0xff]  ;;  %v5924_v58 = vadd.f32 1.0, %v10530_v34  ;;  %10543 = vpow2.f32 %v8560_v44  ;;  %v18921_v63 = vld [vmem:[#allocation33_spill] sm:$0xff] }
 0x464   : > { %18914 = vst [vmem:[#allocation29_spill] sm:$0xff] %v14893_v37  ;;  %18918 = vst [vmem:[#allocation98_spill] sm:$0xff] %v14901_v29  ;;  %v18920_v36 = vmax.f32 %v18919_v17, 0.0  ;;  %v10532_v37 = vpop.eup %10531  ;;  %v8562_v52 = vmul.f32 -1.442695, %v5417_v57  ;;  %v4816_v59 = vadd.f32 %v14661_v55, %v4815_v45  ;;  %v18922_v38 = vmax.f32 %v18921_v63, 0.0 }
 0x465   : > { %v5923_v31 = vadd.f32 1.0, %v10532_v37  ;;  %10545 = vpow2.f32 %v8563_v28  ;;  %v5420_v11 = vadd.f32 2.0, %v4821_v5  ;;  %v14911_v1 = vand.u32 127, %v5404_v53  ;;  %v18923_v41 = vld [vmem:[#allocation50_spill] sm:$0xff]  ;;  %v10172_v57 = vpop.f32.mrb[204].mxu0  ;;  %v18927_v63 = vld [vmem:[#allocation49_spill] sm:$0xff] }
 0x466   : > { %10327 = vmatmul.mubr.msk.f32.gmra.mrb[52].mxu0 %vm311_vm0, %v18920_v36  ;;  %v14915_v17 = vadd.f32 %v18923_v41, %v14545_v14  ;;  %v18925_v36 = vld [vmem:[#allocation100_spill] sm:$0xff]  ;;  %10547 = vrcp.f32 %v5924_v58  ;;  %v5419_v44 = vadd.f32 2.0, %v4816_v59  ;;  %v10534_v45 = vpop.eup %10533  ;;  %v4831_v53 = vadd.f32 %v10172_v57, %v14661_v55  ;;  %v4825_v28 = vpop.f32.mrb[205].mxu0  ;;  %v18929_v5 = vld [vmem:[#allocation30_spill] sm:$0xff] }
 0x467   : > { %10329 = vmatprep.mubr.msk.f32.mxu0 %vm311_vm0, %v18922_v38  ;;  %v14919_v34 = vadd.f32 %v14545_v14, %v18925_v36  ;;  %v14923_v38 = vadd.f32 %v18927_v63, %v14545_v14  ;;  %10549 = vrcp.f32 %v5923_v31  ;;  %v8565_v37 = vmul.f32 -1.442695, %v5420_v11  ;;  %v10175_v57 = vpop.f32.mrb[206].mxu0 }
 0x468   : > { %18924 = vst [vmem:[#allocation99_spill] sm:$0xff] %v14915_v17  ;;  %v18930_v41 = vmax.f32 %v18929_v5, 0.0  ;;  %v10536_v17 = vpop.eup %10535  ;;  %v5926_v36 = vadd.f32 1.0, %v10534_v45  ;;  %10551 = vpow2.f32 %v8562_v52  ;;  %v8564_v58 = vmul.f32 -1.442695, %v5419_v44 }
 0x469   : > { %18926 = vst [vmem:[#allocation26_spill] sm:$0xff] %v14919_v34  ;;  %18928 = vst [vmem:[#allocation33_spill] sm:$0xff] %v14923_v38  ;;  %v4826_v59 = vadd.f32 %v14661_v55, %v4825_v28  ;;  %v18931_v34 = vld [vmem:[#allocation37_spill] sm:$0xff]  ;;  %v5925_v63 = vadd.f32 1.0, %v10536_v17  ;;  %10553 = vpow2.f32 %v8565_v37  ;;  %v5422_v31 = vadd.f32 2.0, %v4831_v53  ;;  %v18933_v28 = vld [vmem:[#allocation34_spill] sm:$0xff] }
 0x46a   : > { %10330 = vmatmul.mubr.msk.f32.gmra.mrb[54].mxu0 %vm311_vm0, %v18930_v41  ;;  %v18932_v29 = vmax.f32 %v18931_v34, 0.0  ;;  %vm5406_vm1 = vcmp.ge.s32.totalorder %v14911_v1, 4  ;;  %10555 = vrcp.f32 %v5926_v36  ;;  %vm5407_vm2 = vcmp.lt.s32.totalorder %v14911_v1, 8  ;;  %v10538_v52 = vpop.eup %10537  ;;  %v4835_v34 = vpop.f32.mrb[207].mxu0  ;;  %v18935_v41 = vld [vmem:[#allocation89_spill] sm:$0xff] }
 0x46b   : > { %v5421_v11 = vadd.f32 2.0, %v4826_v59  ;;  %vm6433_vm3 = vcmp.lt.s32.totalorder %v14911_v1, 4  ;;  %10557 = vrcp.f32 %v5925_v63  ;;  %v8567_v44 = vmul.f32 -1.442695, %v5422_v31  ;;  %v10540_v17 = vpop.eup %10539  ;;  %v18937_v63 = vld [vmem:[#allocation52_spill] sm:$0xff]  ;;  %vm14954_vm4 = vmand %vm5406_vm1, %vm5407_vm2 }
 0x46c   : > { %10332 = vmatprep.mubr.msk.f32.mxu0 %vm311_vm0, %v18932_v29  ;;  %v4841_v45 = vadd.f32 %v10175_v57, %v14661_v55  ;;  %v18934_v29 = vmax.f32 %v18933_v28, 0.0  ;;  %v5928_v37 = vadd.f32 1.0, %v10538_v52  ;;  %10559 = vpow2.f32 %v8564_v58  ;;  %v10542_v59 = vpop.eup %10541 }
 0x46d   : > { %v8566_v53 = vmul.f32 -1.442695, %v5421_v11  ;;  %v4836_v5 = vadd.f32 %v14661_v55, %v4835_v34  ;;  %v18936_v36 = vmax.f32 %v18935_v41, 0.0  ;;  %v14946_v31 = vadd.f32 %v14545_v14, %v18937_v63  ;;  %v10544_v38 = vpop.eup %10543  ;;  %v10178_v11 = vpop.f32.mrb[208].mxu0  ;;  %v18942_v41 = vld [vmem:[#allocation38_spill] sm:$0xff] }
 0x46e   : > { %10333 = vmatmul.mubr.msk.f32.gmra.mrb[56].mxu0 %vm311_vm0, %v18934_v29  ;;  %10561 = vpow2.f32 %v8567_v44  ;;  %v5424_v57 = vadd.f32 2.0, %v4841_v45  ;;  %v6306_v28 = vadd.f32 0.001, %v10540_v17  ;;  %v14948_v29 = vadd.f32 0.001, %v10542_v59 }
 0x46f   : > { %10335 = vmatprep.mubr.msk.f32.mxu0 %vm311_vm0, %v18936_v36  ;;  %18938 = vst [vmem:[#allocation50_spill] sm:$0xff] %v14946_v31  ;;  %10563 = vrcp.f32 %v5928_v37  ;;  %v5423_v58 = vadd.f32 2.0, %v4836_v5  ;;  %v11434_v34 = vmov 0.0   ;;  %v10546_v44 = vpop.eup %10545  ;;  %v5927_v45 = vadd.f32 1.0, %v10544_v38  ;;  %v4845_v5 = vpop.f32.mrb[209].mxu0 }
 0x470   : > { %v14960_v14 = vsel %vm6433_vm3, 1.0, %v11434_v34  ;;  %10565 = vpow2.f32 %v8566_v53  ;;  %v8569_v17 = vmul.f32 -1.442695, %v5424_v57  ;;  %v4851_v37 = vadd.f32 %v10178_v11, %v14661_v55  ;;  %v10548_v59 = vpop.eup %10547 }
 0x471   : > { %18941 = vst [vmem:[#allocation100_spill] sm:$0xff] %v14960_v14  ;;  %v18943_v36 = vmax.f32 %v18942_v41, 0.0  ;;  %v5930_v63 = vadd.f32 1.0, %v10546_v44  ;;  %v8568_v31 = vmul.f32 -1.442695, %v5423_v58  ;;  %v4846_v7 = vadd.f32 %v14661_v55, %v4845_v5  ;;  %v10550_v38 = vpop.eup %10549  ;;  %v10181_v44 = vpop.f32.mrb[210].mxu0 }
 0x472   : > { %v18945_v34 = vmax.f32 %v18944_v21, 0.0  ;;  %10567 = vlog2.f32 %v6306_v28  ;;  %v5426_v53 = vadd.f32 2.0, %v4851_v37  ;;  %v14970_v57 = vadd.f32 0.001, %v10548_v59  ;;  %v10552_v41 = vpop.eup %10551  ;;  %v11294_v5 = vld [vmem:[%s11489_s30 + $0x8] sm:$0xff]  ;;  %v4855_v37 = vpop.f32.mrb[211].mxu0 }
 0x473   : > { %10336 = vmatmul.mubr.msk.f32.gmra.mrb[58].mxu0 %vm311_vm0, %v18943_v36  ;;  %10569 = vrcp.f32 %v5927_v45  ;;  %v6436_v11 = vsel %vm14954_vm4, %v6306_v28, %v14960_v14  ;;  %v14975_v36 = vadd.f32 0.001, %v10550_v38  ;;  %v5425_v58 = vadd.f32 2.0, %v4846_v7  ;;  %v10554_v16 = vpop.eup %10553  ;;  %v18946_v59 = vld [vmem:[#allocation92_spill] sm:$0xff] }
 0x474   : > { %10338 = vmatprep.mubr.msk.f32.mxu0 %vm311_vm0, %v18945_v34  ;;  %10571 = vrcp.f32 %v5930_v63  ;;  %v6564_v21 = vmul.f32 %v11294_v5, %v6436_v11  ;;  %v5929_v34 = vadd.f32 1.0, %v10552_v41  ;;  %v8571_v2 = vmul.f32 -1.442695, %v5426_v53  ;;  %v10556_v28 = vpop.eup %10555  ;;  %v18948_v63 = vld [vmem:[#allocation96_spill] sm:$0xff]  ;;  %v18950_v41 = vld [vmem:[#allocation7_spill] sm:$0xff] }
 0x475   : > { %10573 = vpow2.f32 %v8569_v17  ;;  %v4861_v45 = vadd.f32 %v10181_v44, %v14661_v55  ;;  %v18947_v40 = vmax.f32 %v18946_v59, 0.0  ;;  %v5932_v47 = vadd.f32 1.0, %v10554_v16  ;;  %v10558_v11 = vpop.eup %10557  ;;  %v18951_v59 = vld [vmem:[#allocation95_spill] sm:$0xff] }
 0x476   : > { %10575 = vpow2.f32 %v8568_v31  ;;  %v8570_v38 = vmul.f32 -1.442695, %v5425_v58  ;;  %v4856_v7 = vadd.f32 %v14661_v55, %v4855_v37  ;;  %v18949_v50 = vmax.f32 %v18948_v63, 0.0  ;;  %v10560_v5 = vpop.eup %10559  ;;  %v10184_v31 = vpop.f32.mrb[212].mxu0 }
 0x477   : > { %10339 = vmatmul.mubr.msk.f32.gmra.mrb[60].mxu0 %vm311_vm0, %v18947_v40  ;;  %v14986_v17 = vadd.f32 0.001, %v10556_v28  ;;  %10577 = vrcp.f32 %v5929_v34  ;;  %v5428_v53 = vadd.f32 2.0, %v4861_v45  ;;  %v14989_v44 = vadd.f32 %v6564_v21, %v18950_v41  ;;  %v4865_v21 = vpop.f32.mrb[213].mxu0 }
 0x478   : > { %10341 = vmatprep.mubr.msk.f32.mxu0 %vm311_vm0, %v18949_v50  ;;  %v14991_v40 = vadd.f32 0.001, %v10558_v11  ;;  %10579 = vrcp.f32 %v5932_v47  ;;  %v5427_v16 = vadd.f32 2.0, %v4856_v7  ;;  %v6438_v58 = vsel %vm14954_vm4, %v14970_v57, %v14960_v14  ;;  %v10562_v50 = vpop.eup %10561 }
 0x479   : > { %v5931_v37 = vadd.f32 1.0, %v10560_v5  ;;  %10581 = vpow2.f32 %v8571_v2  ;;  %v8573_v34 = vmul.f32 -1.442695, %v5428_v53  ;;  %v4871_v45 = vadd.f32 %v10184_v31, %v14661_v55  ;;  %v10564_v47 = vpop.eup %10563  ;;  %v11295_v2 = vld [vmem:[%s11489_s30 + $0x18] sm:$0xff] }
 0x47a   : > { %v18952_v28 = vmax.f32 %v18951_v59, 0.0  ;;  %v5934_v7 = vadd.f32 1.0, %v10562_v50  ;;  %10583 = vpow2.f32 %v8570_v38  ;;  %v8572_v63 = vmul.f32 -1.442695, %v5427_v16  ;;  %v10566_v41 = vpop.eup %10565  ;;  %v10187_v59 = vpop.f32.mrb[214].mxu0 }
 0x47b   : > { %v4866_v11 = vadd.f32 %v14661_v55, %v4865_v21  ;;  %v15002_v0 = vadd.f32 0.001, %v10564_v47  ;;  %10585 = vrcp.f32 %v5931_v37  ;;  %v5430_v5 = vadd.f32 2.0, %v4871_v45 }
 0x47c   : > { %10342 = vmatmul.mubr.msk.f32.gmra.mrb[62].mxu0 %vm311_vm0, %v18952_v28  ;;  %v6566_v53 = vmul.f32 %v11295_v2, %v6438_v58  ;;  %v10568_v6 = vpop.eup %10567  ;;  %10587 = vrcp.f32 %v5934_v7  ;;  %v5933_v31 = vadd.f32 1.0, %v10566_v41  ;;  %v6435_v38 = vsel %vm14954_vm4, %v14948_v29, %v14960_v14  ;;  %v4875_v28 = vpop.f32.mrb[215].mxu0 }
 0x47d   : > { %18953 = vst [vmem:[#allocation49_spill] sm:$0xff] %v15002_v0  ;;  %v5429_v48 = vadd.f32 2.0, %v4866_v11  ;;  %v10570_v16 = vpop.eup %10569  ;;  %10589 = vpow2.f32 %v8573_v34  ;;  %v8575_v50 = vmul.f32 -1.442695, %v5430_v5  ;;  %v4881_v21 = vadd.f32 %v10187_v59, %v14661_v55 }
 0x47e   : > { %v6822_v37 = vmul.f32 0.6931472, %v10568_v6  ;;  %v10572_v45 = vpop.eup %10571  ;;  %v15010_v47 = vadd.f32 0.001, %v10570_v16  ;;  %10591 = vrcp.f32 %v5933_v31  ;;  %v4876_v7 = vadd.f32 %v14661_v55, %v4875_v28  ;;  %v10190_v16 = vpop.f32.mrb[216].mxu0 }
 0x47f   : > { %v8574_v58 = vmul.f32 -1.442695, %v5429_v48  ;;  %v10574_v11 = vpop.eup %10573  ;;  %v15013_v41 = vadd.f32 0.001, %v10572_v45  ;;  %10593 = vpow2.f32 %v8572_v63  ;;  %v5432_v2 = vadd.f32 2.0, %v4881_v21  ;;  %v4885_v45 = vpop.f32.mrb[217].mxu0 }
 0x480   : > { %v7076_v34 = vsel %vm14954_vm4, %v6822_v37, 0.0  ;;  %v10576_v5 = vpop.eup %10575  ;;  %v5936_v4 = vadd.f32 1.0, %v10574_v11  ;;  %10595 = vpow2.f32 %v8575_v50  ;;  %v5431_v59 = vadd.f32 2.0, %v4876_v7  ;;  %v10193_v56 = vpop.f32.mrb[218].mxu0 }
 0x481   : > { %18954 = vst [vmem:[#allocation30_spill] sm:$0xff] %v15013_v41  ;;  %v7206_v6 = vsel %vm311_vm0, %v7076_v34, 0.0  ;;  %v10578_v32 = vpop.eup %10577  ;;  %v5935_v31 = vadd.f32 1.0, %v10576_v5  ;;  %10597 = vpow2.f32 %v8574_v58  ;;  %v8577_v48 = vmul.f32 -1.442695, %v5432_v2  ;;  %v18957_v5 = vld [vmem:[#allocation4_spill] sm:$0xff] }
 0x482   : > { %7207 = vadd.xlane.f32.xlu0 %v7206_v6  ;;  %v4891_v28 = vadd.f32 %v10190_v16, %v14661_v55  ;;  %v10580_v63 = vpop.eup %10579  ;;  %v15019_v21 = vadd.f32 0.001, %v10578_v32  ;;  %10599 = vrcp.f32 %v5936_v4  ;;  %v8576_v37 = vmul.f32 -1.442695, %v5431_v59 }
 0x483   : > { %v4886_v50 = vadd.f32 %v14661_v55, %v4885_v45  ;;  %v10582_v7 = vpop.eup %10581  ;;  %v15022_v11 = vadd.f32 0.001, %v10580_v63  ;;  %10601 = vrcp.f32 %v5935_v31  ;;  %v15025_v58 = vadd.f32 %v6566_v53, %v18957_v5  ;;  %v4895_v63 = vpop.f32.mrb[219].mxu0 }
 0x484   : > { %18955 = vst [vmem:[#allocation37_spill] sm:$0xff] %v15019_v21  ;;  %v5434_v34 = vadd.f32 2.0, %v4891_v28  ;;  %v10584_v2 = vpop.eup %10583  ;;  %v5938_v6 = vadd.f32 1.0, %v10582_v7  ;;  %10603 = vpow2.f32 %v8577_v48  ;;  %v6563_v32 = vmul.f32 %v11296_v22, %v6435_v38  ;;  %v18960_v22 = vld [vmem:[#allocation12_spill] sm:$0xff]  ;;  %v10196_v5 = vpop.f32.mrb[220].mxu0 }
 0x485   : > { %18956 = vst [vmem:[#allocation34_spill] sm:$0xff] %v15022_v11  ;;  %v5433_v16 = vadd.f32 2.0, %v4886_v50  ;;  %v10586_v19 = vpop.eup %10585  ;;  %v5937_v4 = vadd.f32 1.0, %v10584_v2  ;;  %10605 = vpow2.f32 %v8576_v37  ;;  %v4901_v45 = vadd.f32 %v10193_v56, %v14661_v55 }
 0x486   : > { %v8579_v59 = vmul.f32 -1.442695, %v5434_v34  ;;  %v10588_v60 = vpop.eup %10587  ;;  %v15029_v31 = vadd.f32 0.001, %v10586_v19  ;;  %10607 = vrcp.f32 %v5938_v6  ;;  %v4896_v28 = vadd.f32 %v14661_v55, %v4895_v63 }
 0x487   : > { %v8578_v53 = vmul.f32 -1.442695, %v5433_v16  ;;  %v10590_v7 = vpop.eup %10589  ;;  %v15032_v48 = vadd.f32 0.001, %v10588_v60  ;;  %10609 = vrcp.f32 %v5937_v4  ;;  %v5436_v50 = vadd.f32 2.0, %v4901_v45 }
 0x488   : > { %18958 = vst [vmem:[#allocation89_spill] sm:$0xff] %v15029_v31  ;;  %v15035_v38 = vadd.f32 %v6563_v32, %v18960_v22  ;;  %v10592_v37 = vpop.eup %10591  ;;  %v5940_v34 = vadd.f32 1.0, %v10590_v7  ;;  %10611 = vpow2.f32 %v8579_v59  ;;  %v5435_v56 = vadd.f32 2.0, %v4896_v28  ;;  %v4905_v32 = vpop.f32.mrb[221].mxu0 }
 0x489   : > { %18959 = vst [vmem:[#allocation52_spill] sm:$0xff] %v15032_v48  ;;  %v6437_v19 = vsel %vm14954_vm4, %v14975_v36, %v14960_v14  ;;  %v10594_v2 = vpop.eup %10593  ;;  %v15041_v6 = vadd.f32 0.001, %v10592_v37  ;;  %10613 = vpow2.f32 %v8578_v53  ;;  %v8581_v60 = vmul.f32 -1.442695, %v5436_v50  ;;  %v10199_v26 = vpop.f32.mrb[222].mxu0 }
 0x48a   : > { %v4911_v16 = vadd.f32 %v10196_v5, %v14661_v55  ;;  %v10596_v4 = vpop.eup %10595  ;;  %10615 = vrcp.f32 %v5940_v34  ;;  %v5939_v45 = vadd.f32 1.0, %v10594_v2  ;;  %v8580_v59 = vmul.f32 -1.442695, %v5435_v56 }
 0x48b   : > { %18961 = vst [vmem:[#allocation38_spill] sm:$0xff] %v15041_v6  ;;  %v4906_v63 = vadd.f32 %v14661_v55, %v4905_v32  ;;  %v10598_v28 = vpop.eup %10597  ;;  %v5942_v7 = vadd.f32 1.0, %v10596_v4  ;;  %10617 = vlog2.f32 %v14970_v57  ;;  %v6565_v9 = vmul.f32 %v11297_v49, %v6437_v19 }
 0x48c   : > { %v5438_v22 = vadd.f32 2.0, %v4911_v16  ;;  %v10600_v37 = vpop.eup %10599  ;;  %10619 = vrcp.f32 %v5939_v45  ;;  %v5941_v53 = vadd.f32 1.0, %v10598_v28  ;;  %v6439_v34 = vsel %vm14954_vm4, %v14991_v40, %v14960_v14  ;;  %v4915_v16 = vpop.f32.mrb[223].mxu0 }
 0x48d   : > { %v5437_v50 = vadd.f32 2.0, %v4906_v63  ;;  %v10602_v56 = vpop.eup %10601  ;;  %v15051_v5 = vadd.f32 0.001, %v10600_v37  ;;  %10621 = vrcp.f32 %v5942_v7  ;;  %v4921_v57 = vadd.f32 %v10199_v26, %v14661_v55  ;;  %v10202_v10 = vpop.f32.mrb[224].mxu0 }
 0x48e   : > { %v8583_v2 = vmul.f32 -1.442695, %v5438_v22  ;;  %v10604_v49 = vpop.eup %10603  ;;  %v15054_v19 = vadd.f32 0.001, %v10602_v56  ;;  %10623 = vrcp.f32 %v5941_v53  ;;  %v4916_v4 = vadd.f32 %v14661_v55, %v4915_v16 }
 0x48f   : > { %18962 = vst [vmem:[#allocation93_spill] sm:$0xff] %v15051_v5  ;;  %v8582_v32 = vmul.f32 -1.442695, %v5437_v50  ;;  %v10606_v45 = vpop.eup %10605  ;;  %v5944_v63 = vadd.f32 1.0, %v10604_v49  ;;  %10625 = vpow2.f32 %v8581_v60  ;;  %v5440_v28 = vadd.f32 2.0, %v4921_v57  ;;  %v4925_v60 = vpop.f32.mrb[225].mxu0 }
 0x490   : > { %18963 = vst [vmem:[#allocation92_spill] sm:$0xff] %v15054_v19  ;;  %v15058_v37 = vadd.f32 %v6565_v9, %v18964_v33  ;;  %v10608_v7 = vpop.eup %10607  ;;  %v5943_v22 = vadd.f32 1.0, %v10606_v45  ;;  %10627 = vlog2.f32 %v14948_v29  ;;  %v5439_v26 = vadd.f32 2.0, %v4916_v4 }
 0x491   : > { %v6567_v56 = vmul.f32 %v11298_v3, %v6439_v34  ;;  %v10610_v8 = vpop.eup %10609  ;;  %v15062_v53 = vadd.f32 0.001, %v10608_v7  ;;  %10629 = vrcp.f32 %v5944_v63  ;;  %v8585_v50 = vmul.f32 -1.442695, %v5440_v28  ;;  %v18967_v3 = vld [vmem:[#allocation20_spill] sm:$0xff] }
 0x492   : > { %v4931_v16 = vadd.f32 %v10202_v10, %v14661_v55  ;;  %v10612_v57 = vpop.eup %10611  ;;  %v15065_v49 = vadd.f32 0.001, %v10610_v8  ;;  %10631 = vrcp.f32 %v5943_v22  ;;  %v8584_v33 = vmul.f32 -1.442695, %v5439_v26  ;;  %v10205_v10 = vpop.f32.mrb[226].mxu0 }
 0x493   : > { %18965 = vst [vmem:[#allocation96_spill] sm:$0xff] %v15062_v53  ;;  %v4926_v9 = vadd.f32 %v14661_v55, %v4925_v60  ;;  %v10614_v29 = vpop.eup %10613  ;;  %v5946_v4 = vadd.f32 1.0, %v10612_v57  ;;  %10633 = vpow2.f32 %v8580_v59  ;;  %v15069_v34 = vadd.f32 %v6567_v56, %v18967_v3  ;;  %v4935_v56 = vpop.f32.mrb[227].mxu0 }
 0x494   : > { %18966 = vst [vmem:[#allocation7_spill] sm:$0xff] %v15065_v49  ;;  %v5442_v45 = vadd.f32 2.0, %v4931_v16  ;;  %v10616_v7 = vpop.eup %10615  ;;  %v5945_v63 = vadd.f32 1.0, %v10614_v29  ;;  %10635 = vpow2.f32 %v8583_v2  ;;  %v6440_v8 = vsel %vm14954_vm4, %v14986_v17, %v14960_v14 }
 0x495   : > { %18968 = vst [vmem:[#allocation95_spill] sm:$0xff] %v15069_v34  ;;  %v5441_v28 = vadd.f32 2.0, %v4926_v9  ;;  %v10618_v22 = vpop.eup %10617  ;;  %v15075_v26 = vadd.f32 0.001, %v10616_v7  ;;  %10637 = vrcp.f32 %v5946_v4  ;;  %v4941_v16 = vadd.f32 %v10205_v10, %v14661_v55  ;;  %v11299_v7 = vld [vmem:[%s11489_s30 + $0x28] sm:$0xff] }
 0x496   : > { %v8587_v59 = vmul.f32 -1.442695, %v5442_v45  ;;  %v10620_v60 = vpop.eup %10619  ;;  %10639 = vrcp.f32 %v5945_v63  ;;  %v6826_v57 = vmul.f32 0.6931472, %v10618_v22  ;;  %v4936_v9 = vadd.f32 %v14661_v55, %v4935_v56 }
 0x497   : > { %18969 = vst [vmem:[#allocation4_spill] sm:$0xff] %v15075_v26  ;;  %v15078_v2 = vmul.f32 -1.442695, %v5441_v28  ;;  %v10622_v29 = vpop.eup %10621  ;;  %v15081_v3 = vadd.f32 0.001, %v10620_v60  ;;  %10641 = vlog2.f32 %v14975_v36  ;;  %v5444_v54 = vadd.f32 2.0, %v4941_v16 }
 0x498   : > { %v6568_v23 = vmul.f32 %v11299_v7, %v6440_v8  ;;  %v10624_v4 = vpop.eup %10623  ;;  %v15085_v45 = vadd.f32 0.001, %v10622_v29  ;;  %v7078_v10 = vsel %vm14954_vm4, %v6826_v57, 0.0  ;;  %10643 = vpow2.f32 %v8582_v32  ;;  %v10208_v28 = vpop.f32.mrb[228].mxu0 }
 0x499   : > { %18970 = vst [vmem:[#allocation12_spill] sm:$0xff] %v15081_v3  ;;  %v5443_v63 = vadd.f32 2.0, %v4936_v9  ;;  %v10626_v22 = vpop.eup %10625  ;;  %v15089_v62 = vadd.f32 0.001, %v10624_v4  ;;  %v7212_v56 = vsel %vm311_vm0, %v7078_v10, 0.0  ;;  %10645 = vlog2.f32 %v14991_v40  ;;  %v4945_v16 = vpop.f32.mrb[229].mxu0 }
 0x49a   : > { %18971 = vst [vmem:[#allocation16_spill] sm:$0xff] %v15085_v45  ;;  %v15093_v36 = vmul.f32 -1.442695, %v5444_v54  ;;  %v10628_v8 = vpop.eup %10627  ;;  %7213 = vadd.xlane.f32.xlu1 %v7212_v56  ;;  %v5948_v60 = vadd.f32 1.0, %v10626_v22  ;;  %10647 = vpow2.f32 %v8585_v50  ;;  %v4951_v32 = vadd.f32 %v10208_v28, %v14661_v55  ;;  %v18973_v4 = vld [vmem:[#allocation19_spill] sm:$0xff]  ;;  %v10211_v22 = vpop.f32.mrb[230].mxu0 }
 0x49b   : > { %18972 = vst [vmem:[#allocation20_spill] sm:$0xff] %v15089_v62  ;;  %v15095_v29 = vmul.f32 -1.442695, %v5443_v63  ;;  %v10630_v57 = vpop.eup %10629  ;;  %v6820_v9 = vmul.f32 0.6931472, %v10628_v8  ;;  %10649 = vlog2.f32 %v14986_v17  ;;  %v4946_v7 = vadd.f32 %v14661_v55, %v4945_v16  ;;  %v4955_v16 = vpop.f32.mrb[231].mxu0 }
 0x49c   : > { %v15101_v10 = vadd.f32 %v6568_v23, %v18973_v4  ;;  %v10632_v54 = vpop.eup %10631  ;;  %v15103_v40 = vadd.f32 0.001, %v10630_v57  ;;  %10651 = vrcp.f32 %v5948_v60  ;;  %v5446_v56 = vadd.f32 2.0, %v4951_v32 }
 0x49d   : > { %v6441_v50 = vsel %vm14954_vm4, %v15010_v47, %v14960_v14  ;;  %v10634_v63 = vpop.eup %10633  ;;  %v15109_v28 = vadd.f32 0.001, %v10632_v54  ;;  %v7075_v17 = vsel %vm14954_vm4, %v6820_v9, 0.0  ;;  %10653 = vpow2.f32 %v8584_v33 }
 0x49e   : > { %18974 = vst [vmem:[#allocation19_spill] sm:$0xff] %v15101_v10  ;;  %18975 = vst [vmem:[#allocation142_spill] sm:$0xff] %v15103_v40  ;;  %v5445_v23 = vadd.f32 2.0, %v4946_v7  ;;  %v10636_v8 = vpop.eup %10635  ;;  %v7203_v60 = vsel %vm311_vm0, %v7075_v17, 0.0  ;;  %v5947_v32 = vadd.f32 1.0, %v10634_v63  ;;  %10655 = vlog2.f32 %v15010_v47  ;;  %v10214_v17 = vpop.f32.mrb[232].mxu0 }
 0x49f   : > { %18976 = vst [vmem:[#allocation143_spill] sm:$0xff] %v15109_v28  ;;  %v15115_v57 = vmul.f32 -1.442695, %v5446_v56  ;;  %v10638_v4 = vpop.eup %10637  ;;  %7204 = vadd.xlane.f32.xlu0 %v7203_v60  ;;  %v5950_v24 = vadd.f32 1.0, %v10636_v8  ;;  %10657 = vpow2.f32 %v8587_v59  ;;  %v4961_v9 = vadd.f32 %v10211_v22, %v14661_v55  ;;  %v11300_v63 = vld [vmem:[%s11489_s30 + $0x30] sm:$0xff] }
 0x4a0   : > { %v15117_v54 = vmul.f32 -1.442695, %v5445_v23  ;;  %v10640_v33 = vpop.eup %10639  ;;  %v15120_v7 = vadd.f32 0.001, %v10638_v4  ;;  %10659 = vrcp.f32 %v5947_v32  ;;  %v4956_v39 = vadd.f32 %v14661_v55, %v4955_v16  ;;  %v4965_v23 = vpop.f32.mrb[233].mxu0 }
 0x4a1   : > { %v15124_v25 = vmul.f32 %v11300_v63, %v6441_v50  ;;  %v10642_v47 = vpop.eup %10641  ;;  %v15126_v56 = vadd.f32 0.001, %v10640_v33  ;;  %10661 = vrcp.f32 %v5950_v24  ;;  %v5448_v8 = vadd.f32 2.0, %v4961_v9 }
 0x4a2   : > { %18977 = vst [vmem:[#allocation144_spill] sm:$0xff] %v15120_v7  ;;  %v4971_v59 = vadd.f32 %v10214_v17, %v14661_v55  ;;  %v10644_v60 = vpop.eup %10643  ;;  %v6824_v22 = vmul.f32 0.6931472, %v10642_v47  ;;  %10663 = vlog2.f32 %v15002_v0  ;;  %v5447_v4 = vadd.f32 2.0, %v4956_v39  ;;  %v10217_v47 = vpop.f32.mrb[234].mxu0 }
 0x4a3   : > { %18978 = vst [vmem:[#allocation145_spill] sm:$0xff] %v15126_v56  ;;  %v4966_v32 = vadd.f32 %v14661_v55, %v4965_v23  ;;  %v10646_v16 = vpop.eup %10645  ;;  %v5949_v13 = vadd.f32 1.0, %v10644_v60  ;;  %10665 = vpow2.f32 %v15078_v2  ;;  %v15132_v50 = vmul.f32 -1.442695, %v5448_v8  ;;  %v4975_v2 = vpop.f32.mrb[235].mxu0 }
 0x4a4   : > { %v5450_v33 = vadd.f32 2.0, %v4971_v59  ;;  %v10648_v63 = vpop.eup %10647  ;;  %v7077_v24 = vsel %vm14954_vm4, %v6824_v22, 0.0  ;;  %v6828_v9 = vmul.f32 0.6931472, %v10646_v16  ;;  %10667 = vlog2.f32 %v15019_v21 }
 0x4a5   : > { %v15137_v17 = vmul.f32 -1.442695, %v5447_v4  ;;  %v10650_v39 = vpop.eup %10649  ;;  %v7209_v23 = vsel %vm311_vm0, %v7077_v24, 0.0  ;;  %10669 = vrcp.f32 %v5949_v13  ;;  %v5952_v60 = vadd.f32 1.0, %v10648_v63 }
 0x4a6   : > { %v15140_v42 = vmul.f32 -1.442695, %v5450_v33  ;;  %v10652_v8 = vpop.eup %10651  ;;  %7210 = vadd.xlane.f32.xlu1 %v7209_v23  ;;  %v7079_v59 = vsel %vm14954_vm4, %v6828_v9, 0.0  ;;  %v6830_v22 = vmul.f32 0.6931472, %v10650_v39  ;;  %10671 = vpow2.f32 %v15093_v36  ;;  %v10220_v36 = vpop.f32.mrb[236].mxu0 }
 0x4a7   : > { %v5449_v16 = vadd.f32 2.0, %v4966_v32  ;;  %v10654_v4 = vpop.eup %10653  ;;  %v15145_v15 = vadd.f32 0.001, %v10652_v8  ;;  %v7215_v35 = vsel %vm311_vm0, %v7079_v59, 0.0  ;;  %10673 = vrcp.f32 %v5952_v60  ;;  %v4985_v8 = vpop.f32.mrb[237].mxu0 }
 0x4a8   : > { %v4981_v13 = vadd.f32 %v10217_v47, %v14661_v55  ;;  %v10656_v33 = vpop.eup %10655  ;;  %7216 = vadd.xlane.f32.xlu0 %v7215_v35  ;;  %v7080_v63 = vsel %vm14954_vm4, %v6830_v22, 0.0  ;;  %v5951_v24 = vadd.f32 1.0, %v10654_v4  ;;  %10675 = vlog2.f32 %v15013_v41 }
 0x4a9   : > { %18979 = vst [vmem:[#allocation146_spill] sm:$0xff] %v15145_v15  ;;  %v15152_v9 = vmul.f32 -1.442695, %v5449_v16  ;;  %v10658_v32 = vpop.eup %10657  ;;  %v7218_v39 = vsel %vm311_vm0, %v7080_v63, 0.0  ;;  %v6832_v23 = vmul.f32 0.6931472, %v10656_v33  ;;  %10677 = vpow2.f32 %v15095_v29 }
 0x4aa   : > { %v5452_v60 = vadd.f32 2.0, %v4981_v13  ;;  %v10660_v47 = vpop.eup %10659  ;;  %7219 = vadd.xlane.f32.xlu1 %v7218_v39  ;;  %10679 = vrcp.f32 %v5951_v24  ;;  %v5954_v35 = vadd.f32 1.0, %v10658_v32  ;;  %v4976_v59 = vadd.f32 %v14661_v55, %v4975_v2  ;;  %v10223_v2 = vpop.f32.mrb[238].mxu0  ;;  %v15172_v39 = vld [vmem:[%s17855_s2 + $0x3] ss:$0 sm:$0xff] }
 0x4ab   : > { %v4991_v22 = vadd.f32 %v10220_v36, %v14661_v55  ;;  %v10662_v4 = vpop.eup %10661  ;;  %v15158_v16 = vadd.f32 0.001, %v10660_v47  ;;  %v7081_v20 = vsel %vm14954_vm4, %v6832_v23, 0.0  ;;  %10681 = vlog2.f32 %v15029_v31 }
 0x4ac   : > { %v15163_v33 = vmul.f32 -1.442695, %v5452_v60  ;;  %v10664_v29 = vpop.eup %10663  ;;  %v15165_v13 = vadd.f32 0.001, %v10662_v4  ;;  %v7221_v63 = vsel %vm311_vm0, %v7081_v20, 0.0  ;;  %10683 = vrcp.f32 %v5954_v35  ;;  %v4995_v60 = vpop.f32.mrb[239].mxu0 }
 0x4ad   : > { %18980 = vst [vmem:[#allocation147_spill] sm:$0xff] %v15158_v16  ;;  %v5451_v24 = vadd.f32 2.0, %v4976_v59  ;;  %v10666_v32 = vpop.eup %10665  ;;  %7222 = vadd.xlane.f32.xlu0 %v7221_v63  ;;  %v6834_v55 = vmul.f32 0.6931472, %v10664_v29  ;;  %10685 = vpow2.f32 %v15115_v57  ;;  %v5454_v36 = vadd.f32 2.0, %v4991_v22 }
 0x4ae   : > { %18981 = vst [vmem:[#allocation148_spill] sm:$0xff] %v15165_v13  ;;  %v4986_v23 = vadd.f32 %v15172_v39, %v4985_v8  ;;  %v10668_v47 = vpop.eup %10667  ;;  %v5953_v4 = vadd.f32 1.0, %v10666_v32  ;;  %10687 = vlog2.f32 %v15022_v11  ;;  %v5001_v35 = vadd.f32 %v15172_v39, %v10223_v2 }
 0x4af   : > { %v15176_v20 = vmul.f32 -1.442695, %v5451_v24  ;;  %v10670_v59 = vpop.eup %10669  ;;  %v7082_v57 = vsel %vm14954_vm4, %v6834_v55, 0.0  ;;  %v6836_v22 = vmul.f32 0.6931472, %v10668_v47  ;;  %10689 = vpow2.f32 %v15117_v54  ;;  %v10226_v24 = vpop.f32.mrb[240].mxu0 }
 0x4b0   : > { %v15182_v29 = vmul.f32 -1.442695, %v5454_v36  ;;  %v10672_v63 = vpop.eup %10671  ;;  %v15184_v8 = vadd.f32 0.001, %v10670_v59  ;;  %v7224_v32 = vsel %vm311_vm0, %v7082_v57, 0.0  ;;  %10691 = vrcp.f32 %v5953_v4  ;;  %v5005_v54 = vpop.f32.mrb[241].mxu0 }
 0x4b1   : > { %v5453_v43 = vadd.f32 2.0, %v4986_v23  ;;  %v10674_v27 = vpop.eup %10673  ;;  %7225 = vadd.xlane.f32.xlu1 %v7224_v32  ;;  %v7083_v2 = vsel %vm14954_vm4, %v6836_v22, 0.0  ;;  %v5956_v61 = vadd.f32 1.0, %v10672_v63  ;;  %10693 = vlog2.f32 %v15041_v6  ;;  %v10229_v30 = vpop.f32.mrb[242].mxu0 }
 0x4b2   : > { %18982 = vst [vmem:[#allocation149_spill] sm:$0xff] %v15184_v8  ;;  %v5456_v55 = vadd.f32 2.0, %v5001_v35  ;;  %v10676_v36 = vpop.eup %10675  ;;  %v15190_v47 = vadd.f32 0.001, %v10674_v27  ;;  %v7227_v59 = vsel %vm311_vm0, %v7083_v2, 0.0  ;;  %10695 = vpow2.f32 %v15132_v50 }
 0x4b3   : > { %v15194_v4 = vmul.f32 -1.442695, %v5453_v43  ;;  %v10678_v23 = vpop.eup %10677  ;;  %7228 = vadd.xlane.f32.xlu0 %v7227_v59  ;;  %10697 = vrcp.f32 %v5956_v61  ;;  %v6838_v57 = vmul.f32 0.6931472, %v10676_v36  ;;  %v4996_v22 = vadd.f32 %v15172_v39, %v4995_v60  ;;  %v5015_v36 = vpop.f32.mrb[243].mxu0 }
 0x4b4   : > { %18983 = vst [vmem:[#allocation150_spill] sm:$0xff] %v15190_v47  ;;  %v15196_v32 = vmul.f32 -1.442695, %v5456_v55  ;;  %v10680_v63 = vpop.eup %10679  ;;  %v5955_v35 = vadd.f32 1.0, %v10678_v23  ;;  %10699 = vlog2.f32 %v15032_v48  ;;  %v5011_v27 = vadd.f32 %v15172_v39, %v10226_v24 }
 0x4b5   : > { %v5006_v2 = vadd.f32 %v15172_v39, %v5005_v54  ;;  %v10682_v50 = vpop.eup %10681  ;;  %v15202_v43 = vadd.f32 0.001, %v10680_v63  ;;  %v7084_v61 = vsel %vm14954_vm4, %v6838_v57, 0.0  ;;  %10701 = vpow2.f32 %v15137_v17 }
 0x4b6   : > { %v5455_v55 = vadd.f32 2.0, %v4996_v22  ;;  %v10684_v60 = vpop.eup %10683  ;;  %v7230_v59 = vsel %vm311_vm0, %v7084_v61, 0.0  ;;  %10703 = vrcp.f32 %v5955_v35  ;;  %v6840_v23 = vmul.f32 0.6931472, %v10682_v50  ;;  %v10232_v35 = vpop.f32.mrb[244].mxu0 }
 0x4b7   : > { %18984 = vst [vmem:[#allocation151_spill] sm:$0xff] %v15202_v43  ;;  %v5458_v12 = vadd.f32 2.0, %v5011_v27  ;;  %v10686_v24 = vpop.eup %10685  ;;  %v15208_v18 = vadd.f32 0.001, %v10684_v60  ;;  %7231 = vadd.xlane.f32.xlu1 %v7230_v59  ;;  %10705 = vlog2.f32 %v15054_v19  ;;  %v5457_v63 = vadd.f32 2.0, %v5006_v2 }
 0x4b8   : > { %v15211_v54 = vmul.f32 -1.442695, %v5455_v55  ;;  %v10688_v57 = vpop.eup %10687  ;;  %v7085_v17 = vsel %vm14954_vm4, %v6840_v23, 0.0  ;;  %v5958_v22 = vadd.f32 1.0, %v10686_v24  ;;  %10707 = vpow2.f32 %v15140_v42  ;;  %v5025_v55 = vpop.f32.mrb[245].mxu0 }
 0x4b9   : > { %18985 = vst [vmem:[#allocation152_spill] sm:$0xff] %v15208_v18  ;;  %v15216_v61 = vmul.f32 -1.442695, %v5458_v12  ;;  %v10690_v27 = vpop.eup %10689  ;;  %v7233_v50 = vsel %vm311_vm0, %v7085_v17, 0.0  ;;  %v6842_v60 = vmul.f32 0.6931472, %v10688_v57  ;;  %10709 = vlog2.f32 %v15051_v5 }
 0x4ba   : > { %v15220_v59 = vmul.f32 -1.442695, %v5457_v63  ;;  %v10692_v2 = vpop.eup %10691  ;;  %7234 = vadd.xlane.f32.xlu0 %v7233_v50  ;;  %10711 = vrcp.f32 %v5958_v22  ;;  %v5957_v51 = vadd.f32 1.0, %v10690_v27  ;;  %v5021_v23 = vadd.f32 %v15172_v39, %v10229_v30  ;;  %v10235_v50 = vpop.f32.mrb[246].mxu0 }
 0x4bb   : > { %v5016_v42 = vadd.f32 %v15172_v39, %v5015_v36  ;;  %v10694_v12 = vpop.eup %10693  ;;  %v15224_v24 = vadd.f32 0.001, %v10692_v2  ;;  %v7086_v17 = vsel %vm14954_vm4, %v6842_v60, 0.0  ;;  %10713 = vpow2.f32 %v15152_v9  ;;  %v5035_v48 = vpop.f32.mrb[247].mxu0 }
 0x4bc   : > { %v5031_v63 = vadd.f32 %v15172_v39, %v10232_v35  ;;  %v10696_v57 = vpop.eup %10695  ;;  %v7236_v5 = vsel %vm311_vm0, %v7086_v17, 0.0  ;;  %10715 = vrcp.f32 %v5957_v51  ;;  %v6844_v22 = vmul.f32 0.6931472, %v10694_v12 }
 0x4bd   : > { %18986 = vst [vmem:[#allocation153_spill] sm:$0xff] %v15224_v24  ;;  %v5460_v27 = vadd.f32 2.0, %v5021_v23  ;;  %v10698_v30 = vpop.eup %10697  ;;  %7237 = vadd.xlane.f32.xlu1 %v7236_v5  ;;  %v5960_v36 = vadd.f32 1.0, %v10696_v57  ;;  %10717 = vlog2.f32 %v15065_v49  ;;  %v5459_v2 = vadd.f32 2.0, %v5016_v42 }
 0x4be   : > { %v5462_v19 = vadd.f32 2.0, %v5031_v63  ;;  %v10700_v60 = vpop.eup %10699  ;;  %v15232_v46 = vadd.f32 0.001, %v10698_v30  ;;  %v7087_v9 = vsel %vm14954_vm4, %v6844_v22, 0.0  ;;  %10719 = vpow2.f32 %v15163_v33  ;;  %v10238_v22 = vpop.f32.mrb[248].mxu0 }
 0x4bf   : > { %v15237_v51 = vmul.f32 -1.442695, %v5460_v27  ;;  %v10702_v35 = vpop.eup %10701  ;;  %v7239_v23 = vsel %vm311_vm0, %v7087_v9, 0.0  ;;  %10721 = vrcp.f32 %v5960_v36  ;;  %v6846_v5 = vmul.f32 0.6931472, %v10700_v60 }
 0x4c0   : > { %18987 = vst [vmem:[#allocation154_spill] sm:$0xff] %v15232_v46  ;;  %v15240_v12 = vmul.f32 -1.442695, %v5459_v2  ;;  %v10704_v42 = vpop.eup %10703  ;;  %7240 = vadd.xlane.f32.xlu0 %v7239_v23  ;;  %v5959_v17 = vadd.f32 1.0, %v10702_v35  ;;  %10723 = vlog2.f32 %v15062_v53  ;;  %v15243_v63 = vmul.f32 -1.442695, %v5462_v19 }
 0x4c1   : > { %v5026_v57 = vadd.f32 %v15172_v39, %v5025_v55  ;;  %v10706_v33 = vpop.eup %10705  ;;  %v15246_v27 = vadd.f32 0.001, %v10704_v42  ;;  %v7088_v30 = vsel %vm14954_vm4, %v6846_v5, 0.0  ;;  %10725 = vpow2.f32 %v15176_v20  ;;  %v5045_v2 = vpop.f32.mrb[249].mxu0 }
 0x4c2   : > { %v5041_v36 = vadd.f32 %v15172_v39, %v10235_v50  ;;  %v10708_v60 = vpop.eup %10707  ;;  %v7242_v9 = vsel %vm311_vm0, %v7088_v30, 0.0  ;;  %10727 = vrcp.f32 %v5959_v17  ;;  %v6848_v19 = vmul.f32 0.6931472, %v10706_v33  ;;  %v10241_v17 = vpop.f32.mrb[250].mxu0 }
 0x4c3   : > { %18988 = vst [vmem:[#allocation155_spill] sm:$0xff] %v15246_v27  ;;  %v5461_v35 = vadd.f32 2.0, %v5026_v57  ;;  %v10710_v23 = vpop.eup %10709  ;;  %7243 = vadd.xlane.f32.xlu1 %v7242_v9  ;;  %v5962_v55 = vadd.f32 1.0, %v10708_v60  ;;  %10729 = vlog2.f32 %v15081_v3  ;;  %v5036_v53 = vadd.f32 %v15172_v39, %v5035_v48 }
 0x4c4   : > { %v5464_v42 = vadd.f32 2.0, %v5041_v36  ;;  %v10712_v5 = vpop.eup %10711  ;;  %v7089_v20 = vsel %vm14954_vm4, %v6848_v19, 0.0  ;;  %v6850_v50 = vmul.f32 0.6931472, %v10710_v23  ;;  %10731 = vpow2.f32 %v15182_v29  ;;  %v5055_v36 = vpop.f32.mrb[251].mxu0 }
 0x4c5   : > { %v15258_v49 = vmul.f32 -1.442695, %v5461_v35  ;;  %v10714_v33 = vpop.eup %10713  ;;  %v15260_v57 = vadd.f32 0.001, %v10712_v5  ;;  %v7245_v30 = vsel %vm311_vm0, %v7089_v20, 0.0  ;;  %10733 = vrcp.f32 %v5962_v55 }
 0x4c6   : > { %v15263_v60 = vmul.f32 -1.442695, %v5464_v42  ;;  %v10716_v48 = vpop.eup %10715  ;;  %7246 = vadd.xlane.f32.xlu0 %v7245_v30  ;;  %v7090_v9 = vsel %vm14954_vm4, %v6850_v50, 0.0  ;;  %v5961_v19 = vadd.f32 1.0, %v10714_v33  ;;  %10735 = vlog2.f32 %v15075_v26  ;;  %v10244_v33 = vpop.f32.mrb[252].mxu0 }
 0x4c7   : > { %18989 = vst [vmem:[#allocation156_spill] sm:$0xff] %v15260_v57  ;;  %v5463_v29 = vadd.f32 2.0, %v5036_v53  ;;  %v10718_v35 = vpop.eup %10717  ;;  %v15268_v23 = vadd.f32 0.001, %v10716_v48  ;;  %v7248_v5 = vsel %vm311_vm0, %v7090_v9, 0.0  ;;  %10737 = vpow2.f32 %v15194_v4  ;;  %v5065_v3 = vpop.f32.mrb[253].mxu0 }
 0x4c8   : > { %v5051_v55 = vadd.f32 %v15172_v39, %v10238_v22  ;;  %v10720_v42 = vpop.eup %10719  ;;  %7249 = vadd.xlane.f32.xlu1 %v7248_v5  ;;  %10739 = vrcp.f32 %v5961_v19  ;;  %v6852_v20 = vmul.f32 0.6931472, %v10718_v35  ;;  %v5046_v50 = vadd.f32 %v15172_v39, %v5045_v2 }
 0x4c9   : > { %18990 = vst [vmem:[#allocation157_spill] sm:$0xff] %v15268_v23  ;;  %v15273_v30 = vmul.f32 -1.442695, %v5463_v29  ;;  %v10722_v26 = vpop.eup %10721  ;;  %v5964_v53 = vadd.f32 1.0, %v10720_v42  ;;  %10741 = vlog2.f32 %v15089_v62  ;;  %v5061_v9 = vadd.f32 %v15172_v39, %v10241_v17  ;;  %v10247_v62 = vpop.f32.mrb[254].mxu0 }
 0x4ca   : > { %v5466_v48 = vadd.f32 2.0, %v5051_v55  ;;  %v10724_v4 = vpop.eup %10723  ;;  %v15278_v6 = vadd.f32 0.001, %v10722_v26  ;;  %v7091_v22 = vsel %vm14954_vm4, %v6852_v20, 0.0  ;;  %10743 = vpow2.f32 %v15196_v32 }
 0x4cb   : > { %v5465_v19 = vadd.f32 2.0, %v5046_v50  ;;  %v10726_v29 = vpop.eup %10725  ;;  %v7251_v2 = vsel %vm311_vm0, %v7091_v22, 0.0  ;;  %10745 = vrcp.f32 %v5964_v53  ;;  %v6854_v35 = vmul.f32 0.6931472, %v10724_v4  ;;  %v5075_v53 = vpop.f32.mrb[255].mxu0 }
 0x4cc   : > { %18991 = vst [vmem:[#allocation158_spill] sm:$0xff] %v15278_v6  ;;  %v15284_v5 = vmul.f32 -1.442695, %v5466_v48  ;;  %v10728_v55 = vpop.eup %10727  ;;  %7252 = vadd.xlane.f32.xlu0 %v7251_v2  ;;  %v5963_v17 = vadd.f32 1.0, %v10726_v29  ;;  %10747 = vlog2.f32 %v15085_v45  ;;  %v5468_v42 = vadd.f32 2.0, %v5061_v9 }
 0x4cd   : > { %v15287_v26 = vmul.f32 -1.442695, %v5465_v19  ;;  %v10730_v20 = vpop.eup %10729  ;;  %v15289_v11 = vadd.f32 0.001, %v10728_v55  ;;  %v7092_v32 = vsel %vm14954_vm4, %v6854_v35, 0.0  ;;  %10749 = vpow2.f32 %v15211_v54 }
 0x4ce   : > { %v5056_v50 = vadd.f32 %v15172_v39, %v5055_v36  ;;  %v10732_v48 = vpop.eup %10731  ;;  %v7254_v4 = vsel %vm311_vm0, %v7092_v32, 0.0  ;;  %10751 = vrcp.f32 %v5963_v17  ;;  %v6856_v22 = vmul.f32 0.6931472, %v10730_v20 }
 0x4cf   : > { %18992 = vst [vmem:[#allocation159_spill] sm:$0xff] %v15289_v11  ;;  %v15296_v19 = vmul.f32 -1.442695, %v5468_v42  ;;  %v10734_v9 = vpop.eup %10733  ;;  %7255 = vadd.xlane.f32.xlu1 %v7254_v4  ;;  %v5966_v29 = vadd.f32 1.0, %v10732_v48  ;;  %10753 = vlog2.f32 %v15109_v28  ;;  %v5071_v35 = vadd.f32 %v15172_v39, %v10244_v33  ;;  %v10250_v42 = vpop.f32.mrb[0].mxu0 }
 0x4d0   : > { %v5467_v2 = vadd.f32 2.0, %v5056_v50  ;;  %v10736_v55 = vpop.eup %10735  ;;  %v15300_v54 = vadd.f32 0.001, %v10734_v9  ;;  %v7093_v36 = vsel %vm14954_vm4, %v6856_v22, 0.0  ;;  %10755 = vpow2.f32 %v15216_v61  ;;  %v5085_v50 = vpop.f32.mrb[1].mxu0 }
 0x4d1   : > { %v5066_v17 = vadd.f32 %v15172_v39, %v5065_v3  ;;  %v10738_v20 = vpop.eup %10737  ;;  %v7257_v32 = vsel %vm311_vm0, %v7093_v36, 0.0  ;;  %10757 = vrcp.f32 %v5966_v29  ;;  %v6858_v48 = vmul.f32 0.6931472, %v10736_v55 }
 0x4d2   : > { %18993 = vst [vmem:[#allocation160_spill] sm:$0xff] %v15300_v54  ;;  %v15307_v4 = vmul.f32 -1.442695, %v5467_v2  ;;  %v10740_v33 = vpop.eup %10739  ;;  %7258 = vadd.xlane.f32.xlu0 %v7257_v32  ;;  %v5965_v9 = vadd.f32 1.0, %v10738_v20  ;;  %10759 = vlog2.f32 %v15103_v40  ;;  %v5470_v28 = vadd.f32 2.0, %v5071_v35  ;;  %v10253_v32 = vpop.f32.mrb[2].mxu0 }
 0x4d3   : > { %v5469_v22 = vadd.f32 2.0, %v5066_v17  ;;  %v10742_v45 = vpop.eup %10741  ;;  %v15310_v61 = vadd.f32 0.001, %v10740_v33  ;;  %v7094_v3 = vsel %vm14954_vm4, %v6858_v48, 0.0  ;;  %10761 = vpow2.f32 %v15220_v59  ;;  %v5095_v40 = vpop.f32.mrb[3].mxu0 }
 0x4d4   : > { %v5081_v29 = vadd.f32 %v15172_v39, %v10247_v62  ;;  %v10744_v2 = vpop.eup %10743  ;;  %v7260_v55 = vsel %vm311_vm0, %v7094_v3, 0.0  ;;  %10763 = vrcp.f32 %v5965_v9  ;;  %v6860_v36 = vmul.f32 0.6931472, %v10742_v45 }
 0x4d5   : > { %18994 = vst [vmem:[#allocation161_spill] sm:$0xff] %v15310_v61  ;;  %v15317_v20 = vmul.f32 -1.442695, %v5470_v28  ;;  %v10746_v35 = vpop.eup %10745  ;;  %7261 = vadd.xlane.f32.xlu1 %v7260_v55  ;;  %v5968_v17 = vadd.f32 1.0, %v10744_v2  ;;  %10765 = vlog2.f32 %v15126_v56  ;;  %v15320_v33 = vmul.f32 -1.442695, %v5469_v22 }
 0x4d6   : > { %v5472_v48 = vadd.f32 2.0, %v5081_v29  ;;  %v10748_v59 = vpop.eup %10747  ;;  %v15322_v31 = vadd.f32 0.001, %v10746_v35  ;;  %v7095_v62 = vsel %vm14954_vm4, %v6860_v36, 0.0  ;;  %10767 = vpow2.f32 %v15237_v51  ;;  %v10256_v36 = vpop.f32.mrb[4].mxu0 }
 0x4d7   : > { %v5076_v45 = vadd.f32 %v15172_v39, %v5075_v53  ;;  %v10750_v28 = vpop.eup %10749  ;;  %v7263_v9 = vsel %vm311_vm0, %v7095_v62, 0.0  ;;  %10769 = vrcp.f32 %v5968_v17  ;;  %v6862_v3 = vmul.f32 0.6931472, %v10748_v59 }
 0x4d8   : > { %18995 = vst [vmem:[#allocation162_spill] sm:$0xff] %v15322_v31  ;;  %v15329_v2 = vmul.f32 -1.442695, %v5472_v48  ;;  %v10752_v22 = vpop.eup %10751  ;;  %7264 = vadd.xlane.f32.xlu0 %v7263_v9  ;;  %v5967_v29 = vadd.f32 1.0, %v10750_v28  ;;  %10771 = vlog2.f32 %v15120_v7  ;;  %v5091_v35 = vadd.f32 %v15172_v39, %v10250_v42  ;;  %v5105_v48 = vpop.f32.mrb[5].mxu0 }
 0x4d9   : > { %v5471_v55 = vadd.f32 2.0, %v5076_v45  ;;  %v10754_v56 = vpop.eup %10753  ;;  %v15333_v51 = vadd.f32 0.001, %v10752_v22  ;;  %v7096_v53 = vsel %vm14954_vm4, %v6862_v3, 0.0  ;;  %10773 = vpow2.f32 %v15240_v12 }
 0x4da   : > { %v5086_v17 = vadd.f32 %v15172_v39, %v5085_v50  ;;  %v10756_v59 = vpop.eup %10755  ;;  %v7266_v62 = vsel %vm311_vm0, %v7096_v53, 0.0  ;;  %10775 = vrcp.f32 %v5967_v29  ;;  %v6864_v28 = vmul.f32 0.6931472, %v10754_v56  ;;  %v10259_v56 = vpop.f32.mrb[6].mxu0 }
 0x4db   : > { %18996 = vst [vmem:[#allocation163_spill] sm:$0xff] %v15333_v51  ;;  %v15340_v45 = vmul.f32 -1.442695, %v5471_v55  ;;  %v10758_v42 = vpop.eup %10757  ;;  %7267 = vadd.xlane.f32.xlu1 %v7266_v62  ;;  %v5970_v9 = vadd.f32 1.0, %v10756_v59  ;;  %10777 = vlog2.f32 %v15158_v16  ;;  %v5474_v22 = vadd.f32 2.0, %v5091_v35  ;;  %v15352_v35 = vpop.f32.mrb[7].mxu0 }
 0x4dc   : > { %v5473_v7 = vadd.f32 2.0, %v5086_v17  ;;  %v10760_v3 = vpop.eup %10759  ;;  %v15343_v41 = vadd.f32 0.001, %v10758_v42  ;;  %v7097_v12 = vsel %vm14954_vm4, %v6864_v28, 0.0  ;;  %10779 = vpow2.f32 %v15243_v63 }
 0x4dd   : > { %v5101_v50 = vadd.f32 %v15172_v39, %v10253_v32  ;;  %v10762_v29 = vpop.eup %10761  ;;  %v7269_v55 = vsel %vm311_vm0, %v7097_v12, 0.0  ;;  %10781 = vrcp.f32 %v5970_v9  ;;  %v6866_v53 = vmul.f32 0.6931472, %v10760_v3 }
 0x4de   : > { %18997 = vst [vmem:[#allocation164_spill] sm:$0xff] %v15343_v41  ;;  %v15350_v59 = vmul.f32 -1.442695, %v5474_v22  ;;  %v10764_v17 = vpop.eup %10763  ;;  %7270 = vadd.xlane.f32.xlu0 %v7269_v55  ;;  %v5969_v62 = vadd.f32 1.0, %v10762_v29  ;;  %10783 = vlog2.f32 %v15145_v15  ;;  %v15355_v28 = vmul.f32 -1.442695, %v5473_v7 }
 0x4df   : > { %v5476_v63 = vadd.f32 2.0, %v5101_v50  ;;  %v10766_v42 = vpop.eup %10765  ;;  %v15357_v32 = vadd.f32 0.001, %v10764_v17  ;;  %v7098_v12 = vsel %vm14954_vm4, %v6866_v53, 0.0  ;;  %10785 = vpow2.f32 %v15258_v49  ;;  %v10262_v7 = vpop.f32.mrb[8].mxu0 }
 0x4e0   : > { %v5096_v9 = vadd.f32 %v15172_v39, %v5095_v40  ;;  %v10768_v22 = vpop.eup %10767  ;;  %v7272_v3 = vsel %vm311_vm0, %v7098_v12, 0.0  ;;  %10787 = vrcp.f32 %v5969_v62  ;;  %v6868_v29 = vmul.f32 0.6931472, %v10766_v42  ;;  %v5125_v16 = vpop.f32.mrb[9].mxu0 }
 0x4e1   : > { %18998 = vst [vmem:[#allocation165_spill] sm:$0xff] %v15357_v32  ;;  %v15364_v55 = vmul.f32 -1.442695, %v5476_v63  ;;  %v10770_v15 = vpop.eup %10769  ;;  %7273 = vadd.xlane.f32.xlu1 %v7272_v3  ;;  %v5972_v50 = vadd.f32 1.0, %v10768_v22  ;;  %10789 = vlog2.f32 %v15184_v8  ;;  %v5111_v53 = vadd.f32 %v15172_v39, %v10256_v36  ;;  %v10265_v8 = vpop.f32.mrb[10].mxu0 }
 0x4e2   : > { %v5475_v17 = vadd.f32 2.0, %v5096_v9  ;;  %v10772_v49 = vpop.eup %10771  ;;  %v15368_v21 = vadd.f32 0.001, %v10770_v15  ;;  %v7099_v40 = vsel %vm14954_vm4, %v6868_v29, 0.0  ;;  %10791 = vpow2.f32 %v15263_v60 }
 0x4e3   : > { %v5106_v62 = vadd.f32 %v15172_v39, %v5105_v48  ;;  %v10774_v63 = vpop.eup %10773  ;;  %v7275_v42 = vsel %vm311_vm0, %v7099_v40, 0.0  ;;  %10793 = vrcp.f32 %v5972_v50  ;;  %v6870_v12 = vmul.f32 0.6931472, %v10772_v49  ;;  %v15384_v50 = vpop.f32.mrb[11].mxu0 }
 0x4e4   : > { %18999 = vst [vmem:[#allocation166_spill] sm:$0xff] %v15368_v21  ;;  %v15375_v22 = vmul.f32 -1.442695, %v5475_v17  ;;  %v10776_v9 = vpop.eup %10775  ;;  %7276 = vadd.xlane.f32.xlu0 %v7275_v42  ;;  %v5971_v36 = vadd.f32 1.0, %v10774_v63  ;;  %10795 = vlog2.f32 %v15165_v13  ;;  %v5478_v15 = vadd.f32 2.0, %v5111_v53 }
 0x4e5   : > { %v5477_v3 = vadd.f32 2.0, %v5106_v62  ;;  %v10778_v29 = vpop.eup %10777  ;;  %v15378_v0 = vadd.f32 0.001, %v10776_v9  ;;  %v7100_v60 = vsel %vm14954_vm4, %v6870_v12, 0.0  ;;  %10797 = vpow2.f32 %v15273_v30 }
 0x4e6   : > { %v5121_v48 = vadd.f32 %v15172_v39, %v10259_v56  ;;  %v10780_v17 = vpop.eup %10779  ;;  %v7278_v49 = vsel %vm311_vm0, %v7100_v60, 0.0  ;;  %10799 = vrcp.f32 %v5971_v36  ;;  %v6872_v40 = vmul.f32 0.6931472, %v10778_v29 }
 0x4e7   : > { %19000 = vst [vmem:[#allocation167_spill] sm:$0xff] %v15378_v0  ;;  %v15387_v53 = vmul.f32 -1.442695, %v5478_v15  ;;  %v10782_v62 = vpop.eup %10781  ;;  %7279 = vadd.xlane.f32.xlu1 %v7278_v49  ;;  %v5974_v63 = vadd.f32 1.0, %v10780_v17  ;;  %10801 = vlog2.f32 %v15202_v43  ;;  %v15390_v42 = vmul.f32 -1.442695, %v5477_v3 }
 0x4e8   : > { %v5480_v12 = vadd.f32 2.0, %v5121_v48  ;;  %v10784_v30 = vpop.eup %10783  ;;  %v15392_v9 = vadd.f32 0.001, %v10782_v62  ;;  %v7101_v56 = vsel %vm14954_vm4, %v6872_v40, 0.0  ;;  %10803 = vpow2.f32 %v15284_v5  ;;  %v15399_v15 = vpop.f32.mrb[12].mxu0 }
 0x4e9   : > { %v5116_v36 = vadd.f32 %v15172_v39, %v15352_v35  ;;  %v10786_v29 = vpop.eup %10785  ;;  %v7281_v60 = vsel %vm311_vm0, %v7101_v56, 0.0  ;;  %10805 = vrcp.f32 %v5974_v63  ;;  %v6874_v3 = vmul.f32 0.6931472, %v10784_v30  ;;  %v15404_v48 = vpop.f32.mrb[13].mxu0 }
 0x4ea   : > { %19001 = vst [vmem:[#allocation168_spill] sm:$0xff] %v15392_v9  ;;  %v15402_v17 = vmul.f32 -1.442695, %v5480_v12  ;;  %v10788_v49 = vpop.eup %10787  ;;  %7282 = vadd.xlane.f32.xlu0 %v7281_v60  ;;  %v5973_v62 = vadd.f32 1.0, %v10786_v29  ;;  %10807 = vlog2.f32 %v15190_v47  ;;  %v5131_v40 = vadd.f32 %v15172_v39, %v10262_v7 }
 0x4eb   : > { %v5479_v5 = vadd.f32 2.0, %v5116_v36  ;;  %v10790_v35 = vpop.eup %10789  ;;  %v15408_v43 = vadd.f32 0.001, %v10788_v49  ;;  %v7102_v56 = vsel %vm14954_vm4, %v6874_v3, 0.0  ;;  %10809 = vpow2.f32 %v15287_v26  ;;  %v15417_v36 = vpop.f32.mrb[14].mxu0 }
 0x4ec   : > { %v5126_v63 = vadd.f32 %v15172_v39, %v5125_v16  ;;  %v10792_v12 = vpop.eup %10791  ;;  %v7284_v30 = vsel %vm311_vm0, %v7102_v56, 0.0  ;;  %10811 = vrcp.f32 %v5973_v62  ;;  %v6876_v29 = vmul.f32 0.6931472, %v10790_v35  ;;  %v15420_v13 = vpop.f32.mrb[15].mxu0 }
 0x4ed   : > { %19002 = vst [vmem:[#allocation169_spill] sm:$0xff] %v15408_v43  ;;  %v15415_v60 = vmul.f32 -1.442695, %v5479_v5  ;;  %v10794_v7 = vpop.eup %10793  ;;  %7285 = vadd.xlane.f32.xlu1 %v7284_v30  ;;  %v5976_v49 = vadd.f32 1.0, %v10792_v12  ;;  %10813 = vlog2.f32 %v15224_v24  ;;  %v5482_v47 = vadd.f32 2.0, %v5131_v40 }
 0x4ee   : > { %v5481_v3 = vadd.f32 2.0, %v5126_v63  ;;  %v10796_v26 = vpop.eup %10795  ;;  %v15422_v16 = vadd.f32 0.001, %v10794_v7  ;;  %v7103_v62 = vsel %vm14954_vm4, %v6876_v29, 0.0  ;;  %10815 = vpow2.f32 %v15296_v19  ;;  %v15434_v29 = vpop.f32.mrb[16].mxu0 }
 0x4ef   : > { %v5141_v5 = vadd.f32 %v15172_v39, %v10265_v8  ;;  %v10798_v35 = vpop.eup %10797  ;;  %v7287_v56 = vsel %vm311_vm0, %v7103_v62, 0.0  ;;  %10817 = vrcp.f32 %v5976_v49  ;;  %v6878_v12 = vmul.f32 0.6931472, %v10796_v26  ;;  %v15443_v49 = vpop.f32.mrb[17].mxu0 }
 0x4f0   : > { %19003 = vst [vmem:[#allocation170_spill] sm:$0xff] %v15422_v16  ;;  %v15429_v30 = vmul.f32 -1.442695, %v5482_v47  ;;  %v10800_v40 = vpop.eup %10799  ;;  %7288 = vadd.xlane.f32.xlu0 %v7287_v56  ;;  %v5975_v63 = vadd.f32 1.0, %v10798_v35  ;;  %10819 = vlog2.f32 %v15208_v18  ;;  %v15432_v7 = vmul.f32 -1.442695, %v5481_v3 }
 0x4f1   : > { %v5484_v24 = vadd.f32 2.0, %v5141_v5  ;;  %v10802_v19 = vpop.eup %10801  ;;  %v15436_v14 = vadd.f32 0.001, %v10800_v40  ;;  %v7104_v8 = vsel %vm14954_vm4, %v6878_v12, 0.0  ;;  %10821 = vpow2.f32 %v15307_v4 }
 0x4f2   : > { %v5136_v47 = vadd.f32 %v15172_v39, %v15384_v50  ;;  %v10804_v26 = vpop.eup %10803  ;;  %v7290_v3 = vsel %vm311_vm0, %v7104_v8, 0.0  ;;  %10823 = vrcp.f32 %v5975_v63  ;;  %v6880_v62 = vmul.f32 0.6931472, %v10802_v19  ;;  %v15458_v63 = vpop.f32.mrb[18].mxu0 }
 0x4f3   : > { %19004 = vst [vmem:[#allocation171_spill] sm:$0xff] %v15436_v14  ;;  %v15446_v5 = vmul.f32 -1.442695, %v5484_v24  ;;  %v10806_v35 = vpop.eup %10805  ;;  %7291 = vadd.xlane.f32.xlu1 %v7290_v3  ;;  %v5978_v56 = vadd.f32 1.0, %v10804_v26  ;;  %10825 = vlog2.f32 %v15246_v27  ;;  %v5151_v4 = vadd.f32 %v15172_v39, %v15399_v15  ;;  %v15463_v15 = vpop.f32.mrb[19].mxu0 }
 0x4f4   : > { %v5483_v12 = vadd.f32 2.0, %v5136_v47  ;;  %v10808_v40 = vpop.eup %10807  ;;  %v15451_v50 = vadd.f32 0.001, %v10806_v35  ;;  %v7105_v18 = vsel %vm14954_vm4, %v6880_v62, 0.0  ;;  %10827 = vpow2.f32 %v15317_v20 }
 0x4f5   : > { %v5146_v24 = vadd.f32 %v15172_v39, %v15404_v48  ;;  %v10810_v19 = vpop.eup %10809  ;;  %v7293_v8 = vsel %vm311_vm0, %v7105_v18, 0.0  ;;  %10829 = vrcp.f32 %v5978_v56  ;;  %v6882_v47 = vmul.f32 0.6931472, %v10808_v40 }
 0x4f6   : > { %19005 = vst [vmem:[#allocation172_spill] sm:$0xff] %v15451_v50  ;;  %v15461_v26 = vmul.f32 -1.442695, %v5483_v12  ;;  %v10812_v3 = vpop.eup %10811  ;;  %7294 = vadd.xlane.f32.xlu0 %v7293_v8  ;;  %v5977_v35 = vadd.f32 1.0, %v10810_v19  ;;  %10831 = vlog2.f32 %v15232_v46  ;;  %v5486_v20 = vadd.f32 2.0, %v5151_v4  ;;  %v15476_v4 = vpop.f32.mrb[20].mxu0 }
 0x4f7   : > { %v5485_v62 = vadd.f32 2.0, %v5146_v24  ;;  %v10814_v27 = vpop.eup %10813  ;;  %v15466_v48 = vadd.f32 0.001, %v10812_v3  ;;  %v7106_v10 = vsel %vm14954_vm4, %v6882_v47, 0.0  ;;  %10833 = vpow2.f32 %v15320_v33  ;;  %v15481_v3 = vpop.f32.mrb[21].mxu0 }
 0x4f8   : > { %v5161_v18 = vadd.f32 %v15172_v39, %v15417_v36  ;;  %v10816_v56 = vpop.eup %10815  ;;  %v7296_v12 = vsel %vm311_vm0, %v7106_v10, 0.0  ;;  %10835 = vrcp.f32 %v5977_v35  ;;  %v6884_v40 = vmul.f32 0.6931472, %v10814_v27 }
 0x4f9   : > { %19006 = vst [vmem:[#allocation173_spill] sm:$0xff] %v15466_v48  ;;  %v15474_v19 = vmul.f32 -1.442695, %v5486_v20  ;;  %v10818_v24 = vpop.eup %10817  ;;  %7297 = vadd.xlane.f32.xlu1 %v7296_v12  ;;  %v5980_v8 = vadd.f32 1.0, %v10816_v56  ;;  %10837 = vlog2.f32 %v15268_v23  ;;  %v15479_v47 = vmul.f32 -1.442695, %v5485_v62 }
 0x4fa   : > { %v5488_v33 = vadd.f32 2.0, %v5161_v18  ;;  %v10820_v36 = vpop.eup %10819  ;;  %v15483_v46 = vadd.f32 0.001, %v10818_v24  ;;  %v7107_v10 = vsel %vm14954_vm4, %v6884_v40, 0.0  ;;  %10839 = vpow2.f32 %v15329_v2  ;;  %v15496_v2 = vpop.f32.mrb[22].mxu0 }
 0x4fb   : > { %v5156_v27 = vadd.f32 %v15172_v39, %v15420_v13  ;;  %v10822_v35 = vpop.eup %10821  ;;  %v7299_v20 = vsel %vm311_vm0, %v7107_v10, 0.0  ;;  %10841 = vrcp.f32 %v5980_v8  ;;  %v6886_v62 = vmul.f32 0.6931472, %v10820_v36  ;;  %v15505_v36 = vpop.f32.mrb[23].mxu0 }
 0x4fc   : > { %19007 = vst [vmem:[#allocation174_spill] sm:$0xff] %v15483_v46  ;;  %v15491_v56 = vmul.f32 -1.442695, %v5488_v33  ;;  %v10824_v18 = vpop.eup %10823  ;;  %7300 = vadd.xlane.f32.xlu0 %v7299_v20  ;;  %v5979_v12 = vadd.f32 1.0, %v10822_v35  ;;  %10843 = vlog2.f32 %v15260_v57  ;;  %v5171_v40 = vadd.f32 %v15172_v39, %v15434_v29 }
 0x4fd   : > { %v5487_v24 = vadd.f32 2.0, %v5156_v27  ;;  %v10826_v23 = vpop.eup %10825  ;;  %v15498_v13 = vadd.f32 0.001, %v10824_v18  ;;  %v7108_v8 = vsel %vm14954_vm4, %v6886_v62, 0.0  ;;  %10845 = vpow2.f32 %v15340_v45 }
 0x4fe   : > { %v5166_v33 = vadd.f32 %v15172_v39, %v15443_v49  ;;  %v10828_v10 = vpop.eup %10827  ;;  %v7302_v27 = vsel %vm311_vm0, %v7108_v8, 0.0  ;;  %10847 = vrcp.f32 %v5979_v12  ;;  %v6888_v29 = vmul.f32 0.6931472, %v10826_v23  ;;  %v15518_v12 = vpop.f32.mrb[24].mxu0 }
 0x4ff   : > { %19008 = vst [vmem:[#allocation175_spill] sm:$0xff] %v15498_v13  ;;  %v15508_v35 = vmul.f32 -1.442695, %v5487_v24  ;;  %v10830_v20 = vpop.eup %10829  ;;  %7303 = vadd.xlane.f32.xlu1 %v7302_v27  ;;  %v5982_v18 = vadd.f32 1.0, %v10828_v10  ;;  %10849 = vlog2.f32 %v15289_v11  ;;  %v5490_v62 = vadd.f32 2.0, %v5171_v40 }
 0x500   : > { %v5489_v57 = vadd.f32 2.0, %v5166_v33  ;;  %v10832_v45 = vpop.eup %10831  ;;  %v15511_v34 = vadd.f32 0.001, %v10830_v20  ;;  %v7109_v49 = vsel %vm14954_vm4, %v6888_v29, 0.0  ;;  %10851 = vpow2.f32 %v15350_v59  ;;  %v15523_v33 = vpop.f32.mrb[25].mxu0 }
 0x501   : > { %v5181_v23 = vadd.f32 %v15172_v39, %v15458_v63  ;;  %v10834_v24 = vpop.eup %10833  ;;  %v7305_v8 = vsel %vm311_vm0, %v7109_v49, 0.0  ;;  %10853 = vrcp.f32 %v5982_v18  ;;  %v6890_v10 = vmul.f32 0.6931472, %v10832_v45 }
 0x502   : > { %19009 = vst [vmem:[#allocation176_spill] sm:$0xff] %v15511_v34  ;;  %v15521_v40 = vmul.f32 -1.442695, %v5490_v62  ;;  %v10836_v27 = vpop.eup %10835  ;;  %7306 = vadd.xlane.f32.xlu0 %v7305_v8  ;;  %v5981_v20 = vadd.f32 1.0, %v10834_v24  ;;  %10855 = vlog2.f32 %v15278_v6  ;;  %v15526_v59 = vmul.f32 -1.442695, %v5489_v57 }
 0x503   : > { %v5492_v29 = vadd.f32 2.0, %v5181_v23  ;;  %v10838_v63 = vpop.eup %10837  ;;  %v15528_v11 = vadd.f32 0.001, %v10836_v27  ;;  %v7110_v49 = vsel %vm14954_vm4, %v6890_v10, 0.0  ;;  %10857 = vpow2.f32 %v15355_v28  ;;  %v15538_v57 = vpop.f32.mrb[26].mxu0 }
 0x504   : > { %v5176_v18 = vadd.f32 %v15172_v39, %v15463_v15  ;;  %v10840_v62 = vpop.eup %10839  ;;  %v7308_v45 = vsel %vm311_vm0, %v7110_v49, 0.0  ;;  %10859 = vrcp.f32 %v5981_v20  ;;  %v6892_v24 = vmul.f32 0.6931472, %v10838_v63  ;;  %v15544_v28 = vld [vmem:[%s17855_s2 + $0x3] ss:$0 sm:$0xff]  ;;  %v15548_v15 = vpop.f32.mrb[27].mxu0 }
 0x505   : > { %19010 = vst [vmem:[#allocation177_spill] sm:$0xff] %v15528_v11  ;;  %v15536_v8 = vmul.f32 -1.442695, %v5492_v29  ;;  %v10842_v23 = vpop.eup %10841  ;;  %7309 = vadd.xlane.f32.xlu1 %v7308_v45  ;;  %v5984_v27 = vadd.f32 1.0, %v10840_v62  ;;  %10861 = vlog2.f32 %v15310_v61  ;;  %v5191_v39 = vadd.f32 %v15544_v28, %v15476_v4 }
 0x506   : > { %v5491_v10 = vadd.f32 2.0, %v5176_v18  ;;  %v10844_v20 = vpop.eup %10843  ;;  %v15550_v29 = vadd.f32 0.001, %v10842_v23  ;;  %v7111_v63 = vsel %vm14954_vm4, %v6892_v24, 0.0  ;;  %10863 = vpow2.f32 %v15364_v55  ;;  %v15561_v24 = vpop.f32.mrb[28].mxu0 }
 0x507   : > { %v5186_v49 = vadd.f32 %v15544_v28, %v15481_v3  ;;  %v10846_v18 = vpop.eup %10845  ;;  %v7311_v62 = vsel %vm311_vm0, %v7111_v63, 0.0  ;;  %10865 = vrcp.f32 %v5984_v27  ;;  %v6894_v45 = vmul.f32 0.6931472, %v10844_v20 }
 0x508   : > { %19011 = vst [vmem:[#allocation178_spill] sm:$0xff] %v15550_v29  ;;  %v15558_v61 = vmul.f32 -1.442695, %v5491_v10  ;;  %v10848_v4 = vpop.eup %10847  ;;  %7312 = vadd.xlane.f32.xlu0 %v7311_v62  ;;  %v5983_v6 = vadd.f32 1.0, %v10846_v18  ;;  %10867 = vlog2.f32 %v15300_v54  ;;  %v5494_v23 = vadd.f32 2.0, %v5191_v39  ;;  %v15570_v10 = vpop.f32.mrb[29].mxu0 }
 0x509   : > { %v5493_v29 = vadd.f32 2.0, %v5186_v49  ;;  %v10850_v55 = vpop.eup %10849  ;;  %v15563_v34 = vadd.f32 0.001, %v10848_v4  ;;  %v7112_v3 = vsel %vm14954_vm4, %v6894_v45, 0.0  ;;  %10869 = vpow2.f32 %v15375_v22 }
 0x50a   : > { %v5201_v27 = vadd.f32 %v15544_v28, %v15496_v2  ;;  %v10852_v20 = vpop.eup %10851  ;;  %v7314_v63 = vsel %vm311_vm0, %v7112_v3, 0.0  ;;  %10871 = vrcp.f32 %v5983_v6  ;;  %v6896_v39 = vmul.f32 0.6931472, %v10850_v55 }
 0x50b   : > { %19012 = vst [vmem:[#allocation179_spill] sm:$0xff] %v15563_v34  ;;  %v15573_v49 = vmul.f32 -1.442695, %v5494_v23  ;;  %v10854_v18 = vpop.eup %10853  ;;  %7315 = vadd.xlane.f32.xlu1 %v7314_v63  ;;  %v5986_v62 = vadd.f32 1.0, %v10852_v20  ;;  %10873 = vlog2.f32 %v15333_v51  ;;  %v15576_v45 = vmul.f32 -1.442695, %v5493_v29 }
 0x50c   : > { %v5496_v22 = vadd.f32 2.0, %v5201_v27  ;;  %v10856_v4 = vpop.eup %10855  ;;  %v15578_v54 = vadd.f32 0.001, %v10854_v18  ;;  %v7113_v2 = vsel %vm14954_vm4, %v6896_v39, 0.0  ;;  %10875 = vpow2.f32 %v15387_v53  ;;  %v15585_v23 = vpop.f32.mrb[30].mxu0 }
 0x50d   : > { %v5196_v6 = vadd.f32 %v15544_v28, %v15505_v36  ;;  %v10858_v55 = vpop.eup %10857  ;;  %v7317_v3 = vsel %vm311_vm0, %v7113_v2, 0.0  ;;  %10877 = vrcp.f32 %v5986_v62  ;;  %v6898_v29 = vmul.f32 0.6931472, %v10856_v4  ;;  %v15590_v27 = vpop.f32.mrb[31].mxu0 }
 0x50e   : > { %19013 = vst [vmem:[#allocation180_spill] sm:$0xff] %v15578_v54  ;;  %v15588_v20 = vmul.f32 -1.442695, %v5496_v22  ;;  %v10860_v63 = vpop.eup %10859  ;;  %7318 = vadd.xlane.f32.xlu0 %v7317_v3  ;;  %v5985_v18 = vadd.f32 1.0, %v10858_v55  ;;  %10879 = vlog2.f32 %v15322_v31  ;;  %v5211_v36 = vadd.f32 %v15544_v28, %v15518_v12  ;;  %v15605_v3 = vpop.f32.mrb[32].mxu0 }
 0x50f   : > { %v5495_v53 = vadd.f32 2.0, %v5196_v6  ;;  %v10862_v39 = vpop.eup %10861  ;;  %v15595_v51 = vadd.f32 0.001, %v10860_v63  ;;  %v7114_v62 = vsel %vm14954_vm4, %v6898_v29, 0.0  ;;  %10881 = vpow2.f32 %v15390_v42  ;;  %v15608_v42 = vpop.f32.mrb[33].mxu0 }
 0x510   : > { %v5206_v22 = vadd.f32 %v15544_v28, %v15523_v33  ;;  %v10864_v4 = vpop.eup %10863  ;;  %v7320_v2 = vsel %vm311_vm0, %v7114_v62, 0.0  ;;  %10883 = vrcp.f32 %v5985_v18  ;;  %v6900_v55 = vmul.f32 0.6931472, %v10862_v39 }
 0x511   : > { %19014 = vst [vmem:[#allocation181_spill] sm:$0xff] %v15595_v51  ;;  %v15603_v6 = vmul.f32 -1.442695, %v5495_v53  ;;  %v10866_v12 = vpop.eup %10865  ;;  %7321 = vadd.xlane.f32.xlu1 %v7320_v2  ;;  %v5988_v63 = vadd.f32 1.0, %v10864_v4  ;;  %10885 = vlog2.f32 %v15357_v32  ;;  %v5498_v29 = vadd.f32 2.0, %v5211_v36  ;;  %v15623_v32 = vpop.f32.mrb[34].mxu0 }
 0x512   : > { %v5497_v31 = vadd.f32 2.0, %v5206_v22  ;;  %v10868_v54 = vpop.eup %10867  ;;  %v15610_v33 = vadd.f32 0.001, %v10866_v12  ;;  %v7115_v18 = vsel %vm14954_vm4, %v6900_v55, 0.0  ;;  %10887 = vpow2.f32 %v15402_v17 }
 0x513   : > { %v5221_v53 = vadd.f32 %v15544_v28, %v15538_v57  ;;  %v10870_v39 = vpop.eup %10869  ;;  %v7323_v62 = vsel %vm311_vm0, %v7115_v18, 0.0  ;;  %10889 = vrcp.f32 %v5988_v63  ;;  %v6902_v4 = vmul.f32 0.6931472, %v10868_v54  ;;  %v15632_v63 = vpop.f32.mrb[35].mxu0 }
 0x514   : > { %19015 = vst [vmem:[#allocation182_spill] sm:$0xff] %v15610_v33  ;;  %v15618_v36 = vmul.f32 -1.442695, %v5498_v29  ;;  %v10872_v22 = vpop.eup %10871  ;;  %7324 = vadd.xlane.f32.xlu0 %v7323_v62  ;;  %v5987_v2 = vadd.f32 1.0, %v10870_v39  ;;  %10891 = vlog2.f32 %v15343_v41  ;;  %v15621_v12 = vmul.f32 -1.442695, %v5497_v31 }
 0x515   : > { %v5500_v55 = vadd.f32 2.0, %v5221_v53  ;;  %v10874_v17 = vpop.eup %10873  ;;  %v15625_v33 = vadd.f32 0.001, %v10872_v22  ;;  %v7116_v57 = vsel %vm14954_vm4, %v6902_v4, 0.0  ;;  %10893 = vpow2.f32 %v15415_v60 }
 0x516   : > { %v5216_v54 = vadd.f32 %v15544_v28, %v15548_v15  ;;  %v10876_v29 = vpop.eup %10875  ;;  %v7326_v31 = vsel %vm311_vm0, %v7116_v57, 0.0  ;;  %10895 = vrcp.f32 %v5987_v2  ;;  %v6904_v18 = vmul.f32 0.6931472, %v10874_v17 }
 0x517   : > { %19016 = vst [vmem:[#allocation183_spill] sm:$0xff] %v15625_v33  ;;  %v15635_v53 = vmul.f32 -1.442695, %v5500_v55  ;;  %v10878_v39 = vpop.eup %10877  ;;  %7327 = vadd.xlane.f32.xlu1 %v7326_v31  ;;  %v5990_v62 = vadd.f32 1.0, %v10876_v29  ;;  %10897 = vlog2.f32 %v15378_v0  ;;  %v5231_v60 = vadd.f32 %v15544_v28, %v15561_v24  ;;  %v15647_v55 = vpop.f32.mrb[36].mxu0 }
 0x518   : > { %v5499_v4 = vadd.f32 2.0, %v5216_v54  ;;  %v10880_v22 = vpop.eup %10879  ;;  %v15640_v15 = vadd.f32 0.001, %v10878_v39  ;;  %v7117_v41 = vsel %vm14954_vm4, %v6904_v18, 0.0  ;;  %10899 = vpow2.f32 %v15429_v30  ;;  %v15652_v24 = vpop.f32.mrb[37].mxu0 }
 0x519   : > { %v5226_v2 = vadd.f32 %v15544_v28, %v15570_v10  ;;  %v10882_v17 = vpop.eup %10881  ;;  %v7329_v57 = vsel %vm311_vm0, %v7117_v41, 0.0  ;;  %10901 = vrcp.f32 %v5990_v62  ;;  %v6906_v54 = vmul.f32 0.6931472, %v10880_v22 }
 0x51a   : > { %19017 = vst [vmem:[#allocation184_spill] sm:$0xff] %v15640_v15  ;;  %v15650_v29 = vmul.f32 -1.442695, %v5499_v4  ;;  %v10884_v31 = vpop.eup %10883  ;;  %7330 = vadd.xlane.f32.xlu0 %v7329_v57  ;;  %v5989_v39 = vadd.f32 1.0, %v10882_v17  ;;  %10903 = vlog2.f32 %v15368_v21  ;;  %v5502_v30 = vadd.f32 2.0, %v5231_v60  ;;  %v15665_v60 = vpop.f32.mrb[38].mxu0 }
 0x51b   : > { %v5501_v18 = vadd.f32 2.0, %v5226_v2  ;;  %v10886_v0 = vpop.eup %10885  ;;  %v15655_v10 = vadd.f32 0.001, %v10884_v31  ;;  %v7118_v15 = vsel %vm14954_vm4, %v6906_v54, 0.0  ;;  %10905 = vpow2.f32 %v15432_v7  ;;  %v7208_v31 = vpop.xlane.xlu0 %7207 }
 0x51c   : > { %v5241_v41 = vadd.f32 %v15544_v28, %v15585_v23  ;;  %v10888_v62 = vpop.eup %10887  ;;  %v7332_v4 = vsel %vm311_vm0, %v7118_v15, 0.0  ;;  %10907 = vrcp.f32 %v5989_v39  ;;  %v6908_v22 = vmul.f32 0.6931472, %v10886_v0  ;;  %v15670_v23 = vpop.f32.mrb[39].mxu0 }
 0x51d   : > { %19018 = vst [vmem:[#allocation185_spill] sm:$0xff] %v15655_v10  ;;  %v15663_v17 = vmul.f32 -1.442695, %v5502_v30  ;;  %v10890_v2 = vpop.eup %10889  ;;  %7333 = vadd.xlane.f32.xlu1 %v7332_v4  ;;  %v5992_v57 = vadd.f32 1.0, %v10888_v62  ;;  %10909 = vlog2.f32 %v15408_v43  ;;  %v15668_v54 = vmul.f32 -1.442695, %v5501_v18 }
 0x51e   : > { %v5504_v7 = vadd.f32 2.0, %v5241_v41  ;;  %v10892_v21 = vpop.eup %10891  ;;  %v15672_v15 = vadd.f32 0.001, %v10890_v2  ;;  %v7119_v0 = vsel %vm14954_vm4, %v6908_v22, 0.0  ;;  %10911 = vpow2.f32 %v15446_v5  ;;  %v15692_v22 = vpop.f32.mrb[40].mxu0 }
 0x51f   : > { %vm7587_vm5 = vcmp.eq.s32.totalorder %v14911_v1, 8  ;;  %v10894_v39 = vpop.eup %10893  ;;  %v7335_v30 = vsel %vm311_vm0, %v7119_v0, 0.0  ;;  %10913 = vrcp.f32 %v5992_v57  ;;  %v6910_v18 = vmul.f32 0.6931472, %v10892_v21 }
 0x520   : > { %19019 = vst [vmem:[#allocation186_spill] sm:$0xff] %v15672_v15  ;;  %v15686_v41 = vmul.f32 -1.442695, %v5504_v7  ;;  %v10896_v62 = vpop.eup %10895  ;;  %7336 = vadd.xlane.f32.xlu0 %v7335_v30  ;;  %v5991_v4 = vadd.f32 1.0, %v10894_v39  ;;  %10915 = vlog2.f32 %v15392_v9  ;;  %v7589_v5 = vsel %vm7587_vm5, %v7208_v31, %v14989_v44  ;;  %v15703_v7 = vpop.f32.mrb[41].mxu0 }
 0x521   : > { %v10898_v2 = vpop.eup %10897  ;;  %v15694_v43 = vadd.f32 0.001, %v10896_v62  ;;  %v7120_v21 = vsel %vm14954_vm4, %v6910_v18, 0.0  ;;  %10917 = vpow2.f32 %v15461_v26  ;;  %7718 = vst.msk [vmem:[%s15682_s28 + $0x8] sm:$0xff] %vm7716_vm6, %v7589_v5  ;;  %v5236_v57 = vadd.f32 %v15544_v28, %v15590_v27 }
 0x522   : > { %v10900_v0 = vpop.eup %10899  ;;  %v7338_v44 = vsel %vm311_vm0, %v7120_v21, 0.0  ;;  %10919 = vrcp.f32 %v5991_v4  ;;  %v6912_v31 = vmul.f32 0.6931472, %v10898_v2  ;;  %v5251_v39 = vadd.f32 %v15544_v28, %v15605_v3  ;;  %v15716_v2 = vpop.f32.mrb[42].mxu0 }
 0x523   : > { %v10902_v30 = vpop.eup %10901  ;;  %7339 = vadd.xlane.f32.xlu1 %v7338_v44  ;;  %v5994_v18 = vadd.f32 1.0, %v10900_v0  ;;  %10921 = vlog2.f32 %v15436_v14  ;;  %v5503_v26 = vadd.f32 2.0, %v5236_v57  ;;  %v5246_v62 = vadd.f32 %v15544_v28, %v15608_v42  ;;  %v15721_v14 = vpop.f32.mrb[43].mxu0 }
 0x524   : > { %v10904_v27 = vpop.eup %10903  ;;  %v15711_v5 = vadd.f32 0.001, %v10902_v30  ;;  %v7121_v21 = vsel %vm14954_vm4, %v6912_v31, 0.0  ;;  %10923 = vpow2.f32 %v15474_v19  ;;  %v5506_v4 = vadd.f32 2.0, %v5251_v39 }
 0x525   : > { %v10906_v3 = vpop.eup %10905  ;;  %v7341_v0 = vsel %vm311_vm0, %v7121_v21, 0.0  ;;  %10925 = vrcp.f32 %v5994_v18  ;;  %v6914_v44 = vmul.f32 0.6931472, %v10904_v27  ;;  %v15719_v57 = vmul.f32 -1.442695, %v5503_v26 }
 0x526   : > { %19020 = vst [vmem:[#allocation187_spill] sm:$0xff] %v15711_v5  ;;  %v10908_v42 = vpop.eup %10907  ;;  %7342 = vadd.xlane.f32.xlu0 %v7341_v0  ;;  %v5993_v30 = vadd.f32 1.0, %v10906_v3  ;;  %10927 = vlog2.f32 %v15422_v16  ;;  %v15724_v31 = vmul.f32 -1.442695, %v5506_v4  ;;  %v5505_v19 = vadd.f32 2.0, %v5246_v62 }
 0x527   : > { %v10910_v39 = vpop.eup %10909  ;;  %v15726_v9 = vadd.f32 0.001, %v10908_v42  ;;  %v7122_v18 = vsel %vm14954_vm4, %v6914_v44, 0.0  ;;  %10929 = vpow2.f32 %v15479_v47  ;;  %v7214_v26 = vpop.xlane.xlu1 %7213  ;;  %v5261_v27 = vadd.f32 %v15544_v28, %v15623_v32 }
 0x528   : > { %v10912_v21 = vpop.eup %10911  ;;  %v7344_v3 = vsel %vm311_vm0, %v7122_v18, 0.0  ;;  %10931 = vrcp.f32 %v5993_v30  ;;  %v6916_v4 = vmul.f32 0.6931472, %v10910_v39  ;;  %v7591_v62 = vsel %vm7587_vm5, %v7214_v26, %v15025_v58  ;;  %v15737_v0 = vpop.f32.mrb[44].mxu0 }
 0x529   : > { %19021 = vst [vmem:[#allocation188_spill] sm:$0xff] %v15726_v9  ;;  %v10914_v42 = vpop.eup %10913  ;;  %7345 = vadd.xlane.f32.xlu1 %v7344_v3  ;;  %v5996_v44 = vadd.f32 1.0, %v10912_v21  ;;  %10933 = vlog2.f32 %v15466_v48  ;;  %7720 = vst.msk [vmem:[%s15682_s28 + $0x18] sm:$0xff] %vm7716_vm6, %v7591_v62  ;;  %v15742_v47 = vmul.f32 -1.442695, %v5505_v19  ;;  %v5508_v32 = vadd.f32 2.0, %v5261_v27 }
 0x52a   : > { %v15744_v16 = vpop.f32.mrb[45].mxu0  ;;  %v10916_v30 = vpop.eup %10915  ;;  %v15746_v39 = vadd.f32 0.001, %v10914_v42  ;;  %v7123_v58 = vsel %vm14954_vm4, %v6916_v4, 0.0  ;;  %10935 = vpow2.f32 %v15491_v56  ;;  %v5256_v18 = vadd.f32 %v15544_v28, %v15632_v63 }
 0x52b   : > { %19022 = vst [vmem:[#allocation189_spill] sm:$0xff] %v15742_v47  ;;  %v10918_v26 = vpop.eup %10917  ;;  %v7347_v21 = vsel %vm311_vm0, %v7123_v58, 0.0  ;;  %10937 = vrcp.f32 %v5996_v44  ;;  %v6918_v19 = vmul.f32 0.6931472, %v10916_v30  ;;  %v15754_v3 = vmul.f32 -1.442695, %v5508_v32 }
 0x52c   : > { %19023 = vst [vmem:[#allocation190_spill] sm:$0xff] %v15746_v39  ;;  %v10920_v27 = vpop.eup %10919  ;;  %7348 = vadd.xlane.f32.xlu0 %v7347_v21  ;;  %v5995_v62 = vadd.f32 1.0, %v10918_v26  ;;  %10939 = vlog2.f32 %v15451_v50  ;;  %v7205_v42 = vpop.xlane.xlu0 %7204  ;;  %v5507_v4 = vadd.f32 2.0, %v5256_v18  ;;  %v5271_v56 = vadd.f32 %v15544_v28, %v15647_v55  ;;  %v19032_v50 = vld [vmem:[#allocation176_spill] sm:$0xff] }
 0x52d   : > { %v15759_v48 = vpop.f32.mrb[46].mxu0  ;;  %v10922_v63 = vpop.eup %10921  ;;  %v15761_v47 = vadd.f32 0.001, %v10920_v27  ;;  %v7124_v44 = vsel %vm14954_vm4, %v6918_v19, 0.0  ;;  %10941 = vpow2.f32 %v15508_v35  ;;  %v7588_v32 = vsel %vm7587_vm5, %v7205_v42, %v15035_v38 }
 0x52e   : > { %v15769_v30 = vpop.f32.mrb[47].mxu0  ;;  %v10924_v58 = vpop.eup %10923  ;;  %v7350_v18 = vsel %vm311_vm0, %v7124_v44, 0.0  ;;  %10943 = vrcp.f32 %v5995_v62  ;;  %v6920_v55 = vmul.f32 0.6931472, %v10922_v63  ;;  %7717 = vst.msk [vmem:[%s15682_s28] sm:$0xff] %vm7716_vm6, %v7588_v32  ;;  %v5510_v35 = vadd.f32 2.0, %v5271_v56 }
 0x52f   : > { %19024 = vst [vmem:[#allocation191_spill] sm:$0xff] %v15761_v47  ;;  %v15774_v26 = vmul.f32 -1.442695, %v5507_v4  ;;  %v10926_v21 = vpop.eup %10925  ;;  %7351 = vadd.xlane.f32.xlu1 %v7350_v18  ;;  %v5998_v19 = vadd.f32 1.0, %v10924_v58  ;;  %10945 = vlog2.f32 %v15498_v13  ;;  %v5266_v38 = vadd.f32 %v15544_v28, %v15652_v24  ;;  %v19026_v63 = vld [vmem:[#allocation9_spill] sm:$0xff] }
 0x530   : > { %v10928_v27 = vpop.eup %10927  ;;  %v15779_v42 = vadd.f32 0.001, %v10926_v21  ;;  %v7125_v62 = vsel %vm14954_vm4, %v6920_v55, 0.0  ;;  %10947 = vpow2.f32 %v15521_v40  ;;  %v15786_v4 = vadd.f32 %v15124_v25, %v19026_v63  ;;  %v15788_v44 = vpop.f32.mrb[48].mxu0 }
 0x531   : > { %v10930_v32 = vpop.eup %10929  ;;  %v7353_v56 = vsel %vm311_vm0, %v7125_v62, 0.0  ;;  %10949 = vrcp.f32 %v5998_v19  ;;  %v6922_v58 = vmul.f32 0.6931472, %v10928_v27  ;;  %v15791_v24 = vmul.f32 -1.442695, %v5510_v35  ;;  %v15793_v18 = vpop.f32.mrb[49].mxu0 }
 0x532   : > { %19025 = vst [vmem:[#allocation192_spill] sm:$0xff] %v15779_v42  ;;  %v10932_v21 = vpop.eup %10931  ;;  %7354 = vadd.xlane.f32.xlu0 %v7353_v56  ;;  %v5997_v55 = vadd.f32 1.0, %v10930_v32  ;;  %10951 = vlog2.f32 %v15483_v46  ;;  %v5509_v40 = vadd.f32 2.0, %v5266_v38  ;;  %v5281_v25 = vadd.f32 %v15544_v28, %v15665_v60 }
 0x533   : > { %v10934_v63 = vpop.eup %10933  ;;  %v15798_v13 = vadd.f32 0.001, %v10932_v21  ;;  %v7126_v19 = vsel %vm14954_vm4, %v6922_v58, 0.0  ;;  %10953 = vpow2.f32 %v15526_v59  ;;  %v7211_v35 = vpop.xlane.xlu1 %7210  ;;  %v5276_v27 = vadd.f32 %v15544_v28, %v15670_v23 }
 0x534   : > { %v10936_v62 = vpop.eup %10935  ;;  %v7356_v32 = vsel %vm311_vm0, %v7126_v19, 0.0  ;;  %10955 = vrcp.f32 %v5997_v55  ;;  %v6924_v38 = vmul.f32 0.6931472, %v10934_v63  ;;  %v7590_v60 = vsel %vm7587_vm5, %v7211_v35, %v15058_v37  ;;  %v15809_v56 = vpop.f32.mrb[50].mxu0  ;;  %v19031_v35 = vld [vmem:[#allocation95_spill] sm:$0xff] }
 0x535   : > { %19027 = vst [vmem:[#allocation9_spill] sm:$0xff] %v15798_v13  ;;  %19028 = vst [vmem:[#allocation193_spill] sm:$0xff] %v15809_v56  ;;  %v10938_v21 = vpop.eup %10937  ;;  %7357 = vadd.xlane.f32.xlu1 %v7356_v32  ;;  %v6000_v58 = vadd.f32 1.0, %v10936_v62  ;;  %10957 = vlog2.f32 %v15528_v11  ;;  %v7217_v59 = vpop.xlane.xlu0 %7216  ;;  %v15814_v23 = vmul.f32 -1.442695, %v5509_v40  ;;  %v5512_v19 = vadd.f32 2.0, %v5281_v25 }
 0x536   : > { %7719 = vst.msk [vmem:[%s15682_s28 + $0x10] sm:$0xff] %vm7716_vm6, %v7590_v60  ;;  %v15816_v55 = vpop.f32.mrb[51].mxu0  ;;  %v10940_v63 = vpop.eup %10939  ;;  %v15818_v46 = vadd.f32 0.001, %v10938_v21  ;;  %v7127_v37 = vsel %vm14954_vm4, %v6924_v38, 0.0  ;;  %10959 = vpow2.f32 %v15536_v8  ;;  %v7592_v62 = vsel %vm7587_vm5, %v7217_v59, %v19031_v35  ;;  %v19033_v8 = vld [vmem:[#allocation19_spill] sm:$0xff] }
 0x537   : > { %19029 = vst [vmem:[#allocation194_spill] sm:$0xff] %v15816_v55  ;;  %v10942_v32 = vpop.eup %10941  ;;  %v7359_v60 = vsel %vm311_vm0, %v7127_v37, 0.0  ;;  %10961 = vrcp.f32 %v6000_v58  ;;  %v6926_v40 = vmul.f32 0.6931472, %v10940_v63  ;;  %7721 = vst.msk [vmem:[%s15682_s28 + $0x20] sm:$0xff] %vm7716_vm6, %v7592_v62  ;;  %v7220_v25 = vpop.xlane.xlu1 %7219  ;;  %v5511_v35 = vadd.f32 2.0, %v5276_v27 }
 0x538   : > { %19030 = vst [vmem:[#allocation195_spill] sm:$0xff] %v15818_v46  ;;  %v15829_v21 = vmul.f32 -1.442695, %v5512_v19  ;;  %v10944_v11 = vpop.eup %10943  ;;  %7360 = vadd.xlane.f32.xlu0 %v7359_v60  ;;  %v5999_v38 = vadd.f32 1.0, %v10942_v32  ;;  %10963 = vlog2.f32 %v19032_v50  ;;  %v7593_v59 = vsel %vm7587_vm5, %v7220_v25, %v19033_v8  ;;  %v19036_v19 = vld [vmem:[#allocation100_spill] sm:$0xff]  ;;  %v19037_v62 = vld [vmem:[#allocation49_spill] sm:$0xff] }
 0x539   : > { %v15835_v55 = vpop.f32.mrb[52].mxu0  ;;  %v10946_v58 = vpop.eup %10945  ;;  %v15837_v37 = vadd.f32 0.001, %v10944_v11  ;;  %v7128_v63 = vsel %vm14954_vm4, %v6926_v40, 0.0  ;;  %10965 = vpow2.f32 %v15558_v61  ;;  %7722 = vst.msk [vmem:[%s15682_s28 + $0x28] sm:$0xff] %vm7716_vm6, %v7593_v59  ;;  %v6442_v32 = vsel %vm14954_vm4, %v19037_v62, %v19036_v19  ;;  %v11303_v62 = vld [vmem:[%s11489_s30 + $0x38] sm:$0xff] }
 0x53a   : > { %19034 = vst [vmem:[#allocation95_spill] sm:$0xff] %v15835_v55  ;;  %v15848_v60 = vpop.f32.mrb[53].mxu0  ;;  %v10948_v27 = vpop.eup %10947  ;;  %v7362_v25 = vsel %vm311_vm0, %v7128_v63, 0.0  ;;  %10967 = vrcp.f32 %v5999_v38  ;;  %v6928_v11 = vmul.f32 0.6931472, %v10946_v58 }
 0x53b   : > { %19035 = vst [vmem:[#allocation19_spill] sm:$0xff] %v15837_v37  ;;  %19038 = vst [vmem:[#allocation100_spill] sm:$0xff] %v15848_v60  ;;  %v7223_v8 = vpop.xlane.xlu0 %7222  ;;  %v15851_v40 = vmul.f32 -1.442695, %v5511_v35  ;;  %v10950_v50 = vpop.eup %10949  ;;  %7363 = vadd.xlane.f32.xlu1 %v7362_v25  ;;  %v6002_v61 = vadd.f32 1.0, %v10948_v27  ;;  %10969 = vlog2.f32 %v15563_v34  ;;  %v6570_v60 = vmul.f32 %v11303_v62, %v6442_v32  ;;  %v19041_v35 = vld [vmem:[#allocation37_spill] sm:$0xff] }
 0x53c   : > { %v7594_v59 = vsel %vm7587_vm5, %v7223_v8, %v15786_v4  ;;  %v10952_v55 = vpop.eup %10951  ;;  %v15858_v56 = vadd.f32 0.001, %v10950_v50  ;;  %v7129_v38 = vsel %vm14954_vm4, %v6928_v11, 0.0  ;;  %10971 = vpow2.f32 %v15573_v49  ;;  %v19043_v27 = vld [vmem:[#allocation23_spill] sm:$0xff]  ;;  %v11304_v34 = vld [vmem:[%s11489_s30 + $0x40] sm:$0xff] }
 0x53d   : > { %19039 = vst [vmem:[#allocation49_spill] sm:$0xff] %v15851_v40  ;;  %7723 = vst.msk [vmem:[%s15682_s28 + $0x30] sm:$0xff] %vm7716_vm6, %v7594_v59  ;;  %v6443_v58 = vsel %vm14954_vm4, %v19041_v35, %v19036_v19  ;;  %v15869_v63 = vpop.f32.mrb[54].mxu0  ;;  %v10954_v4 = vpop.eup %10953  ;;  %v7365_v32 = vsel %vm311_vm0, %v7129_v38, 0.0  ;;  %10973 = vrcp.f32 %v6002_v61  ;;  %v6930_v50 = vmul.f32 0.6931472, %v10952_v55 }
 0x53e   : > { %19040 = vst [vmem:[#allocation196_spill] sm:$0xff] %v15858_v56  ;;  %19042 = vst [vmem:[#allocation37_spill] sm:$0xff] %v15869_v63  ;;  %v6698_v25 = vadd.f32 %v6570_v60, %v19043_v27  ;;  %v15873_v11 = vpop.f32.mrb[55].mxu0  ;;  %v10956_v8 = vpop.eup %10955  ;;  %7366 = vadd.xlane.f32.xlu0 %v7365_v32  ;;  %v6001_v49 = vadd.f32 1.0, %v10954_v4  ;;  %v19044_v59 = vld [vmem:[#allocation178_spill] sm:$0xff]  ;;  %v6571_v35 = vmul.f32 %v11304_v34, %v6443_v58  ;;  %v19046_v34 = vld [vmem:[#allocation27_spill] sm:$0xff] }
 0x53f   : > { %10975 = vlog2.f32 %v19044_v59  ;;  %v7226_v62 = vpop.xlane.xlu1 %7225  ;;  %v5291_v63 = vadd.f32 %v15544_v28, %v15692_v22  ;;  %v10958_v40 = vpop.eup %10957  ;;  %v15879_v38 = vadd.f32 0.001, %v10956_v8  ;;  %v7130_v55 = vsel %vm14954_vm4, %v6930_v50, 0.0 }
 0x540   : > { %10977 = vpow2.f32 %v15576_v45  ;;  %v7595_v60 = vsel %vm7587_vm5, %v7226_v62, %v6698_v25  ;;  %v10960_v61 = vpop.eup %10959  ;;  %v7368_v4 = vsel %vm311_vm0, %v7130_v55, 0.0  ;;  %v6932_v32 = vmul.f32 0.6931472, %v10958_v40  ;;  %v7229_v58 = vpop.xlane.xlu0 %7228 }
 0x541   : > { %19045 = vst [vmem:[#allocation23_spill] sm:$0xff] %v15879_v38  ;;  %10979 = vrcp.f32 %v6001_v49  ;;  %7724 = vst.msk [vmem:[%s15682_s28 + $0x38] sm:$0xff] %vm7716_vm6, %v7595_v60  ;;  %v6699_v22 = vadd.f32 %v6571_v35, %v19046_v34  ;;  %v15890_v27 = vpop.f32.mrb[56].mxu0  ;;  %v10962_v8 = vpop.eup %10961  ;;  %7369 = vadd.xlane.f32.xlu1 %v7368_v4  ;;  %v6004_v50 = vadd.f32 1.0, %v10960_v61  ;;  %v5514_v45 = vadd.f32 2.0, %v5291_v63 }
 0x542   : > { %10981 = vlog2.f32 %v15595_v51  ;;  %v5286_v25 = vadd.f32 %v15544_v28, %v15703_v7  ;;  %v15895_v62 = vpop.f32.mrb[57].mxu0  ;;  %v10964_v40 = vpop.eup %10963  ;;  %v15897_v49 = vadd.f32 0.001, %v10962_v8  ;;  %v7131_v35 = vsel %vm14954_vm4, %v6932_v32, 0.0  ;;  %v19049_v8 = vld [vmem:[#allocation180_spill] sm:$0xff] }
 0x543   : > { %19047 = vst [vmem:[#allocation27_spill] sm:$0xff] %v15895_v62  ;;  %10983 = vpow2.f32 %v15588_v20  ;;  %v7596_v55 = vsel %vm7587_vm5, %v7229_v58, %v6699_v22  ;;  %v10966_v60 = vpop.eup %10965  ;;  %v7371_v61 = vsel %vm311_vm0, %v7131_v35, 0.0  ;;  %v6934_v63 = vmul.f32 0.6931472, %v10964_v40  ;;  %v19050_v20 = vld [vmem:[#allocation30_spill] sm:$0xff] }
 0x544   : > { %19048 = vst [vmem:[#allocation197_spill] sm:$0xff] %v15897_v49  ;;  %10985 = vrcp.f32 %v6004_v50  ;;  %7725 = vst.msk [vmem:[%s15682_s28 + $0x40] sm:$0xff] %vm7716_vm6, %v7596_v55  ;;  %v15907_v7 = vmul.f32 -1.442695, %v5514_v45  ;;  %v10968_v4 = vpop.eup %10967  ;;  %7372 = vadd.xlane.f32.xlu0 %v7371_v61  ;;  %v6003_v34 = vadd.f32 1.0, %v10966_v60  ;;  %v5513_v32 = vadd.f32 2.0, %v5286_v25  ;;  %v7232_v58 = vpop.xlane.xlu1 %7231 }
 0x545   : > { %10987 = vlog2.f32 %v19049_v8  ;;  %v6444_v22 = vsel %vm14954_vm4, %v19050_v20, %v19036_v19  ;;  %v10970_v50 = vpop.eup %10969  ;;  %v15916_v40 = vadd.f32 0.001, %v10968_v4  ;;  %v7132_v45 = vsel %vm14954_vm4, %v6934_v63, 0.0  ;;  %v11305_v55 = vld [vmem:[%s11489_s30 + $0x48] sm:$0xff]  ;;  %v19054_v63 = vld [vmem:[#allocation24_spill] sm:$0xff]  ;;  %v19057_v62 = vld [vmem:[#allocation182_spill] sm:$0xff] }
 0x546   : > { %v15914_v35 = vpop.f32.mrb[58].mxu0  ;;  %10989 = vpow2.f32 %v15603_v6  ;;  %v6572_v60 = vmul.f32 %v11305_v55, %v6444_v22  ;;  %v10972_v61 = vpop.eup %10971  ;;  %v7374_v25 = vsel %vm311_vm0, %v7132_v45, 0.0  ;;  %v6936_v8 = vmul.f32 0.6931472, %v10970_v50  ;;  %v19055_v6 = vld [vmem:[#allocation89_spill] sm:$0xff]  ;;  %v11306_v50 = vld [vmem:[%s11489_s30 + $0x50] sm:$0xff] }
 0x547   : > { %19051 = vst [vmem:[#allocation30_spill] sm:$0xff] %v15914_v35  ;;  %19052 = vst [vmem:[#allocation198_spill] sm:$0xff] %v15916_v40  ;;  %10991 = vrcp.f32 %v6003_v34  ;;  %v15923_v20 = vmul.f32 -1.442695, %v5513_v32  ;;  %v15925_v51 = vpop.f32.mrb[59].mxu0  ;;  %v10974_v59 = vpop.eup %10973  ;;  %7375 = vadd.xlane.f32.xlu1 %v7374_v25  ;;  %v6006_v4 = vadd.f32 1.0, %v10972_v61  ;;  %v6445_v22 = vsel %vm14954_vm4, %v19055_v6, %v19036_v19 }
 0x548   : > { %19053 = vst [vmem:[#allocation199_spill] sm:$0xff] %v15925_v51  ;;  %10993 = vlog2.f32 %v15625_v33  ;;  %v6700_v35 = vadd.f32 %v6572_v60, %v19054_v63  ;;  %v7235_v45 = vpop.xlane.xlu0 %7234  ;;  %v15933_v34 = vadd.f32 0.001, %v10974_v59  ;;  %v7133_v32 = vsel %vm14954_vm4, %v6936_v8, 0.0 }
 0x549   : > { %v10976_v55 = vpop.eup %10975  ;;  %10995 = vpow2.f32 %v15618_v36  ;;  %v6573_v61 = vmul.f32 %v11306_v50, %v6445_v22  ;;  %v7377_v60 = vsel %vm311_vm0, %v7133_v32, 0.0  ;;  %v19058_v36 = vld [vmem:[#allocation31_spill] sm:$0xff]  ;;  %v5301_v22 = vadd.f32 %v15544_v28, %v15716_v2 }
 0x54a   : > { %v10978_v25 = vpop.eup %10977  ;;  %10997 = vrcp.f32 %v6006_v4  ;;  %v6938_v63 = vmul.f32 0.6931472, %v10976_v55  ;;  %v7597_v6 = vsel %vm7587_vm5, %v7232_v58, %v6700_v35  ;;  %v15942_v33 = vpop.f32.mrb[60].mxu0  ;;  %7378 = vadd.xlane.f32.xlu0 %v7377_v60  ;;  %v5296_v35 = vadd.f32 %v15544_v28, %v15721_v14 }
 0x54b   : > { %19056 = vst [vmem:[#allocation24_spill] sm:$0xff] %v15942_v33  ;;  %v10980_v51 = vpop.eup %10979  ;;  %v6005_v59 = vadd.f32 1.0, %v10978_v25  ;;  %10999 = vlog2.f32 %v19057_v62  ;;  %7726 = vst.msk [vmem:[%s15682_s28 + $0x48] sm:$0xff] %vm7716_vm6, %v7597_v6  ;;  %v6701_v8 = vadd.f32 %v6573_v61, %v19058_v36  ;;  %v15950_v32 = vpop.xlane.xlu1 %7237 }
 0x54c   : > { %v10982_v4 = vpop.eup %10981  ;;  %v15952_v55 = vadd.f32 0.001, %v10980_v51  ;;  %v7134_v58 = vsel %vm14954_vm4, %v6938_v63, 0.0  ;;  %11001 = vpow2.f32 %v15621_v12  ;;  %v15962_v60 = vpop.f32.mrb[61].mxu0  ;;  %v5516_v12 = vadd.f32 2.0, %v5301_v22 }
 0x54d   : > { %v10984_v50 = vpop.eup %10983  ;;  %v7380_v61 = vsel %vm311_vm0, %v7134_v58, 0.0  ;;  %11003 = vrcp.f32 %v6005_v59  ;;  %v6940_v25 = vmul.f32 0.6931472, %v10982_v4  ;;  %v7598_v2 = vsel %vm7587_vm5, %v7235_v45, %v6701_v8  ;;  %19059 = vst [vmem:[#allocation89_spill] sm:$0xff] %v15962_v60  ;;  %v7241_v14 = vpop.xlane.xlu0 %7240  ;;  %v19061_v45 = vld [vmem:[#allocation34_spill] sm:$0xff] }
 0x54e   : > { %v10986_v51 = vpop.eup %10985  ;;  %7381 = vadd.xlane.f32.xlu1 %v7380_v61  ;;  %v6008_v6 = vadd.f32 1.0, %v10984_v50  ;;  %11005 = vlog2.f32 %v15655_v10  ;;  %7727 = vst.msk [vmem:[%s15682_s28 + $0x50] sm:$0xff] %vm7716_vm6, %v7598_v2  ;;  %v5515_v63 = vadd.f32 2.0, %v5296_v35  ;;  %v6446_v8 = vsel %vm14954_vm4, %v19061_v45, %v19036_v19  ;;  %v11307_v10 = vld [vmem:[%s11489_s30 + $0x58] sm:$0xff] }
 0x54f   : > { %v10988_v36 = vpop.eup %10987  ;;  %v15967_v58 = vadd.f32 0.001, %v10986_v51  ;;  %v7135_v59 = vsel %vm14954_vm4, %v6940_v25, 0.0  ;;  %11007 = vpow2.f32 %v15635_v53  ;;  %v15977_v35 = vmul.f32 -1.442695, %v5516_v12  ;;  %v15979_v61 = vpop.f32.mrb[62].mxu0 }
 0x550   : > { %v10990_v4 = vpop.eup %10989  ;;  %v7383_v50 = vsel %vm311_vm0, %v7135_v59, 0.0  ;;  %11009 = vrcp.f32 %v6008_v6  ;;  %v6942_v22 = vmul.f32 0.6931472, %v10988_v36  ;;  %19062 = vst [vmem:[#allocation34_spill] sm:$0xff] %v15979_v61  ;;  %v19063_v25 = vld [vmem:[#allocation184_spill] sm:$0xff]  ;;  %v6574_v62 = vmul.f32 %v11307_v10, %v6446_v8  ;;  %v15985_v60 = vpop.xlane.xlu1 %7243  ;;  %v19065_v12 = vld [vmem:[#allocation38_spill] sm:$0xff] }
 0x551   : > { %19060 = vst [vmem:[#allocation31_spill] sm:$0xff] %v15967_v58  ;;  %v10992_v2 = vpop.eup %10991  ;;  %7384 = vadd.xlane.f32.xlu0 %v7383_v50  ;;  %v6007_v51 = vadd.f32 1.0, %v10990_v4  ;;  %11011 = vlog2.f32 %v19063_v25  ;;  %v15982_v53 = vmul.f32 -1.442695, %v5515_v63  ;;  %v6447_v36 = vsel %vm14954_vm4, %v19065_v12, %v19036_v19  ;;  %v19066_v8 = vld [vmem:[#allocation28_spill] sm:$0xff]  ;;  %v15998_v25 = vpop.f32.mrb[63].mxu0 }
 0x552   : > { %v10994_v45 = vpop.eup %10993  ;;  %v15987_v59 = vadd.f32 0.001, %v10992_v2  ;;  %v7136_v6 = vsel %vm14954_vm4, %v6942_v22, 0.0  ;;  %11013 = vpow2.f32 %v15650_v29  ;;  %v6702_v50 = vadd.f32 %v6574_v62, %v19066_v8  ;;  %v11308_v29 = vld [vmem:[%s11489_s30 + $0x60] sm:$0xff] }
 0x553   : > { %v10996_v63 = vpop.eup %10995  ;;  %v7386_v4 = vsel %vm311_vm0, %v7136_v6, 0.0  ;;  %11015 = vrcp.f32 %v6007_v51  ;;  %v6944_v10 = vmul.f32 0.6931472, %v10994_v45  ;;  %v6575_v61 = vmul.f32 %v11308_v29, %v6447_v36  ;;  %v16004_v33 = vpop.xlane.xlu0 %7246 }
 0x554   : > { %19064 = vst [vmem:[#allocation200_spill] sm:$0xff] %v15987_v59  ;;  %v10998_v2 = vpop.eup %10997  ;;  %7387 = vadd.xlane.f32.xlu1 %v7386_v4  ;;  %v6010_v22 = vadd.f32 1.0, %v10996_v63  ;;  %11017 = vlog2.f32 %v15694_v43  ;;  %v5311_v12 = vadd.f32 %v15544_v28, %v15737_v0  ;;  %v7599_v45 = vsel %vm7587_vm5, %v15950_v32, %v6702_v50  ;;  %v19068_v0 = vld [vmem:[#allocation35_spill] sm:$0xff] }
 0x555   : > { %v11000_v6 = vpop.eup %10999  ;;  %v16006_v51 = vadd.f32 0.001, %v10998_v2  ;;  %v7137_v62 = vsel %vm14954_vm4, %v6944_v10, 0.0  ;;  %11019 = vpow2.f32 %v15663_v17  ;;  %7728 = vst.msk [vmem:[%s15682_s28 + $0x58] sm:$0xff] %vm7716_vm6, %v7599_v45  ;;  %v6703_v8 = vadd.f32 %v6575_v61, %v19068_v0  ;;  %v16021_v32 = vpop.xlane.xlu1 %7249 }
 0x556   : > { %v11002_v63 = vpop.eup %11001  ;;  %v7389_v36 = vsel %vm311_vm0, %v7137_v62, 0.0  ;;  %11021 = vrcp.f32 %v6010_v22  ;;  %v6946_v4 = vmul.f32 0.6931472, %v11000_v6  ;;  %v5518_v17 = vadd.f32 2.0, %v5311_v12 }
 0x557   : > { %19067 = vst [vmem:[#allocation38_spill] sm:$0xff] %v16006_v51  ;;  %v11004_v2 = vpop.eup %11003  ;;  %7390 = vadd.xlane.f32.xlu0 %v7389_v36  ;;  %v6009_v29 = vadd.f32 1.0, %v11002_v63  ;;  %11023 = vlog2.f32 %v15672_v15  ;;  %v5306_v10 = vadd.f32 %v15544_v28, %v15744_v16  ;;  %v7600_v61 = vsel %vm7587_vm5, %v7241_v14, %v6703_v8 }
 0x558   : > { %v11006_v50 = vpop.eup %11005  ;;  %v16023_v62 = vadd.f32 0.001, %v11004_v2  ;;  %v7138_v22 = vsel %vm14954_vm4, %v6946_v4, 0.0  ;;  %11025 = vpow2.f32 %v15668_v54  ;;  %7729 = vst.msk [vmem:[%s15682_s28 + $0x60] sm:$0xff] %vm7716_vm6, %v7600_v61  ;;  %v16033_v16 = vmul.f32 -1.442695, %v5518_v17 }
 0x559   : > { %v11008_v6 = vpop.eup %11007  ;;  %v7392_v45 = vsel %vm311_vm0, %v7138_v22, 0.0  ;;  %11027 = vrcp.f32 %v6009_v29  ;;  %v6948_v12 = vmul.f32 0.6931472, %v11006_v50  ;;  %v5517_v36 = vadd.f32 2.0, %v5306_v10  ;;  %v19070_v54 = vld [vmem:[#allocation52_spill] sm:$0xff]  ;;  %v16040_v4 = vpop.xlane.xlu0 %7252  ;;  %v11309_v29 = vld [vmem:[%s11489_s30 + $0x68] sm:$0xff] }
 0x55a   : > { %19069 = vst [vmem:[#allocation28_spill] sm:$0xff] %v16023_v62  ;;  %v11010_v28 = vpop.eup %11009  ;;  %7393 = vadd.xlane.f32.xlu1 %v7392_v45  ;;  %v6012_v63 = vadd.f32 1.0, %v11008_v6  ;;  %11029 = vlog2.f32 %v15726_v9  ;;  %v6448_v14 = vsel %vm14954_vm4, %v19070_v54, %v19036_v19 }
 0x55b   : > { %v11012_v0 = vpop.eup %11011  ;;  %v16042_v8 = vadd.f32 0.001, %v11010_v28  ;;  %v7139_v2 = vsel %vm14954_vm4, %v6948_v12, 0.0  ;;  %11031 = vpow2.f32 %v15686_v41  ;;  %v6576_v17 = vmul.f32 %v11309_v29, %v6448_v14  ;;  %v19072_v28 = vld [vmem:[#allocation32_spill] sm:$0xff] }
 0x55c   : > { %v11014_v50 = vpop.eup %11013  ;;  %v7395_v10 = vsel %vm311_vm0, %v7139_v2, 0.0  ;;  %11033 = vrcp.f32 %v6012_v63  ;;  %v6950_v22 = vmul.f32 0.6931472, %v11012_v0  ;;  %v16049_v61 = vmul.f32 -1.442695, %v5517_v36  ;;  %v19073_v12 = vld [vmem:[#allocation92_spill] sm:$0xff]  ;;  %v16057_v14 = vpop.xlane.xlu1 %7255 }
 0x55d   : > { %19071 = vst [vmem:[#allocation35_spill] sm:$0xff] %v16042_v8  ;;  %v11016_v6 = vpop.eup %11015  ;;  %7396 = vadd.xlane.f32.xlu0 %v7395_v10  ;;  %v6011_v45 = vadd.f32 1.0, %v11014_v50  ;;  %11035 = vlog2.f32 %v15711_v5  ;;  %v6704_v54 = vadd.f32 %v6576_v17, %v19072_v28  ;;  %v6449_v41 = vsel %vm14954_vm4, %v19073_v12, %v19036_v19  ;;  %v11310_v0 = vld [vmem:[%s11489_s30 + $0x70] sm:$0xff] }
 0x55e   : > { %v11018_v2 = vpop.eup %11017  ;;  %v16059_v63 = vadd.f32 0.001, %v11016_v6  ;;  %v7140_v36 = vsel %vm14954_vm4, %v6950_v22, 0.0  ;;  %11037 = vpow2.f32 %v15719_v57  ;;  %v6577_v29 = vmul.f32 %v11310_v0, %v6449_v41  ;;  %v19075_v22 = vld [vmem:[#allocation90_spill] sm:$0xff] }
 0x55f   : > { %v11020_v50 = vpop.eup %11019  ;;  %v7398_v17 = vsel %vm311_vm0, %v7140_v36, 0.0  ;;  %11039 = vrcp.f32 %v6011_v45  ;;  %v6952_v10 = vmul.f32 0.6931472, %v11018_v2  ;;  %v7601_v28 = vsel %vm7587_vm5, %v15985_v60, %v6704_v54  ;;  %v16076_v41 = vld [vmem:[%s17855_s2 + $0x3] ss:$0 sm:$0xff]  ;;  %v16080_v2 = vpop.xlane.xlu0 %7258 }
 0x560   : > { %19074 = vst [vmem:[#allocation52_spill] sm:$0xff] %v16059_v63  ;;  %v11022_v12 = vpop.eup %11021  ;;  %7399 = vadd.xlane.f32.xlu1 %v7398_v17  ;;  %v6014_v6 = vadd.f32 1.0, %v11020_v50  ;;  %11041 = vlog2.f32 %v15761_v47  ;;  %7730 = vst.msk [vmem:[%s15682_s28 + $0x68] sm:$0xff] %vm7716_vm6, %v7601_v28  ;;  %v6705_v57 = vadd.f32 %v6577_v29, %v19075_v22  ;;  %v5321_v45 = vadd.f32 %v16076_v41, %v15759_v48 }
 0x561   : > { %v11024_v60 = vpop.eup %11023  ;;  %v16082_v54 = vadd.f32 0.001, %v11022_v12  ;;  %v7141_v36 = vsel %vm14954_vm4, %v6952_v10, 0.0  ;;  %11043 = vpow2.f32 %v15724_v31  ;;  %v5316_v0 = vadd.f32 %v16076_v41, %v15769_v30 }
 0x562   : > { %v11026_v29 = vpop.eup %11025  ;;  %v7401_v50 = vsel %vm311_vm0, %v7141_v36, 0.0  ;;  %11045 = vrcp.f32 %v6014_v6  ;;  %v6954_v17 = vmul.f32 0.6931472, %v11024_v60  ;;  %v7602_v48 = vsel %vm7587_vm5, %v16004_v33, %v6705_v57  ;;  %v16096_v22 = vpop.xlane.xlu1 %7261  ;;  %v19078_v60 = vld [vmem:[#allocation189_spill] sm:$0xff] }
 0x563   : > { %19076 = vst [vmem:[#allocation32_spill] sm:$0xff] %v16082_v54  ;;  %v11028_v28 = vpop.eup %11027  ;;  %7402 = vadd.xlane.f32.xlu0 %v7401_v50  ;;  %v6013_v12 = vadd.f32 1.0, %v11026_v29  ;;  %11047 = vlog2.f32 %v15746_v39  ;;  %7731 = vst.msk [vmem:[%s15682_s28 + $0x70] sm:$0xff] %vm7716_vm6, %v7602_v48  ;;  %v5520_v31 = vadd.f32 2.0, %v5321_v45  ;;  %v5519_v10 = vadd.f32 2.0, %v5316_v0  ;;  %v19079_v33 = vld [vmem:[#allocation93_spill] sm:$0xff] }
 0x564   : > { %v11030_v30 = vpop.eup %11029  ;;  %v16098_v36 = vadd.f32 0.001, %v11028_v28  ;;  %v7142_v6 = vsel %vm14954_vm4, %v6954_v17, 0.0  ;;  %11049 = vpow2.f32 %v19078_v60  ;;  %v6450_v57 = vsel %vm14954_vm4, %v19079_v33, %v19036_v19  ;;  %v11312_v60 = vld [vmem:[%s11489_s30 + $0x78] sm:$0xff] }
 0x565   : > { %v11032_v29 = vpop.eup %11031  ;;  %v7404_v45 = vsel %vm311_vm0, %v7142_v6, 0.0  ;;  %11051 = vrcp.f32 %v6013_v12  ;;  %v6956_v0 = vmul.f32 0.6931472, %v11030_v30  ;;  %v16108_v50 = vmul.f32 -1.442695, %v5520_v31  ;;  %v16114_v47 = vpop.xlane.xlu0 %7264  ;;  %v19081_v31 = vld [vmem:[#allocation7_spill] sm:$0xff] }
 0x566   : > { %19077 = vst [vmem:[#allocation92_spill] sm:$0xff] %v16098_v36  ;;  %v11034_v48 = vpop.eup %11033  ;;  %7405 = vadd.xlane.f32.xlu1 %v7404_v45  ;;  %v6016_v28 = vadd.f32 1.0, %v11032_v29  ;;  %11053 = vlog2.f32 %v15798_v13  ;;  %v16111_v17 = vmul.f32 -1.442695, %v5519_v10  ;;  %v6578_v39 = vmul.f32 %v11312_v60, %v6450_v57  ;;  %v19082_v29 = vld [vmem:[#allocation39_spill] sm:$0xff] }
 0x567   : > { %v11036_v33 = vpop.eup %11035  ;;  %v16116_v5 = vadd.f32 0.001, %v11034_v48  ;;  %v7143_v12 = vsel %vm14954_vm4, %v6956_v0, 0.0  ;;  %11055 = vpow2.f32 %v15754_v3  ;;  %v6451_v30 = vsel %vm14954_vm4, %v19081_v31, %v19036_v19  ;;  %v11313_v0 = vld [vmem:[%s11489_s30 + $0x80] sm:$0xff] }
 0x568   : > { %v11038_v10 = vpop.eup %11037  ;;  %v7407_v6 = vsel %vm311_vm0, %v7143_v12, 0.0  ;;  %11057 = vrcp.f32 %v6016_v28  ;;  %v6958_v57 = vmul.f32 0.6931472, %v11036_v33  ;;  %v6706_v45 = vadd.f32 %v6578_v39, %v19082_v29  ;;  %v16131_v9 = vpop.xlane.xlu1 %7267 }
 0x569   : > { %19080 = vst [vmem:[#allocation90_spill] sm:$0xff] %v16116_v5  ;;  %v11040_v60 = vpop.eup %11039  ;;  %7408 = vadd.xlane.f32.xlu0 %v7407_v6  ;;  %v6015_v48 = vadd.f32 1.0, %v11038_v10  ;;  %11059 = vlog2.f32 %v15779_v42  ;;  %v6579_v3 = vmul.f32 %v11313_v0, %v6451_v30  ;;  %v5331_v13 = vadd.f32 %v16076_v41, %v15788_v44  ;;  %v19084_v44 = vld [vmem:[#allocation94_spill] sm:$0xff] }
 0x56a   : > { %v11042_v31 = vpop.eup %11041  ;;  %v16133_v15 = vadd.f32 0.001, %v11040_v60  ;;  %v7144_v28 = vsel %vm14954_vm4, %v6958_v57, 0.0  ;;  %11061 = vpow2.f32 %v15774_v26  ;;  %v7603_v39 = vsel %vm7587_vm5, %v16021_v32, %v6706_v45 }
 0x56b   : > { %v11044_v33 = vpop.eup %11043  ;;  %v7410_v12 = vsel %vm311_vm0, %v7144_v28, 0.0  ;;  %11063 = vrcp.f32 %v6015_v48  ;;  %v6960_v30 = vmul.f32 0.6931472, %v11042_v31  ;;  %7732 = vst.msk [vmem:[%s15682_s28 + $0x78] sm:$0xff] %vm7716_vm6, %v7603_v39  ;;  %v6707_v10 = vadd.f32 %v6579_v3, %v19084_v44  ;;  %v16148_v32 = vpop.xlane.xlu0 %7270 }
 0x56c   : > { %19083 = vst [vmem:[#allocation189_spill] sm:$0xff] %v16133_v15  ;;  %v11046_v6 = vpop.eup %11045  ;;  %7411 = vadd.xlane.f32.xlu1 %v7410_v12  ;;  %v6018_v29 = vadd.f32 1.0, %v11044_v33  ;;  %11065 = vlog2.f32 %v15837_v37  ;;  %v5522_v26 = vadd.f32 2.0, %v5331_v13  ;;  %v5326_v57 = vadd.f32 %v16076_v41, %v15793_v18  ;;  %v19086_v33 = vld [vmem:[#allocation96_spill] sm:$0xff] }
 0x56d   : > { %v11048_v45 = vpop.eup %11047  ;;  %v16150_v60 = vadd.f32 0.001, %v11046_v6  ;;  %v7145_v48 = vsel %vm14954_vm4, %v6960_v30, 0.0  ;;  %11067 = vpow2.f32 %v15791_v24  ;;  %v7604_v0 = vsel %vm7587_vm5, %v16040_v4, %v6707_v10  ;;  %v11314_v6 = vld [vmem:[%s11489_s30 + $0x88] sm:$0xff] }
 0x56e   : > { %v11050_v3 = vpop.eup %11049  ;;  %v7413_v13 = vsel %vm311_vm0, %v7145_v48, 0.0  ;;  %11069 = vrcp.f32 %v6018_v29  ;;  %v6962_v18 = vmul.f32 0.6931472, %v11048_v45  ;;  %7733 = vst.msk [vmem:[%s15682_s28 + $0x80] sm:$0xff] %vm7716_vm6, %v7604_v0  ;;  %v16161_v31 = vmul.f32 -1.442695, %v5522_v26  ;;  %v16168_v12 = vpop.xlane.xlu1 %7273 }
 0x56f   : > { %19085 = vst [vmem:[#allocation93_spill] sm:$0xff] %v16150_v60  ;;  %v11052_v28 = vpop.eup %11051  ;;  %7414 = vadd.xlane.f32.xlu0 %v7413_v13  ;;  %v6017_v39 = vadd.f32 1.0, %v11050_v3  ;;  %11071 = vlog2.f32 %v15818_v46  ;;  %v5521_v24 = vadd.f32 2.0, %v5326_v57  ;;  %v6452_v4 = vsel %vm14954_vm4, %v19086_v33, %v19036_v19  ;;  %v19088_v13 = vld [vmem:[#allocation91_spill] sm:$0xff] }
 0x570   : > { %v11054_v30 = vpop.eup %11053  ;;  %v16170_v44 = vadd.f32 0.001, %v11052_v28  ;;  %v7146_v10 = vsel %vm14954_vm4, %v6962_v18, 0.0  ;;  %11073 = vpow2.f32 %v15814_v23  ;;  %v6580_v29 = vmul.f32 %v11314_v6, %v6452_v4  ;;  %v19089_v18 = vld [vmem:[#allocation12_spill] sm:$0xff] }
 0x571   : > { %v11056_v26 = vpop.eup %11055  ;;  %v7416_v57 = vsel %vm311_vm0, %v7146_v10, 0.0  ;;  %11075 = vrcp.f32 %v6017_v39  ;;  %v6964_v45 = vmul.f32 0.6931472, %v11054_v30  ;;  %v16177_v48 = vmul.f32 -1.442695, %v5521_v24  ;;  %v16185_v33 = vpop.xlane.xlu0 %7276  ;;  %v11315_v30 = vld [vmem:[%s11489_s30 + $0x90] sm:$0xff] }
 0x572   : > { %19087 = vst [vmem:[#allocation7_spill] sm:$0xff] %v16170_v44  ;;  %v11058_v0 = vpop.eup %11057  ;;  %7417 = vadd.xlane.f32.xlu1 %v7416_v57  ;;  %v6020_v3 = vadd.f32 1.0, %v11056_v26  ;;  %11077 = vlog2.f32 %v15879_v38  ;;  %v6708_v28 = vadd.f32 %v6580_v29, %v19088_v13  ;;  %v6453_v23 = vsel %vm14954_vm4, %v19089_v18, %v19036_v19  ;;  %v19091_v18 = vld [vmem:[#allocation193_spill] sm:$0xff] }
 0x573   : > { %v11060_v4 = vpop.eup %11059  ;;  %v16187_v39 = vadd.f32 0.001, %v11058_v0  ;;  %v7147_v24 = vsel %vm14954_vm4, %v6964_v45, 0.0  ;;  %11079 = vpow2.f32 %v15829_v21  ;;  %v6581_v10 = vmul.f32 %v11315_v30, %v6453_v23  ;;  %v19090_v45 = vld [vmem:[#allocation102_spill] sm:$0xff] }
 0x574   : > { %v11062_v6 = vpop.eup %11061  ;;  %v7419_v29 = vsel %vm311_vm0, %v7147_v24, 0.0  ;;  %11081 = vrcp.f32 %v6020_v3  ;;  %v6966_v26 = vmul.f32 0.6931472, %v11060_v4  ;;  %v7605_v57 = vsel %vm7587_vm5, %v16057_v14, %v6708_v28  ;;  %v16203_v24 = vpop.xlane.xlu1 %7279  ;;  %v19092_v28 = vld [vmem:[#allocation49_spill] sm:$0xff]  ;;  %v19093_v30 = vld [vmem:[#allocation194_spill] sm:$0xff] }
 0x575   : > { %v11064_v13 = vpop.eup %11063  ;;  %7420 = vadd.xlane.f32.xlu0 %v7419_v29  ;;  %v6019_v0 = vadd.f32 1.0, %v11062_v6  ;;  %11083 = vlog2.f32 %v15858_v56  ;;  %7734 = vst.msk [vmem:[%s15682_s28 + $0x88] sm:$0xff] %vm7716_vm6, %v7605_v57  ;;  %v6709_v21 = vadd.f32 %v6581_v10, %v19090_v45  ;;  %v5341_v23 = vadd.f32 %v16076_v41, %v19091_v18 }
 0x576   : > { %v11066_v3 = vpop.eup %11065  ;;  %v16205_v4 = vadd.f32 0.001, %v11064_v13  ;;  %v7148_v14 = vsel %vm14954_vm4, %v6966_v26, 0.0  ;;  %11085 = vpow2.f32 %v19092_v28  ;;  %v5336_v6 = vadd.f32 %v16076_v41, %v19093_v30 }
 0x577   : > { %v11068_v29 = vpop.eup %11067  ;;  %v7422_v10 = vsel %vm311_vm0, %v7148_v14, 0.0  ;;  %11087 = vrcp.f32 %v6019_v0  ;;  %v6968_v57 = vmul.f32 0.6931472, %v11066_v3  ;;  %v7606_v45 = vsel %vm7587_vm5, %v16080_v2, %v6709_v21  ;;  %v16219_v56 = vpop.xlane.xlu0 %7282  ;;  %v19095_v2 = vld [vmem:[#allocation4_spill] sm:$0xff] }
 0x578   : > { %v11070_v18 = vpop.eup %11069  ;;  %7423 = vadd.xlane.f32.xlu1 %v7422_v10  ;;  %v6022_v13 = vadd.f32 1.0, %v11068_v29  ;;  %11089 = vlog2.f32 %v15916_v40  ;;  %7735 = vst.msk [vmem:[%s15682_s28 + $0x90] sm:$0xff] %vm7716_vm6, %v7606_v45  ;;  %v5524_v26 = vadd.f32 2.0, %v5341_v23  ;;  %v5523_v28 = vadd.f32 2.0, %v5336_v6 }
 0x579   : > { %v11072_v30 = vpop.eup %11071  ;;  %v16221_v14 = vadd.f32 0.001, %v11070_v18  ;;  %v7149_v0 = vsel %vm14954_vm4, %v6968_v57, 0.0  ;;  %11091 = vpow2.f32 %v15907_v7  ;;  %v6454_v21 = vsel %vm14954_vm4, %v19095_v2, %v19036_v19  ;;  %v11316_v7 = vld [vmem:[%s11489_s30 + $0x98] sm:$0xff] }
 0x57a   : > { %v11074_v3 = vpop.eup %11073  ;;  %v7425_v23 = vsel %vm311_vm0, %v7149_v0, 0.0  ;;  %11093 = vrcp.f32 %v6022_v13  ;;  %v6970_v6 = vmul.f32 0.6931472, %v11072_v30  ;;  %v16231_v29 = vmul.f32 -1.442695, %v5524_v26  ;;  %v16237_v40 = vpop.xlane.xlu1 %7285  ;;  %v19096_v26 = vld [vmem:[#allocation20_spill] sm:$0xff] }
 0x57b   : > { %19094 = vst [vmem:[#allocation39_spill] sm:$0xff] %v16221_v14  ;;  %v11076_v10 = vpop.eup %11075  ;;  %7426 = vadd.xlane.f32.xlu0 %v7425_v23  ;;  %v6021_v45 = vadd.f32 1.0, %v11074_v3  ;;  %11095 = vlog2.f32 %v15897_v49  ;;  %v16234_v57 = vmul.f32 -1.442695, %v5523_v28  ;;  %v6582_v18 = vmul.f32 %v11316_v7, %v6454_v21  ;;  %v19097_v3 = vld [vmem:[#allocation6_spill] sm:$0xff]  ;;  %v19098_v49 = vld [vmem:[#allocation95_spill] sm:$0xff] }
 0x57c   : > { %v11078_v2 = vpop.eup %11077  ;;  %v16239_v38 = vadd.f32 0.001, %v11076_v10  ;;  %v7150_v13 = vsel %vm14954_vm4, %v6970_v6, 0.0  ;;  %11097 = vpow2.f32 %v15923_v20  ;;  %v6455_v30 = vsel %vm14954_vm4, %v19096_v26, %v19036_v19  ;;  %v11317_v6 = vld [vmem:[%s11489_s30 + $0xa0] sm:$0xff] }
 0x57d   : > { %v11080_v28 = vpop.eup %11079  ;;  %v7428_v0 = vsel %vm311_vm0, %v7150_v13, 0.0  ;;  %11099 = vrcp.f32 %v6021_v45  ;;  %v6972_v21 = vmul.f32 0.6931472, %v11078_v2  ;;  %v6710_v23 = vadd.f32 %v6582_v18, %v19097_v3  ;;  %v16254_v37 = vpop.xlane.xlu0 %7288 }
 0x57e   : > { %v11082_v7 = vpop.eup %11081  ;;  %7429 = vadd.xlane.f32.xlu1 %v7428_v0  ;;  %v6024_v10 = vadd.f32 1.0, %v11080_v28  ;;  %11101 = vlog2.f32 %v15952_v55  ;;  %v6583_v20 = vmul.f32 %v11317_v6, %v6455_v30  ;;  %v5351_v46 = vadd.f32 %v16076_v41, %v19098_v49  ;;  %v19100_v49 = vld [vmem:[#allocation104_spill] sm:$0xff] }
 0x57f   : > { %v11084_v26 = vpop.eup %11083  ;;  %v16256_v42 = vadd.f32 0.001, %v11082_v7  ;;  %v7151_v45 = vsel %vm14954_vm4, %v6972_v21, 0.0  ;;  %11103 = vpow2.f32 %v15977_v35  ;;  %v7607_v18 = vsel %vm7587_vm5, %v16096_v22, %v6710_v23  ;;  %v19101_v21 = vld [vmem:[#allocation100_spill] sm:$0xff] }
 0x580   : > { %v11086_v2 = vpop.eup %11085  ;;  %v7431_v13 = vsel %vm311_vm0, %v7151_v45, 0.0  ;;  %11105 = vrcp.f32 %v6024_v10  ;;  %v6974_v30 = vmul.f32 0.6931472, %v11084_v26  ;;  %7736 = vst.msk [vmem:[%s15682_s28 + $0x98] sm:$0xff] %vm7716_vm6, %v7607_v18  ;;  %v6711_v28 = vadd.f32 %v6583_v20, %v19100_v49  ;;  %v16271_v22 = vpop.xlane.xlu1 %7291 }
 0x581   : > { %19099 = vst [vmem:[#allocation94_spill] sm:$0xff] %v16256_v42  ;;  %v11088_v0 = vpop.eup %11087  ;;  %7432 = vadd.xlane.f32.xlu0 %v7431_v13  ;;  %v6023_v3 = vadd.f32 1.0, %v11086_v2  ;;  %11107 = vlog2.f32 %v15933_v34  ;;  %v5526_v35 = vadd.f32 2.0, %v5351_v46  ;;  %v5346_v7 = vadd.f32 %v16076_v41, %v19101_v21 }
 0x582   : > { %v11090_v23 = vpop.eup %11089  ;;  %v16273_v6 = vadd.f32 0.001, %v11088_v0  ;;  %v7152_v10 = vsel %vm14954_vm4, %v6974_v30, 0.0  ;;  %11109 = vpow2.f32 %v15982_v53  ;;  %v7608_v20 = vsel %vm7587_vm5, %v16114_v47, %v6711_v28  ;;  %v19102_v30 = vld [vmem:[#allocation16_spill] sm:$0xff] }
 0x583   : > { %v11092_v26 = vpop.eup %11091  ;;  %v7434_v46 = vsel %vm311_vm0, %v7152_v10, 0.0  ;;  %11111 = vrcp.f32 %v6023_v3  ;;  %v6976_v45 = vmul.f32 0.6931472, %v11090_v23  ;;  %7737 = vst.msk [vmem:[%s15682_s28 + $0xa0] sm:$0xff] %vm7716_vm6, %v7608_v20  ;;  %v16284_v18 = vmul.f32 -1.442695, %v5526_v35  ;;  %v16291_v49 = vpop.xlane.xlu0 %7294 }
 0x584   : > { %v11094_v2 = vpop.eup %11093  ;;  %7435 = vadd.xlane.f32.xlu1 %v7434_v46  ;;  %v6026_v13 = vadd.f32 1.0, %v11092_v26  ;;  %11113 = vlog2.f32 %v15987_v59  ;;  %v5525_v53 = vadd.f32 2.0, %v5346_v7  ;;  %v6456_v47 = vsel %vm14954_vm4, %v19102_v30, %v19036_v19  ;;  %v11318_v35 = vld [vmem:[%s11489_s30 + $0xa8] sm:$0xff] }
 0x585   : > { %v11096_v28 = vpop.eup %11095  ;;  %v16293_v0 = vadd.f32 0.001, %v11094_v2  ;;  %v7153_v3 = vsel %vm14954_vm4, %v6976_v45, 0.0  ;;  %11115 = vpow2.f32 %v16033_v16  ;;  %v6584_v21 = vmul.f32 %v11318_v35, %v6456_v47  ;;  %v19104_v2 = vld [vmem:[#allocation103_spill] sm:$0xff] }
 0x586   : > { %v11098_v23 = vpop.eup %11097  ;;  %v7437_v7 = vsel %vm311_vm0, %v7153_v3, 0.0  ;;  %11117 = vrcp.f32 %v6026_v13  ;;  %v6978_v10 = vmul.f32 0.6931472, %v11096_v28  ;;  %v16300_v20 = vmul.f32 -1.442695, %v5525_v53  ;;  %v19105_v45 = vld [vmem:[#allocation143_spill] sm:$0xff]  ;;  %v16308_v47 = vpop.xlane.xlu1 %7297 }
 0x587   : > { %19103 = vst [vmem:[#allocation96_spill] sm:$0xff] %v16293_v0  ;;  %v11100_v26 = vpop.eup %11099  ;;  %7438 = vadd.xlane.f32.xlu0 %v7437_v7  ;;  %v6025_v46 = vadd.f32 1.0, %v11098_v23  ;;  %11119 = vlog2.f32 %v15967_v58  ;;  %v6712_v30 = vadd.f32 %v6584_v21, %v19104_v2  ;;  %v6457_v16 = vsel %vm14954_vm4, %v19105_v45, %v19036_v19  ;;  %v11319_v28 = vld [vmem:[%s11489_s30 + $0xb0] sm:$0xff]  ;;  %v19108_v58 = vld [vmem:[#allocation37_spill] sm:$0xff] }
 0x588   : > { %v11102_v3 = vpop.eup %11101  ;;  %v16310_v13 = vadd.f32 0.001, %v11100_v26  ;;  %v7154_v53 = vsel %vm14954_vm4, %v6978_v10, 0.0  ;;  %11121 = vpow2.f32 %v16049_v61  ;;  %v6585_v35 = vmul.f32 %v11319_v28, %v6457_v16  ;;  %v19107_v10 = vld [vmem:[#allocation105_spill] sm:$0xff] }
 0x589   : > { %v11104_v23 = vpop.eup %11103  ;;  %v7440_v21 = vsel %vm311_vm0, %v7154_v53, 0.0  ;;  %11123 = vrcp.f32 %v6025_v46  ;;  %v6980_v7 = vmul.f32 0.6931472, %v11102_v3  ;;  %v7609_v2 = vsel %vm7587_vm5, %v16131_v9, %v6712_v30  ;;  %v16326_v53 = vpop.xlane.xlu0 %7300 }
 0x58a   : > { %19106 = vst [vmem:[#allocation91_spill] sm:$0xff] %v16310_v13  ;;  %v11106_v45 = vpop.eup %11105  ;;  %7441 = vadd.xlane.f32.xlu1 %v7440_v21  ;;  %v6028_v26 = vadd.f32 1.0, %v11104_v23  ;;  %11125 = vlog2.f32 %v16023_v62  ;;  %7738 = vst.msk [vmem:[%s15682_s28 + $0xa8] sm:$0xff] %vm7716_vm6, %v7609_v2  ;;  %v6713_v61 = vadd.f32 %v6585_v35, %v19107_v10  ;;  %v5361_v16 = vadd.f32 %v16076_v41, %v19108_v58 }
 0x58b   : > { %v11108_v46 = vpop.eup %11107  ;;  %v16328_v3 = vadd.f32 0.001, %v11106_v45  ;;  %v7155_v9 = vsel %vm14954_vm4, %v6980_v7, 0.0  ;;  %11127 = vpow2.f32 %v16108_v50  ;;  %v5356_v30 = vadd.f32 %v16076_v41, %v15873_v11 }
 0x58c   : > { %v11110_v28 = vpop.eup %11109  ;;  %v7443_v35 = vsel %vm311_vm0, %v7155_v9, 0.0  ;;  %11129 = vrcp.f32 %v6028_v26  ;;  %v6982_v23 = vmul.f32 0.6931472, %v11108_v46  ;;  %v7610_v58 = vsel %vm7587_vm5, %v16148_v32, %v6713_v61  ;;  %v16342_v45 = vpop.xlane.xlu1 %7303  ;;  %v19110_v32 = vld [vmem:[#allocation142_spill] sm:$0xff] }
 0x58d   : > { %19109 = vst [vmem:[#allocation12_spill] sm:$0xff] %v16328_v3  ;;  %v11112_v21 = vpop.eup %11111  ;;  %7444 = vadd.xlane.f32.xlu0 %v7443_v35  ;;  %v6027_v2 = vadd.f32 1.0, %v11110_v28  ;;  %11131 = vlog2.f32 %v16006_v51  ;;  %7739 = vst.msk [vmem:[%s15682_s28 + $0xb0] sm:$0xff] %vm7716_vm6, %v7610_v58  ;;  %v5528_v50 = vadd.f32 2.0, %v5361_v16  ;;  %v5527_v7 = vadd.f32 2.0, %v5356_v30 }
 0x58e   : > { %v11114_v11 = vpop.eup %11113  ;;  %v16344_v10 = vadd.f32 0.001, %v11112_v21  ;;  %v7156_v26 = vsel %vm14954_vm4, %v6982_v23, 0.0  ;;  %11133 = vpow2.f32 %v16111_v17  ;;  %v6458_v61 = vsel %vm14954_vm4, %v19110_v32, %v19036_v19  ;;  %v11320_v17 = vld [vmem:[%s11489_s30 + $0xb8] sm:$0xff] }
 0x58f   : > { %v11116_v46 = vpop.eup %11115  ;;  %v7446_v16 = vsel %vm311_vm0, %v7156_v26, 0.0  ;;  %11135 = vrcp.f32 %v6027_v2  ;;  %v6984_v9 = vmul.f32 0.6931472, %v11114_v11  ;;  %v16354_v30 = vmul.f32 -1.442695, %v5528_v50  ;;  %v16360_v21 = vpop.xlane.xlu0 %7306  ;;  %v19112_v50 = vld [vmem:[#allocation145_spill] sm:$0xff] }
 0x590   : > { %v11118_v28 = vpop.eup %11117  ;;  %7447 = vadd.xlane.f32.xlu1 %v7446_v16  ;;  %v6030_v35 = vadd.f32 1.0, %v11116_v46  ;;  %11137 = vlog2.f32 %v16059_v63  ;;  %v16357_v23 = vmul.f32 -1.442695, %v5527_v7  ;;  %v6586_v58 = vmul.f32 %v11320_v17, %v6458_v61  ;;  %v19113_v46 = vld [vmem:[#allocation11_spill] sm:$0xff] }
 0x591   : > { %v11120_v32 = vpop.eup %11119  ;;  %v16362_v51 = vadd.f32 0.001, %v11118_v28  ;;  %v7157_v2 = vsel %vm14954_vm4, %v6984_v9, 0.0  ;;  %11139 = vpow2.f32 %v16161_v31  ;;  %v6459_v11 = vsel %vm14954_vm4, %v19112_v50, %v19036_v19  ;;  %v11321_v9 = vld [vmem:[%s11489_s30 + $0xc0] sm:$0xff] }
 0x592   : > { %v11122_v7 = vpop.eup %11121  ;;  %v7449_v26 = vsel %vm311_vm0, %v7157_v2, 0.0  ;;  %11141 = vrcp.f32 %v6030_v35  ;;  %v6986_v61 = vmul.f32 0.6931472, %v11120_v32  ;;  %v6714_v16 = vadd.f32 %v6586_v58, %v19113_v46  ;;  %v16377_v62 = vpop.xlane.xlu1 %7309 }
 0x593   : > { %19111 = vst [vmem:[#allocation102_spill] sm:$0xff] %v16362_v51  ;;  %v11124_v17 = vpop.eup %11123  ;;  %7450 = vadd.xlane.f32.xlu0 %v7449_v26  ;;  %v6029_v28 = vadd.f32 1.0, %v11122_v7  ;;  %11143 = vlog2.f32 %v16042_v8  ;;  %v6587_v31 = vmul.f32 %v11321_v9, %v6459_v11  ;;  %v5371_v63 = vadd.f32 %v16076_v41, %v15890_v27  ;;  %v19115_v27 = vld [vmem:[#allocation107_spill] sm:$0xff] }
 0x594   : > { %v11126_v50 = vpop.eup %11125  ;;  %v16379_v59 = vadd.f32 0.001, %v11124_v17  ;;  %v7158_v35 = vsel %vm14954_vm4, %v6986_v61, 0.0  ;;  %11145 = vpow2.f32 %v16177_v48  ;;  %v7611_v58 = vsel %vm7587_vm5, %v16168_v12, %v6714_v16  ;;  %v19116_v61 = vld [vmem:[#allocation27_spill] sm:$0xff] }
 0x595   : > { %v11128_v32 = vpop.eup %11127  ;;  %v7452_v2 = vsel %vm311_vm0, %v7158_v35, 0.0  ;;  %11147 = vrcp.f32 %v6029_v28  ;;  %v6988_v11 = vmul.f32 0.6931472, %v11126_v50  ;;  %7740 = vst.msk [vmem:[%s15682_s28 + $0xb8] sm:$0xff] %vm7716_vm6, %v7611_v58  ;;  %v6715_v7 = vadd.f32 %v6587_v31, %v19115_v27  ;;  %v16394_v12 = vpop.xlane.xlu0 %7312 }
 0x596   : > { %19114 = vst [vmem:[#allocation193_spill] sm:$0xff] %v16379_v59  ;;  %v11130_v26 = vpop.eup %11129  ;;  %7453 = vadd.xlane.f32.xlu1 %v7452_v2  ;;  %v6032_v46 = vadd.f32 1.0, %v11128_v32  ;;  %11149 = vlog2.f32 %v16098_v36  ;;  %v5530_v48 = vadd.f32 2.0, %v5371_v63  ;;  %v5366_v17 = vadd.f32 %v16076_v41, %v19116_v61 }
 0x597   : > { %v11132_v16 = vpop.eup %11131  ;;  %v16396_v9 = vadd.f32 0.001, %v11130_v26  ;;  %v7159_v28 = vsel %vm14954_vm4, %v6988_v11, 0.0  ;;  %11151 = vpow2.f32 %v16231_v29  ;;  %v7612_v31 = vsel %vm7587_vm5, %v16185_v33, %v6715_v7  ;;  %v19117_v11 = vld [vmem:[#allocation144_spill] sm:$0xff] }
 0x598   : > { %v11134_v50 = vpop.eup %11133  ;;  %v7455_v63 = vsel %vm311_vm0, %v7159_v28, 0.0  ;;  %11153 = vrcp.f32 %v6032_v46  ;;  %v6990_v35 = vmul.f32 0.6931472, %v11132_v16  ;;  %7741 = vst.msk [vmem:[%s15682_s28 + $0xc0] sm:$0xff] %vm7716_vm6, %v7612_v31  ;;  %v16407_v58 = vmul.f32 -1.442695, %v5530_v48  ;;  %v16414_v27 = vpop.xlane.xlu1 %7315 }
 0x599   : > { %v11136_v32 = vpop.eup %11135  ;;  %7456 = vadd.xlane.f32.xlu0 %v7455_v63  ;;  %v6031_v2 = vadd.f32 1.0, %v11134_v50  ;;  %11155 = vlog2.f32 %v16082_v54  ;;  %v5529_v29 = vadd.f32 2.0, %v5366_v17  ;;  %v6460_v33 = vsel %vm14954_vm4, %v19117_v11, %v19036_v19  ;;  %v11322_v48 = vld [vmem:[%s11489_s30 + $0xc8] sm:$0xff] }
 0x59a   : > { %v11138_v7 = vpop.eup %11137  ;;  %v16416_v26 = vadd.f32 0.001, %v11136_v32  ;;  %v7160_v46 = vsel %vm14954_vm4, %v6990_v35, 0.0  ;;  %11157 = vpow2.f32 %v16234_v57  ;;  %v6588_v61 = vmul.f32 %v11322_v48, %v6460_v33  ;;  %v19119_v32 = vld [vmem:[#allocation106_spill] sm:$0xff]  ;;  %v19120_v35 = vld [vmem:[#allocation147_spill] sm:$0xff] }
 0x59b   : > { %v11140_v16 = vpop.eup %11139  ;;  %v7458_v17 = vsel %vm311_vm0, %v7160_v46, 0.0  ;;  %11159 = vrcp.f32 %v6031_v2  ;;  %v6992_v28 = vmul.f32 0.6931472, %v11138_v7  ;;  %v16423_v31 = vmul.f32 -1.442695, %v5529_v29  ;;  %v16431_v33 = vpop.xlane.xlu0 %7318  ;;  %v11323_v7 = vld [vmem:[%s11489_s30 + $0xd0] sm:$0xff] }
 0x59c   : > { %19118 = vst [vmem:[#allocation49_spill] sm:$0xff] %v16416_v26  ;;  %v11142_v50 = vpop.eup %11141  ;;  %7459 = vadd.xlane.f32.xlu1 %v7458_v17  ;;  %v6034_v63 = vadd.f32 1.0, %v11140_v16  ;;  %11161 = vlog2.f32 %v16133_v15  ;;  %v6716_v11 = vadd.f32 %v6588_v61, %v19119_v32  ;;  %v6461_v57 = vsel %vm14954_vm4, %v19120_v35, %v19036_v19  ;;  %v19122_v15 = vld [vmem:[#allocation30_spill] sm:$0xff] }
 0x59d   : > { %v11144_v46 = vpop.eup %11143  ;;  %v16433_v2 = vadd.f32 0.001, %v11142_v50  ;;  %v7161_v29 = vsel %vm14954_vm4, %v6992_v28, 0.0  ;;  %11163 = vpow2.f32 %v16284_v18  ;;  %v6589_v48 = vmul.f32 %v11323_v7, %v6461_v57  ;;  %v19121_v28 = vld [vmem:[#allocation109_spill] sm:$0xff] }
 0x59e   : > { %v11146_v16 = vpop.eup %11145  ;;  %v7461_v61 = vsel %vm311_vm0, %v7161_v29, 0.0  ;;  %11165 = vrcp.f32 %v6034_v63  ;;  %v6994_v17 = vmul.f32 0.6931472, %v11144_v46  ;;  %v7613_v32 = vsel %vm7587_vm5, %v16203_v24, %v6716_v11  ;;  %v16449_v29 = vpop.xlane.xlu1 %7321  ;;  %v19123_v11 = vld [vmem:[#allocation199_spill] sm:$0xff] }
 0x59f   : > { %v11148_v35 = vpop.eup %11147  ;;  %7462 = vadd.xlane.f32.xlu0 %v7461_v61  ;;  %v6033_v50 = vadd.f32 1.0, %v11146_v16  ;;  %11167 = vlog2.f32 %v16116_v5  ;;  %7742 = vst.msk [vmem:[%s15682_s28 + $0xc8] sm:$0xff] %vm7716_vm6, %v7613_v32  ;;  %v6717_v18 = vadd.f32 %v6589_v48, %v19121_v28  ;;  %v5381_v57 = vadd.f32 %v16076_v41, %v19122_v15 }
 0x5a0   : > { %v11150_v63 = vpop.eup %11149  ;;  %v16451_v46 = vadd.f32 0.001, %v11148_v35  ;;  %v7162_v24 = vsel %vm14954_vm4, %v6994_v17, 0.0  ;;  %11169 = vpow2.f32 %v16300_v20  ;;  %v5376_v7 = vadd.f32 %v16076_v41, %v19123_v11 }
 0x5a1   : > { %v11152_v16 = vpop.eup %11151  ;;  %v7464_v48 = vsel %vm311_vm0, %v7162_v24, 0.0  ;;  %11171 = vrcp.f32 %v6033_v50  ;;  %v6996_v61 = vmul.f32 0.6931472, %v11150_v63  ;;  %v7614_v15 = vsel %vm7587_vm5, %v16219_v56, %v6717_v18  ;;  %v16465_v28 = vpop.xlane.xlu0 %7324  ;;  %v19125_v56 = vld [vmem:[#allocation146_spill] sm:$0xff] }
 0x5a2   : > { %v11154_v32 = vpop.eup %11153  ;;  %7465 = vadd.xlane.f32.xlu1 %v7464_v48  ;;  %v6036_v35 = vadd.f32 1.0, %v11152_v16  ;;  %11173 = vlog2.f32 %v16170_v44  ;;  %7743 = vst.msk [vmem:[%s15682_s28 + $0xd0] sm:$0xff] %vm7716_vm6, %v7614_v15  ;;  %v5532_v20 = vadd.f32 2.0, %v5381_v57  ;;  %v5531_v17 = vadd.f32 2.0, %v5376_v7 }
 0x5a3   : > { %v11156_v11 = vpop.eup %11155  ;;  %v16467_v24 = vadd.f32 0.001, %v11154_v32  ;;  %v7163_v50 = vsel %vm14954_vm4, %v6996_v61, 0.0  ;;  %11175 = vpow2.f32 %v16354_v30  ;;  %v6462_v18 = vsel %vm14954_vm4, %v19125_v56, %v19036_v19  ;;  %v11324_v30 = vld [vmem:[%s11489_s30 + $0xd8] sm:$0xff] }
 0x5a4   : > { %v11158_v63 = vpop.eup %11157  ;;  %v7467_v57 = vsel %vm311_vm0, %v7163_v50, 0.0  ;;  %11177 = vrcp.f32 %v6036_v35  ;;  %v6998_v7 = vmul.f32 0.6931472, %v11156_v11  ;;  %v16477_v16 = vmul.f32 -1.442695, %v5532_v20  ;;  %v16483_v44 = vpop.xlane.xlu1 %7327  ;;  %v19127_v20 = vld [vmem:[#allocation149_spill] sm:$0xff] }
 0x5a5   : > { %19124 = vst [vmem:[#allocation194_spill] sm:$0xff] %v16467_v24  ;;  %v11160_v48 = vpop.eup %11159  ;;  %7468 = vadd.xlane.f32.xlu0 %v7467_v57  ;;  %v6035_v15 = vadd.f32 1.0, %v11158_v63  ;;  %11179 = vlog2.f32 %v16150_v60  ;;  %v16480_v61 = vmul.f32 -1.442695, %v5531_v17  ;;  %v6590_v32 = vmul.f32 %v11324_v30, %v6462_v18  ;;  %v19128_v63 = vld [vmem:[#allocation108_spill] sm:$0xff] }
 0x5a6   : > { %v11162_v56 = vpop.eup %11161  ;;  %v16485_v5 = vadd.f32 0.001, %v11160_v48  ;;  %v7164_v35 = vsel %vm14954_vm4, %v6998_v7, 0.0  ;;  %11181 = vpow2.f32 %v16357_v23  ;;  %v6463_v11 = vsel %vm14954_vm4, %v19127_v20, %v19036_v19  ;;  %v11325_v7 = vld [vmem:[%s11489_s30 + $0xe0] sm:$0xff]  ;;  %v19129_v60 = vld [vmem:[#allocation24_spill] sm:$0xff] }
 0x5a7   : > { %v11164_v17 = vpop.eup %11163  ;;  %v7470_v50 = vsel %vm311_vm0, %v7164_v35, 0.0  ;;  %11183 = vrcp.f32 %v6035_v15  ;;  %v7000_v18 = vmul.f32 0.6931472, %v11162_v56  ;;  %v6718_v57 = vadd.f32 %v6590_v32, %v19128_v63  ;;  %v16500_v36 = vpop.xlane.xlu0 %7330 }
 0x5a8   : > { %19126 = vst [vmem:[#allocation4_spill] sm:$0xff] %v16485_v5  ;;  %v11166_v30 = vpop.eup %11165  ;;  %7471 = vadd.xlane.f32.xlu1 %v7470_v50  ;;  %v6038_v48 = vadd.f32 1.0, %v11164_v17  ;;  %11185 = vlog2.f32 %v16205_v4  ;;  %v6591_v23 = vmul.f32 %v11325_v7, %v6463_v11  ;;  %v5391_v54 = vadd.f32 %v16076_v41, %v19129_v60  ;;  %v19130_v60 = vld [vmem:[#allocation111_spill] sm:$0xff] }
 0x5a9   : > { %v11168_v20 = vpop.eup %11167  ;;  %v16502_v8 = vadd.f32 0.001, %v11166_v30  ;;  %v7165_v15 = vsel %vm14954_vm4, %v7000_v18, 0.0  ;;  %11187 = vpow2.f32 %v16407_v58  ;;  %v7615_v32 = vsel %vm7587_vm5, %v16237_v40, %v6718_v57  ;;  %v19131_v18 = vld [vmem:[#allocation89_spill] sm:$0xff] }
 0x5aa   : > { %v11170_v56 = vpop.eup %11169  ;;  %v7473_v35 = vsel %vm311_vm0, %v7165_v15, 0.0  ;;  %11189 = vrcp.f32 %v6038_v48  ;;  %v7002_v11 = vmul.f32 0.6931472, %v11168_v20  ;;  %7744 = vst.msk [vmem:[%s15682_s28 + $0xd8] sm:$0xff] %vm7716_vm6, %v7615_v32  ;;  %v6719_v17 = vadd.f32 %v6591_v23, %v19130_v60  ;;  %v16517_v40 = vpop.xlane.xlu1 %7333 }
 0x5ab   : > { %v11172_v50 = vpop.eup %11171  ;;  %7474 = vadd.xlane.f32.xlu0 %v7473_v35  ;;  %v6037_v63 = vadd.f32 1.0, %v11170_v56  ;;  %11191 = vlog2.f32 %v16187_v39  ;;  %v5534_v58 = vadd.f32 2.0, %v5391_v54  ;;  %v5386_v30 = vadd.f32 %v16076_v41, %v19131_v18 }
 0x5ac   : > { %v11174_v57 = vpop.eup %11173  ;;  %v16519_v7 = vadd.f32 0.001, %v11172_v50  ;;  %v7166_v48 = vsel %vm14954_vm4, %v7002_v11, 0.0  ;;  %11193 = vpow2.f32 %v16423_v31  ;;  %v7616_v23 = vsel %vm7587_vm5, %v16254_v37, %v6719_v17  ;;  %v19133_v31 = vld [vmem:[#allocation148_spill] sm:$0xff] }
 0x5ad   : > { %v11176_v20 = vpop.eup %11175  ;;  %v7476_v54 = vsel %vm311_vm0, %v7166_v48, 0.0  ;;  %11195 = vrcp.f32 %v6037_v63  ;;  %v7004_v15 = vmul.f32 0.6931472, %v11174_v57  ;;  %7745 = vst.msk [vmem:[%s15682_s28 + $0xe0] sm:$0xff] %vm7716_vm6, %v7616_v23  ;;  %v8679_v32 = vmul.f32 -1.442695, %v5534_v58  ;;  %v16535_v60 = vpop.xlane.xlu0 %7336 }
 0x5ae   : > { %19132 = vst [vmem:[#allocation20_spill] sm:$0xff] %v16519_v7  ;;  %v11178_v56 = vpop.eup %11177  ;;  %7477 = vadd.xlane.f32.xlu1 %v7476_v54  ;;  %v6040_v35 = vadd.f32 1.0, %v11176_v20  ;;  %11197 = vlog2.f32 %v16239_v38  ;;  %v5533_v11 = vadd.f32 2.0, %v5386_v30  ;;  %v6464_v37 = vsel %vm14954_vm4, %v19133_v31, %v19036_v19  ;;  %v11326_v58 = vld [vmem:[%s11489_s30 + $0xe8] sm:$0xff] }
 0x5af   : > { %v11180_v17 = vpop.eup %11179  ;;  %v16537_v50 = vadd.f32 0.001, %v11178_v56  ;;  %v7167_v63 = vsel %vm14954_vm4, %v7004_v15, 0.0  ;;  %11199 = vpow2.f32 %v16477_v16  ;;  %v6592_v18 = vmul.f32 %v11326_v58, %v6464_v37  ;;  %v19134_v56 = vld [vmem:[#allocation110_spill] sm:$0xff]  ;;  %v19135_v15 = vld [vmem:[#allocation151_spill] sm:$0xff] }
 0x5b0   : > { %v11182_v57 = vpop.eup %11181  ;;  %v7479_v30 = vsel %vm311_vm0, %v7167_v63, 0.0  ;;  %11201 = vrcp.f32 %v6040_v35  ;;  %v7006_v48 = vmul.f32 0.6931472, %v11180_v17  ;;  %v8678_v23 = vmul.f32 -1.442695, %v5533_v11  ;;  %v16550_v37 = vpop.xlane.xlu1 %7339  ;;  %v11327_v11 = vld [vmem:[%s11489_s30 + $0xf0] sm:$0xff] }
 0x5b1   : > { %v11184_v20 = vpop.eup %11183  ;;  %7480 = vadd.xlane.f32.xlu0 %v7479_v30  ;;  %v6039_v54 = vadd.f32 1.0, %v11182_v57  ;;  %11203 = vlog2.f32 %v16221_v14  ;;  %v6720_v31 = vadd.f32 %v6592_v18, %v19134_v56  ;;  %v6465_v16 = vsel %vm14954_vm4, %v19135_v15, %v19036_v19  ;;  %v19137_v14 = vld [vmem:[#allocation34_spill] sm:$0xff] }
 0x5b2   : > { %v11186_v58 = vpop.eup %11185  ;;  %v16552_v63 = vadd.f32 0.001, %v11184_v20  ;;  %v7168_v35 = vsel %vm14954_vm4, %v7006_v48, 0.0  ;;  %11205 = vpow2.f32 %v16480_v61  ;;  %v6593_v17 = vmul.f32 %v11327_v11, %v6465_v16  ;;  %v19136_v48 = vld [vmem:[#allocation113_spill] sm:$0xff] }
 0x5b3   : > { %v11188_v57 = vpop.eup %11187  ;;  %v7482_v18 = vsel %vm311_vm0, %v7168_v35, 0.0  ;;  %11207 = vrcp.f32 %v6039_v54  ;;  %v7008_v30 = vmul.f32 0.6931472, %v11186_v58  ;;  %v7617_v56 = vsel %vm7587_vm5, %v16271_v22, %v6720_v31  ;;  %v16568_v35 = vpop.xlane.xlu0 %7342 }
 0x5b4   : > { %v11190_v15 = vpop.eup %11189  ;;  %7483 = vadd.xlane.f32.xlu1 %v7482_v18  ;;  %v6042_v20 = vadd.f32 1.0, %v11188_v57  ;;  %11209 = vlog2.f32 %v16273_v6  ;;  %7746 = vst.msk [vmem:[%s15682_s28 + $0xe8] sm:$0xff] %vm7716_vm6, %v7617_v56  ;;  %v6721_v61 = vadd.f32 %v6593_v17, %v19136_v48  ;;  %v5401_v16 = vadd.f32 %v16076_v41, %v19137_v14 }
 0x5b5   : > { %v11192_v54 = vpop.eup %11191  ;;  %v16570_v58 = vadd.f32 0.001, %v11190_v15  ;;  %v7169_v22 = vsel %vm14954_vm4, %v7008_v30, 0.0  ;;  %11211 = vpow2.f32 %v8679_v32  ;;  %v5396_v31 = vadd.f32 %v16076_v41, %v15998_v25 }
 0x5b6   : > { %v11194_v11 = vpop.eup %11193  ;;  %v7485_v57 = vsel %vm311_vm0, %v7169_v22, 0.0  ;;  %11213 = vrcp.f32 %v6042_v20  ;;  %v7010_v17 = vmul.f32 0.6931472, %v11192_v54  ;;  %v7618_v14 = vsel %vm7587_vm5, %v16291_v49, %v6721_v61  ;;  %v16583_v15 = vpop.xlane.xlu1 %7345  ;;  %v19138_v49 = vld [vmem:[#allocation150_spill] sm:$0xff] }
 0x5b7   : > { %v11196_v18 = vpop.eup %11195  ;;  %7486 = vadd.xlane.f32.xlu0 %v7485_v57  ;;  %v6041_v56 = vadd.f32 1.0, %v11194_v11  ;;  %11215 = vlog2.f32 %v16256_v42  ;;  %7747 = vst.msk [vmem:[%s15682_s28 + $0xf0] sm:$0xff] %vm7716_vm6, %v7618_v14  ;;  %v5536_v32 = vadd.f32 2.0, %v5401_v16  ;;  %v5535_v30 = vadd.f32 2.0, %v5396_v31  ;;  %v11328_v14 = vld [vmem:[%s11489_s30 + $0xf8] sm:$0xff] }
 0x5b8   : > { %v11198_v25 = vpop.eup %11197  ;;  %v16585_v41 = vadd.f32 0.001, %v11196_v18  ;;  %v7170_v20 = vsel %vm14954_vm4, %v7010_v17, 0.0  ;;  %11217 = vpow2.f32 %v8678_v23  ;;  %v6466_v48 = vsel %vm14954_vm4, %v19138_v49, %v19036_v19 }
 0x5b9   : > { %v11200_v61 = vpop.eup %11199  ;;  %v7488_v54 = vsel %vm311_vm0, %v7170_v20, 0.0  ;;  %11219 = vrcp.f32 %v6041_v56  ;;  %v7012_v16 = vmul.f32 0.6931472, %v11198_v25  ;;  %v8681_v22 = vmul.f32 -1.442695, %v5536_v32  ;;  %v16596_v23 = vpop.xlane.xlu0 %7348  ;;  %v19139_v56 = vld [vmem:[#allocation153_spill] sm:$0xff] }
 0x5ba   : > { %v11202_v31 = vpop.eup %11201  ;;  %7489 = vadd.xlane.f32.xlu1 %v7488_v54  ;;  %v6044_v11 = vadd.f32 1.0, %v11200_v61  ;;  %11221 = vlog2.f32 %v16310_v13  ;;  %v8680_v57 = vmul.f32 -1.442695, %v5535_v30  ;;  %v6594_v17 = vmul.f32 %v11328_v14, %v6466_v48  ;;  %v19140_v48 = vld [vmem:[#allocation112_spill] sm:$0xff] }
 0x5bb   : > { %v11204_v18 = vpop.eup %11203  ;;  %v16598_v42 = vadd.f32 0.001, %v11202_v31  ;;  %v7171_v20 = vsel %vm14954_vm4, %v7012_v16, 0.0  ;;  %11223 = vpow2.f32 %v8681_v22  ;;  %v6467_v32 = vsel %vm14954_vm4, %v19139_v56, %v19036_v19  ;;  %v11329_v16 = vld [vmem:[%s11489_s30 + $0x100] sm:$0xff]  ;;  %v19141_v14 = vld [vmem:[#allocation152_spill] sm:$0xff] }
 0x5bc   : > { %v11206_v25 = vpop.eup %11205  ;;  %v7491_v30 = vsel %vm311_vm0, %v7171_v20, 0.0  ;;  %11225 = vrcp.f32 %v6044_v11  ;;  %v7014_v49 = vmul.f32 0.6931472, %v11204_v18  ;;  %v6722_v61 = vadd.f32 %v6594_v17, %v19140_v48  ;;  %v16614_v13 = vpop.xlane.xlu1 %7351  ;;  %v19142_v48 = vld [vmem:[#allocation8_spill] sm:$0xff] }
 0x5bd   : > { %v11208_v54 = vpop.eup %11207  ;;  %7492 = vadd.xlane.f32.xlu0 %v7491_v30  ;;  %v6043_v31 = vadd.f32 1.0, %v11206_v25  ;;  %11227 = vlog2.f32 %v16293_v0  ;;  %v6595_v22 = vmul.f32 %v11329_v16, %v6467_v32  ;;  %v6468_v56 = vsel %vm14954_vm4, %v19141_v14, %v19036_v19  ;;  %v19143_v0 = vld [vmem:[#allocation155_spill] sm:$0xff] }
 0x5be   : > { %v11210_v11 = vpop.eup %11209  ;;  %v16616_v18 = vadd.f32 0.001, %v11208_v54  ;;  %v7172_v17 = vsel %vm14954_vm4, %v7014_v49, 0.0  ;;  %11229 = vpow2.f32 %v8680_v57  ;;  %v7619_v20 = vsel %vm7587_vm5, %v16308_v47, %v6722_v61  ;;  %v11330_v57 = vld [vmem:[%s11489_s30 + $0x108] sm:$0xff] }
 0x5bf   : > { %v11212_v32 = vpop.eup %11211  ;;  %v7494_v25 = vsel %vm311_vm0, %v7172_v17, 0.0  ;;  %11231 = vrcp.f32 %v6043_v31  ;;  %v7016_v30 = vmul.f32 0.6931472, %v11210_v11  ;;  %7748 = vst.msk [vmem:[%s15682_s28 + $0xf8] sm:$0xff] %vm7716_vm6, %v7619_v20  ;;  %v6723_v16 = vadd.f32 %v6595_v22, %v19142_v48  ;;  %v16633_v61 = vpop.xlane.xlu0 %7354 }
 0x5c0   : > { %v11214_v14 = vpop.eup %11213  ;;  %7495 = vadd.xlane.f32.xlu1 %v7494_v25  ;;  %v6046_v54 = vadd.f32 1.0, %v11212_v32  ;;  %11233 = vlog2.f32 %v16344_v10  ;;  %v6596_v49 = vmul.f32 %v11330_v57, %v6468_v56  ;;  %v6469_v47 = vsel %vm14954_vm4, %v19143_v0, %v19036_v19  ;;  %v19144_v32 = vld [vmem:[#allocation114_spill] sm:$0xff] }
 0x5c1   : > { %v11216_v31 = vpop.eup %11215  ;;  %v16635_v11 = vadd.f32 0.001, %v11214_v14  ;;  %v7173_v22 = vsel %vm14954_vm4, %v7016_v30, 0.0  ;;  %v7620_v17 = vsel %vm7587_vm5, %v16326_v53, %v6723_v16  ;;  %11235 = vlog2.f32 %v16328_v3  ;;  %v11331_v30 = vld [vmem:[%s11489_s30 + $0x110] sm:$0xff]  ;;  %v19145_v53 = vld [vmem:[#allocation154_spill] sm:$0xff] }
 0x5c2   : > { %v11218_v56 = vpop.eup %11217  ;;  %v7497_v20 = vsel %vm311_vm0, %v7173_v22, 0.0  ;;  %11237 = vrcp.f32 %v6046_v54  ;;  %v7018_v0 = vmul.f32 0.6931472, %v11216_v31  ;;  %7749 = vst.msk [vmem:[%s15682_s28 + $0x100] sm:$0xff] %vm7716_vm6, %v7620_v17  ;;  %v6724_v25 = vadd.f32 %v6596_v49, %v19144_v32  ;;  %v16653_v54 = vpop.xlane.xlu1 %7357  ;;  %v19146_v32 = vld [vmem:[#allocation116_spill] sm:$0xff] }
 0x5c3   : > { %v11220_v48 = vpop.eup %11219  ;;  %7498 = vadd.xlane.f32.xlu0 %v7497_v20  ;;  %v6045_v14 = vadd.f32 1.0, %v11218_v56  ;;  %11239 = vlog2.f32 %v16379_v59  ;;  %v6597_v57 = vmul.f32 %v11331_v30, %v6469_v47  ;;  %v6470_v16 = vsel %vm14954_vm4, %v19145_v53, %v19036_v19 }
 0x5c4   : > { %v11222_v31 = vpop.eup %11221  ;;  %v16655_v22 = vadd.f32 0.001, %v11220_v48  ;;  %v7174_v49 = vsel %vm14954_vm4, %v7018_v0, 0.0  ;;  %v7621_v17 = vsel %vm7587_vm5, %v16342_v45, %v6724_v25  ;;  %11241 = vlog2.f32 %v16362_v51  ;;  %v11332_v0 = vld [vmem:[%s11489_s30 + $0x118] sm:$0xff] }
 0x5c5   : > { %v11224_v47 = vpop.eup %11223  ;;  %v7500_v56 = vsel %vm311_vm0, %v7174_v49, 0.0  ;;  %11243 = vrcp.f32 %v6045_v14  ;;  %v7020_v20 = vmul.f32 0.6931472, %v11222_v31  ;;  %7750 = vst.msk [vmem:[%s15682_s28 + $0x108] sm:$0xff] %vm7716_vm6, %v7621_v17  ;;  %v6725_v48 = vadd.f32 %v6597_v57, %v19146_v32  ;;  %v19147_v45 = vld [vmem:[#allocation157_spill] sm:$0xff]  ;;  %v16673_v14 = vpop.xlane.xlu0 %7360 }
 0x5c6   : > { %v11226_v30 = vpop.eup %11225  ;;  %7501 = vadd.xlane.f32.xlu1 %v7500_v56  ;;  %v6048_v53 = vadd.f32 1.0, %v11224_v47  ;;  %v6598_v59 = vmul.f32 %v11332_v0, %v6470_v16  ;;  %11245 = vlog2.f32 %v16416_v26  ;;  %v6471_v25 = vsel %vm14954_vm4, %v19147_v45, %v19036_v19  ;;  %v11333_v16 = vld [vmem:[%s11489_s30 + $0x120] sm:$0xff]  ;;  %v19148_v45 = vld [vmem:[#allocation115_spill] sm:$0xff]  ;;  %v19149_v51 = vld [vmem:[#allocation117_spill] sm:$0xff] }
 0x5c7   : > { %v11228_v31 = vpop.eup %11227  ;;  %v16675_v49 = vadd.f32 0.001, %v11226_v30  ;;  %v7175_v57 = vsel %vm14954_vm4, %v7020_v20, 0.0  ;;  %v7622_v17 = vsel %vm7587_vm5, %v16360_v21, %v6725_v48  ;;  %v6599_v47 = vmul.f32 %v11333_v16, %v6471_v25  ;;  %v19150_v21 = vld [vmem:[#allocation156_spill] sm:$0xff] }
 0x5c8   : > { %v11230_v56 = vpop.eup %11229  ;;  %v7503_v32 = vsel %vm311_vm0, %v7175_v57, 0.0  ;;  %11247 = vrcp.f32 %v6048_v53  ;;  %v7022_v0 = vmul.f32 0.6931472, %v11228_v31  ;;  %7751 = vst.msk [vmem:[%s15682_s28 + $0x110] sm:$0xff] %vm7716_vm6, %v7622_v17  ;;  %v6726_v30 = vadd.f32 %v6598_v59, %v19148_v45  ;;  %v16693_v25 = vpop.xlane.xlu1 %7363  ;;  %v11334_v57 = vld [vmem:[%s11489_s30 + $0x128] sm:$0xff] }
 0x5c9   : > { %v11232_v26 = vpop.eup %11231  ;;  %7504 = vadd.xlane.f32.xlu0 %v7503_v32  ;;  %v6047_v20 = vadd.f32 1.0, %v11230_v56  ;;  %v6727_v3 = vadd.f32 %v6599_v47, %v19149_v51  ;;  %11249 = vlog2.f32 %v16396_v9  ;;  %v6472_v48 = vsel %vm14954_vm4, %v19150_v21, %v19036_v19 }
 0x5ca   : > { %v11234_v53 = vpop.eup %11233  ;;  %v16695_v31 = vadd.f32 0.001, %v11232_v26  ;;  %v7176_v59 = vsel %vm14954_vm4, %v7022_v0, 0.0  ;;  %v7623_v51 = vsel %vm7587_vm5, %v16377_v62, %v6726_v30  ;;  %v6600_v17 = vmul.f32 %v11334_v57, %v6472_v48  ;;  %v19151_v62 = vld [vmem:[#allocation13_spill] sm:$0xff]  ;;  %v19152_v30 = vld [vmem:[#allocation159_spill] sm:$0xff] }
 0x5cb   : > { %v11236_v16 = vpop.eup %11235  ;;  %v7506_v47 = vsel %vm311_vm0, %v7176_v59, 0.0  ;;  %11251 = vrcp.f32 %v6047_v20  ;;  %v7024_v56 = vmul.f32 0.6931472, %v11234_v53  ;;  %7752 = vst.msk [vmem:[%s15682_s28 + $0x118] sm:$0xff] %vm7716_vm6, %v7623_v51  ;;  %v7624_v26 = vsel %vm7587_vm5, %v16394_v12, %v6727_v3  ;;  %v16717_v21 = vpop.xlane.xlu0 %7366  ;;  %v11335_v12 = vld [vmem:[%s11489_s30 + $0x130] sm:$0xff] }
 0x5cc   : > { %v11238_v32 = vpop.eup %11237  ;;  %7507 = vadd.xlane.f32.xlu1 %v7506_v47  ;;  %v7026_v0 = vmul.f32 0.6931472, %v11236_v16  ;;  %7753 = vst.msk [vmem:[%s15682_s28 + $0x120] sm:$0xff] %vm7716_vm6, %v7624_v26  ;;  %v6728_v45 = vadd.f32 %v6600_v17, %v19151_v62  ;;  %11253 = vlog2.f32 %v16451_v46  ;;  %v6473_v20 = vsel %vm14954_vm4, %v19152_v30, %v19036_v19  ;;  %v19153_v62 = vld [vmem:[#allocation119_spill] sm:$0xff] }
 0x5cd   : > { %v11240_v48 = vpop.eup %11239  ;;  %v16719_v53 = vadd.f32 0.001, %v11238_v32  ;;  %v7177_v3 = vsel %vm14954_vm4, %v7024_v56, 0.0  ;;  %v6601_v59 = vmul.f32 %v11335_v12, %v6473_v20  ;;  %11255 = vlog2.f32 %v16433_v2  ;;  %v19154_v20 = vld [vmem:[#allocation158_spill] sm:$0xff] }
 0x5ce   : > { %v11242_v51 = vpop.eup %11241  ;;  %v7509_v57 = vsel %vm311_vm0, %v7177_v3, 0.0  ;;  %v7178_v17 = vsel %vm14954_vm4, %v7026_v0, 0.0  ;;  %v7028_v16 = vmul.f32 0.6931472, %v11240_v48  ;;  %v7625_v47 = vsel %vm7587_vm5, %v16414_v27, %v6728_v45  ;;  %v16739_v48 = vpop.xlane.xlu1 %7369  ;;  %v11336_v45 = vld [vmem:[%s11489_s30 + $0x138] sm:$0xff] }
 0x5cf   : > { %v11244_v26 = vpop.eup %11243  ;;  %7510 = vadd.xlane.f32.xlu0 %v7509_v57  ;;  %v7512_v56 = vsel %vm311_vm0, %v7178_v17, 0.0  ;;  %v7030_v32 = vmul.f32 0.6931472, %v11242_v51  ;;  %7754 = vst.msk [vmem:[%s15682_s28 + $0x128] sm:$0xff] %vm7716_vm6, %v7625_v47  ;;  %v6729_v30 = vadd.f32 %v6601_v59, %v19153_v62  ;;  %v6474_v0 = vsel %vm14954_vm4, %v19154_v20, %v19036_v19  ;;  %v19156_v20 = vld [vmem:[#allocation161_spill] sm:$0xff] }
 0x5d0   : > { %v11246_v3 = vpop.eup %11245  ;;  %v16741_v12 = vadd.f32 0.001, %v11244_v26  ;;  %7513 = vadd.xlane.f32.xlu1 %v7512_v56  ;;  %v7179_v27 = vsel %vm14954_vm4, %v7028_v16, 0.0  ;;  %v6602_v51 = vmul.f32 %v11336_v45, %v6474_v0  ;;  %11257 = vlog2.f32 %v16485_v5  ;;  %v19155_v16 = vld [vmem:[#allocation118_spill] sm:$0xff] }
 0x5d1   : > { %v7515_v59 = vsel %vm311_vm0, %v7179_v27, 0.0  ;;  %v7180_v57 = vsel %vm14954_vm4, %v7030_v32, 0.0  ;;  %v7032_v17 = vmul.f32 0.6931472, %v11246_v3  ;;  %v7626_v47 = vsel %vm7587_vm5, %v16431_v33, %v6729_v30  ;;  %v16762_v32 = vpop.xlane.xlu0 %7372  ;;  %v11337_v27 = vld [vmem:[%s11489_s30 + $0x140] sm:$0xff] }
 0x5d2   : > { %v11248_v26 = vpop.eup %11247  ;;  %v7518_v56 = vsel %vm311_vm0, %v7180_v57, 0.0  ;;  %7755 = vst.msk [vmem:[%s15682_s28 + $0x130] sm:$0xff] %vm7716_vm6, %v7626_v47  ;;  %v6730_v62 = vadd.f32 %v6602_v51, %v19155_v16  ;;  %v6475_v0 = vsel %vm14954_vm4, %v19156_v20, %v19036_v19  ;;  %11259 = vlog2.f32 %v16467_v24  ;;  %v19157_v51 = vld [vmem:[#allocation160_spill] sm:$0xff] }
 0x5d3   : > { %v11250_v3 = vpop.eup %11249  ;;  %v16764_v33 = vadd.f32 0.001, %v11248_v26  ;;  %7516 = vadd.xlane.f32.xlu0 %v7515_v59  ;;  %v7181_v30 = vsel %vm14954_vm4, %v7032_v17, 0.0  ;;  %v6603_v45 = vmul.f32 %v11337_v27, %v6475_v0  ;;  %v6476_v57 = vsel %vm14954_vm4, %v19157_v51, %v19036_v19  ;;  %v11338_v59 = vld [vmem:[%s11489_s30 + $0x148] sm:$0xff]  ;;  %v19158_v17 = vld [vmem:[#allocation121_spill] sm:$0xff] }
 0x5d4   : > { %7519 = vadd.xlane.f32.xlu1 %v7518_v56  ;;  %v7521_v47 = vsel %vm311_vm0, %v7181_v30, 0.0  ;;  %v7034_v16 = vmul.f32 0.6931472, %v11250_v3  ;;  %v7627_v26 = vsel %vm7587_vm5, %v16449_v29, %v6730_v62  ;;  %v6604_v20 = vmul.f32 %v11338_v59, %v6476_v57  ;;  %v19159_v27 = vld [vmem:[#allocation163_spill] sm:$0xff]  ;;  %v19160_v3 = vld [vmem:[#allocation162_spill] sm:$0xff]  ;;  %v16790_v29 = vpop.xlane.xlu1 %7375  ;;  %v19161_v57 = vld [vmem:[#allocation120_spill] sm:$0xff] }
 0x5d5   : > { %v11252_v24 = vpop.eup %11251  ;;  %7756 = vst.msk [vmem:[%s15682_s28 + $0x138] sm:$0xff] %vm7716_vm6, %v7627_v26  ;;  %v6731_v0 = vadd.f32 %v6603_v45, %v19158_v17  ;;  %11261 = vlog2.f32 %v16519_v7  ;;  %v6477_v56 = vsel %vm14954_vm4, %v19159_v27, %v19036_v19  ;;  %v6478_v30 = vsel %vm14954_vm4, %v19160_v3, %v19036_v19  ;;  %v11339_v59 = vld [vmem:[%s11489_s30 + $0x150] sm:$0xff] }
 0x5d6   : > { %v11254_v62 = vpop.eup %11253  ;;  %v16792_v51 = vadd.f32 0.001, %v11252_v24  ;;  %v7182_v45 = vsel %vm14954_vm4, %v7034_v16, 0.0  ;;  %v6732_v26 = vadd.f32 %v6604_v20, %v19161_v57  ;;  %v6605_v17 = vmul.f32 %v11339_v59, %v6477_v56  ;;  %v19162_v20 = vld [vmem:[#allocation123_spill] sm:$0xff] }
 0x5d7   : > { %v11256_v27 = vpop.eup %11255  ;;  %7522 = vadd.xlane.f32.xlu0 %v7521_v47  ;;  %v7524_v7 = vsel %vm311_vm0, %v7182_v45, 0.0  ;;  %v7036_v3 = vmul.f32 0.6931472, %v11254_v62  ;;  %v7628_v5 = vsel %vm7587_vm5, %v16465_v28, %v6731_v0  ;;  %11263 = vlog2.f32 %v16502_v8  ;;  %v11340_v47 = vld [vmem:[%s11489_s30 + $0x158] sm:$0xff]  ;;  %v16810_v62 = vpop.xlane.xlu0 %7378 }
 0x5d8   : > { %7525 = vadd.xlane.f32.xlu1 %v7524_v7  ;;  %v7038_v24 = vmul.f32 0.6931472, %v11256_v27  ;;  %7757 = vst.msk [vmem:[%s15682_s28 + $0x140] sm:$0xff] %vm7716_vm6, %v7628_v5  ;;  %v7629_v16 = vsel %vm7587_vm5, %v16483_v44, %v6732_v26  ;;  %v6733_v56 = vadd.f32 %v6605_v17, %v19162_v20  ;;  %v6606_v45 = vmul.f32 %v11340_v47, %v6478_v30  ;;  %v19163_v5 = vld [vmem:[#allocation165_spill] sm:$0xff]  ;;  %v19164_v7 = vld [vmem:[#allocation164_spill] sm:$0xff]  ;;  %v19165_v17 = vld [vmem:[#allocation122_spill] sm:$0xff] }
 0x5d9   : > { %v7183_v28 = vsel %vm14954_vm4, %v7036_v3, 0.0  ;;  %7758 = vst.msk [vmem:[%s15682_s28 + $0x148] sm:$0xff] %vm7716_vm6, %v7629_v16  ;;  %11265 = vlog2.f32 %v16552_v63  ;;  %v6479_v44 = vsel %vm14954_vm4, %v19163_v5, %v19036_v19  ;;  %v6480_v0 = vsel %vm14954_vm4, %v19164_v7, %v19036_v19  ;;  %v11341_v20 = vld [vmem:[%s11489_s30 + $0x160] sm:$0xff]  ;;  %v19166_v5 = vld [vmem:[#allocation167_spill] sm:$0xff] }
 0x5da   : > { %v11258_v30 = vpop.eup %11257  ;;  %v7527_v57 = vsel %vm311_vm0, %v7183_v28, 0.0  ;;  %v7184_v26 = vsel %vm14954_vm4, %v7038_v24, 0.0  ;;  %v7630_v59 = vsel %vm7587_vm5, %v16500_v36, %v6733_v56  ;;  %v6734_v27 = vadd.f32 %v6606_v45, %v19165_v17  ;;  %v11342_v56 = vld [vmem:[%s11489_s30 + $0x168] sm:$0xff]  ;;  %v19168_v17 = vld [vmem:[#allocation10_spill] sm:$0xff] }
 0x5db   : > { %7528 = vadd.xlane.f32.xlu0 %v7527_v57  ;;  %v7530_v3 = vsel %vm311_vm0, %v7184_v26, 0.0  ;;  %v7040_v16 = vmul.f32 0.6931472, %v11258_v30  ;;  %7759 = vst.msk [vmem:[%s15682_s28 + $0x150] sm:$0xff] %vm7716_vm6, %v7630_v59  ;;  %v6607_v47 = vmul.f32 %v11341_v20, %v6479_v44  ;;  %11267 = vlog2.f32 %v16537_v50  ;;  %v16837_v28 = vpop.xlane.xlu1 %7381  ;;  %v19167_v57 = vld [vmem:[#allocation124_spill] sm:$0xff] }
 0x5dc   : > { %v11260_v24 = vpop.eup %11259  ;;  %7531 = vadd.xlane.f32.xlu1 %v7530_v3  ;;  %v7631_v36 = vsel %vm7587_vm5, %v16517_v40, %v6734_v27  ;;  %v6608_v45 = vmul.f32 %v11342_v56, %v6480_v0  ;;  %11269 = vlog2.f32 %v16585_v41  ;;  %v6481_v7 = vsel %vm14954_vm4, %v19166_v5, %v19036_v19  ;;  %v11343_v59 = vld [vmem:[%s11489_s30 + $0x170] sm:$0xff]  ;;  %v19169_v3 = vld [vmem:[#allocation166_spill] sm:$0xff]  ;;  %v19170_v56 = vld [vmem:[#allocation125_spill] sm:$0xff] }
 0x5dd   : > { %v7185_v44 = vsel %vm14954_vm4, %v7040_v16, 0.0  ;;  %v7042_v30 = vmul.f32 0.6931472, %v11260_v24  ;;  %7760 = vst.msk [vmem:[%s15682_s28 + $0x158] sm:$0xff] %vm7716_vm6, %v7631_v36  ;;  %v6735_v26 = vadd.f32 %v6607_v47, %v19167_v57  ;;  %v6609_v40 = vmul.f32 %v11343_v59, %v6481_v7  ;;  %v11344_v5 = vld [vmem:[%s11489_s30 + $0x178] sm:$0xff] }
 0x5de   : > { %v7533_v0 = vsel %vm311_vm0, %v7185_v44, 0.0  ;;  %v6736_v27 = vadd.f32 %v6608_v45, %v19168_v17  ;;  %11271 = vlog2.f32 %v16570_v58  ;;  %v6482_v16 = vsel %vm14954_vm4, %v19169_v3, %v19036_v19  ;;  %v16861_v20 = vpop.xlane.xlu0 %7384 }
 0x5df   : > { %v11262_v24 = vpop.eup %11261  ;;  %7534 = vadd.xlane.f32.xlu0 %v7533_v0  ;;  %v7186_v47 = vsel %vm14954_vm4, %v7042_v30, 0.0  ;;  %v7632_v36 = vsel %vm7587_vm5, %v16535_v60, %v6735_v26  ;;  %v6737_v45 = vadd.f32 %v6609_v40, %v19170_v56  ;;  %v6610_v7 = vmul.f32 %v11344_v5, %v6482_v16  ;;  %v19171_v26 = vld [vmem:[#allocation17_spill] sm:$0xff]  ;;  %v11345_v16 = vld [vmem:[%s11489_s30 + $0x180] sm:$0xff]  ;;  %v11346_v5 = vld [vmem:[%s11489_s30 + $0x188] sm:$0xff] }
 0x5e0   : > { %v7536_v44 = vsel %vm311_vm0, %v7186_v47, 0.0  ;;  %v7044_v57 = vmul.f32 0.6931472, %v11262_v24  ;;  %7761 = vst.msk [vmem:[%s15682_s28 + $0x160] sm:$0xff] %vm7716_vm6, %v7632_v36  ;;  %v7633_v59 = vsel %vm7587_vm5, %v16550_v37, %v6736_v27  ;;  %11273 = vlog2.f32 %v16616_v18  ;;  %v19172_v0 = vld [vmem:[#allocation169_spill] sm:$0xff]  ;;  %v19173_v24 = vld [vmem:[#allocation168_spill] sm:$0xff] }
 0x5e1   : > { %v11264_v30 = vpop.eup %11263  ;;  %7537 = vadd.xlane.f32.xlu1 %v7536_v44  ;;  %7762 = vst.msk [vmem:[%s15682_s28 + $0x168] sm:$0xff] %vm7716_vm6, %v7633_v59  ;;  %v7634_v60 = vsel %vm7587_vm5, %v16568_v35, %v6737_v45  ;;  %v6738_v40 = vadd.f32 %v6610_v7, %v19171_v26  ;;  %v6483_v17 = vsel %vm14954_vm4, %v19172_v0, %v19036_v19  ;;  %11275 = vlog2.f32 %v16598_v42  ;;  %v16888_v37 = vpop.xlane.xlu1 %7387  ;;  %v19174_v59 = vld [vmem:[#allocation127_spill] sm:$0xff] }
 0x5e2   : > { %v7187_v27 = vsel %vm14954_vm4, %v7044_v57, 0.0  ;;  %v7046_v3 = vmul.f32 0.6931472, %v11264_v30  ;;  %7763 = vst.msk [vmem:[%s15682_s28 + $0x170] sm:$0xff] %vm7716_vm6, %v7634_v60  ;;  %v6611_v35 = vmul.f32 %v11345_v16, %v6483_v17  ;;  %v6484_v47 = vsel %vm14954_vm4, %v19173_v24, %v19036_v19  ;;  %v19175_v60 = vld [vmem:[#allocation171_spill] sm:$0xff]  ;;  %v19176_v17 = vld [vmem:[#allocation126_spill] sm:$0xff] }
 0x5e3   : > { %v11266_v36 = vpop.eup %11265  ;;  %v7539_v56 = vsel %vm311_vm0, %v7187_v27, 0.0  ;;  %v7635_v45 = vsel %vm7587_vm5, %v16583_v15, %v6738_v40  ;;  %v6612_v7 = vmul.f32 %v11346_v5, %v6484_v47  ;;  %11277 = vlog2.f32 %v16655_v22  ;;  %v11347_v16 = vld [vmem:[%s11489_s30 + $0x190] sm:$0xff] }
 0x5e4   : > { %7540 = vadd.xlane.f32.xlu0 %v7539_v56  ;;  %v7188_v44 = vsel %vm14954_vm4, %v7046_v3, 0.0  ;;  %v7048_v57 = vmul.f32 0.6931472, %v11266_v36  ;;  %7764 = vst.msk [vmem:[%s15682_s28 + $0x178] sm:$0xff] %vm7716_vm6, %v7635_v45  ;;  %v6739_v30 = vadd.f32 %v6611_v35, %v19174_v59  ;;  %v6485_v26 = vsel %vm14954_vm4, %v19175_v60, %v19036_v19  ;;  %v16914_v15 = vpop.xlane.xlu0 %7390  ;;  %v19177_v56 = vld [vmem:[#allocation170_spill] sm:$0xff] }
 0x5e5   : > { %v11268_v40 = vpop.eup %11267  ;;  %v7542_v0 = vsel %vm311_vm0, %v7188_v44, 0.0  ;;  %v6740_v27 = vadd.f32 %v6612_v7, %v19176_v17  ;;  %v6613_v3 = vmul.f32 %v11347_v16, %v6485_v26  ;;  %11279 = vlog2.f32 %v16635_v11  ;;  %v11348_v26 = vld [vmem:[%s11489_s30 + $0x198] sm:$0xff] }
 0x5e6   : > { %v11270_v24 = vpop.eup %11269  ;;  %7543 = vadd.xlane.f32.xlu1 %v7542_v0  ;;  %v7189_v35 = vsel %vm14954_vm4, %v7048_v57, 0.0  ;;  %v7050_v47 = vmul.f32 0.6931472, %v11268_v40  ;;  %v7636_v36 = vsel %vm7587_vm5, %v16596_v23, %v6739_v30  ;;  %v6486_v45 = vsel %vm14954_vm4, %v19177_v56, %v19036_v19  ;;  %v19178_v57 = vld [vmem:[#allocation129_spill] sm:$0xff]  ;;  %v11349_v56 = vld [vmem:[%s11489_s30 + $0x1a0] sm:$0xff] }
 0x5e7   : > { %v7545_v5 = vsel %vm311_vm0, %v7189_v35, 0.0  ;;  %v7052_v7 = vmul.f32 0.6931472, %v11270_v24  ;;  %7765 = vst.msk [vmem:[%s15682_s28 + $0x180] sm:$0xff] %vm7716_vm6, %v7636_v36  ;;  %v7637_v44 = vsel %vm7587_vm5, %v16614_v13, %v6740_v27  ;;  %v6741_v59 = vadd.f32 %v6613_v3, %v19178_v57  ;;  %v16936_v60 = vpop.xlane.xlu1 %7393  ;;  %v19179_v0 = vld [vmem:[#allocation173_spill] sm:$0xff]  ;;  %v19181_v57 = vld [vmem:[#allocation172_spill] sm:$0xff] }
 0x5e8   : > { %v11272_v23 = vpop.eup %11271  ;;  %7546 = vadd.xlane.f32.xlu0 %v7545_v5  ;;  %v7190_v30 = vsel %vm14954_vm4, %v7050_v47, 0.0  ;;  %7766 = vst.msk [vmem:[%s15682_s28 + $0x188] sm:$0xff] %vm7716_vm6, %v7637_v44  ;;  %v6614_v40 = vmul.f32 %v11348_v26, %v6486_v45  ;;  %11281 = vlog2.f32 %v16695_v31  ;;  %v6487_v13 = vsel %vm14954_vm4, %v19179_v0, %v19036_v19  ;;  %v19180_v47 = vld [vmem:[#allocation128_spill] sm:$0xff] }
 0x5e9   : > { %v7548_v17 = vsel %vm311_vm0, %v7190_v30, 0.0  ;;  %v7191_v27 = vsel %vm14954_vm4, %v7052_v7, 0.0  ;;  %v7054_v16 = vmul.f32 0.6931472, %v11272_v23  ;;  %v7638_v3 = vsel %vm7587_vm5, %v16633_v61, %v6741_v59 }
 0x5ea   : > { %v11274_v24 = vpop.eup %11273  ;;  %7549 = vadd.xlane.f32.xlu1 %v7548_v17  ;;  %v7551_v35 = vsel %vm311_vm0, %v7191_v27, 0.0  ;;  %7767 = vst.msk [vmem:[%s15682_s28 + $0x190] sm:$0xff] %vm7716_vm6, %v7638_v3  ;;  %v6742_v36 = vadd.f32 %v6614_v40, %v19180_v47  ;;  %v6615_v45 = vmul.f32 %v11349_v56, %v6487_v13  ;;  %11283 = vlog2.f32 %v16675_v49  ;;  %v16960_v5 = vpop.xlane.xlu0 %7396  ;;  %v19182_v40 = vld [vmem:[#allocation130_spill] sm:$0xff]  ;;  %v11350_v27 = vld [vmem:[%s11489_s30 + $0x1a8] sm:$0xff] }
 0x5eb   : > { %v11276_v7 = vpop.eup %11275  ;;  %v7192_v61 = vsel %vm14954_vm4, %v7054_v16, 0.0  ;;  %v7056_v44 = vmul.f32 0.6931472, %v11274_v24  ;;  %v6488_v59 = vsel %vm14954_vm4, %v19181_v57, %v19036_v19  ;;  %11285 = vlog2.f32 %v16741_v12  ;;  %v19183_v3 = vld [vmem:[#allocation175_spill] sm:$0xff]  ;;  %v11351_v57 = vld [vmem:[%s11489_s30 + $0x1b0] sm:$0xff] }
 0x5ec   : > { %7552 = vadd.xlane.f32.xlu0 %v7551_v35  ;;  %v7554_v23 = vsel %vm311_vm0, %v7192_v61, 0.0  ;;  %v7058_v30 = vmul.f32 0.6931472, %v11276_v7  ;;  %v7639_v26 = vsel %vm7587_vm5, %v16653_v54, %v6742_v36  ;;  %v6743_v0 = vadd.f32 %v6615_v45, %v19182_v40  ;;  %v19184_v61 = vld [vmem:[#allocation14_spill] sm:$0xff]  ;;  %v11352_v40 = vld [vmem:[%s11489_s30 + $0x1b8] sm:$0xff] }
 0x5ed   : > { %v11278_v13 = vpop.eup %11277  ;;  %v7193_v17 = vsel %vm14954_vm4, %v7056_v44, 0.0  ;;  %7768 = vst.msk [vmem:[%s15682_s28 + $0x198] sm:$0xff] %vm7716_vm6, %v7639_v26  ;;  %v6616_v16 = vmul.f32 %v11350_v27, %v6488_v59  ;;  %v6489_v24 = vsel %vm14954_vm4, %v19183_v3, %v19036_v19  ;;  %11287 = vlog2.f32 %v16719_v53  ;;  %v16984_v54 = vpop.xlane.xlu1 %7399 }
 0x5ee   : > { %7555 = vadd.xlane.f32.xlu1 %v7554_v23  ;;  %v7557_v35 = vsel %vm311_vm0, %v7193_v17, 0.0  ;;  %v7194_v47 = vsel %vm14954_vm4, %v7058_v30, 0.0  ;;  %v7060_v36 = vmul.f32 0.6931472, %v11278_v13  ;;  %v7640_v56 = vsel %vm7587_vm5, %v16673_v14, %v6743_v0  ;;  %v19185_v23 = vld [vmem:[#allocation174_spill] sm:$0xff] }
 0x5ef   : > { %v11280_v45 = vpop.eup %11279  ;;  %v7560_v7 = vsel %vm311_vm0, %v7194_v47, 0.0  ;;  %7769 = vst.msk [vmem:[%s15682_s28 + $0x1a0] sm:$0xff] %vm7716_vm6, %v7640_v56  ;;  %v6744_v44 = vadd.f32 %v6616_v16, %v19184_v61  ;;  %v6617_v59 = vmul.f32 %v11351_v57, %v6489_v24  ;;  %v6490_v30 = vsel %vm14954_vm4, %v19185_v23, %v19036_v19  ;;  %v19186_v16 = vld [vmem:[#allocation131_spill] sm:$0xff]  ;;  %v19187_v24 = vld [vmem:[#allocation177_spill] sm:$0xff]  ;;  %v11353_v61 = vld [vmem:[%s11489_s30 + $0x1c0] sm:$0xff] }
 0x5f0   : > { %7558 = vadd.xlane.f32.xlu0 %v7557_v35  ;;  %v7195_v14 = vsel %vm14954_vm4, %v7060_v36, 0.0  ;;  %v7062_v26 = vmul.f32 0.6931472, %v11280_v45  ;;  %v6618_v0 = vmul.f32 %v11352_v40, %v6490_v30  ;;  %11289 = vlog2.f32 %v16792_v51  ;;  %v17005_v13 = vpop.xlane.xlu0 %7402  ;;  %v19188_v56 = vld [vmem:[#allocation21_spill] sm:$0xff] }
 0x5f1   : > { %v7563_v17 = vsel %vm311_vm0, %v7195_v14, 0.0  ;;  %v7641_v27 = vsel %vm7587_vm5, %v16693_v25, %v6744_v44  ;;  %v6745_v3 = vadd.f32 %v6617_v59, %v19186_v16  ;;  %v6491_v35 = vsel %vm14954_vm4, %v19187_v24, %v19036_v19  ;;  %v19189_v59 = vld [vmem:[#allocation176_spill] sm:$0xff]  ;;  %v19190_v40 = vld [vmem:[#allocation133_spill] sm:$0xff] }
 0x5f2   : > { %v11282_v47 = vpop.eup %11281  ;;  %7561 = vadd.xlane.f32.xlu1 %v7560_v7  ;;  %v7196_v36 = vsel %vm14954_vm4, %v7062_v26, 0.0  ;;  %7770 = vst.msk [vmem:[%s15682_s28 + $0x1a8] sm:$0xff] %vm7716_vm6, %v7641_v27  ;;  %v6746_v45 = vadd.f32 %v6618_v0, %v19188_v56  ;;  %v6619_v25 = vmul.f32 %v11353_v61, %v6491_v35  ;;  %11291 = vlog2.f32 %v16764_v33  ;;  %v11354_v27 = vld [vmem:[%s11489_s30 + $0x1c8] sm:$0xff] }
 0x5f3   : > { %v7566_v44 = vsel %vm311_vm0, %v7196_v36, 0.0  ;;  %v7064_v57 = vmul.f32 0.6931472, %v11282_v47  ;;  %v7642_v7 = vsel %vm7587_vm5, %v16717_v21, %v6745_v3  ;;  %v6492_v23 = vsel %vm14954_vm4, %v19189_v59, %v19036_v19  ;;  %v17031_v30 = vpop.xlane.xlu1 %7405  ;;  %v19191_v21 = vld [vmem:[#allocation179_spill] sm:$0xff]  ;;  %v11355_v47 = vld [vmem:[%s11489_s30 + $0x1d0] sm:$0xff]  ;;  %v19192_v36 = vld [vmem:[#allocation178_spill] sm:$0xff] }
 0x5f4   : > { %v11284_v14 = vpop.eup %11283  ;;  %7564 = vadd.xlane.f32.xlu0 %v7563_v17  ;;  %7771 = vst.msk [vmem:[%s15682_s28 + $0x1b0] sm:$0xff] %vm7716_vm6, %v7642_v7  ;;  %v7643_v26 = vsel %vm7587_vm5, %v16739_v48, %v6746_v45  ;;  %v6747_v0 = vadd.f32 %v6619_v25, %v19190_v40  ;;  %v6620_v16 = vmul.f32 %v11354_v27, %v6492_v23  ;;  %v11356_v40 = vld [vmem:[%s11489_s30 + $0x1d8] sm:$0xff] }
 0x5f5   : > { %v6493_v3 = vsel %vm14954_vm4, %v19191_v21, %v19036_v19  ;;  %v11286_v24 = vpop.eup %11285  ;;  %v7197_v17 = vsel %vm14954_vm4, %v7064_v57, 0.0  ;;  %v7066_v35 = vmul.f32 0.6931472, %v11284_v14  ;;  %7772 = vst.msk [vmem:[%s15682_s28 + $0x1b8] sm:$0xff] %vm7716_vm6, %v7643_v26  ;;  %v6494_v56 = vsel %vm14954_vm4, %v19192_v36, %v19036_v19  ;;  %v19193_v57 = vld [vmem:[#allocation132_spill] sm:$0xff]  ;;  %v19195_v21 = vld [vmem:[#allocation181_spill] sm:$0xff] }
 0x5f6   : > { %v6621_v48 = vmul.f32 %v11355_v47, %v6493_v3  ;;  %7567 = vadd.xlane.f32.xlu1 %v7566_v44  ;;  %v7569_v45 = vsel %vm311_vm0, %v7197_v17, 0.0  ;;  %v7068_v61 = vmul.f32 0.6931472, %v11286_v24  ;;  %v7644_v25 = vsel %vm7587_vm5, %v16762_v32, %v6747_v0  ;;  %v17058_v59 = vpop.xlane.xlu0 %7408  ;;  %v19194_v44 = vld [vmem:[#allocation135_spill] sm:$0xff]  ;;  %v19196_v47 = vld [vmem:[#allocation134_spill] sm:$0xff] }
 0x5f7   : > { %v6748_v7 = vadd.f32 %v6620_v16, %v19193_v57  ;;  %v11288_v23 = vpop.eup %11287  ;;  %v7198_v14 = vsel %vm14954_vm4, %v7066_v35, 0.0  ;;  %7773 = vst.msk [vmem:[%s15682_s28 + $0x1c0] sm:$0xff] %vm7716_vm6, %v7644_v25  ;;  %v6622_v27 = vmul.f32 %v11356_v40, %v6494_v56  ;;  %v6495_v32 = vsel %vm14954_vm4, %v19195_v21, %v19036_v19  ;;  %v11357_v36 = vld [vmem:[%s11489_s30 + $0x1e0] sm:$0xff]  ;;  %v19197_v25 = vld [vmem:[#allocation180_spill] sm:$0xff]  ;;  %v19198_v57 = vld [vmem:[#allocation183_spill] sm:$0xff] }
 0x5f8   : > { %v6749_v26 = vadd.f32 %v6621_v48, %v19194_v44  ;;  %7570 = vadd.xlane.f32.xlu0 %v7569_v45  ;;  %v7572_v0 = vsel %vm311_vm0, %v7198_v14, 0.0  ;;  %v7199_v16 = vsel %vm14954_vm4, %v7068_v61, 0.0  ;;  %v7070_v3 = vmul.f32 0.6931472, %v11288_v23  ;;  %v19199_v23 = vld [vmem:[#allocation182_spill] sm:$0xff] }
 0x5f9   : > { %v7645_v24 = vsel %vm7587_vm5, %v16790_v29, %v6748_v7  ;;  %v7575_v17 = vsel %vm311_vm0, %v7199_v16, 0.0  ;;  %v6750_v48 = vadd.f32 %v6622_v27, %v19196_v47  ;;  %v6623_v56 = vmul.f32 %v11357_v36, %v6495_v32  ;;  %v17084_v45 = vpop.xlane.xlu1 %7411  ;;  %v19200_v27 = vld [vmem:[#allocation136_spill] sm:$0xff]  ;;  %v19201_v36 = vld [vmem:[#allocation185_spill] sm:$0xff] }
 0x5fa   : > { %7774 = vst.msk [vmem:[%s15682_s28 + $0x1c8] sm:$0xff] %vm7716_vm6, %v7645_v24  ;;  %v7646_v35 = vsel %vm7587_vm5, %v16810_v62, %v6749_v26  ;;  %v11290_v61 = vpop.eup %11289  ;;  %7573 = vadd.xlane.f32.xlu1 %v7572_v0  ;;  %v7200_v29 = vsel %vm14954_vm4, %v7070_v3, 0.0  ;;  %v6496_v62 = vsel %vm14954_vm4, %v19197_v25, %v19036_v19  ;;  %v6497_v7 = vsel %vm14954_vm4, %v19198_v57, %v19036_v19  ;;  %v11358_v0 = vld [vmem:[%s11489_s30 + $0x1e8] sm:$0xff]  ;;  %v11359_v3 = vld [vmem:[%s11489_s30 + $0x1f0] sm:$0xff]  ;;  %v19202_v57 = vld [vmem:[#allocation18_spill] sm:$0xff] }
 0x5fb   : > { %7775 = vst.msk [vmem:[%s15682_s28 + $0x1d0] sm:$0xff] %vm7716_vm6, %v7646_v35  ;;  %v6498_v14 = vsel %vm14954_vm4, %v19199_v23, %v19036_v19  ;;  %v7578_v44 = vsel %vm311_vm0, %v7200_v29, 0.0  ;;  %v7072_v26 = vmul.f32 0.6931472, %v11290_v61  ;;  %v7647_v40 = vsel %vm7587_vm5, %v16837_v28, %v6750_v48  ;;  %v11360_v35 = vld [vmem:[%s11489_s30 + $0x1f8] sm:$0xff]  ;;  %v11361_v29 = vld [vmem:[%s11489_s30 + $0x200] sm:$0xff] }
 0x5fc   : > { %v6751_v21 = vadd.f32 %v6623_v56, %v19200_v27  ;;  %v11292_v32 = vpop.eup %11291  ;;  %7576 = vadd.xlane.f32.xlu0 %v7575_v17  ;;  %7776 = vst.msk [vmem:[%s15682_s28 + $0x1d8] sm:$0xff] %vm7716_vm6, %v7647_v40  ;;  %v6624_v16 = vmul.f32 %v11358_v0, %v6496_v62  ;;  %v6625_v24 = vmul.f32 %v11359_v3, %v6497_v7  ;;  %v17116_v28 = vpop.xlane.xlu0 %7414  ;;  %v19203_v23 = vld [vmem:[#allocation137_spill] sm:$0xff]  ;;  %v19205_v27 = vld [vmem:[#allocation139_spill] sm:$0xff] }
 0x5fd   : > { %v6626_v47 = vmul.f32 %v11360_v35, %v6498_v14  ;;  %v6499_v61 = vsel %vm14954_vm4, %v19201_v36, %v19036_v19  ;;  %v7201_v48 = vsel %vm14954_vm4, %v7072_v26, 0.0  ;;  %v7074_v17 = vmul.f32 0.6931472, %v11292_v32  ;;  %v19204_v26 = vld [vmem:[#allocation25_spill] sm:$0xff] }
 0x5fe   : > { %v7648_v56 = vsel %vm7587_vm5, %v16861_v20, %v6751_v21  ;;  %v6627_v25 = vmul.f32 %v11361_v29, %v6499_v61  ;;  %7579 = vadd.xlane.f32.xlu1 %v7578_v44  ;;  %v7581_v62 = vsel %vm311_vm0, %v7201_v48, 0.0  ;;  %v6752_v7 = vadd.f32 %v6624_v16, %v19202_v57  ;;  %v19206_v21 = vld [vmem:[#allocation184_spill] sm:$0xff]  ;;  %v19207_v48 = vld [vmem:[#allocation186_spill] sm:$0xff]  ;;  %v19210_v57 = vld [vmem:[#allocation191_spill] sm:$0xff] }
 0x5ff   : > { %7777 = vst.msk [vmem:[%s15682_s28 + $0x1e0] sm:$0xff] %vm7716_vm6, %v7648_v56  ;;  %v6753_v14 = vadd.f32 %v6625_v24, %v19203_v23  ;;  %v6754_v40 = vadd.f32 %v6626_v47, %v19204_v26  ;;  %v7202_v20 = vsel %vm14954_vm4, %v7074_v17, 0.0  ;;  %v6500_v32 = vsel %vm14954_vm4, %v19206_v21, %v19036_v19  ;;  %v17141_v16 = vpop.xlane.xlu1 %7417  ;;  %v11363_v61 = vld [vmem:[%s11489_s30 + $0x210] sm:$0xff]  ;;  %v11364_v17 = vld [vmem:[%s11489_s30 + $0x218] sm:$0xff]  ;;  %v11366_v21 = vld [vmem:[%s11489_s30 + $0x228] sm:$0xff] }
 0x600   : > { %v6755_v44 = vadd.f32 %v6627_v25, %v19205_v27  ;;  %v6501_v0 = vsel %vm14954_vm4, %v15694_v43, %v19036_v19  ;;  %7582 = vadd.xlane.f32.xlu0 %v7581_v62  ;;  %v7584_v3 = vsel %vm311_vm0, %v7202_v20, 0.0  ;;  %v7649_v24 = vsel %vm7587_vm5, %v16888_v37, %v6752_v7  ;;  %v11362_v37 = vld [vmem:[%s11489_s30 + $0x208] sm:$0xff]  ;;  %v19208_v29 = vld [vmem:[#allocation188_spill] sm:$0xff]  ;;  %v11365_v27 = vld [vmem:[%s11489_s30 + $0x220] sm:$0xff] }
 0x601   : > { %v7650_v35 = vsel %vm7587_vm5, %v16914_v15, %v6753_v14  ;;  %v7651_v47 = vsel %vm7587_vm5, %v16936_v60, %v6754_v40  ;;  %7778 = vst.msk [vmem:[%s15682_s28 + $0x1e8] sm:$0xff] %vm7716_vm6, %v7649_v24  ;;  %v6628_v36 = vmul.f32 %v11362_v37, %v6500_v32  ;;  %v6629_v15 = vmul.f32 %v11363_v61, %v6501_v0  ;;  %v19209_v25 = vld [vmem:[#allocation187_spill] sm:$0xff]  ;;  %v19211_v14 = vld [vmem:[#allocation138_spill] sm:$0xff]  ;;  %v19212_v40 = vld [vmem:[#allocation141_spill] sm:$0xff] }
 0x602   : > { %7779 = vst.msk [vmem:[%s15682_s28 + $0x1f0] sm:$0xff] %vm7716_vm6, %v7650_v35  ;;  %7780 = vst.msk [vmem:[%s15682_s28 + $0x1f8] sm:$0xff] %vm7716_vm6, %v7651_v47  ;;  %v7652_v43 = vsel %vm7587_vm5, %v16960_v5, %v6755_v44  ;;  %v6502_v60 = vsel %vm14954_vm4, %v19207_v48, %v19036_v19  ;;  %7585 = vadd.xlane.f32.xlu1 %v7584_v3  ;;  %v6503_v5 = vsel %vm14954_vm4, %v19208_v29, %v19036_v19  ;;  %v7421_v23 = vpop.xlane.xlu0 %7420  ;;  %v19213_v0 = vld [vmem:[#allocation140_spill] sm:$0xff]  ;;  %v19214_v47 = vld [vmem:[#allocation190_spill] sm:$0xff] }
 0x603   : > { %7781 = vst.msk [vmem:[%s15682_s28 + $0x200] sm:$0xff] %vm7716_vm6, %v7652_v43  ;;  %v6630_v56 = vmul.f32 %v11364_v17, %v6502_v60  ;;  %v6504_v62 = vsel %vm14954_vm4, %v19209_v25, %v19036_v19  ;;  %v6505_v7 = vsel %vm14954_vm4, %v19210_v57, %v19036_v19  ;;  %v6756_v26 = vadd.f32 %v6628_v36, %v19211_v14  ;;  %v11367_v24 = vld [vmem:[%s11489_s30 + $0x230] sm:$0xff]  ;;  %v19215_v37 = vld [vmem:[#allocation9_spill] sm:$0xff]  ;;  %v19217_v17 = vld [vmem:[#allocation22_spill] sm:$0xff] }
 0x604   : > { %v6757_v20 = vadd.f32 %v6629_v15, %v19212_v40  ;;  %v6631_v44 = vmul.f32 %v11365_v27, %v6503_v5  ;;  %v6632_v32 = vmul.f32 %v11366_v21, %v6504_v62  ;;  %v6633_v35 = vmul.f32 %v11367_v24, %v6505_v7  ;;  %v19216_v48 = vld [vmem:[#allocation29_spill] sm:$0xff]  ;;  %v11369_v57 = vld [vmem:[%s11489_s30 + $0x240] sm:$0xff] }
 0x605   : > { %v6758_v3 = vadd.f32 %v6630_v56, %v19213_v0  ;;  %v6506_v43 = vsel %vm14954_vm4, %v19214_v47, %v19036_v19  ;;  %v6507_v36 = vsel %vm14954_vm4, %v19215_v37, %v19036_v19  ;;  %v7653_v61 = vsel %vm7587_vm5, %v16984_v54, %v6756_v26  ;;  %v7424_v29 = vpop.xlane.xlu1 %7423  ;;  %v19218_v54 = vld [vmem:[#allocation98_spill] sm:$0xff]  ;;  %v11368_v62 = vld [vmem:[%s11489_s30 + $0x238] sm:$0xff]  ;;  %v11370_v0 = vld [vmem:[%s11489_s30 + $0x248] sm:$0xff] }
 0x606   : > { %v7654_v15 = vsel %vm7587_vm5, %v17005_v13, %v6757_v20  ;;  %v6759_v60 = vadd.f32 %v6631_v44, %v19216_v48  ;;  %v6760_v56 = vadd.f32 %v6632_v32, %v19217_v17  ;;  %7782 = vst.msk [vmem:[%s15682_s28 + $0x208] sm:$0xff] %vm7716_vm6, %v7653_v61  ;;  %v6761_v25 = vadd.f32 %v6633_v35, %v19218_v54  ;;  %v19220_v20 = vld [vmem:[#allocation19_spill] sm:$0xff]  ;;  %v19222_v21 = vld [vmem:[#allocation26_spill] sm:$0xff]  ;;  %v11371_v35 = vld [vmem:[%s11489_s30 + $0x250] sm:$0xff] }
 0x607   : > { %7783 = vst.msk [vmem:[%s15682_s28 + $0x210] sm:$0xff] %vm7716_vm6, %v7654_v15  ;;  %v7655_v5 = vsel %vm7587_vm5, %v17031_v30, %v6758_v3  ;;  %v6634_v13 = vmul.f32 %v11368_v62, %v6506_v43  ;;  %v6635_v7 = vmul.f32 %v11369_v57, %v6507_v36  ;;  %v19219_v30 = vld [vmem:[#allocation192_spill] sm:$0xff]  ;;  %v6509_v27 = vsel %vm14954_vm4, %v19220_v20, %v19036_v19  ;;  %v19223_v43 = vld [vmem:[#allocation195_spill] sm:$0xff]  ;;  %v19227_v62 = vld [vmem:[#allocation54_spill] sm:$0xff] }
 0x608   : > { %7784 = vst.msk [vmem:[%s15682_s28 + $0x218] sm:$0xff] %vm7716_vm6, %v7655_v5  ;;  %v7656_v14 = vsel %vm7587_vm5, %v17058_v59, %v6759_v60  ;;  %v7657_v26 = vsel %vm7587_vm5, %v17084_v45, %v6760_v56  ;;  %v6508_v40 = vsel %vm14954_vm4, %v19219_v30, %v19036_v19  ;;  %v7658_v59 = vsel %vm7587_vm5, %v17116_v28, %v6761_v25  ;;  %v19221_v45 = vld [vmem:[#allocation97_spill] sm:$0xff]  ;;  %v7427_v24 = vpop.xlane.xlu0 %7426  ;;  %v19224_v28 = vld [vmem:[#allocation23_spill] sm:$0xff]  ;;  %v19225_v61 = vld [vmem:[#allocation196_spill] sm:$0xff] }
 0x609   : > { %7785 = vst.msk [vmem:[%s15682_s28 + $0x220] sm:$0xff] %vm7716_vm6, %v7656_v14  ;;  %7786 = vst.msk [vmem:[%s15682_s28 + $0x228] sm:$0xff] %vm7716_vm6, %v7657_v26  ;;  %v6762_v44 = vadd.f32 %v6634_v13, %v19221_v45  ;;  %v6763_v32 = vadd.f32 %v6635_v7, %v19222_v21  ;;  %v6636_v3 = vmul.f32 %v11370_v0, %v6508_v40  ;;  %v19226_v17 = vld [vmem:[#allocation99_spill] sm:$0xff]  ;;  %v11372_v5 = vld [vmem:[%s11489_s30 + $0x258] sm:$0xff] }
 0x60a   : > { %7787 = vst.msk [vmem:[%s15682_s28 + $0x230] sm:$0xff] %vm7716_vm6, %v7658_v59  ;;  %v6637_v47 = vmul.f32 %v11371_v35, %v6509_v27  ;;  %v6510_v37 = vsel %vm14954_vm4, %v19223_v43, %v19036_v19  ;;  %v6511_v36 = vsel %vm14954_vm4, %v19224_v28, %v19036_v19  ;;  %v6512_v15 = vsel %vm14954_vm4, %v19225_v61, %v19036_v19  ;;  %v17266_v25 = vld [vmem:[%s17855_s2 + $0x2] ss:$0 sm:$0xff]  ;;  %v19229_v30 = vld [vmem:[#allocation33_spill] sm:$0xff]  ;;  %v11375_v20 = vld [vmem:[%s11489_s30 + $0x268] sm:$0xff] }
 0x60b   : > { %v7659_v48 = vsel %vm7587_vm5, %v17141_v16, %v6762_v44  ;;  %v7660_v60 = vsel %vm7587_vm5, %v7421_v23, %v6763_v32  ;;  %v6764_v56 = vadd.f32 %v6636_v3, %v19226_v17  ;;  %v6638_v54 = vmul.f32 %v11372_v5, %v6510_v37  ;;  %v19228_v16 = vld [vmem:[#allocation50_spill] sm:$0xff]  ;;  %v7430_v57 = vpop.xlane.xlu1 %7429  ;;  %v19231_v32 = vld [vmem:[#allocation51_spill] sm:$0xff]  ;;  %v19232_v43 = vld [vmem:[#allocation197_spill] sm:$0xff] }
 0x60c   : > { %v4436_v13 = vadd.f32 %v17266_v25, %v19227_v62  ;;  %7788 = vst.msk [vmem:[%s15682_s28 + $0x238] sm:$0xff] %vm7716_vm6, %v7659_v48  ;;  %7789 = vst.msk [vmem:[%s15682_s28 + $0x240] sm:$0xff] %vm7716_vm6, %v7660_v60  ;;  %v6765_v23 = vadd.f32 %v6637_v47, %v19228_v16  ;;  %v11374_v7 = vld [vmem:[%s11489_s30 + $0x260] sm:$0xff]  ;;  %v6640_v27 = vmul.f32 %v11375_v20, %v6512_v15  ;;  %v11376_v47 = vld [vmem:[%s11489_s30 + $0x270] sm:$0xff] }
 0x60d   : > { %v6639_v14 = vmul.f32 %v11374_v7, %v6511_v36  ;;  %v7661_v26 = vsel %vm7587_vm5, %v7424_v29, %v6764_v56  ;;  %v6766_v40 = vadd.f32 %v6638_v54, %v19229_v30  ;;  %v19230_v59 = vld [vmem:[#allocation198_spill] sm:$0xff]  ;;  %v4441_v29 = vadd.f32 %v17266_v25, %v19231_v32  ;;  %v19233_v36 = vld [vmem:[#allocation56_spill] sm:$0xff]  ;;  %v11377_v60 = vld [vmem:[%s11489_s30 + $0x278] sm:$0xff] }
 0x60e   : > { %v6513_v45 = vsel %vm14954_vm4, %v19230_v59, %v19036_v19  ;;  %7790 = vst.msk [vmem:[%s15682_s28 + $0x248] sm:$0xff] %vm7716_vm6, %v7661_v26  ;;  %v7662_v44 = vsel %vm7587_vm5, %v7427_v24, %v6765_v23  ;;  %v7433_v3 = vpop.xlane.xlu0 %7432  ;;  %v6514_v37 = vsel %vm14954_vm4, %v19232_v43, %v19036_v19  ;;  %v4446_v61 = vadd.f32 %v17266_v25, %v19233_v36  ;;  %v19234_v54 = vld [vmem:[#allocation53_spill] sm:$0xff]  ;;  %v11378_v23 = vld [vmem:[%s11489_s30 + $0x280] sm:$0xff]  ;;  %v11379_v20 = vld [vmem:[%s11489_s30 + $0x288] sm:$0xff] }
 0x60f   : > { %v6767_v21 = vadd.f32 %v6639_v14, %v4436_v13  ;;  %7791 = vst.msk [vmem:[%s15682_s28 + $0x250] sm:$0xff] %vm7716_vm6, %v7662_v44  ;;  %v7663_v0 = vsel %vm7587_vm5, %v7430_v57, %v6766_v40  ;;  %v6641_v24 = vmul.f32 %v11376_v47, %v6513_v45  ;;  %v6768_v28 = vadd.f32 %v6640_v27, %v4441_v29  ;;  %v19235_v14 = vld [vmem:[#allocation58_spill] sm:$0xff]  ;;  %v19236_v59 = vld [vmem:[#allocation200_spill] sm:$0xff]  ;;  %v19237_v44 = vld [vmem:[#allocation55_spill] sm:$0xff] }
 0x610   : > { %7792 = vst.msk [vmem:[%s15682_s28 + $0x258] sm:$0xff] %vm7716_vm6, %v7663_v0  ;;  %v6642_v17 = vmul.f32 %v11377_v60, %v6514_v37  ;;  %v6515_v56 = vsel %vm14954_vm4, %v15952_v55, %v19036_v19  ;;  %v4451_v62 = vadd.f32 %v17266_v25, %v19234_v54  ;;  %v6516_v7 = vsel %vm14954_vm4, %v15933_v34, %v19036_v19  ;;  %v11380_v0 = vld [vmem:[%s11489_s30 + $0x290] sm:$0xff] }
 0x611   : > { %v7664_v35 = vsel %vm7587_vm5, %v7433_v3, %v6767_v21  ;;  %v7436_v15 = vpop.xlane.xlu1 %7435  ;;  %v6769_v5 = vadd.f32 %v6641_v24, %v4446_v61  ;;  %v6643_v57 = vmul.f32 %v11378_v23, %v6515_v56  ;;  %v4456_v26 = vadd.f32 %v17266_v25, %v19235_v14  ;;  %v19239_v43 = vld [vmem:[#allocation60_spill] sm:$0xff]  ;;  %v11381_v61 = vld [vmem:[%s11489_s30 + $0x298] sm:$0xff]  ;;  %v19242_v23 = vld [vmem:[#allocation38_spill] sm:$0xff] }
 0x612   : > { %7793 = vst.msk [vmem:[%s15682_s28 + $0x260] sm:$0xff] %vm7716_vm6, %v7664_v35  ;;  %v7665_v48 = vsel %vm7587_vm5, %v7436_v15, %v6768_v28  ;;  %v6770_v55 = vadd.f32 %v6642_v17, %v4451_v62  ;;  %v6644_v27 = vmul.f32 %v11379_v20, %v6516_v7  ;;  %v6517_v45 = vsel %vm14954_vm4, %v19236_v59, %v19036_v19  ;;  %v19238_v35 = vld [vmem:[#allocation31_spill] sm:$0xff]  ;;  %v19241_v56 = vld [vmem:[#allocation57_spill] sm:$0xff] }
 0x613   : > { %7794 = vst.msk [vmem:[%s15682_s28 + $0x268] sm:$0xff] %vm7716_vm6, %v7665_v48  ;;  %v6771_v34 = vadd.f32 %v6643_v57, %v4456_v26  ;;  %v4461_v21 = vadd.f32 %v17266_v25, %v19237_v44  ;;  %v6645_v3 = vmul.f32 %v11380_v0, %v6517_v45  ;;  %v6518_v47 = vsel %vm14954_vm4, %v19238_v35, %v19036_v19  ;;  %v19240_v48 = vld [vmem:[#allocation28_spill] sm:$0xff] }
 0x614   : > { %v7439_v13 = vpop.xlane.xlu0 %7438  ;;  %v4466_v37 = vadd.f32 %v17266_v25, %v19239_v43  ;;  %v6646_v15 = vmul.f32 %v11381_v61, %v6518_v47  ;;  %v6519_v60 = vsel %vm14954_vm4, %v19240_v48, %v19036_v19  ;;  %v6520_v57 = vsel %vm14954_vm4, %v19242_v23, %v19036_v19 }
 0x615   : > { %v7666_v16 = vsel %vm7587_vm5, %v7439_v13, %v6769_v5  ;;  %v6772_v24 = vadd.f32 %v6644_v27, %v4461_v21  ;;  %v4471_v5 = vadd.f32 %v17266_v25, %v19241_v56  ;;  %v11382_v13 = vld [vmem:[%s11489_s30 + $0x2a0] sm:$0xff]  ;;  %v19244_v27 = vld [vmem:[#allocation52_spill] sm:$0xff] }
 0x616   : > { %7795 = vst.msk [vmem:[%s15682_s28 + $0x270] sm:$0xff] %vm7716_vm6, %v7666_v16  ;;  %v6773_v17 = vadd.f32 %v6645_v3, %v4466_v37  ;;  %v6647_v16 = vmul.f32 %v11382_v13, %v6519_v60  ;;  %v6521_v59 = vsel %vm14954_vm4, %v19244_v27, %v19036_v19  ;;  %v19246_v3 = vld [vmem:[#allocation35_spill] sm:$0xff] }
 0x617   : > { %v7442_v30 = vpop.xlane.xlu1 %7441  ;;  %v6774_v7 = vadd.f32 %v6646_v15, %v4471_v5  ;;  %v6522_v35 = vsel %vm14954_vm4, %v19246_v3, %v19036_v19  ;;  %v19248_v15 = vld [vmem:[#allocation92_spill] sm:$0xff] }
 0x618   : > { %v7667_v40 = vsel %vm7587_vm5, %v7442_v30, %v6770_v55  ;;  %v19243_v55 = vld [vmem:[#allocation62_spill] sm:$0xff]  ;;  %v6523_v48 = vsel %vm14954_vm4, %v19248_v15, %v19036_v19 }
 0x619   : > { %7796 = vst.msk [vmem:[%s15682_s28 + $0x278] sm:$0xff] %vm7716_vm6, %v7667_v40  ;;  %v4476_v14 = vadd.f32 %v17266_v25, %v19243_v55  ;;  %v11383_v40 = vld [vmem:[%s11489_s30 + $0x2a8] sm:$0xff] }
 0x61a   : > { %v7445_v32 = vpop.xlane.xlu0 %7444  ;;  %v6648_v20 = vmul.f32 %v11383_v40, %v6520_v57 }
 0x61b   : > { %v7668_v29 = vsel %vm7587_vm5, %v7445_v32, %v6771_v34  ;;  %v6775_v45 = vadd.f32 %v6647_v16, %v4476_v14  ;;  %v19245_v34 = vld [vmem:[#allocation59_spill] sm:$0xff]  ;;  %v19250_v16 = vld [vmem:[#allocation32_spill] sm:$0xff] }
 0x61c   : > { %7797 = vst.msk [vmem:[%s15682_s28 + $0x280] sm:$0xff] %vm7716_vm6, %v7668_v29  ;;  %v4481_v44 = vadd.f32 %v17266_v25, %v19245_v34  ;;  %v11384_v29 = vld [vmem:[%s11489_s30 + $0x2b0] sm:$0xff]  ;;  %v6524_v23 = vsel %vm14954_vm4, %v19250_v16, %v19036_v19 }
 0x61d   : > { %v7448_v28 = vpop.xlane.xlu1 %7447  ;;  %v6649_v0 = vmul.f32 %v11384_v29, %v6521_v59 }
 0x61e   : > { %v7669_v36 = vsel %vm7587_vm5, %v7448_v28, %v6772_v24  ;;  %v6776_v47 = vadd.f32 %v6648_v20, %v4481_v44  ;;  %v19247_v24 = vld [vmem:[#allocation43_spill] sm:$0xff]  ;;  %v19252_v20 = vld [vmem:[#allocation189_spill] sm:$0xff] }
 0x61f   : > { %7798 = vst.msk [vmem:[%s15682_s28 + $0x288] sm:$0xff] %vm7716_vm6, %v7669_v36  ;;  %v4486_v43 = vadd.f32 %v17266_v25, %v19247_v24  ;;  %v11385_v36 = vld [vmem:[%s11489_s30 + $0x2b8] sm:$0xff]  ;;  %v6525_v27 = vsel %vm14954_vm4, %v19252_v20, %v19036_v19 }
 0x620   : > { %v7451_v54 = vpop.xlane.xlu0 %7450  ;;  %v6650_v61 = vmul.f32 %v11385_v36, %v6522_v35 }
 0x621   : > { %v7670_v62 = vsel %vm7587_vm5, %v7451_v54, %v6773_v17  ;;  %v6777_v60 = vadd.f32 %v6649_v0, %v4486_v43  ;;  %v19249_v17 = vld [vmem:[#allocation61_spill] sm:$0xff]  ;;  %v19254_v0 = vld [vmem:[#allocation90_spill] sm:$0xff] }
 0x622   : > { %7799 = vst.msk [vmem:[%s15682_s28 + $0x290] sm:$0xff] %vm7716_vm6, %v7670_v62  ;;  %v4491_v56 = vadd.f32 %v17266_v25, %v19249_v17  ;;  %v11386_v62 = vld [vmem:[%s11489_s30 + $0x2c0] sm:$0xff]  ;;  %v6526_v3 = vsel %vm14954_vm4, %v19254_v0, %v19036_v19 }
 0x623   : > { %v7454_v26 = vpop.xlane.xlu1 %7453  ;;  %v6651_v13 = vmul.f32 %v11386_v62, %v6523_v48 }
 0x624   : > { %v7671_v30 = vsel %vm7587_vm5, %v7454_v26, %v6774_v7  ;;  %v6778_v57 = vadd.f32 %v6650_v61, %v4491_v56  ;;  %v19251_v7 = vld [vmem:[#allocation45_spill] sm:$0xff]  ;;  %v19256_v61 = vld [vmem:[#allocation7_spill] sm:$0xff] }
 0x625   : > { %7800 = vst.msk [vmem:[%s15682_s28 + $0x298] sm:$0xff] %vm7716_vm6, %v7671_v30  ;;  %v4496_v55 = vadd.f32 %v17266_v25, %v19251_v7  ;;  %v11387_v30 = vld [vmem:[%s11489_s30 + $0x2c8] sm:$0xff]  ;;  %v6527_v15 = vsel %vm14954_vm4, %v19256_v61, %v19036_v19 }
 0x626   : > { %v7457_v21 = vpop.xlane.xlu0 %7456  ;;  %v6652_v40 = vmul.f32 %v11387_v30, %v6524_v23 }
 0x627   : > { %v7672_v32 = vsel %vm7587_vm5, %v7457_v21, %v6775_v45  ;;  %v6779_v59 = vadd.f32 %v6651_v13, %v4496_v55  ;;  %v19253_v45 = vld [vmem:[#allocation40_spill] sm:$0xff]  ;;  %v19258_v13 = vld [vmem:[#allocation93_spill] sm:$0xff] }
 0x628   : > { %7801 = vst.msk [vmem:[%s15682_s28 + $0x2a0] sm:$0xff] %vm7716_vm6, %v7672_v32  ;;  %v4501_v34 = vadd.f32 %v17266_v25, %v19253_v45  ;;  %v11388_v32 = vld [vmem:[%s11489_s30 + $0x2d0] sm:$0xff]  ;;  %v6528_v16 = vsel %vm14954_vm4, %v19258_v13, %v19036_v19  ;;  %v11395_v13 = vld [vmem:[%s11489_s30 + $0x308] sm:$0xff] }
 0x629   : > { %v7460_v37 = vpop.xlane.xlu1 %7459  ;;  %v6653_v29 = vmul.f32 %v11388_v32, %v6525_v27  ;;  %v19260_v27 = vld [vmem:[#allocation42_spill] sm:$0xff]  ;;  %v6530_v32 = vsel %vm14954_vm4, %v16187_v39, %v19036_v19 }
 0x62a   : > { %v7673_v28 = vsel %vm7587_vm5, %v7460_v37, %v6776_v47  ;;  %v6780_v35 = vadd.f32 %v6652_v40, %v4501_v34  ;;  %v19255_v47 = vld [vmem:[#allocation47_spill] sm:$0xff]  ;;  %v6529_v40 = vsel %vm14954_vm4, %v16205_v4, %v19036_v19 }
 0x62b   : > { %7802 = vst.msk [vmem:[%s15682_s28 + $0x2a8] sm:$0xff] %vm7716_vm6, %v7673_v28  ;;  %v4506_v24 = vadd.f32 %v17266_v25, %v19255_v47  ;;  %v11389_v28 = vld [vmem:[%s11489_s30 + $0x2d8] sm:$0xff] }
 0x62c   : > { %v7463_v5 = vpop.xlane.xlu0 %7462  ;;  %v6654_v36 = vmul.f32 %v11389_v28, %v6526_v3  ;;  %v11393_v47 = vld [vmem:[%s11489_s30 + $0x2f8] sm:$0xff] }
 0x62d   : > { %v7674_v54 = vsel %vm7587_vm5, %v7463_v5, %v6777_v60  ;;  %v6781_v48 = vadd.f32 %v6653_v29, %v4506_v24  ;;  %v19257_v60 = vld [vmem:[#allocation41_spill] sm:$0xff]  ;;  %v19261_v29 = vld [vmem:[#allocation64_spill] sm:$0xff]  ;;  %v6658_v24 = vmul.f32 %v11393_v47, %v6530_v32 }
 0x62e   : > { %7803 = vst.msk [vmem:[%s15682_s28 + $0x2b0] sm:$0xff] %vm7716_vm6, %v7674_v54  ;;  %v4511_v17 = vadd.f32 %v17266_v25, %v19257_v60  ;;  %v11390_v54 = vld [vmem:[%s11489_s30 + $0x2e0] sm:$0xff]  ;;  %v4526_v0 = vadd.f32 %v17266_v25, %v19261_v29  ;;  %v19263_v60 = vld [vmem:[#allocation39_spill] sm:$0xff] }
 0x62f   : > { %v7466_v14 = vpop.xlane.xlu1 %7465  ;;  %v6655_v62 = vmul.f32 %v11390_v54, %v6527_v15  ;;  %v11394_v15 = vld [vmem:[%s11489_s30 + $0x300] sm:$0xff] }
 0x630   : > { %v7675_v26 = vsel %vm7587_vm5, %v7466_v14, %v6778_v57  ;;  %v6782_v23 = vadd.f32 %v6654_v36, %v4511_v17  ;;  %v19259_v57 = vld [vmem:[#allocation46_spill] sm:$0xff]  ;;  %v6532_v17 = vsel %vm14954_vm4, %v19263_v60, %v19036_v19 }
 0x631   : > { %7804 = vst.msk [vmem:[%s15682_s28 + $0x2b8] sm:$0xff] %vm7716_vm6, %v7675_v26  ;;  %v4516_v7 = vadd.f32 %v17266_v25, %v19259_v57  ;;  %v11391_v26 = vld [vmem:[%s11489_s30 + $0x2e8] sm:$0xff] }
 0x632   : > { %v7469_v44 = vpop.xlane.xlu0 %7468  ;;  %v6656_v30 = vmul.f32 %v11391_v26, %v6528_v16  ;;  %v6660_v16 = vmul.f32 %v11395_v13, %v6532_v17  ;;  %v11399_v17 = vld [vmem:[%s11489_s30 + $0x328] sm:$0xff]  ;;  %v19273_v13 = vld [vmem:[#allocation65_spill] sm:$0xff] }
 0x633   : > { %v7676_v21 = vsel %vm7587_vm5, %v7469_v44, %v6779_v59  ;;  %v6783_v20 = vadd.f32 %v6655_v62, %v4516_v7  ;;  %v4521_v59 = vadd.f32 %v17266_v25, %v19260_v27  ;;  %v11392_v44 = vld [vmem:[%s11489_s30 + $0x2f0] sm:$0xff] }
 0x634   : > { %7805 = vst.msk [vmem:[%s15682_s28 + $0x2c0] sm:$0xff] %vm7716_vm6, %v7676_v21  ;;  %v6657_v21 = vmul.f32 %v11392_v44, %v6529_v40  ;;  %v19265_v7 = vld [vmem:[#allocation48_spill] sm:$0xff] }
 0x635   : > { %v7472_v43 = vpop.xlane.xlu1 %7471  ;;  %v6784_v4 = vadd.f32 %v6656_v30, %v4521_v59  ;;  %v11396_v30 = vld [vmem:[%s11489_s30 + $0x310] sm:$0xff] }
 0x636   : > { %v7677_v37 = vsel %vm7587_vm5, %v7472_v43, %v6780_v35  ;;  %v6531_v43 = vsel %vm14954_vm4, %v16239_v38, %v19036_v19  ;;  %v6785_v39 = vadd.f32 %v6657_v21, %v4526_v0  ;;  %v19267_v59 = vld [vmem:[#allocation68_spill] sm:$0xff]  ;;  %v11397_v21 = vld [vmem:[%s11489_s30 + $0x318] sm:$0xff] }
 0x637   : > { %7806 = vst.msk [vmem:[%s15682_s28 + $0x2c8] sm:$0xff] %vm7716_vm6, %v7677_v37  ;;  %v19262_v37 = vld [vmem:[#allocation44_spill] sm:$0xff] }
 0x638   : > { %v7475_v56 = vpop.xlane.xlu0 %7474  ;;  %v4531_v28 = vadd.f32 %v17266_v25, %v19262_v37  ;;  %v19270_v37 = vld [vmem:[#allocation96_spill] sm:$0xff] }
 0x639   : > { %v7678_v5 = vsel %vm7587_vm5, %v7475_v56, %v6781_v48  ;;  %v6659_v48 = vmul.f32 %v11394_v15, %v6531_v43  ;;  %v19264_v56 = vld [vmem:[#allocation66_spill] sm:$0xff] }
 0x63a   : > { %7807 = vst.msk [vmem:[%s15682_s28 + $0x2d0] sm:$0xff] %vm7716_vm6, %v7678_v5  ;;  %v6786_v38 = vadd.f32 %v6658_v24, %v4531_v28  ;;  %v4536_v5 = vadd.f32 %v17266_v25, %v19264_v56  ;;  %v11398_v43 = vld [vmem:[%s11489_s30 + $0x320] sm:$0xff]  ;;  %v6536_v28 = vsel %vm14954_vm4, %v19270_v37, %v19036_v19  ;;  %v6537_v56 = vsel %vm14954_vm4, %v16344_v10, %v19036_v19 }
 0x63b   : > { %v7478_v55 = vpop.xlane.xlu1 %7477 }
 0x63c   : > { %v7679_v14 = vsel %vm7587_vm5, %v7478_v55, %v6782_v23  ;;  %v6533_v23 = vsel %vm14954_vm4, %v16273_v6, %v19036_v19  ;;  %v6787_v57 = vadd.f32 %v6659_v48, %v4536_v5  ;;  %v4541_v55 = vadd.f32 %v17266_v25, %v19265_v7  ;;  %v11400_v7 = vld [vmem:[%s11489_s30 + $0x330] sm:$0xff] }
 0x63d   : > { %7808 = vst.msk [vmem:[%s15682_s28 + $0x2d8] sm:$0xff] %vm7716_vm6, %v7679_v14  ;;  %v6661_v40 = vmul.f32 %v11396_v30, %v6533_v23  ;;  %v19274_v30 = vld [vmem:[#allocation193_spill] sm:$0xff] }
 0x63e   : > { %v7481_v45 = vpop.xlane.xlu0 %7480  ;;  %v6788_v6 = vadd.f32 %v6660_v16, %v4541_v55  ;;  %v4561_v16 = vadd.f32 %v17266_v25, %v19273_v13  ;;  %v6665_v55 = vmul.f32 %v11400_v7, %v6537_v56  ;;  %v6543_v13 = vsel %vm14954_vm4, %v16451_v46, %v19036_v19 }
 0x63f   : > { %v7680_v34 = vsel %vm7587_vm5, %v7481_v45, %v6783_v20  ;;  %v19266_v20 = vld [vmem:[#allocation94_spill] sm:$0xff]  ;;  %v4546_v45 = vadd.f32 %v17266_v25, %v19267_v59 }
 0x640   : > { %7809 = vst.msk [vmem:[%s15682_s28 + $0x2e0] sm:$0xff] %vm7716_vm6, %v7680_v34  ;;  %v6534_v27 = vsel %vm14954_vm4, %v19266_v20, %v19036_v19  ;;  %v19275_v20 = vld [vmem:[#allocation72_spill] sm:$0xff]  ;;  %v19276_v59 = vld [vmem:[#allocation102_spill] sm:$0xff] }
 0x641   : > { %v7484_v3 = vpop.xlane.xlu1 %7483  ;;  %v6662_v32 = vmul.f32 %v11397_v21, %v6534_v27  ;;  %v6789_v0 = vadd.f32 %v6661_v40, %v4546_v45  ;;  %v6539_v40 = vsel %vm14954_vm4, %v19274_v30, %v19036_v19  ;;  %v4566_v27 = vadd.f32 %v17266_v25, %v19275_v20  ;;  %v11406_v30 = vld [vmem:[%s11489_s30 + $0x360] sm:$0xff] }
 0x642   : > { %v7681_v35 = vsel %vm7587_vm5, %v7484_v3, %v6784_v4  ;;  %v19268_v4 = vld [vmem:[#allocation91_spill] sm:$0xff]  ;;  %v6540_v45 = vsel %vm14954_vm4, %v19276_v59, %v19036_v19  ;;  %v19283_v59 = vld [vmem:[#allocation4_spill] sm:$0xff] }
 0x643   : > { %7810 = vst.msk [vmem:[%s15682_s28 + $0x2e8] sm:$0xff] %vm7716_vm6, %v7681_v35  ;;  %v6535_v29 = vsel %vm14954_vm4, %v19268_v4, %v19036_v19  ;;  %v19269_v3 = vld [vmem:[#allocation63_spill] sm:$0xff]  ;;  %v11402_v4 = vld [vmem:[%s11489_s30 + $0x340] sm:$0xff] }
 0x644   : > { %v7487_v36 = vpop.xlane.xlu0 %7486  ;;  %v4551_v35 = vadd.f32 %v17266_v25, %v19269_v3 }
 0x645   : > { %v7682_v61 = vsel %vm7587_vm5, %v7487_v36, %v6785_v39  ;;  %v6663_v39 = vmul.f32 %v11398_v43, %v6535_v29  ;;  %v6667_v29 = vmul.f32 %v11402_v4, %v6539_v40  ;;  %v6671_v40 = vmul.f32 %v11406_v30, %v6543_v13  ;;  %v19285_v4 = vld [vmem:[#allocation73_spill] sm:$0xff] }
 0x646   : > { %7811 = vst.msk [vmem:[%s15682_s28 + $0x2f0] sm:$0xff] %vm7716_vm6, %v7682_v61  ;;  %v6790_v36 = vadd.f32 %v6662_v32, %v4551_v35  ;;  %v19271_v61 = vld [vmem:[#allocation70_spill] sm:$0xff]  ;;  %v6793_v32 = vadd.f32 %v6665_v55, %v4566_v27  ;;  %v11403_v35 = vld [vmem:[%s11489_s30 + $0x348] sm:$0xff]  ;;  %v6544_v55 = vsel %vm14954_vm4, %v16433_v2, %v19036_v19 }
 0x647   : > { %v7490_v54 = vpop.xlane.xlu1 %7489  ;;  %v4556_v15 = vadd.f32 %v17266_v25, %v19271_v61  ;;  %v6542_v61 = vsel %vm14954_vm4, %v16396_v9, %v19036_v19 }
 0x648   : > { %v7683_v62 = vsel %vm7587_vm5, %v7490_v54, %v6786_v38  ;;  %v6664_v38 = vmul.f32 %v11399_v17, %v6536_v28  ;;  %v19272_v54 = vld [vmem:[#allocation12_spill] sm:$0xff] }
 0x649   : > { %7812 = vst.msk [vmem:[%s15682_s28 + $0x2f8] sm:$0xff] %vm7716_vm6, %v7683_v62  ;;  %v6791_v5 = vadd.f32 %v6663_v39, %v4556_v15  ;;  %v6538_v62 = vsel %vm14954_vm4, %v19272_v54, %v19036_v19  ;;  %v19279_v39 = vld [vmem:[#allocation74_spill] sm:$0xff]  ;;  %v19280_v15 = vld [vmem:[#allocation69_spill] sm:$0xff] }
 0x64a   : > { %v7493_v14 = vpop.xlane.xlu0 %7492  ;;  %v6792_v10 = vadd.f32 %v6664_v38, %v4561_v16  ;;  %v4576_v37 = vadd.f32 %v17266_v25, %v19279_v39  ;;  %v11404_v38 = vld [vmem:[%s11489_s30 + $0x350] sm:$0xff] }
 0x64b   : > { %v7684_v26 = vsel %vm7587_vm5, %v7493_v14, %v6787_v57  ;;  %v11401_v14 = vld [vmem:[%s11489_s30 + $0x338] sm:$0xff]  ;;  %v19281_v16 = vld [vmem:[#allocation76_spill] sm:$0xff] }
 0x64c   : > { %7813 = vst.msk [vmem:[%s15682_s28 + $0x300] sm:$0xff] %vm7716_vm6, %v7684_v26  ;;  %v6666_v26 = vmul.f32 %v11401_v14, %v6538_v62  ;;  %v6795_v17 = vadd.f32 %v6667_v29, %v4576_v37  ;;  %v11405_v62 = vld [vmem:[%s11489_s30 + $0x358] sm:$0xff]  ;;  %v4601_v29 = vadd.f32 %v17266_v25, %v19285_v4 }
 0x64d   : > { %v7496_v34 = vpop.xlane.xlu1 %7495  ;;  %v6670_v9 = vmul.f32 %v11405_v62, %v6542_v61 }
 0x64e   : > { %v7685_v44 = vsel %vm7587_vm5, %v7496_v34, %v6788_v6  ;;  %v19277_v34 = vld [vmem:[#allocation67_spill] sm:$0xff] }
 0x64f   : > { %7814 = vst.msk [vmem:[%s15682_s28 + $0x308] sm:$0xff] %vm7716_vm6, %v7685_v44  ;;  %v4571_v44 = vadd.f32 %v17266_v25, %v19277_v34  ;;  %v19284_v34 = vld [vmem:[#allocation78_spill] sm:$0xff] }
 0x650   : > { %v7499_v47 = vpop.xlane.xlu0 %7498 }
 0x651   : > { %v7686_v24 = vsel %vm7587_vm5, %v7499_v47, %v6789_v0  ;;  %v6794_v3 = vadd.f32 %v6666_v26, %v4571_v44  ;;  %v6668_v47 = vmul.f32 %v11403_v35, %v6540_v45  ;;  %v6545_v45 = vsel %vm14954_vm4, %v19283_v59, %v19036_v19 }
 0x652   : > { %7815 = vst.msk [vmem:[%s15682_s28 + $0x310] sm:$0xff] %vm7716_vm6, %v7686_v24  ;;  %v19278_v24 = vld [vmem:[#allocation49_spill] sm:$0xff]  ;;  %v4596_v44 = vadd.f32 %v17266_v25, %v19284_v34  ;;  %v19292_v34 = vld [vmem:[#allocation84_spill] sm:$0xff] }
 0x653   : > { %v7502_v48 = vpop.xlane.xlu1 %7501  ;;  %v6541_v43 = vsel %vm14954_vm4, %v19278_v24, %v19036_v19  ;;  %v11408_v24 = vld [vmem:[%s11489_s30 + $0x370] sm:$0xff] }
 0x654   : > { %v7687_v60 = vsel %vm7587_vm5, %v7502_v48, %v6790_v36  ;;  %v4581_v48 = vadd.f32 %v17266_v25, %v19280_v15  ;;  %v6669_v56 = vmul.f32 %v11404_v38, %v6541_v43  ;;  %v6673_v43 = vmul.f32 %v11408_v24, %v6545_v45  ;;  %v11414_v24 = vld [vmem:[%s11489_s30 + $0x3a0] sm:$0xff] }
 0x655   : > { %7816 = vst.msk [vmem:[%s15682_s28 + $0x318] sm:$0xff] %vm7716_vm6, %v7687_v60  ;;  %v6551_v45 = vsel %vm14954_vm4, %v16585_v41, %v19036_v19  ;;  %v19293_v41 = vld [vmem:[#allocation79_spill] sm:$0xff] }
 0x656   : > { %v7505_v23 = vpop.xlane.xlu0 %7504  ;;  %v6796_v54 = vadd.f32 %v6668_v47, %v4581_v48  ;;  %v6799_v47 = vadd.f32 %v6671_v40, %v4596_v44  ;;  %v11409_v48 = vld [vmem:[%s11489_s30 + $0x378] sm:$0xff]  ;;  %v6550_v40 = vsel %vm14954_vm4, %v16537_v50, %v19036_v19  ;;  %v4626_v44 = vadd.f32 %v17266_v25, %v19292_v34 }
 0x657   : > { %v7688_v57 = vsel %vm7587_vm5, %v7505_v23, %v6791_v5  ;;  %v4586_v23 = vadd.f32 %v17266_v25, %v19281_v16  ;;  %v11410_v16 = vld [vmem:[%s11489_s30 + $0x380] sm:$0xff] }
 0x658   : > { %7817 = vst.msk [vmem:[%s15682_s28 + $0x320] sm:$0xff] %vm7716_vm6, %v7688_v57 }
 0x659   : > { %v7508_v6 = vpop.xlane.xlu1 %7507  ;;  %v6797_v26 = vadd.f32 %v6669_v56, %v4586_v23 }
 0x65a   : > { %v7689_v21 = vsel %vm7587_vm5, %v7508_v6, %v6792_v10  ;;  %v19282_v10 = vld [vmem:[#allocation71_spill] sm:$0xff] }
 0x65b   : > { %7818 = vst.msk [vmem:[%s15682_s28 + $0x328] sm:$0xff] %vm7716_vm6, %v7689_v21  ;;  %v4591_v14 = vadd.f32 %v17266_v25, %v19282_v10  ;;  %v11407_v6 = vld [vmem:[%s11489_s30 + $0x368] sm:$0xff]  ;;  %v19290_v10 = vld [vmem:[#allocation82_spill] sm:$0xff] }
 0x65c   : > { %v7511_v0 = vpop.xlane.xlu0 %7510  ;;  %v6672_v2 = vmul.f32 %v11407_v6, %v6544_v55  ;;  %v6549_v55 = vsel %vm14954_vm4, %v16552_v63, %v19036_v19  ;;  %v11412_v6 = vld [vmem:[%s11489_s30 + $0x390] sm:$0xff] }
 0x65d   : > { %v7690_v28 = vsel %vm7587_vm5, %v7511_v0, %v6793_v32  ;;  %v7514_v36 = vpop.xlane.xlu1 %7513  ;;  %v6798_v27 = vadd.f32 %v6670_v9, %v4591_v14  ;;  %v6548_v9 = vsel %vm14954_vm4, %v16502_v8, %v19036_v19  ;;  %v4616_v14 = vadd.f32 %v17266_v25, %v19290_v10 }
 0x65e   : > { %7819 = vst.msk [vmem:[%s15682_s28 + $0x330] sm:$0xff] %vm7716_vm6, %v7690_v28  ;;  %v7691_v60 = vsel %vm7587_vm5, %v7514_v36, %v6794_v3  ;;  %v19286_v3 = vld [vmem:[#allocation194_spill] sm:$0xff]  ;;  %v6800_v37 = vadd.f32 %v6672_v2, %v4601_v29  ;;  %v19287_v28 = vld [vmem:[#allocation80_spill] sm:$0xff]  ;;  %v6677_v2 = vmul.f32 %v11412_v6, %v6549_v55 }
 0x65f   : > { %7820 = vst.msk [vmem:[%s15682_s28 + $0x338] sm:$0xff] %vm7716_vm6, %v7691_v60  ;;  %v6546_v35 = vsel %vm14954_vm4, %v19286_v3, %v19036_v19  ;;  %v4606_v36 = vadd.f32 %v17266_v25, %v19287_v28  ;;  %v4631_v3 = vadd.f32 %v17266_v25, %v19293_v41  ;;  %v6559_v41 = vsel %vm14954_vm4, %v16741_v12, %v19036_v19  ;;  %v19301_v12 = vld [vmem:[#allocation87_spill] sm:$0xff] }
 0x660   : > { %v7517_v5 = vpop.xlane.xlu0 %7516  ;;  %v6674_v60 = vmul.f32 %v11409_v48, %v6546_v35 }
 0x661   : > { %v7692_v57 = vsel %vm7587_vm5, %v7517_v5, %v6795_v17  ;;  %v7520_v7 = vpop.xlane.xlu1 %7519  ;;  %v19288_v17 = vld [vmem:[#allocation20_spill] sm:$0xff]  ;;  %v19289_v5 = vld [vmem:[#allocation75_spill] sm:$0xff]  ;;  %v6801_v62 = vadd.f32 %v6673_v43, %v4606_v36  ;;  %v6679_v43 = vmul.f32 %v11414_v24, %v6551_v45  ;;  %v11421_v24 = vld [vmem:[%s11489_s30 + $0x3d8] sm:$0xff] }
 0x662   : > { %7821 = vst.msk [vmem:[%s15682_s28 + $0x340] sm:$0xff] %vm7716_vm6, %v7692_v57  ;;  %v7693_v46 = vsel %vm7587_vm5, %v7520_v7, %v6796_v54  ;;  %v6547_v38 = vsel %vm14954_vm4, %v19288_v17, %v19036_v19  ;;  %v4611_v54 = vadd.f32 %v17266_v25, %v19289_v5  ;;  %v6554_v17 = vsel %vm14954_vm4, %v16598_v42, %v19036_v19  ;;  %v19296_v42 = vld [vmem:[#allocation88_spill] sm:$0xff] }
 0x663   : > { %7822 = vst.msk [vmem:[%s15682_s28 + $0x348] sm:$0xff] %vm7716_vm6, %v7693_v46  ;;  %v6675_v23 = vmul.f32 %v11410_v16, %v6547_v38  ;;  %v11411_v46 = vld [vmem:[%s11489_s30 + $0x388] sm:$0xff]  ;;  %v4646_v16 = vadd.f32 %v17266_v25, %v19296_v42 }
 0x664   : > { %v7523_v20 = vpop.xlane.xlu0 %7522  ;;  %v6802_v7 = vadd.f32 %v6674_v60, %v4611_v54  ;;  %v11416_v54 = vld [vmem:[%s11489_s30 + $0x3b0] sm:$0xff] }
 0x665   : > { %v7694_v21 = vsel %vm7587_vm5, %v7523_v20, %v6797_v26  ;;  %v7526_v32 = vpop.xlane.xlu1 %7525  ;;  %v6676_v26 = vmul.f32 %v11411_v46, %v6548_v9  ;;  %v19291_v20 = vld [vmem:[#allocation77_spill] sm:$0xff] }
 0x666   : > { %7823 = vst.msk [vmem:[%s15682_s28 + $0x350] sm:$0xff] %vm7716_vm6, %v7694_v21  ;;  %v7695_v0 = vsel %vm7587_vm5, %v7526_v32, %v6798_v27  ;;  %v4621_v63 = vadd.f32 %v17266_v25, %v19291_v20  ;;  %v6803_v27 = vadd.f32 %v6675_v23, %v4616_v14  ;;  %v11413_v32 = vld [vmem:[%s11489_s30 + $0x398] sm:$0xff]  ;;  %v6556_v14 = vsel %vm14954_vm4, %v16635_v11, %v19036_v19  ;;  %v19298_v11 = vld [vmem:[#allocation3_spill] sm:$0xff] }
 0x667   : > { %7824 = vst.msk [vmem:[%s15682_s28 + $0x358] sm:$0xff] %vm7716_vm6, %v7695_v0  ;;  %v6678_v4 = vmul.f32 %v11413_v32, %v6550_v40  ;;  %v6552_v0 = vsel %vm14954_vm4, %v16570_v58, %v19036_v19  ;;  %v19294_v58 = vld [vmem:[#allocation86_spill] sm:$0xff] }
 0x668   : > { %v7529_v39 = vpop.xlane.xlu0 %7528  ;;  %v6804_v21 = vadd.f32 %v6676_v26, %v4621_v63  ;;  %v4636_v28 = vadd.f32 %v17266_v25, %v19294_v58  ;;  %v6557_v63 = vsel %vm14954_vm4, %v16695_v31, %v19036_v19  ;;  %v19299_v31 = vld [vmem:[#allocation85_spill] sm:$0xff]  ;;  %v4671_v58 = vadd.f32 %v17266_v25, %v19301_v12 }
 0x669   : > { %v7696_v61 = vsel %vm7587_vm5, %v7529_v39, %v6799_v47  ;;  %v7532_v15 = vpop.xlane.xlu1 %7531  ;;  %v6805_v47 = vadd.f32 %v6677_v2, %v4626_v44  ;;  %v6558_v44 = vsel %vm14954_vm4, %v16675_v49, %v19036_v19  ;;  %v19300_v49 = vld [vmem:[#allocation5_spill] sm:$0xff] }
 0x66a   : > { %7825 = vst.msk [vmem:[%s15682_s28 + $0x360] sm:$0xff] %vm7716_vm6, %v7696_v61  ;;  %v7697_v56 = vsel %vm7587_vm5, %v7532_v15, %v6800_v37  ;;  %v6553_v37 = vsel %vm14954_vm4, %v16616_v18, %v19036_v19  ;;  %v6806_v61 = vadd.f32 %v6678_v4, %v4631_v3  ;;  %v11415_v15 = vld [vmem:[%s11489_s30 + $0x3a8] sm:$0xff]  ;;  %v19295_v18 = vld [vmem:[#allocation81_spill] sm:$0xff]  ;;  %v6807_v5 = vadd.f32 %v6679_v43, %v4636_v28  ;;  %v11420_v4 = vld [vmem:[%s11489_s30 + $0x3d0] sm:$0xff] }
 0x66b   : > { %7826 = vst.msk [vmem:[%s15682_s28 + $0x368] sm:$0xff] %vm7716_vm6, %v7697_v56  ;;  %v6680_v48 = vmul.f32 %v11415_v15, %v6552_v0  ;;  %v4641_v38 = vadd.f32 %v17266_v25, %v19295_v18  ;;  %v4666_v3 = vadd.f32 %v17266_v25, %v19300_v49  ;;  %v6686_v43 = vmul.f32 %v11421_v24, %v6558_v44 }
 0x66c   : > { %v7535_v13 = vpop.xlane.xlu0 %7534 }
 0x66d   : > { %v7698_v57 = vsel %vm7587_vm5, %v7535_v13, %v6801_v62  ;;  %v6681_v62 = vmul.f32 %v11416_v54, %v6553_v37  ;;  %v6555_v13 = vsel %vm14954_vm4, %v16655_v22, %v19036_v19  ;;  %v19297_v22 = vld [vmem:[#allocation83_spill] sm:$0xff]  ;;  %v6560_v37 = vsel %vm14954_vm4, %v16719_v53, %v19036_v19 }
 0x66e   : > { %7827 = vst.msk [vmem:[%s15682_s28 + $0x370] sm:$0xff] %vm7716_vm6, %v7698_v57  ;;  %v7538_v8 = vpop.xlane.xlu1 %7537  ;;  %v6808_v57 = vadd.f32 %v6680_v48, %v4641_v38  ;;  %v19302_v53 = vld [vmem:[#allocation15_spill] sm:$0xff]  ;;  %v6814_v38 = vadd.f32 %v6686_v43, %v4671_v58 }
 0x66f   : > { %v7699_v30 = vsel %vm7587_vm5, %v7538_v8, %v6802_v7  ;;  %v11417_v7 = vld [vmem:[%s11489_s30 + $0x3b8] sm:$0xff]  ;;  %v4651_v8 = vadd.f32 %v17266_v25, %v19297_v22  ;;  %v6809_v26 = vadd.f32 %v6681_v62, %v4646_v16  ;;  %v6562_v62 = vsel %vm14954_vm4, %v16764_v33, %v19036_v19  ;;  %v11424_v16 = vld [vmem:[%s11489_s30 + $0x3f0] sm:$0xff] }
 0x670   : > { %7828 = vst.msk [vmem:[%s15682_s28 + $0x378] sm:$0xff] %vm7716_vm6, %v7699_v30  ;;  %v6682_v55 = vmul.f32 %v11417_v7, %v6554_v17  ;;  %v11418_v30 = vld [vmem:[%s11489_s30 + $0x3c0] sm:$0xff]  ;;  %v4676_v17 = vadd.f32 %v17266_v25, %v19302_v53  ;;  %v19304_v7 = vld [vmem:[#allocation101_spill] sm:$0xff]  ;;  %v19305_v22 = vld [vmem:[#allocation36_spill] sm:$0xff] }
 0x671   : > { %v7541_v59 = vpop.xlane.xlu0 %7540  ;;  %v6683_v40 = vmul.f32 %v11418_v30, %v6555_v13  ;;  %v11425_v33 = vld [vmem:[%s11489_s30 + $0x3f8] sm:$0xff] }
 0x672   : > { %v7700_v50 = vsel %vm7587_vm5, %v7541_v59, %v6803_v27  ;;  %v4656_v27 = vadd.f32 %v17266_v25, %v19298_v11  ;;  %v6810_v2 = vadd.f32 %v6682_v55, %v4651_v8  ;;  %v11419_v59 = vld [vmem:[%s11489_s30 + $0x3c8] sm:$0xff]  ;;  %v4686_v55 = vadd.f32 %v17266_v25, %v19304_v7 }
 0x673   : > { %7829 = vst.msk [vmem:[%s15682_s28 + $0x380] sm:$0xff] %vm7716_vm6, %v7700_v50  ;;  %v7544_v29 = vpop.xlane.xlu1 %7543  ;;  %v6684_v45 = vmul.f32 %v11419_v59, %v6556_v14  ;;  %v4661_v50 = vadd.f32 %v17266_v25, %v19299_v31  ;;  %v4691_v8 = vadd.f32 %v17266_v25, %v19305_v22 }
 0x674   : > { %v7701_v35 = vsel %vm7587_vm5, %v7544_v29, %v6804_v21  ;;  %v6811_v32 = vadd.f32 %v6683_v40, %v4656_v27  ;;  %v6685_v29 = vmul.f32 %v11420_v4, %v6557_v63 }
 0x675   : > { %7830 = vst.msk [vmem:[%s15682_s28 + $0x388] sm:$0xff] %vm7716_vm6, %v7701_v35  ;;  %v7547_v39 = vpop.xlane.xlu0 %7546 }
 0x676   : > { %v7702_v36 = vsel %vm7587_vm5, %v7547_v39, %v6805_v47  ;;  %v6812_v47 = vadd.f32 %v6684_v45, %v4661_v50 }
 0x677   : > { %7831 = vst.msk [vmem:[%s15682_s28 + $0x390] sm:$0xff] %vm7716_vm6, %v7702_v36  ;;  %v7550_v60 = vpop.xlane.xlu1 %7549  ;;  %v6813_v36 = vadd.f32 %v6685_v29, %v4666_v3 }
 0x678   : > { %v7703_v56 = vsel %vm7587_vm5, %v7550_v60, %v6806_v61  ;;  %v11422_v61 = vld [vmem:[%s11489_s30 + $0x3e0] sm:$0xff]  ;;  %v6561_v60 = vsel %vm14954_vm4, %v16792_v51, %v19036_v19 }
 0x679   : > { %7832 = vst.msk [vmem:[%s15682_s28 + $0x398] sm:$0xff] %vm7716_vm6, %v7703_v56  ;;  %v7553_v9 = vpop.xlane.xlu0 %7552  ;;  %v6687_v15 = vmul.f32 %v11422_v61, %v6559_v41  ;;  %v11423_v56 = vld [vmem:[%s11489_s30 + $0x3e8] sm:$0xff]  ;;  %v19303_v51 = vld [vmem:[#allocation2_spill] sm:$0xff] }
 0x67a   : > { %v7704_v23 = vsel %vm7587_vm5, %v7553_v9, %v6807_v5  ;;  %v6688_v5 = vmul.f32 %v11423_v56, %v6560_v37  ;;  %v4681_v9 = vadd.f32 %v17266_v25, %v19303_v51 }
 0x67b   : > { %7833 = vst.msk [vmem:[%s15682_s28 + $0x3a0] sm:$0xff] %vm7716_vm6, %v7704_v23  ;;  %v7556_v10 = vpop.xlane.xlu1 %7555  ;;  %v6815_v42 = vadd.f32 %v6687_v15, %v4676_v17  ;;  %v6689_v23 = vmul.f32 %v11424_v16, %v6561_v60 }
 0x67c   : > { %v7705_v46 = vsel %vm7587_vm5, %v7556_v10, %v6808_v57  ;;  %v6816_v19 = vadd.f32 %v6688_v5, %v4681_v9  ;;  %v6690_v10 = vmul.f32 %v11425_v33, %v6562_v62 }
 0x67d   : > { %7834 = vst.msk [vmem:[%s15682_s28 + $0x3a8] sm:$0xff] %vm7716_vm6, %v7705_v46  ;;  %v7559_v20 = vpop.xlane.xlu0 %7558 }
 0x67e   : > { %v7706_v6 = vsel %vm7587_vm5, %v7559_v20, %v6809_v26  ;;  %v6817_v26 = vadd.f32 %v6689_v23, %v4686_v55  ;;  %v6818_v20 = vadd.f32 %v6690_v10, %v4691_v8 }
 0x67f   : > { %7835 = vst.msk [vmem:[%s15682_s28 + $0x3b0] sm:$0xff] %vm7716_vm6, %v7706_v6  ;;  %v7562_v34 = vpop.xlane.xlu1 %7561 }
 0x680   : > { %v7707_v21 = vsel %vm7587_vm5, %v7562_v34, %v6810_v2 }
 0x681   : > { %7836 = vst.msk [vmem:[%s15682_s28 + $0x3b8] sm:$0xff] %vm7716_vm6, %v7707_v21  ;;  %v7565_v0 = vpop.xlane.xlu0 %7564 }
 0x682   : > { %v7708_v35 = vsel %vm7587_vm5, %v7565_v0, %v6811_v32 }
 0x683   : > { %7837 = vst.msk [vmem:[%s15682_s28 + $0x3c0] sm:$0xff] %vm7716_vm6, %v7708_v35  ;;  %v7568_v39 = vpop.xlane.xlu1 %7567 }
 0x684   : > { %v7709_v28 = vsel %vm7587_vm5, %v7568_v39, %v6812_v47 }
 0x685   : > { %7838 = vst.msk [vmem:[%s15682_s28 + $0x3c8] sm:$0xff] %vm7716_vm6, %v7709_v28  ;;  %v7571_v48 = vpop.xlane.xlu0 %7570 }
 0x686   : > { %v7710_v18 = vsel %vm7587_vm5, %v7571_v48, %v6813_v36 }
 0x687   : > { %7839 = vst.msk [vmem:[%s15682_s28 + $0x3d0] sm:$0xff] %vm7716_vm6, %v7710_v18  ;;  %v7574_v54 = vpop.xlane.xlu1 %7573 }
 0x688   : > { %v7711_v13 = vsel %vm7587_vm5, %v7574_v54, %v6814_v38 }
 0x689   : > { %7840 = vst.msk [vmem:[%s15682_s28 + $0x3d8] sm:$0xff] %vm7716_vm6, %v7711_v13  ;;  %v7577_v57 = vpop.xlane.xlu0 %7576 }
 0x68a   : > { %v7712_v52 = vsel %vm7587_vm5, %v7577_v57, %v6815_v42 }
 0x68b   : > { %7841 = vst.msk [vmem:[%s15682_s28 + $0x3e0] sm:$0xff] %vm7716_vm6, %v7712_v52  ;;  %v7580_v14 = vpop.xlane.xlu1 %7579 }
 0x68c   : > { %v7713_v46 = vsel %vm7587_vm5, %v7580_v14, %v6816_v19 }
 0x68d   : > { %7842 = vst.msk [vmem:[%s15682_s28 + $0x3e8] sm:$0xff] %vm7716_vm6, %v7713_v46  ;;  %v7583_v30 = vpop.xlane.xlu0 %7582 }
 0x68e   : > { %v7714_v40 = vsel %vm7587_vm5, %v7583_v30, %v6817_v26 }
 0x68f   : > { %7843 = vst.msk [vmem:[%s15682_s28 + $0x3f0] sm:$0xff] %vm7716_vm6, %v7714_v40  ;;  %v7586_v63 = vpop.xlane.xlu1 %7585 }
 0x690   : > { %v7715_v11 = vsel %vm7587_vm5, %v7586_v63, %v6818_v20 }
 0x691   : > { %7844 = vst.msk [vmem:[%s15682_s28 + $0x3f8] sm:$0xff] %vm7716_vm6, %v7715_v11 }
 0x692 PF: > { %s13_s12 = sadd.s32 1, %s11432_s12  }
 0x693   : > { %p10_p4 = scmp.ge.s32.totalorder %s13_s12, 4  }
 0x695   :  { %12 = sbr.rel (!%p10_p4) target bundleno = 1 (0x1), region = 62 }

</bundles_post_ra>
